<compile_context>
chip_gen: v5e
topology: v5e:2x2
jax: 0.10.0
libtpu: 0.0.40
codegen_flags: <defaults>
</compile_context>

<pallas_src>
import functools
import numpy as np
import jax
import jax.numpy as jnp
from jax import lax
from jax.experimental import pallas as pl
from jax.experimental.pallas import tpu as pltpu

LEAKY = 0.1
_PADZ = 128   # lane-aligned zero block used for in-kernel shifted (dilated) conv taps


def _leaky(v):
    return jnp.maximum(v, LEAKY * v)


# ---------------------------------------------------------------------------
# In-kernel helpers
# ---------------------------------------------------------------------------
def _dilated_taps(h, dil, seg_len):
    """im2col slab for a kernel-size-3 / dilation-d / padding-d conv.

    h: (C, B*seg_len) f32, batch segments concatenated along the lane axis.
    Returns (3*C, B*seg_len); tap k rows hold x[:, j + (k-1)*d] with per-batch-segment
    zero padding (values shifted in from the neighbouring segment are masked to 0).
    """
    C, BL = h.shape
    z = jnp.zeros((C, _PADZ), h.dtype)
    hp = jnp.concatenate([z, h, z], axis=-1)                       # lane-aligned pieces
    pos = lax.broadcasted_iota(jnp.int32, (1, BL), 1) % seg_len    # within-segment index
    taps = []
    for k in range(3):
        s = (k - 1) * dil
        t = lax.slice(hp, (0, _PADZ + s), (C, _PADZ + s + BL))
        if s > 0:
            t = t * (pos < (seg_len - s)).astype(h.dtype)
        elif s < 0:
            t = t * (pos >= (-s)).astype(h.dtype)
        taps.append(t)
    return jnp.concatenate(taps, axis=0)                           # (3*C, B*seg_len)


def _fused_forward_kernel(block_cfg, seg_len, *refs):
    """Entire WaveletCNN forward on VMEM-resident data (single invocation, no grid)."""
    refs = list(refs)
    o_ref = refs.pop()                       # single output ref
    it = iter(refs)
    nxt = lambda: next(it)

    def conv_bn(w_ref, shift_ref, rhs):
        # bf16 MXU inputs, f32 accumulation; BN scale is pre-folded into w, shift added here.
        w = w_ref[...]
        return jnp.dot(w, rhs.astype(w.dtype),
                       preferred_element_type=jnp.float32) + shift_ref[...]

    # ---- stem: Conv1d(k=15, pad=7) + BN + LeakyReLU, fused with MaxPool1d(2) ----
    se, so, sw_ref, ssh_ref = nxt(), nxt(), nxt(), nxt()
    ye = conv_bn(sw_ref, ssh_ref, se[...])           # even output positions
    yo = conv_bn(sw_ref, ssh_ref, so[...])           # odd  output positions
    h = jnp.maximum(_leaky(ye), _leaky(yo))          # (64, B*seg_len) pooled activation

    # ---- residual blocks: dilated convs as single deep-contraction matmuls ----
    for dil, has_down in block_cfg:
        w1, s1, w2, s2 = nxt(), nxt(), nxt(), nxt()
        if has_down:
            wd, sd = nxt(), nxt()
            identity = conv_bn(wd, sd, h)            # 1x1 conv + BN (no activation)
        else:
            identity = h
        t = _leaky(conv_bn(w1, s1, _dilated_taps(h, dil, seg_len)))
        t = conv_bn(w2, s2, _dilated_taps(t, dil, seg_len)) + identity
        h = _leaky(t)                                # (C_out, B*seg_len)

    # ---- attention + classifier head (f32; VPU/XLU reductions, batched FC matmuls) ----
    wa, ba, pm, w1h, b1h, w2c, b2h = (nxt() for _ in range(7))
    logits = jnp.sum(h * wa[...], axis=0, keepdims=True) + ba[...]      # (1, B*L)
    attn = 1.0 / (1.0 + jnp.exp(-logits))                               # sigmoid
    xw = h * attn                                                       # (256, B*L)
    pooled = jnp.dot(xw, pm[...], preferred_element_type=jnp.float32)   # (256, B) per-batch mean
    z = jnp.dot(w1h[...], pooled, preferred_element_type=jnp.float32) + b1h[...]
    z = jnp.maximum(z, 0.0)                                             # ReLU
    # TODO(synk): Dropout(0.3) is identity (inference mode).
    out = jnp.sum(z * w2c[...], axis=0, keepdims=True) + b2h[...]       # (1, B)
    o_ref[...] = out.astype(o_ref.dtype)


# ---------------------------------------------------------------------------
# Trace-time parameter / input preprocessing (constant-folded under jit)
# ---------------------------------------------------------------------------
def _fold_conv_bn(w, scale):
    """PyTorch conv weight (C_out, C_in, K) * BN scale -> (C_out, K*C_in) matmul weight
    whose columns match the tap-major / channel-minor im2col slab row order."""
    c_out, c_in, k = w.shape
    return (w * scale[:, None, None]).transpose(0, 2, 1).reshape(c_out, k * c_in)


def _stem_slabs(x, k, pad):
    """Even/odd-output-position im2col slabs for the stem conv, built once in XLA on the raw
    network input; MaxPool1d(2) then becomes a max of two lane-dense in-kernel matmuls."""
    b, c_in, l0 = x.shape
    xp = jnp.pad(x, ((0, 0), (0, 0), (pad, pad)))
    taps = jnp.stack([xp[:, :, t:t + l0] for t in range(k)], axis=1)   # (B, K, C_in, L0)
    slab = taps.reshape(b, k * c_in, l0).transpose(1, 0, 2)            # (K*C_in, B, L0)
    half = l0 // 2
    se = slab[:, :, 0::2].reshape(k * c_in, b * half)
    so = slab[:, :, 1::2].reshape(k * c_in, b * half)
    return se, so


def wavelet_cnn_forward(x, p):
    B, _, L0 = x.shape
    assert L0 % 2 == 0
    L = L0 // 2                     # length after MaxPool1d(2); constant for all res blocks
    BL = B * L                      # lane width of every activation tile (= 128 for B=2, L0=128)
    f32, bf16 = jnp.float32, jnp.bfloat16

    se, so = _stem_slabs(x, k=15, pad=7)
    args = [se, so,
            _fold_conv_bn(p["stem_w"], p["stem_scale"]).astype(bf16),
            p["stem_shift"].reshape(-1, 1)]

    block_cfg = []
    for blk in p["blocks"]:
        has_down = blk["dw"] is not None
        block_cfg.append((blk["dil"], has_down))
        args += [_fold_conv_bn(blk["w1"], blk["s1"]).astype(bf16), blk["sh1"].reshape(-1, 1),
                 _fold_conv_bn(blk["w2"], blk["s2"]).astype(bf16), blk["sh2"].reshape(-1, 1)]
        if has_down:
            args += [_fold_conv_bn(blk["dw"], blk["ds"]).astype(bf16), blk["dsh"].reshape(-1, 1)]

    # Per-batch mean-pool matrix: pooled[:, b] = mean over batch b's L lanes (AdaptiveAvgPool1d(1)).
    pool_m = (jnp.arange(BL)[:, None] // L == jnp.arange(B)[None, :]).astype(f32) / L

    args += [p["attn_w"].reshape(-1, 1),     # (256, 1) attention 1x1-conv weight as a column
             p["attn_b"].reshape(1, 1),
             pool_m,                         # (B*L, B)
             p["fc1_w"],                     # (128, 256)
             p["fc1_b"].reshape(-1, 1),
             p["fc2_w"].reshape(-1, 1),      # (128, 1) fc2 weight as a column
             p["fc2_b"].reshape(1, 1)]

    kernel = functools.partial(_fused_forward_kernel, tuple(block_cfg), L)
    vmem = pl.BlockSpec(memory_space=pltpu.MemorySpace.VMEM)
    out = pl.pallas_call(
        kernel,
        out_shape=jax.ShapeDtypeStruct((1, B), f32),
        in_specs=[vmem] * len(args),
        out_specs=vmem,
    )(*args)
    return out.reshape(B, 1)


# ---------------------------------------------------------------------------
# Pure-JAX reference (same BN-folded, bf16-rounded conv weights; f32 math)
# ---------------------------------------------------------------------------
def _round_bf16(w):
    return w.astype(jnp.bfloat16).astype(jnp.float32)


def wavelet_cnn_reference(x, p):
    def conv(v, w, dil, pad):
        return lax.conv_general_dilated(
            v, w, window_strides=(1,), padding=[(pad, pad)], rhs_dilation=(dil,),
            dimension_numbers=("NCH", "OIH", "NCH"))

    def fold(w, scale):
        return _round_bf16(w * scale[:, None, None])

    y = _leaky(conv(x, fold(p["stem_w"], p["stem_scale"]), 1, 7)
               + p["stem_shift"][None, :, None])
    b, c, l0 = y.shape
    y = jnp.max(y.reshape(b, c, l0 // 2, 2), axis=-1)              # MaxPool1d(2)

    for blk in p["blocks"]:
        d = blk["dil"]
        if blk["dw"] is not None:
            identity = conv(y, fold(blk["dw"], blk["ds"]), 1, 0) + blk["dsh"][None, :, None]
        else:
            identity = y
        t = _leaky(conv(y, fold(blk["w1"], blk["s1"]), d, d) + blk["sh1"][None, :, None])
        t = conv(t, fold(blk["w2"], blk["s2"]), d, d) + blk["sh2"][None, :, None]
        y = _leaky(t + identity)

    a = jax.nn.sigmoid(jnp.einsum("oc,bcl->bol", p["attn_w"][:, :, 0], y)
                       + p["attn_b"][None, :, None])
    pooled = jnp.mean(y * a, axis=-1)                              # (B, 256)
    h = jnp.maximum(pooled @ p["fc1_w"].T + p["fc1_b"], 0.0)
    return h @ p["fc2_w"].T + p["fc2_b"]                           # (B, 1)


# ---------------------------------------------------------------------------
# Deterministic parameter init (eval-mode BN folded to scale/shift)
# ---------------------------------------------------------------------------
def _conv_w(key, c_out, c_in, k):
    fan_in = c_in * k
    return (jax.random.normal(key, (c_out, c_in, k), jnp.float32) / np.sqrt(fan_in)).astype(jnp.float32)


def _bn(key, c, eps=1e-5):
    k1, k2, k3 = jax.random.split(key, 3)
    gamma = 1.0 + 0.1 * jax.random.normal(k1, (c,), jnp.float32)
    beta = 0.1 * jax.random.normal(k2, (c,), jnp.float32)
    mean = 0.1 * jax.random.normal(k3, (c,), jnp.float32)
    var = jnp.ones((c,), jnp.float32)
    scale = gamma / jnp.sqrt(var + eps)
    shift = beta - mean * scale
    return scale, shift


def init_params(key, in_channels):
    keys = iter(jax.random.split(key, 64))
    p = {}
    p["stem_w"] = _conv_w(next(keys), 64, in_channels, 15)
    p["stem_scale"], p["stem_shift"] = _bn(next(keys), 64)

    cfg = [(64, 64, 1), (64, 128, 2), (128, 128, 4), (128, 256, 8)]
    blocks = []
    for c_in, c_out, dil in cfg:
        blk = {"dil": dil}
        blk["w1"] = _conv_w(next(keys), c_out, c_in, 3)
        blk["s1"], blk["sh1"] = _bn(next(keys), c_out)
        blk["w2"] = _conv_w(next(keys), c_out, c_out, 3)
        blk["s2"], blk["sh2"] = _bn(next(keys), c_out)
        if c_in != c_out:
            blk["dw"] = _conv_w(next(keys), c_out, c_in, 1)
            blk["ds"], blk["dsh"] = _bn(next(keys), c_out)
        else:
            blk["dw"] = None
        blocks.append(blk)
    p["blocks"] = blocks

    p["attn_w"] = _conv_w(next(keys), 1, 256, 1)
    p["attn_b"] = 0.1 * jax.random.normal(next(keys), (1,), jnp.float32)
    p["fc1_w"] = (jax.random.normal(next(keys), (128, 256), jnp.float32) / np.sqrt(256)).astype(jnp.float32)
    p["fc1_b"] = 0.1 * jax.random.normal(next(keys), (128,), jnp.float32)
    p["fc2_w"] = (jax.random.normal(next(keys), (1, 128), jnp.float32) / np.sqrt(128)).astype(jnp.float32)
    p["fc2_b"] = 0.1 * jax.random.normal(next(keys), (1,), jnp.float32)
    return p


# ---------------------------------------------------------------------------
if __name__ == "__main__":
    key = jax.random.PRNGKey(0)
    k_param, k_x = jax.random.split(key)

    batch, in_channels, seq_len = 2, 4, 128   # NCL; after MaxPool(2): B*L = 2*64 = 128 lanes
    x = jax.random.normal(k_x, (batch, in_channels, seq_len), jnp.float32)
    params = init_params(k_param, in_channels)

    fwd = jax.jit(functools.partial(wavelet_cnn_forward, p=params))
    out = jax.block_until_ready(fwd(x))

    assert out.shape == (batch, 1), out.shape
    assert bool(jnp.all(jnp.isfinite(out)))

    # Correctness check against a pure-JAX reference (loose tol covers bf16 MXU inputs).
    ref = wavelet_cnn_reference(x, params)
    np.testing.assert_allclose(np.asarray(out), np.asarray(ref), rtol=1e-1, atol=1e-1)

    print("KERNEL_OK")
</pallas_src>

<mosaic_0001>
module attributes {stable_mosaic.version = 11 : i64} {
  func.func @_fused_forward_kernel(%arg0: memref<60x128xf32, #tpu.memory_space<vmem>>, %arg1: memref<60x128xf32, #tpu.memory_space<vmem>>, %arg2: memref<64x60xbf16, #tpu.memory_space<vmem>>, %arg3: memref<64x1xf32, #tpu.memory_space<vmem>>, %arg4: memref<64x192xbf16, #tpu.memory_space<vmem>>, %arg5: memref<64x1xf32, #tpu.memory_space<vmem>>, %arg6: memref<64x192xbf16, #tpu.memory_space<vmem>>, %arg7: memref<64x1xf32, #tpu.memory_space<vmem>>, %arg8: memref<128x192xbf16, #tpu.memory_space<vmem>>, %arg9: memref<128x1xf32, #tpu.memory_space<vmem>>, %arg10: memref<128x384xbf16, #tpu.memory_space<vmem>>, %arg11: memref<128x1xf32, #tpu.memory_space<vmem>>, %arg12: memref<128x64xbf16, #tpu.memory_space<vmem>>, %arg13: memref<128x1xf32, #tpu.memory_space<vmem>>, %arg14: memref<128x384xbf16, #tpu.memory_space<vmem>>, %arg15: memref<128x1xf32, #tpu.memory_space<vmem>>, %arg16: memref<128x384xbf16, #tpu.memory_space<vmem>>, %arg17: memref<128x1xf32, #tpu.memory_space<vmem>>, %arg18: memref<256x384xbf16, #tpu.memory_space<vmem>>, %arg19: memref<256x1xf32, #tpu.memory_space<vmem>>, %arg20: memref<256x768xbf16, #tpu.memory_space<vmem>>, %arg21: memref<256x1xf32, #tpu.memory_space<vmem>>, %arg22: memref<256x128xbf16, #tpu.memory_space<vmem>>, %arg23: memref<256x1xf32, #tpu.memory_space<vmem>>, %arg24: memref<256x1xf32, #tpu.memory_space<vmem>>, %arg25: memref<1x1xf32, #tpu.memory_space<vmem>>, %arg26: memref<128x2xf32, #tpu.memory_space<vmem>>, %arg27: memref<128x256xf32, #tpu.memory_space<vmem>>, %arg28: memref<128x1xf32, #tpu.memory_space<vmem>>, %arg29: memref<128x1xf32, #tpu.memory_space<vmem>>, %arg30: memref<1x1xf32, #tpu.memory_space<vmem>>, %arg31: memref<1x2xf32, #tpu.memory_space<vmem>>) attributes {dimension_semantics = [], scalar_prefetch = 0 : i64, scratch_operands = 0 : i64, tpu.core_type = #tpu.core_type<tc>} {
    %c0 = arith.constant 0 : index
    %c0_0 = arith.constant 0 : index
    %0 = vector.load %arg0[%c0, %c0_0] : memref<60x128xf32, #tpu.memory_space<vmem>>, vector<60x128xf32>
    %c0_1 = arith.constant 0 : index
    %c0_2 = arith.constant 0 : index
    %1 = vector.load %arg2[%c0_1, %c0_2] : memref<64x60xbf16, #tpu.memory_space<vmem>>, vector<64x60xbf16>
    %2 = arith.truncf %0 : vector<60x128xf32> to vector<60x128xbf16>
    %cst = arith.constant dense<0.000000e+00> : vector<64x128xf32>
    %3 = tpu.matmul %1, %2, %cst {dimension_numbers = #tpu.dot_dimension_numbers<[1], [0], [0], [1], [0, 0, 1, 1], [], []>} : vector<64x60xbf16>, vector<60x128xbf16>, vector<64x128xf32> -> vector<64x128xf32>
    %c0_3 = arith.constant 0 : index
    %c0_4 = arith.constant 0 : index
    %4 = vector.load %arg3[%c0_3, %c0_4] : memref<64x1xf32, #tpu.memory_space<vmem>>, vector<64x1xf32>
    %5 = vector.broadcast %4 : vector<64x1xf32> to vector<64x128xf32>
    %6 = arith.addf %3, %5 : vector<64x128xf32>
    %c0_5 = arith.constant 0 : index
    %c0_6 = arith.constant 0 : index
    %7 = vector.load %arg1[%c0_5, %c0_6] : memref<60x128xf32, #tpu.memory_space<vmem>>, vector<60x128xf32>
    %c0_7 = arith.constant 0 : index
    %c0_8 = arith.constant 0 : index
    %8 = vector.load %arg2[%c0_7, %c0_8] : memref<64x60xbf16, #tpu.memory_space<vmem>>, vector<64x60xbf16>
    %9 = arith.truncf %7 : vector<60x128xf32> to vector<60x128xbf16>
    %cst_9 = arith.constant dense<0.000000e+00> : vector<64x128xf32>
    %10 = tpu.matmul %8, %9, %cst_9 {dimension_numbers = #tpu.dot_dimension_numbers<[1], [0], [0], [1], [0, 0, 1, 1], [], []>} : vector<64x60xbf16>, vector<60x128xbf16>, vector<64x128xf32> -> vector<64x128xf32>
    %c0_10 = arith.constant 0 : index
    %c0_11 = arith.constant 0 : index
    %11 = vector.load %arg3[%c0_10, %c0_11] : memref<64x1xf32, #tpu.memory_space<vmem>>, vector<64x1xf32>
    %12 = vector.broadcast %11 : vector<64x1xf32> to vector<64x128xf32>
    %13 = arith.addf %10, %12 : vector<64x128xf32>
    %cst_12 = arith.constant 1.000000e-01 : f32
    %14 = vector.broadcast %cst_12 : f32 to vector<64x128xf32>
    %15 = arith.mulf %14, %6 : vector<64x128xf32>
    %16 = arith.maximumf %6, %15 : vector<64x128xf32>
    %cst_13 = arith.constant 1.000000e-01 : f32
    %17 = vector.broadcast %cst_13 : f32 to vector<64x128xf32>
    %18 = arith.mulf %17, %13 : vector<64x128xf32>
    %19 = arith.maximumf %13, %18 : vector<64x128xf32>
    %20 = arith.maximumf %16, %19 : vector<64x128xf32>
    %cst_14 = arith.constant 0.000000e+00 : f32
    %21 = vector.broadcast %cst_14 : f32 to vector<64x128xf32>
    %22 = tpu.concatenate %21, %20, %21 in 1 : vector<64x128xf32>, vector<64x128xf32>, vector<64x128xf32> -> vector<64x384xf32>
    %23 = tpu.iota {dimensions = array<i32: 1>} : vector<1x128xi32>
    %c64_i32 = arith.constant 64 : i32
    %c0_i32 = arith.constant 0 : i32
    %24 = arith.cmpi eq, %c64_i32, %c0_i32 : i32
    %c1_i32 = arith.constant 1 : i32
    %25 = arith.select %24, %c1_i32, %c64_i32 : i32
    %26 = vector.broadcast %25 : i32 to vector<1x128xi32>
    %27 = arith.remsi %23, %26 : vector<1x128xi32>
    %c0_i32_15 = arith.constant 0 : i32
    %28 = vector.broadcast %c0_i32_15 : i32 to vector<1x128xi32>
    %29 = arith.cmpi ne, %27, %28 : vector<1x128xi32>
    %c0_i32_16 = arith.constant 0 : i32
    %30 = vector.broadcast %c0_i32_16 : i32 to vector<1x128xi32>
    %31 = arith.cmpi slt, %27, %30 : vector<1x128xi32>
    %c0_i32_17 = arith.constant 0 : i32
    %32 = arith.cmpi slt, %25, %c0_i32_17 : i32
    %33 = vector.broadcast %32 : i1 to vector<1x128xi1>
    %34 = vector.broadcast %33 : vector<1x128xi1> to vector<1x128xi1>
    %35 = arith.xori %31, %34 : vector<1x128xi1>
    %36 = arith.andi %35, %29 : vector<1x128xi1>
    %37 = vector.broadcast %25 : i32 to vector<1x128xi32>
    %38 = arith.addi %27, %37 : vector<1x128xi32>
    %39 = arith.select %36, %38, %27 : vector<1x128xi1>, vector<1x128xi32>
    %40 = vector.extract_strided_slice %22 {offsets = [0, 127], sizes = [64, 128], strides = [1, 1]} : vector<64x384xf32> to vector<64x128xf32>
    %c1_i32_18 = arith.constant 1 : i32
    %41 = vector.broadcast %c1_i32_18 : i32 to vector<1x128xi32>
    %42 = arith.cmpi sge, %39, %41 : vector<1x128xi32>
    %43 = arith.extui %42 : vector<1x128xi1> to vector<1x128xi32>
    %44 = arith.sitofp %43 : vector<1x128xi32> to vector<1x128xf32>
    %45 = vector.broadcast %44 : vector<1x128xf32> to vector<64x128xf32>
    %46 = arith.mulf %40, %45 : vector<64x128xf32>
    %47 = vector.extract_strided_slice %22 {offsets = [0, 128], sizes = [64, 128], strides = [1, 1]} : vector<64x384xf32> to vector<64x128xf32>
    %48 = vector.extract_strided_slice %22 {offsets = [0, 129], sizes = [64, 128], strides = [1, 1]} : vector<64x384xf32> to vector<64x128xf32>
    %c63_i32 = arith.constant 63 : i32
    %49 = vector.broadcast %c63_i32 : i32 to vector<1x128xi32>
    %50 = arith.cmpi slt, %39, %49 : vector<1x128xi32>
    %51 = arith.extui %50 : vector<1x128xi1> to vector<1x128xi32>
    %52 = arith.sitofp %51 : vector<1x128xi32> to vector<1x128xf32>
    %53 = vector.broadcast %52 : vector<1x128xf32> to vector<64x128xf32>
    %54 = arith.mulf %48, %53 : vector<64x128xf32>
    %55 = tpu.concatenate %46, %47, %54 in 0 : vector<64x128xf32>, vector<64x128xf32>, vector<64x128xf32> -> vector<192x128xf32>
    %c0_19 = arith.constant 0 : index
    %c0_20 = arith.constant 0 : index
    %56 = vector.load %arg4[%c0_19, %c0_20] : memref<64x192xbf16, #tpu.memory_space<vmem>>, vector<64x192xbf16>
    %57 = arith.truncf %55 : vector<192x128xf32> to vector<192x128xbf16>
    %cst_21 = arith.constant dense<0.000000e+00> : vector<64x128xf32>
    %58 = tpu.matmul %56, %57, %cst_21 {dimension_numbers = #tpu.dot_dimension_numbers<[1], [0], [0], [1], [0, 0, 1, 1], [], []>} : vector<64x192xbf16>, vector<192x128xbf16>, vector<64x128xf32> -> vector<64x128xf32>
    %c0_22 = arith.constant 0 : index
    %c0_23 = arith.constant 0 : index
    %59 = vector.load %arg5[%c0_22, %c0_23] : memref<64x1xf32, #tpu.memory_space<vmem>>, vector<64x1xf32>
    %60 = vector.broadcast %59 : vector<64x1xf32> to vector<64x128xf32>
    %61 = arith.addf %58, %60 : vector<64x128xf32>
    %cst_24 = arith.constant 1.000000e-01 : f32
    %62 = vector.broadcast %cst_24 : f32 to vector<64x128xf32>
    %63 = arith.mulf %62, %61 : vector<64x128xf32>
    %64 = arith.maximumf %61, %63 : vector<64x128xf32>
    %cst_25 = arith.constant 0.000000e+00 : f32
    %65 = vector.broadcast %cst_25 : f32 to vector<64x128xf32>
    %66 = tpu.concatenate %65, %64, %65 in 1 : vector<64x128xf32>, vector<64x128xf32>, vector<64x128xf32> -> vector<64x384xf32>
    %67 = tpu.iota {dimensions = array<i32: 1>} : vector<1x128xi32>
    %c64_i32_26 = arith.constant 64 : i32
    %c0_i32_27 = arith.constant 0 : i32
    %68 = arith.cmpi eq, %c64_i32_26, %c0_i32_27 : i32
    %c1_i32_28 = arith.constant 1 : i32
    %69 = arith.select %68, %c1_i32_28, %c64_i32_26 : i32
    %70 = vector.broadcast %69 : i32 to vector<1x128xi32>
    %71 = arith.remsi %67, %70 : vector<1x128xi32>
    %c0_i32_29 = arith.constant 0 : i32
    %72 = vector.broadcast %c0_i32_29 : i32 to vector<1x128xi32>
    %73 = arith.cmpi ne, %71, %72 : vector<1x128xi32>
    %c0_i32_30 = arith.constant 0 : i32
    %74 = vector.broadcast %c0_i32_30 : i32 to vector<1x128xi32>
    %75 = arith.cmpi slt, %71, %74 : vector<1x128xi32>
    %c0_i32_31 = arith.constant 0 : i32
    %76 = arith.cmpi slt, %69, %c0_i32_31 : i32
    %77 = vector.broadcast %76 : i1 to vector<1x128xi1>
    %78 = vector.broadcast %77 : vector<1x128xi1> to vector<1x128xi1>
    %79 = arith.xori %75, %78 : vector<1x128xi1>
    %80 = arith.andi %79, %73 : vector<1x128xi1>
    %81 = vector.broadcast %69 : i32 to vector<1x128xi32>
    %82 = arith.addi %71, %81 : vector<1x128xi32>
    %83 = arith.select %80, %82, %71 : vector<1x128xi1>, vector<1x128xi32>
    %84 = vector.extract_strided_slice %66 {offsets = [0, 127], sizes = [64, 128], strides = [1, 1]} : vector<64x384xf32> to vector<64x128xf32>
    %c1_i32_32 = arith.constant 1 : i32
    %85 = vector.broadcast %c1_i32_32 : i32 to vector<1x128xi32>
    %86 = arith.cmpi sge, %83, %85 : vector<1x128xi32>
    %87 = arith.extui %86 : vector<1x128xi1> to vector<1x128xi32>
    %88 = arith.sitofp %87 : vector<1x128xi32> to vector<1x128xf32>
    %89 = vector.broadcast %88 : vector<1x128xf32> to vector<64x128xf32>
    %90 = arith.mulf %84, %89 : vector<64x128xf32>
    %91 = vector.extract_strided_slice %66 {offsets = [0, 128], sizes = [64, 128], strides = [1, 1]} : vector<64x384xf32> to vector<64x128xf32>
    %92 = vector.extract_strided_slice %66 {offsets = [0, 129], sizes = [64, 128], strides = [1, 1]} : vector<64x384xf32> to vector<64x128xf32>
    %c63_i32_33 = arith.constant 63 : i32
    %93 = vector.broadcast %c63_i32_33 : i32 to vector<1x128xi32>
    %94 = arith.cmpi slt, %83, %93 : vector<1x128xi32>
    %95 = arith.extui %94 : vector<1x128xi1> to vector<1x128xi32>
    %96 = arith.sitofp %95 : vector<1x128xi32> to vector<1x128xf32>
    %97 = vector.broadcast %96 : vector<1x128xf32> to vector<64x128xf32>
    %98 = arith.mulf %92, %97 : vector<64x128xf32>
    %99 = tpu.concatenate %90, %91, %98 in 0 : vector<64x128xf32>, vector<64x128xf32>, vector<64x128xf32> -> vector<192x128xf32>
    %c0_34 = arith.constant 0 : index
    %c0_35 = arith.constant 0 : index
    %100 = vector.load %arg6[%c0_34, %c0_35] : memref<64x192xbf16, #tpu.memory_space<vmem>>, vector<64x192xbf16>
    %101 = arith.truncf %99 : vector<192x128xf32> to vector<192x128xbf16>
    %cst_36 = arith.constant dense<0.000000e+00> : vector<64x128xf32>
    %102 = tpu.matmul %100, %101, %cst_36 {dimension_numbers = #tpu.dot_dimension_numbers<[1], [0], [0], [1], [0, 0, 1, 1], [], []>} : vector<64x192xbf16>, vector<192x128xbf16>, vector<64x128xf32> -> vector<64x128xf32>
    %c0_37 = arith.constant 0 : index
    %c0_38 = arith.constant 0 : index
    %103 = vector.load %arg7[%c0_37, %c0_38] : memref<64x1xf32, #tpu.memory_space<vmem>>, vector<64x1xf32>
    %104 = vector.broadcast %103 : vector<64x1xf32> to vector<64x128xf32>
    %105 = arith.addf %102, %104 : vector<64x128xf32>
    %106 = arith.addf %105, %20 : vector<64x128xf32>
    %cst_39 = arith.constant 1.000000e-01 : f32
    %107 = vector.broadcast %cst_39 : f32 to vector<64x128xf32>
    %108 = arith.mulf %107, %106 : vector<64x128xf32>
    %109 = arith.maximumf %106, %108 : vector<64x128xf32>
    %c0_40 = arith.constant 0 : index
    %c0_41 = arith.constant 0 : index
    %110 = vector.load %arg12[%c0_40, %c0_41] : memref<128x64xbf16, #tpu.memory_space<vmem>>, vector<128x64xbf16>
    %111 = arith.truncf %109 : vector<64x128xf32> to vector<64x128xbf16>
    %cst_42 = arith.constant dense<0.000000e+00> : vector<128x128xf32>
    %112 = tpu.matmul %110, %111, %cst_42 {dimension_numbers = #tpu.dot_dimension_numbers<[1], [0], [0], [1], [0, 0, 1, 1], [], []>} : vector<128x64xbf16>, vector<64x128xbf16>, vector<128x128xf32> -> vector<128x128xf32>
    %c0_43 = arith.constant 0 : index
    %c0_44 = arith.constant 0 : index
    %113 = vector.load %arg13[%c0_43, %c0_44] : memref<128x1xf32, #tpu.memory_space<vmem>>, vector<128x1xf32>
    %114 = vector.broadcast %113 : vector<128x1xf32> to vector<128x128xf32>
    %115 = arith.addf %112, %114 : vector<128x128xf32>
    %cst_45 = arith.constant 0.000000e+00 : f32
    %116 = vector.broadcast %cst_45 : f32 to vector<64x128xf32>
    %117 = tpu.concatenate %116, %109, %116 in 1 : vector<64x128xf32>, vector<64x128xf32>, vector<64x128xf32> -> vector<64x384xf32>
    %118 = tpu.iota {dimensions = array<i32: 1>} : vector<1x128xi32>
    %c64_i32_46 = arith.constant 64 : i32
    %c0_i32_47 = arith.constant 0 : i32
    %119 = arith.cmpi eq, %c64_i32_46, %c0_i32_47 : i32
    %c1_i32_48 = arith.constant 1 : i32
    %120 = arith.select %119, %c1_i32_48, %c64_i32_46 : i32
    %121 = vector.broadcast %120 : i32 to vector<1x128xi32>
    %122 = arith.remsi %118, %121 : vector<1x128xi32>
    %c0_i32_49 = arith.constant 0 : i32
    %123 = vector.broadcast %c0_i32_49 : i32 to vector<1x128xi32>
    %124 = arith.cmpi ne, %122, %123 : vector<1x128xi32>
    %c0_i32_50 = arith.constant 0 : i32
    %125 = vector.broadcast %c0_i32_50 : i32 to vector<1x128xi32>
    %126 = arith.cmpi slt, %122, %125 : vector<1x128xi32>
    %c0_i32_51 = arith.constant 0 : i32
    %127 = arith.cmpi slt, %120, %c0_i32_51 : i32
    %128 = vector.broadcast %127 : i1 to vector<1x128xi1>
    %129 = vector.broadcast %128 : vector<1x128xi1> to vector<1x128xi1>
    %130 = arith.xori %126, %129 : vector<1x128xi1>
    %131 = arith.andi %130, %124 : vector<1x128xi1>
    %132 = vector.broadcast %120 : i32 to vector<1x128xi32>
    %133 = arith.addi %122, %132 : vector<1x128xi32>
    %134 = arith.select %131, %133, %122 : vector<1x128xi1>, vector<1x128xi32>
    %135 = vector.extract_strided_slice %117 {offsets = [0, 126], sizes = [64, 128], strides = [1, 1]} : vector<64x384xf32> to vector<64x128xf32>
    %c2_i32 = arith.constant 2 : i32
    %136 = vector.broadcast %c2_i32 : i32 to vector<1x128xi32>
    %137 = arith.cmpi sge, %134, %136 : vector<1x128xi32>
    %138 = arith.extui %137 : vector<1x128xi1> to vector<1x128xi32>
    %139 = arith.sitofp %138 : vector<1x128xi32> to vector<1x128xf32>
    %140 = vector.broadcast %139 : vector<1x128xf32> to vector<64x128xf32>
    %141 = arith.mulf %135, %140 : vector<64x128xf32>
    %142 = vector.extract_strided_slice %117 {offsets = [0, 128], sizes = [64, 128], strides = [1, 1]} : vector<64x384xf32> to vector<64x128xf32>
    %143 = vector.extract_strided_slice %117 {offsets = [0, 130], sizes = [64, 128], strides = [1, 1]} : vector<64x384xf32> to vector<64x128xf32>
    %c62_i32 = arith.constant 62 : i32
    %144 = vector.broadcast %c62_i32 : i32 to vector<1x128xi32>
    %145 = arith.cmpi slt, %134, %144 : vector<1x128xi32>
    %146 = arith.extui %145 : vector<1x128xi1> to vector<1x128xi32>
    %147 = arith.sitofp %146 : vector<1x128xi32> to vector<1x128xf32>
    %148 = vector.broadcast %147 : vector<1x128xf32> to vector<64x128xf32>
    %149 = arith.mulf %143, %148 : vector<64x128xf32>
    %150 = tpu.concatenate %141, %142, %149 in 0 : vector<64x128xf32>, vector<64x128xf32>, vector<64x128xf32> -> vector<192x128xf32>
    %c0_52 = arith.constant 0 : index
    %c0_53 = arith.constant 0 : index
    %151 = vector.load %arg8[%c0_52, %c0_53] : memref<128x192xbf16, #tpu.memory_space<vmem>>, vector<128x192xbf16>
    %152 = arith.truncf %150 : vector<192x128xf32> to vector<192x128xbf16>
    %cst_54 = arith.constant dense<0.000000e+00> : vector<128x128xf32>
    %153 = tpu.matmul %151, %152, %cst_54 {dimension_numbers = #tpu.dot_dimension_numbers<[1], [0], [0], [1], [0, 0, 1, 1], [], []>} : vector<128x192xbf16>, vector<192x128xbf16>, vector<128x128xf32> -> vector<128x128xf32>
    %c0_55 = arith.constant 0 : index
    %c0_56 = arith.constant 0 : index
    %154 = vector.load %arg9[%c0_55, %c0_56] : memref<128x1xf32, #tpu.memory_space<vmem>>, vector<128x1xf32>
    %155 = vector.broadcast %154 : vector<128x1xf32> to vector<128x128xf32>
    %156 = arith.addf %153, %155 : vector<128x128xf32>
    %cst_57 = arith.constant 1.000000e-01 : f32
    %157 = vector.broadcast %cst_57 : f32 to vector<128x128xf32>
    %158 = arith.mulf %157, %156 : vector<128x128xf32>
    %159 = arith.maximumf %156, %158 : vector<128x128xf32>
    %cst_58 = arith.constant 0.000000e+00 : f32
    %160 = vector.broadcast %cst_58 : f32 to vector<128x128xf32>
    %161 = tpu.concatenate %160, %159, %160 in 1 : vector<128x128xf32>, vector<128x128xf32>, vector<128x128xf32> -> vector<128x384xf32>
    %162 = tpu.iota {dimensions = array<i32: 1>} : vector<1x128xi32>
    %c64_i32_59 = arith.constant 64 : i32
    %c0_i32_60 = arith.constant 0 : i32
    %163 = arith.cmpi eq, %c64_i32_59, %c0_i32_60 : i32
    %c1_i32_61 = arith.constant 1 : i32
    %164 = arith.select %163, %c1_i32_61, %c64_i32_59 : i32
    %165 = vector.broadcast %164 : i32 to vector<1x128xi32>
    %166 = arith.remsi %162, %165 : vector<1x128xi32>
    %c0_i32_62 = arith.constant 0 : i32
    %167 = vector.broadcast %c0_i32_62 : i32 to vector<1x128xi32>
    %168 = arith.cmpi ne, %166, %167 : vector<1x128xi32>
    %c0_i32_63 = arith.constant 0 : i32
    %169 = vector.broadcast %c0_i32_63 : i32 to vector<1x128xi32>
    %170 = arith.cmpi slt, %166, %169 : vector<1x128xi32>
    %c0_i32_64 = arith.constant 0 : i32
    %171 = arith.cmpi slt, %164, %c0_i32_64 : i32
    %172 = vector.broadcast %171 : i1 to vector<1x128xi1>
    %173 = vector.broadcast %172 : vector<1x128xi1> to vector<1x128xi1>
    %174 = arith.xori %170, %173 : vector<1x128xi1>
    %175 = arith.andi %174, %168 : vector<1x128xi1>
    %176 = vector.broadcast %164 : i32 to vector<1x128xi32>
    %177 = arith.addi %166, %176 : vector<1x128xi32>
    %178 = arith.select %175, %177, %166 : vector<1x128xi1>, vector<1x128xi32>
    %179 = vector.extract_strided_slice %161 {offsets = [0, 126], sizes = [128, 128], strides = [1, 1]} : vector<128x384xf32> to vector<128x128xf32>
    %c2_i32_65 = arith.constant 2 : i32
    %180 = vector.broadcast %c2_i32_65 : i32 to vector<1x128xi32>
    %181 = arith.cmpi sge, %178, %180 : vector<1x128xi32>
    %182 = arith.extui %181 : vector<1x128xi1> to vector<1x128xi32>
    %183 = arith.sitofp %182 : vector<1x128xi32> to vector<1x128xf32>
    %184 = vector.broadcast %183 : vector<1x128xf32> to vector<128x128xf32>
    %185 = arith.mulf %179, %184 : vector<128x128xf32>
    %186 = vector.extract_strided_slice %161 {offsets = [0, 128], sizes = [128, 128], strides = [1, 1]} : vector<128x384xf32> to vector<128x128xf32>
    %187 = vector.extract_strided_slice %161 {offsets = [0, 130], sizes = [128, 128], strides = [1, 1]} : vector<128x384xf32> to vector<128x128xf32>
    %c62_i32_66 = arith.constant 62 : i32
    %188 = vector.broadcast %c62_i32_66 : i32 to vector<1x128xi32>
    %189 = arith.cmpi slt, %178, %188 : vector<1x128xi32>
    %190 = arith.extui %189 : vector<1x128xi1> to vector<1x128xi32>
    %191 = arith.sitofp %190 : vector<1x128xi32> to vector<1x128xf32>
    %192 = vector.broadcast %191 : vector<1x128xf32> to vector<128x128xf32>
    %193 = arith.mulf %187, %192 : vector<128x128xf32>
    %194 = tpu.concatenate %185, %186, %193 in 0 : vector<128x128xf32>, vector<128x128xf32>, vector<128x128xf32> -> vector<384x128xf32>
    %c0_67 = arith.constant 0 : index
    %c0_68 = arith.constant 0 : index
    %195 = vector.load %arg10[%c0_67, %c0_68] : memref<128x384xbf16, #tpu.memory_space<vmem>>, vector<128x384xbf16>
    %196 = arith.truncf %194 : vector<384x128xf32> to vector<384x128xbf16>
    %cst_69 = arith.constant dense<0.000000e+00> : vector<128x128xf32>
    %197 = tpu.matmul %195, %196, %cst_69 {dimension_numbers = #tpu.dot_dimension_numbers<[1], [0], [0], [1], [0, 0, 1, 1], [], []>} : vector<128x384xbf16>, vector<384x128xbf16>, vector<128x128xf32> -> vector<128x128xf32>
    %c0_70 = arith.constant 0 : index
    %c0_71 = arith.constant 0 : index
    %198 = vector.load %arg11[%c0_70, %c0_71] : memref<128x1xf32, #tpu.memory_space<vmem>>, vector<128x1xf32>
    %199 = vector.broadcast %198 : vector<128x1xf32> to vector<128x128xf32>
    %200 = arith.addf %197, %199 : vector<128x128xf32>
    %201 = arith.addf %200, %115 : vector<128x128xf32>
    %cst_72 = arith.constant 1.000000e-01 : f32
    %202 = vector.broadcast %cst_72 : f32 to vector<128x128xf32>
    %203 = arith.mulf %202, %201 : vector<128x128xf32>
    %204 = arith.maximumf %201, %203 : vector<128x128xf32>
    %cst_73 = arith.constant 0.000000e+00 : f32
    %205 = vector.broadcast %cst_73 : f32 to vector<128x128xf32>
    %206 = tpu.concatenate %205, %204, %205 in 1 : vector<128x128xf32>, vector<128x128xf32>, vector<128x128xf32> -> vector<128x384xf32>
    %207 = tpu.iota {dimensions = array<i32: 1>} : vector<1x128xi32>
    %c64_i32_74 = arith.constant 64 : i32
    %c0_i32_75 = arith.constant 0 : i32
    %208 = arith.cmpi eq, %c64_i32_74, %c0_i32_75 : i32
    %c1_i32_76 = arith.constant 1 : i32
    %209 = arith.select %208, %c1_i32_76, %c64_i32_74 : i32
    %210 = vector.broadcast %209 : i32 to vector<1x128xi32>
    %211 = arith.remsi %207, %210 : vector<1x128xi32>
    %c0_i32_77 = arith.constant 0 : i32
    %212 = vector.broadcast %c0_i32_77 : i32 to vector<1x128xi32>
    %213 = arith.cmpi ne, %211, %212 : vector<1x128xi32>
    %c0_i32_78 = arith.constant 0 : i32
    %214 = vector.broadcast %c0_i32_78 : i32 to vector<1x128xi32>
    %215 = arith.cmpi slt, %211, %214 : vector<1x128xi32>
    %c0_i32_79 = arith.constant 0 : i32
    %216 = arith.cmpi slt, %209, %c0_i32_79 : i32
    %217 = vector.broadcast %216 : i1 to vector<1x128xi1>
    %218 = vector.broadcast %217 : vector<1x128xi1> to vector<1x128xi1>
    %219 = arith.xori %215, %218 : vector<1x128xi1>
    %220 = arith.andi %219, %213 : vector<1x128xi1>
    %221 = vector.broadcast %209 : i32 to vector<1x128xi32>
    %222 = arith.addi %211, %221 : vector<1x128xi32>
    %223 = arith.select %220, %222, %211 : vector<1x128xi1>, vector<1x128xi32>
    %224 = vector.extract_strided_slice %206 {offsets = [0, 124], sizes = [128, 128], strides = [1, 1]} : vector<128x384xf32> to vector<128x128xf32>
    %c4_i32 = arith.constant 4 : i32
    %225 = vector.broadcast %c4_i32 : i32 to vector<1x128xi32>
    %226 = arith.cmpi sge, %223, %225 : vector<1x128xi32>
    %227 = arith.extui %226 : vector<1x128xi1> to vector<1x128xi32>
    %228 = arith.sitofp %227 : vector<1x128xi32> to vector<1x128xf32>
    %229 = vector.broadcast %228 : vector<1x128xf32> to vector<128x128xf32>
    %230 = arith.mulf %224, %229 : vector<128x128xf32>
    %231 = vector.extract_strided_slice %206 {offsets = [0, 128], sizes = [128, 128], strides = [1, 1]} : vector<128x384xf32> to vector<128x128xf32>
    %232 = vector.extract_strided_slice %206 {offsets = [0, 132], sizes = [128, 128], strides = [1, 1]} : vector<128x384xf32> to vector<128x128xf32>
    %c60_i32 = arith.constant 60 : i32
    %233 = vector.broadcast %c60_i32 : i32 to vector<1x128xi32>
    %234 = arith.cmpi slt, %223, %233 : vector<1x128xi32>
    %235 = arith.extui %234 : vector<1x128xi1> to vector<1x128xi32>
    %236 = arith.sitofp %235 : vector<1x128xi32> to vector<1x128xf32>
    %237 = vector.broadcast %236 : vector<1x128xf32> to vector<128x128xf32>
    %238 = arith.mulf %232, %237 : vector<128x128xf32>
    %239 = tpu.concatenate %230, %231, %238 in 0 : vector<128x128xf32>, vector<128x128xf32>, vector<128x128xf32> -> vector<384x128xf32>
    %c0_80 = arith.constant 0 : index
    %c0_81 = arith.constant 0 : index
    %240 = vector.load %arg14[%c0_80, %c0_81] : memref<128x384xbf16, #tpu.memory_space<vmem>>, vector<128x384xbf16>
    %241 = arith.truncf %239 : vector<384x128xf32> to vector<384x128xbf16>
    %cst_82 = arith.constant dense<0.000000e+00> : vector<128x128xf32>
    %242 = tpu.matmul %240, %241, %cst_82 {dimension_numbers = #tpu.dot_dimension_numbers<[1], [0], [0], [1], [0, 0, 1, 1], [], []>} : vector<128x384xbf16>, vector<384x128xbf16>, vector<128x128xf32> -> vector<128x128xf32>
    %c0_83 = arith.constant 0 : index
    %c0_84 = arith.constant 0 : index
    %243 = vector.load %arg15[%c0_83, %c0_84] : memref<128x1xf32, #tpu.memory_space<vmem>>, vector<128x1xf32>
    %244 = vector.broadcast %243 : vector<128x1xf32> to vector<128x128xf32>
    %245 = arith.addf %242, %244 : vector<128x128xf32>
    %cst_85 = arith.constant 1.000000e-01 : f32
    %246 = vector.broadcast %cst_85 : f32 to vector<128x128xf32>
    %247 = arith.mulf %246, %245 : vector<128x128xf32>
    %248 = arith.maximumf %245, %247 : vector<128x128xf32>
    %cst_86 = arith.constant 0.000000e+00 : f32
    %249 = vector.broadcast %cst_86 : f32 to vector<128x128xf32>
    %250 = tpu.concatenate %249, %248, %249 in 1 : vector<128x128xf32>, vector<128x128xf32>, vector<128x128xf32> -> vector<128x384xf32>
    %251 = tpu.iota {dimensions = array<i32: 1>} : vector<1x128xi32>
    %c64_i32_87 = arith.constant 64 : i32
    %c0_i32_88 = arith.constant 0 : i32
    %252 = arith.cmpi eq, %c64_i32_87, %c0_i32_88 : i32
    %c1_i32_89 = arith.constant 1 : i32
    %253 = arith.select %252, %c1_i32_89, %c64_i32_87 : i32
    %254 = vector.broadcast %253 : i32 to vector<1x128xi32>
    %255 = arith.remsi %251, %254 : vector<1x128xi32>
    %c0_i32_90 = arith.constant 0 : i32
    %256 = vector.broadcast %c0_i32_90 : i32 to vector<1x128xi32>
    %257 = arith.cmpi ne, %255, %256 : vector<1x128xi32>
    %c0_i32_91 = arith.constant 0 : i32
    %258 = vector.broadcast %c0_i32_91 : i32 to vector<1x128xi32>
    %259 = arith.cmpi slt, %255, %258 : vector<1x128xi32>
    %c0_i32_92 = arith.constant 0 : i32
    %260 = arith.cmpi slt, %253, %c0_i32_92 : i32
    %261 = vector.broadcast %260 : i1 to vector<1x128xi1>
    %262 = vector.broadcast %261 : vector<1x128xi1> to vector<1x128xi1>
    %263 = arith.xori %259, %262 : vector<1x128xi1>
    %264 = arith.andi %263, %257 : vector<1x128xi1>
    %265 = vector.broadcast %253 : i32 to vector<1x128xi32>
    %266 = arith.addi %255, %265 : vector<1x128xi32>
    %267 = arith.select %264, %266, %255 : vector<1x128xi1>, vector<1x128xi32>
    %268 = vector.extract_strided_slice %250 {offsets = [0, 124], sizes = [128, 128], strides = [1, 1]} : vector<128x384xf32> to vector<128x128xf32>
    %c4_i32_93 = arith.constant 4 : i32
    %269 = vector.broadcast %c4_i32_93 : i32 to vector<1x128xi32>
    %270 = arith.cmpi sge, %267, %269 : vector<1x128xi32>
    %271 = arith.extui %270 : vector<1x128xi1> to vector<1x128xi32>
    %272 = arith.sitofp %271 : vector<1x128xi32> to vector<1x128xf32>
    %273 = vector.broadcast %272 : vector<1x128xf32> to vector<128x128xf32>
    %274 = arith.mulf %268, %273 : vector<128x128xf32>
    %275 = vector.extract_strided_slice %250 {offsets = [0, 128], sizes = [128, 128], strides = [1, 1]} : vector<128x384xf32> to vector<128x128xf32>
    %276 = vector.extract_strided_slice %250 {offsets = [0, 132], sizes = [128, 128], strides = [1, 1]} : vector<128x384xf32> to vector<128x128xf32>
    %c60_i32_94 = arith.constant 60 : i32
    %277 = vector.broadcast %c60_i32_94 : i32 to vector<1x128xi32>
    %278 = arith.cmpi slt, %267, %277 : vector<1x128xi32>
    %279 = arith.extui %278 : vector<1x128xi1> to vector<1x128xi32>
    %280 = arith.sitofp %279 : vector<1x128xi32> to vector<1x128xf32>
    %281 = vector.broadcast %280 : vector<1x128xf32> to vector<128x128xf32>
    %282 = arith.mulf %276, %281 : vector<128x128xf32>
    %283 = tpu.concatenate %274, %275, %282 in 0 : vector<128x128xf32>, vector<128x128xf32>, vector<128x128xf32> -> vector<384x128xf32>
    %c0_95 = arith.constant 0 : index
    %c0_96 = arith.constant 0 : index
    %284 = vector.load %arg16[%c0_95, %c0_96] : memref<128x384xbf16, #tpu.memory_space<vmem>>, vector<128x384xbf16>
    %285 = arith.truncf %283 : vector<384x128xf32> to vector<384x128xbf16>
    %cst_97 = arith.constant dense<0.000000e+00> : vector<128x128xf32>
    %286 = tpu.matmul %284, %285, %cst_97 {dimension_numbers = #tpu.dot_dimension_numbers<[1], [0], [0], [1], [0, 0, 1, 1], [], []>} : vector<128x384xbf16>, vector<384x128xbf16>, vector<128x128xf32> -> vector<128x128xf32>
    %c0_98 = arith.constant 0 : index
    %c0_99 = arith.constant 0 : index
    %287 = vector.load %arg17[%c0_98, %c0_99] : memref<128x1xf32, #tpu.memory_space<vmem>>, vector<128x1xf32>
    %288 = vector.broadcast %287 : vector<128x1xf32> to vector<128x128xf32>
    %289 = arith.addf %286, %288 : vector<128x128xf32>
    %290 = arith.addf %289, %204 : vector<128x128xf32>
    %cst_100 = arith.constant 1.000000e-01 : f32
    %291 = vector.broadcast %cst_100 : f32 to vector<128x128xf32>
    %292 = arith.mulf %291, %290 : vector<128x128xf32>
    %293 = arith.maximumf %290, %292 : vector<128x128xf32>
    %c0_101 = arith.constant 0 : index
    %c0_102 = arith.constant 0 : index
    %294 = vector.load %arg22[%c0_101, %c0_102] : memref<256x128xbf16, #tpu.memory_space<vmem>>, vector<256x128xbf16>
    %295 = arith.truncf %293 : vector<128x128xf32> to vector<128x128xbf16>
    %cst_103 = arith.constant dense<0.000000e+00> : vector<256x128xf32>
    %296 = tpu.matmul %294, %295, %cst_103 {dimension_numbers = #tpu.dot_dimension_numbers<[1], [0], [0], [1], [0, 0, 1, 1], [], []>} : vector<256x128xbf16>, vector<128x128xbf16>, vector<256x128xf32> -> vector<256x128xf32>
    %c0_104 = arith.constant 0 : index
    %c0_105 = arith.constant 0 : index
    %297 = vector.load %arg23[%c0_104, %c0_105] : memref<256x1xf32, #tpu.memory_space<vmem>>, vector<256x1xf32>
    %298 = vector.broadcast %297 : vector<256x1xf32> to vector<256x128xf32>
    %299 = arith.addf %296, %298 : vector<256x128xf32>
    %cst_106 = arith.constant 0.000000e+00 : f32
    %300 = vector.broadcast %cst_106 : f32 to vector<128x128xf32>
    %301 = tpu.concatenate %300, %293, %300 in 1 : vector<128x128xf32>, vector<128x128xf32>, vector<128x128xf32> -> vector<128x384xf32>
    %302 = tpu.iota {dimensions = array<i32: 1>} : vector<1x128xi32>
    %c64_i32_107 = arith.constant 64 : i32
    %c0_i32_108 = arith.constant 0 : i32
    %303 = arith.cmpi eq, %c64_i32_107, %c0_i32_108 : i32
    %c1_i32_109 = arith.constant 1 : i32
    %304 = arith.select %303, %c1_i32_109, %c64_i32_107 : i32
    %305 = vector.broadcast %304 : i32 to vector<1x128xi32>
    %306 = arith.remsi %302, %305 : vector<1x128xi32>
    %c0_i32_110 = arith.constant 0 : i32
    %307 = vector.broadcast %c0_i32_110 : i32 to vector<1x128xi32>
    %308 = arith.cmpi ne, %306, %307 : vector<1x128xi32>
    %c0_i32_111 = arith.constant 0 : i32
    %309 = vector.broadcast %c0_i32_111 : i32 to vector<1x128xi32>
    %310 = arith.cmpi slt, %306, %309 : vector<1x128xi32>
    %c0_i32_112 = arith.constant 0 : i32
    %311 = arith.cmpi slt, %304, %c0_i32_112 : i32
    %312 = vector.broadcast %311 : i1 to vector<1x128xi1>
    %313 = vector.broadcast %312 : vector<1x128xi1> to vector<1x128xi1>
    %314 = arith.xori %310, %313 : vector<1x128xi1>
    %315 = arith.andi %314, %308 : vector<1x128xi1>
    %316 = vector.broadcast %304 : i32 to vector<1x128xi32>
    %317 = arith.addi %306, %316 : vector<1x128xi32>
    %318 = arith.select %315, %317, %306 : vector<1x128xi1>, vector<1x128xi32>
    %319 = vector.extract_strided_slice %301 {offsets = [0, 120], sizes = [128, 128], strides = [1, 1]} : vector<128x384xf32> to vector<128x128xf32>
    %c8_i32 = arith.constant 8 : i32
    %320 = vector.broadcast %c8_i32 : i32 to vector<1x128xi32>
    %321 = arith.cmpi sge, %318, %320 : vector<1x128xi32>
    %322 = arith.extui %321 : vector<1x128xi1> to vector<1x128xi32>
    %323 = arith.sitofp %322 : vector<1x128xi32> to vector<1x128xf32>
    %324 = vector.broadcast %323 : vector<1x128xf32> to vector<128x128xf32>
    %325 = arith.mulf %319, %324 : vector<128x128xf32>
    %326 = vector.extract_strided_slice %301 {offsets = [0, 128], sizes = [128, 128], strides = [1, 1]} : vector<128x384xf32> to vector<128x128xf32>
    %327 = vector.extract_strided_slice %301 {offsets = [0, 136], sizes = [128, 128], strides = [1, 1]} : vector<128x384xf32> to vector<128x128xf32>
    %c56_i32 = arith.constant 56 : i32
    %328 = vector.broadcast %c56_i32 : i32 to vector<1x128xi32>
    %329 = arith.cmpi slt, %318, %328 : vector<1x128xi32>
    %330 = arith.extui %329 : vector<1x128xi1> to vector<1x128xi32>
    %331 = arith.sitofp %330 : vector<1x128xi32> to vector<1x128xf32>
    %332 = vector.broadcast %331 : vector<1x128xf32> to vector<128x128xf32>
    %333 = arith.mulf %327, %332 : vector<128x128xf32>
    %334 = tpu.concatenate %325, %326, %333 in 0 : vector<128x128xf32>, vector<128x128xf32>, vector<128x128xf32> -> vector<384x128xf32>
    %c0_113 = arith.constant 0 : index
    %c0_114 = arith.constant 0 : index
    %335 = vector.load %arg18[%c0_113, %c0_114] : memref<256x384xbf16, #tpu.memory_space<vmem>>, vector<256x384xbf16>
    %336 = arith.truncf %334 : vector<384x128xf32> to vector<384x128xbf16>
    %cst_115 = arith.constant dense<0.000000e+00> : vector<256x128xf32>
    %337 = tpu.matmul %335, %336, %cst_115 {dimension_numbers = #tpu.dot_dimension_numbers<[1], [0], [0], [1], [0, 0, 1, 1], [], []>} : vector<256x384xbf16>, vector<384x128xbf16>, vector<256x128xf32> -> vector<256x128xf32>
    %c0_116 = arith.constant 0 : index
    %c0_117 = arith.constant 0 : index
    %338 = vector.load %arg19[%c0_116, %c0_117] : memref<256x1xf32, #tpu.memory_space<vmem>>, vector<256x1xf32>
    %339 = vector.broadcast %338 : vector<256x1xf32> to vector<256x128xf32>
    %340 = arith.addf %337, %339 : vector<256x128xf32>
    %cst_118 = arith.constant 1.000000e-01 : f32
    %341 = vector.broadcast %cst_118 : f32 to vector<256x128xf32>
    %342 = arith.mulf %341, %340 : vector<256x128xf32>
    %343 = arith.maximumf %340, %342 : vector<256x128xf32>
    %cst_119 = arith.constant 0.000000e+00 : f32
    %344 = vector.broadcast %cst_119 : f32 to vector<256x128xf32>
    %345 = tpu.concatenate %344, %343, %344 in 1 : vector<256x128xf32>, vector<256x128xf32>, vector<256x128xf32> -> vector<256x384xf32>
    %346 = tpu.iota {dimensions = array<i32: 1>} : vector<1x128xi32>
    %c64_i32_120 = arith.constant 64 : i32
    %c0_i32_121 = arith.constant 0 : i32
    %347 = arith.cmpi eq, %c64_i32_120, %c0_i32_121 : i32
    %c1_i32_122 = arith.constant 1 : i32
    %348 = arith.select %347, %c1_i32_122, %c64_i32_120 : i32
    %349 = vector.broadcast %348 : i32 to vector<1x128xi32>
    %350 = arith.remsi %346, %349 : vector<1x128xi32>
    %c0_i32_123 = arith.constant 0 : i32
    %351 = vector.broadcast %c0_i32_123 : i32 to vector<1x128xi32>
    %352 = arith.cmpi ne, %350, %351 : vector<1x128xi32>
    %c0_i32_124 = arith.constant 0 : i32
    %353 = vector.broadcast %c0_i32_124 : i32 to vector<1x128xi32>
    %354 = arith.cmpi slt, %350, %353 : vector<1x128xi32>
    %c0_i32_125 = arith.constant 0 : i32
    %355 = arith.cmpi slt, %348, %c0_i32_125 : i32
    %356 = vector.broadcast %355 : i1 to vector<1x128xi1>
    %357 = vector.broadcast %356 : vector<1x128xi1> to vector<1x128xi1>
    %358 = arith.xori %354, %357 : vector<1x128xi1>
    %359 = arith.andi %358, %352 : vector<1x128xi1>
    %360 = vector.broadcast %348 : i32 to vector<1x128xi32>
    %361 = arith.addi %350, %360 : vector<1x128xi32>
    %362 = arith.select %359, %361, %350 : vector<1x128xi1>, vector<1x128xi32>
    %363 = vector.extract_strided_slice %345 {offsets = [0, 120], sizes = [256, 128], strides = [1, 1]} : vector<256x384xf32> to vector<256x128xf32>
    %c8_i32_126 = arith.constant 8 : i32
    %364 = vector.broadcast %c8_i32_126 : i32 to vector<1x128xi32>
    %365 = arith.cmpi sge, %362, %364 : vector<1x128xi32>
    %366 = arith.extui %365 : vector<1x128xi1> to vector<1x128xi32>
    %367 = arith.sitofp %366 : vector<1x128xi32> to vector<1x128xf32>
    %368 = vector.broadcast %367 : vector<1x128xf32> to vector<256x128xf32>
    %369 = arith.mulf %363, %368 : vector<256x128xf32>
    %370 = vector.extract_strided_slice %345 {offsets = [0, 128], sizes = [256, 128], strides = [1, 1]} : vector<256x384xf32> to vector<256x128xf32>
    %371 = vector.extract_strided_slice %345 {offsets = [0, 136], sizes = [256, 128], strides = [1, 1]} : vector<256x384xf32> to vector<256x128xf32>
    %c56_i32_127 = arith.constant 56 : i32
    %372 = vector.broadcast %c56_i32_127 : i32 to vector<1x128xi32>
    %373 = arith.cmpi slt, %362, %372 : vector<1x128xi32>
    %374 = arith.extui %373 : vector<1x128xi1> to vector<1x128xi32>
    %375 = arith.sitofp %374 : vector<1x128xi32> to vector<1x128xf32>
    %376 = vector.broadcast %375 : vector<1x128xf32> to vector<256x128xf32>
    %377 = arith.mulf %371, %376 : vector<256x128xf32>
    %378 = tpu.concatenate %369, %370, %377 in 0 : vector<256x128xf32>, vector<256x128xf32>, vector<256x128xf32> -> vector<768x128xf32>
    %c0_128 = arith.constant 0 : index
    %c0_129 = arith.constant 0 : index
    %379 = vector.load %arg20[%c0_128, %c0_129] : memref<256x768xbf16, #tpu.memory_space<vmem>>, vector<256x768xbf16>
    %380 = arith.truncf %378 : vector<768x128xf32> to vector<768x128xbf16>
    %cst_130 = arith.constant dense<0.000000e+00> : vector<256x128xf32>
    %381 = tpu.matmul %379, %380, %cst_130 {dimension_numbers = #tpu.dot_dimension_numbers<[1], [0], [0], [1], [0, 0, 1, 1], [], []>} : vector<256x768xbf16>, vector<768x128xbf16>, vector<256x128xf32> -> vector<256x128xf32>
    %c0_131 = arith.constant 0 : index
    %c0_132 = arith.constant 0 : index
    %382 = vector.load %arg21[%c0_131, %c0_132] : memref<256x1xf32, #tpu.memory_space<vmem>>, vector<256x1xf32>
    %383 = vector.broadcast %382 : vector<256x1xf32> to vector<256x128xf32>
    %384 = arith.addf %381, %383 : vector<256x128xf32>
    %385 = arith.addf %384, %299 : vector<256x128xf32>
    %cst_133 = arith.constant 1.000000e-01 : f32
    %386 = vector.broadcast %cst_133 : f32 to vector<256x128xf32>
    %387 = arith.mulf %386, %385 : vector<256x128xf32>
    %388 = arith.maximumf %385, %387 : vector<256x128xf32>
    %c0_134 = arith.constant 0 : index
    %c0_135 = arith.constant 0 : index
    %389 = vector.load %arg24[%c0_134, %c0_135] : memref<256x1xf32, #tpu.memory_space<vmem>>, vector<256x1xf32>
    %390 = vector.broadcast %389 : vector<256x1xf32> to vector<256x128xf32>
    %391 = arith.mulf %388, %390 : vector<256x128xf32>
    %cst_136 = arith.constant dense<0.000000e+00> : vector<128xf32>
    %392 = vector.multi_reduction <add>, %391, %cst_136 [0] : vector<256x128xf32> to vector<128xf32>
    %393 = vector.shape_cast %392 : vector<128xf32> to vector<1x128xf32>
    %c0_137 = arith.constant 0 : index
    %c0_138 = arith.constant 0 : index
    %394 = vector.load %arg25[%c0_137, %c0_138] : memref<1x1xf32, #tpu.memory_space<vmem>>, vector<1x1xf32>
    %395 = vector.broadcast %394 : vector<1x1xf32> to vector<1x128xf32>
    %396 = arith.addf %393, %395 : vector<1x128xf32>
    %cst_139 = arith.constant 0.000000e+00 : f32
    %397 = vector.broadcast %cst_139 : f32 to vector<1x128xf32>
    %398 = arith.subf %397, %396 : vector<1x128xf32>
    %399 = math.exp %398 : vector<1x128xf32>
    %cst_140 = arith.constant 1.000000e+00 : f32
    %400 = vector.broadcast %cst_140 : f32 to vector<1x128xf32>
    %401 = arith.addf %400, %399 : vector<1x128xf32>
    %cst_141 = arith.constant 1.000000e+00 : f32
    %402 = vector.broadcast %cst_141 : f32 to vector<1x128xf32>
    %403 = arith.divf %402, %401 : vector<1x128xf32>
    %404 = vector.broadcast %403 : vector<1x128xf32> to vector<256x128xf32>
    %405 = arith.mulf %388, %404 : vector<256x128xf32>
    %c0_142 = arith.constant 0 : index
    %c0_143 = arith.constant 0 : index
    %406 = vector.load %arg26[%c0_142, %c0_143] : memref<128x2xf32, #tpu.memory_space<vmem>>, vector<128x2xf32>
    %cst_144 = arith.constant dense<0.000000e+00> : vector<256x2xf32>
    %407 = tpu.matmul %405, %406, %cst_144 {dimension_numbers = #tpu.dot_dimension_numbers<[1], [0], [0], [1], [0, 0, 1, 1], [], []>} : vector<256x128xf32>, vector<128x2xf32>, vector<256x2xf32> -> vector<256x2xf32>
    %c0_145 = arith.constant 0 : index
    %c0_146 = arith.constant 0 : index
    %408 = vector.load %arg27[%c0_145, %c0_146] : memref<128x256xf32, #tpu.memory_space<vmem>>, vector<128x256xf32>
    %cst_147 = arith.constant dense<0.000000e+00> : vector<128x2xf32>
    %409 = tpu.matmul %408, %407, %cst_147 {dimension_numbers = #tpu.dot_dimension_numbers<[1], [0], [0], [1], [0, 0, 1, 1], [], []>} : vector<128x256xf32>, vector<256x2xf32>, vector<128x2xf32> -> vector<128x2xf32>
    %c0_148 = arith.constant 0 : index
    %c0_149 = arith.constant 0 : index
    %410 = vector.load %arg28[%c0_148, %c0_149] : memref<128x1xf32, #tpu.memory_space<vmem>>, vector<128x1xf32>
    %411 = vector.broadcast %410 : vector<128x1xf32> to vector<128x2xf32>
    %412 = arith.addf %409, %411 : vector<128x2xf32>
    %cst_150 = arith.constant 0.000000e+00 : f32
    %413 = vector.broadcast %cst_150 : f32 to vector<128x2xf32>
    %414 = arith.maximumf %412, %413 : vector<128x2xf32>
    %c0_151 = arith.constant 0 : index
    %c0_152 = arith.constant 0 : index
    %415 = vector.load %arg29[%c0_151, %c0_152] : memref<128x1xf32, #tpu.memory_space<vmem>>, vector<128x1xf32>
    %416 = vector.broadcast %415 : vector<128x1xf32> to vector<128x2xf32>
    %417 = arith.mulf %414, %416 : vector<128x2xf32>
    %cst_153 = arith.constant dense<0.000000e+00> : vector<2xf32>
    %418 = vector.multi_reduction <add>, %417, %cst_153 [0] : vector<128x2xf32> to vector<2xf32>
    %419 = vector.shape_cast %418 : vector<2xf32> to vector<1x2xf32>
    %c0_154 = arith.constant 0 : index
    %c0_155 = arith.constant 0 : index
    %420 = vector.load %arg30[%c0_154, %c0_155] : memref<1x1xf32, #tpu.memory_space<vmem>>, vector<1x1xf32>
    %421 = vector.broadcast %420 : vector<1x1xf32> to vector<1x2xf32>
    %422 = arith.addf %419, %421 : vector<1x2xf32>
    %c0_156 = arith.constant 0 : index
    %c0_157 = arith.constant 0 : index
    %423 = vector.load %arg31[%c0_156, %c0_157] : memref<1x2xf32, #tpu.memory_space<vmem>>, vector<1x2xf32>
    tpu.vector_store %arg31[%c0_156, %c0_157], %422 {strides = array<i32>} : memref<1x2xf32, #tpu.memory_space<vmem>>, vector<1x2xf32>,
    return
  }
}

</mosaic_0001>

<bundles_post_ra>
// kernel: wavelet_cnn_forward.1
= control target key start
LH: loop header
LB: loop body
LE: loop exit
PB: predicated region body
PF: predicated region fallthrough
CT: control target
= control target key end

     0   :  { %s12063_s6 = smov 1   ;;  %s12064_s10 = smov 2   ;;  %s16272_s0 = inlined_call_operand.smem [shape: u32[32], index: -1, kind: input, shape index: {}] }
   0x1   :  { %s12142_s5 = sld [smem:[%s16272_s0]]   ;;  %s12065_s14 = smov 3  }
   0x2   :  { %s12147_s9 = sld [smem:[%s16272_s0 + %s12063_s6]]   ;;  %s12066_s18 = smov 4  }
   0x3   :  { %s12152_s13 = sld [smem:[%s16272_s0 + %s12064_s10]]   ;;  %s12067_s22 = smov 5  }
   0x4   :  { %s12157_s17 = sld [smem:[%s16272_s0 + %s12065_s14]]   ;;  %s12068_s26 = smov 6  }
   0x5   :  { %s12162_s21 = sld [smem:[%s16272_s0 + %s12066_s18]]   ;;  %s12069_s30 = smov 7  }
   0x6   :  { %s12167_s25 = sld [smem:[%s16272_s0 + %s12067_s22]]   ;;  %s12070_s4 = smov 8  }
   0x7   :  { %16332 = sst [smem:[#allocation53_spill]] %s12142_s5  ;;  %s12071_s10 = smov 9  }
   0x8   :  { %16333 = sst [smem:[#allocation54_spill]] %s12147_s9  ;;  %s12072_s15 = smov 10  }
   0x9   :  { %16334 = sst [smem:[#allocation55_spill]] %s12152_s13  ;;  %s12073_s20 = smov 11  }
   0xa   :  { %s12172_s29 = sld [smem:[%s16272_s0 + %s12068_s26]]   ;;  %s12074_s26 = smov 12  }
   0xb   :  { %s12177_s3 = sld [smem:[%s16272_s0 + %s12069_s30]]   ;;  %s12075_s1 = smov 13  }
   0xc   :  { %s12182_s8 = sld [smem:[%s16272_s0 + %s12070_s4]]   ;;  %s12076_s7 = smov 14  }
   0xd   :  { %s12187_s14 = sld [smem:[%s16272_s0 + %s12071_s10]]   ;;  %s12078_s22 = smov 16  }
   0xe   :  { %s12192_s19 = sld [smem:[%s16272_s0 + %s12072_s15]]   ;;  %s12077_s15 = smov 15  }
   0xf   :  { %s12197_s24 = sld [smem:[%s16272_s0 + %s12073_s20]]   ;;  %s12079_s28 = smov 17  }
  0x10   :  { %s12202_s30 = sld [smem:[%s16272_s0 + %s12074_s26]]   ;;  %s12088_s10 = smov 26  }
  0x11   :  { %s12207_s6 = sld [smem:[%s16272_s0 + %s12075_s1]]   ;;  %s12089_s16 = smov 27  }
  0x12   :  { %s12212_s12 = sld [smem:[%s16272_s0 + %s12076_s7]]   ;;  %s12080_s7 = smov 18  }
  0x13   :  { %s12217_s20 = sld [smem:[%s16272_s0 + %s12077_s15]]   ;;  %s12081_s15 = smov 19  }
  0x14   :  { %s12222_s27 = sld [smem:[%s16272_s0 + %s12078_s22]]   ;;  %s12082_s22 = smov 20  }
  0x15   :  { %16335 = sst [smem:[#allocation56_spill]] %s12197_s24  ;;  %s12090_s23 = smov 28  }
  0x16   :  { %s12227_s4 = sld [smem:[%s16272_s0 + %s12079_s28]]   ;;  %s12083_s28 = smov 21  }
  0x17   :  { %16336 = sst [smem:[#allocation57_spill]] %s12207_s6  ;;  %s12091_s1 = smov 29  }
  0x18   :  { %s12232_s13 = sld [smem:[%s16272_s0 + %s12080_s7]]   ;;  %s12084_s7 = smov 22  }
  0x19   :  { %16337 = sst [smem:[#allocation58_spill]] %s12217_s20 }
  0x1a   :  { %s12237_s9 = sld [smem:[%s16272_s0 + %s12081_s15]]   ;;  %s12085_s15 = smov 23  }
  0x1b   :  { %s12242_s5 = sld [smem:[%s16272_s0 + %s12082_s22]]   ;;  %s12086_s22 = smov 24  }
  0x1c   :  { %16338 = sst [smem:[#allocation59_spill]] %s12227_s4 }
  0x1d   :  { %s12247_s4 = sld [smem:[%s16272_s0 + %s12083_s28]]   ;;  %s12087_s28 = smov 25  }
  0x1e   :  { %16339 = sst [smem:[#allocation60_spill]] %s12232_s13 }
  0x1f   :  { %s12252_s13 = sld [smem:[%s16272_s0 + %s12084_s7]]  }
  0x20   :  { %s12257_s20 = sld [smem:[%s16272_s0 + %s12085_s15]]  }
  0x21   :  { %16340 = sst [smem:[#allocation61_spill]] %s12242_s5 }
  0x22   :  { %s12262_s5 = sld [smem:[%s16272_s0 + %s12086_s22]]  }
  0x23   :  { %16341 = sst [smem:[#allocation62_spill]] %s12247_s4 }
  0x24   :  { %s9372_s4 = sld [smem:[%s16272_s0 + %s12087_s28]]  }
  0x25   :  { %s12270_s6 = sld [smem:[%s16272_s0 + %s12088_s10]]   ;;  %s12092_s10 = smov 31  }
  0x26   :  { %16342 = sst [smem:[#allocation63_spill]] %s12257_s20 }
  0x27   :  { %s12275_s20 = sld [smem:[%s16272_s0 + %s12089_s16]]   ;;  %s12093_s16 = smov 30  }
  0x28   :  { %16343 = sst [smem:[#allocation64_spill]] %s12262_s5 }
  0x29   :  { %s12280_s5 = sld [smem:[%s16272_s0 + %s12090_s23]]  }
  0x2a   :  { %s12285_s24 = sld [smem:[%s16272_s0 + %s12091_s1]]   ;;  %v68_v0 = vstv %s9372_s4 }
  0x2b   :  { %16344 = sst [smem:[#allocation65_spill]] %s12270_s6  ;;  %69 = vst [vmem:[#allocation2] sm:$0x1] %v68_v0 }
  0x2c   :  { %s12290_s6 = sld [smem:[%s16272_s0 + %s12092_s10]]  }
  0x2d   :  { %s9377_s22 = sld [smem:[%s16272_s0 + %s12093_s16]]  }
  0x33   :  { %v70_v1 = vstv %s9377_s22 }
  0x34   :  { %71 = vst [vmem:[#allocation3] sm:$0x1] %v70_v1 }
  0x35   :  { %72 = vsyncpa [#allocation5], 0 }
  0x36   :  { %73 = vsyncpa [#allocation8], 0 }
  0x37   :  { %74 = vsyncpa [#allocation11], 0 }
  0x38   :  { %75 = vsyncpa [#allocation14], 0 }
  0x39   :  { %76 = vsyncpa [#allocation17], 0 }
  0x3a   :  { %77 = vsyncpa [#allocation20], 0 }
  0x3b   :  { %78 = vsyncpa [#allocation23], 0 }
  0x3c   :  { %79 = vsyncpa [#allocation26], 0 }
  0x3d   :  { %80 = vsyncpa [#allocation29], 0 }
  0x3e   :  { %81 = vsyncpa [#allocation32], 0 }
  0x3f   :  { %82 = vsyncpa [#allocation35], 0 }
  0x40   :  { %83 = vsyncpa [#allocation38], 0 }
  0x41   :  { %84 = vsyncpa [#allocation6], 0  ;;  %s108_s0 = sshll.u32 %s12162_s21, 4  ;;  %s12094_s4 = smov [#allocation7]   ;;  %s109_s0 = int_to_ptr.hbm [resolvable:$true] %s108_s0 }
  0x42   :  { %s110_s23 = sshll.u32 %s12094_s4, 4  ;;  %s134_s26 = sshll.u32 %s12172_s29, 4  ;;  %s111_s23 = int_to_ptr.vmem [resolvable:$true] %s110_s23  ;;  %s135_s26 = int_to_ptr.hbm [resolvable:$true] %s134_s26 }
  0x43   :  { %s11485_s1 = sshra.s32 %s109_s0, 4  ;;  %s11489_s2 = scalar_lea.hbm %s12162_s21, 64  ;;  %s11486_s1 = int_to_ptr.hbm [resolvable:$true] %s11485_s1 }
  0x44   :  { %s11487_s28 = scalar_lea.hbm %s11486_s1, 64  ;;  %p11490_p1 = scmp.lt.s32.totalorder %s11486_s1, %s12162_s21 }
  0x45   :  { %p11488_p0 = scmp.ne.s32.totalorder %s11486_s1, %s11487_s28  ;;  %p11491_p2 = scmp.lt.s32.totalorder %s11489_s2, %s11487_s28 }
  0x47   :  { %p11492_p3 = por %p11491_p2, %p11490_p1 }
  0x49   :  { %p11493_p4 = pnand %p11492_p3, %p11488_p0 }
  0x4b   :  { %11496 = shalt.err (!%p11493_p4)
}
  0x4c   :  { %s12095_s10 = smov 128   ;;  %s12096_s7 = smov 8  }
  0x4d   :  { %116 = dma.hbm_to_vmem [thread:$0]  %s109_s0, 1024, %s111_s23, [#allocation8], %s12095_s10, %s12095_s10, %s12096_s7  }
  0x4e   :  { %s12097_s11 = smov [#allocation10]   ;;  %s160_s15 = sshll.u32 %s12182_s8, 4  ;;  %s12303_s15 = int_to_ptr.hbm [resolvable:$true] %s160_s15 }
  0x4f   :  { %s136_s16 = sshll.u32 %s12097_s11, 4  ;;  %s11509_s21 = sshra.s32 %s135_s26, 4  ;;  %s137_s16 = int_to_ptr.vmem [resolvable:$true] %s136_s16  ;;  %s11510_s21 = int_to_ptr.hbm [resolvable:$true] %s11509_s21 }
  0x50   :  { %s11511_s18 = scalar_lea.hbm %s11510_s21, 64  ;;  %s11513_s22 = scalar_lea.hbm %s12172_s29, 64 }
  0x51   :  { %p11512_p5 = scmp.ne.s32.totalorder %s11510_s21, %s11511_s18  ;;  %p11514_p6 = scmp.lt.s32.totalorder %s11510_s21, %s12172_s29 }
  0x52   :  { %p11515_p7 = scmp.lt.s32.totalorder %s11513_s22, %s11511_s18 }
  0x54   :  { %p11516_p8 = por %p11515_p7, %p11514_p6 }
  0x56   :  { %p11517_p9 = pnand %p11516_p8, %p11512_p5 }
  0x58   :  { %11520 = shalt.err (!%p11517_p9)
}
  0x59   :  { %142 = dma.hbm_to_vmem [thread:$0]  %s135_s26, 1024, %s137_s16, [#allocation11], %s12095_s10, %s12095_s10, %s12096_s7  }
  0x5a   :  { %s186_s0 = sshll.u32 %s12192_s19, 4  ;;  %s12098_s4 = smov [#allocation13]   ;;  %s12311_s0 = int_to_ptr.hbm [resolvable:$true] %s186_s0 }
  0x5b   :  { %s162_s23 = sshll.u32 %s12098_s4, 4  ;;  %s11533_s1 = sshra.s32 %s12303_s15, 4  ;;  %s163_s23 = int_to_ptr.vmem [resolvable:$true] %s162_s23  ;;  %s11534_s1 = int_to_ptr.hbm [resolvable:$true] %s11533_s1 }
  0x5c   :  { %s11535_s29 = scalar_lea.hbm %s11534_s1, 128  ;;  %s11537_s28 = scalar_lea.hbm %s12182_s8, 128 }
  0x5d   :  { %p11536_p10 = scmp.ne.s32.totalorder %s11534_s1, %s11535_s29  ;;  %p11538_p11 = scmp.lt.s32.totalorder %s11534_s1, %s12182_s8 }
  0x5e   :  { %p11539_p12 = scmp.lt.s32.totalorder %s11537_s28, %s11535_s29 }
  0x60   :  { %p11540_p13 = por %p11539_p12, %p11538_p11 }
  0x62   :  { %p11541_p0 = pnand %p11540_p13, %p11536_p10 }
  0x64   :  { %11544 = shalt.err (!%p11541_p0)
}
  0x65   :  { %168 = dma.hbm_to_vmem [thread:$0]  %s12303_s15, 2048, %s163_s23, [#allocation14], %s12095_s10, %s12095_s10, %s12096_s7  }
  0x66   :  { %s12099_s26 = smov [#allocation16]   ;;  %s11557_s11 = sshra.s32 %s12311_s0, 4  ;;  %s11558_s11 = int_to_ptr.hbm [resolvable:$true] %s11557_s11 }
  0x67   :  { %s188_s2 = sshll.u32 %s12099_s26, 4  ;;  %s11559_s16 = scalar_lea.hbm %s11558_s11, 192  ;;  %s189_s2 = int_to_ptr.vmem [resolvable:$true] %s188_s2 }
  0x68   :  { %p11560_p1 = scmp.ne.s32.totalorder %s11558_s11, %s11559_s16  ;;  %s11561_s8 = scalar_lea.hbm %s12192_s19, 192 }
  0x69   :  { %p11562_p2 = scmp.lt.s32.totalorder %s11558_s11, %s12192_s19  ;;  %p11563_p3 = scmp.lt.s32.totalorder %s11561_s8, %s11559_s16 }
  0x6b   :  { %p11564_p4 = por %p11563_p3, %p11562_p2 }
  0x6d   :  { %p11565_p5 = pnand %p11564_p4, %p11560_p1 }
  0x6f   :  { %11568 = shalt.err (!%p11565_p5)
}
  0x70   :  { %s12100_s21 = smov 192   ;;  %s12101_s15 = smov 12  }
  0x71   :  { %194 = dma.hbm_to_vmem [thread:$0]  %s12311_s0, 3072, %s189_s2, [#allocation17], %s12100_s21, %s12100_s21, %s12101_s15  }
  0x72   :  { %s212_s18 = sshll.u32 %s12202_s30, 4  ;;  %s12102_s22 = smov [#allocation19]   ;;  %s213_s18 = int_to_ptr.hbm [resolvable:$true] %s212_s18 }
  0x73   :  { %s214_s4 = sshll.u32 %s12102_s22, 4  ;;  %s238_s19 = sshll.u32 %s12212_s12, 4  ;;  %s215_s4 = int_to_ptr.vmem [resolvable:$true] %s214_s4  ;;  %s239_s19 = int_to_ptr.hbm [resolvable:$true] %s238_s19 }
  0x74   :  { %s11581_s23 = sshra.s32 %s213_s18, 4  ;;  %s11585_s29 = scalar_lea.hbm %s12202_s30, 64  ;;  %s11582_s23 = int_to_ptr.hbm [resolvable:$true] %s11581_s23 }
  0x75   :  { %s11583_s1 = scalar_lea.hbm %s11582_s23, 64  ;;  %p11586_p7 = scmp.lt.s32.totalorder %s11582_s23, %s12202_s30 }
  0x76   :  { %p11584_p6 = scmp.ne.s32.totalorder %s11582_s23, %s11583_s1  ;;  %p11587_p8 = scmp.lt.s32.totalorder %s11585_s29, %s11583_s1 }
  0x78   :  { %p11588_p9 = por %p11587_p8, %p11586_p7 }
  0x7a   :  { %p11589_p10 = pnand %p11588_p9, %p11584_p6 }
  0x7c   :  { %11592 = shalt.err (!%p11589_p10)
}
  0x7d   :  { %s12103_s28 = smov 64   ;;  %s12104_s0 = smov 4  }
  0x7e   :  { %220 = dma.hbm_to_vmem [thread:$0]  %s213_s18, 1024, %s215_s4, [#allocation20], %s12103_s28, %s12103_s28, %s12104_s0  }
  0x7f   :  { %s12105_s26 = smov [#allocation22]   ;;  %s264_s11 = sshll.u32 %s12222_s27, 4  ;;  %s12335_s11 = int_to_ptr.hbm [resolvable:$true] %s264_s11 }
  0x80   :  { %s240_s2 = sshll.u32 %s12105_s26, 4  ;;  %s11605_s30 = sshra.s32 %s239_s19, 4  ;;  %s241_s2 = int_to_ptr.vmem [resolvable:$true] %s240_s2  ;;  %s11606_s30 = int_to_ptr.hbm [resolvable:$true] %s11605_s30 }
  0x81   :  { %s11607_s16 = scalar_lea.hbm %s11606_s30, 192  ;;  %s11609_s8 = scalar_lea.hbm %s12212_s12, 192 }
  0x82   :  { %p11608_p11 = scmp.ne.s32.totalorder %s11606_s30, %s11607_s16  ;;  %p11610_p12 = scmp.lt.s32.totalorder %s11606_s30, %s12212_s12 }
  0x83   :  { %p11611_p13 = scmp.lt.s32.totalorder %s11609_s8, %s11607_s16 }
  0x85   :  { %p11612_p0 = por %p11611_p13, %p11610_p12 }
  0x87   :  { %p11613_p1 = pnand %p11612_p0, %p11608_p11 }
  0x89   :  { %11616 = shalt.err (!%p11613_p1)
}
  0x8a   :  { %246 = dma.hbm_to_vmem [thread:$0]  %s239_s19, 3072, %s241_s2, [#allocation23], %s12100_s21, %s12100_s21, %s12101_s15  }
  0x8b   :  { %s292_s18 = sshll.u32 %s12237_s9, 4  ;;  %s12106_s22 = smov [#allocation25]   ;;  %s12343_s18 = int_to_ptr.hbm [resolvable:$true] %s292_s18 }
  0x8c   :  { %s266_s4 = sshll.u32 %s12106_s22, 4  ;;  %s11629_s23 = sshra.s32 %s12335_s11, 4  ;;  %s267_s4 = int_to_ptr.vmem [resolvable:$true] %s266_s4  ;;  %s11630_s23 = int_to_ptr.hbm [resolvable:$true] %s11629_s23 }
  0x8d   :  { %s11631_s12 = scalar_lea.hbm %s11630_s23, 192  ;;  %s11633_s1 = scalar_lea.hbm %s12222_s27, 192 }
  0x8e   :  { %p11632_p2 = scmp.ne.s32.totalorder %s11630_s23, %s11631_s12  ;;  %p11634_p3 = scmp.lt.s32.totalorder %s11630_s23, %s12222_s27 }
  0x8f   :  { %p11635_p4 = scmp.lt.s32.totalorder %s11633_s1, %s11631_s12 }
  0x91   :  { %p11636_p5 = por %p11635_p4, %p11634_p3 }
  0x93   :  { %p11637_p6 = pnand %p11636_p5, %p11632_p2 }
  0x95   :  { %11640 = shalt.err (!%p11637_p6)
}
  0x96   :  { %272 = dma.hbm_to_vmem [thread:$0]  %s12335_s11, 3072, %s267_s4, [#allocation26], %s12100_s21, %s12100_s21, %s12101_s15  }
  0x97   :  { %s12107_s19 = smov [#allocation28]   ;;  %s320_s26 = sshll.u32 %s12252_s13, 4  ;;  %s12353_s26 = int_to_ptr.hbm [resolvable:$true] %s320_s26 }
  0x98   :  { %s294_s29 = sshll.u32 %s12107_s19, 4  ;;  %s11653_s27 = sshra.s32 %s12343_s18, 4  ;;  %s295_s29 = int_to_ptr.vmem [resolvable:$true] %s294_s29  ;;  %s11654_s27 = int_to_ptr.hbm [resolvable:$true] %s11653_s27 }
  0x99   :  { %s11655_s2 = scalar_lea.hbm %s11654_s27, 256  ;;  %s11657_s30 = scalar_lea.hbm %s12237_s9, 256 }
  0x9a   :  { %p11656_p7 = scmp.ne.s32.totalorder %s11654_s27, %s11655_s2  ;;  %p11658_p8 = scmp.lt.s32.totalorder %s11654_s27, %s12237_s9 }
  0x9b   :  { %p11659_p9 = scmp.lt.s32.totalorder %s11657_s30, %s11655_s2 }
  0x9d   :  { %p11660_p10 = por %p11659_p9, %p11658_p8 }
  0x9f   :  { %p11661_p11 = pnand %p11660_p10, %p11656_p7 }
  0xa1   :  { %11664 = shalt.err (!%p11661_p11)
}
  0xa2   :  { %300 = dma.hbm_to_vmem [thread:$0]  %s12343_s18, 4096, %s295_s29, [#allocation29], %s12095_s10, %s12095_s10, %s12096_s7  }
  0xa3   :  { %s352_s21 = sshll.u32 %s12275_s20, 4  ;;  %s12108_s15 = smov [#allocation31]   ;;  %s12363_s21 = int_to_ptr.hbm [resolvable:$true] %s352_s21 }
  0xa4   :  { %s322_s11 = sshll.u32 %s12108_s15, 4  ;;  %s11677_s9 = sshra.s32 %s12353_s26, 4  ;;  %s323_s11 = int_to_ptr.vmem [resolvable:$true] %s322_s11  ;;  %s11678_s9 = int_to_ptr.hbm [resolvable:$true] %s11677_s9 }
  0xa5   :  { %s11679_s16 = scalar_lea.hbm %s11678_s9, 128  ;;  %s11681_s8 = scalar_lea.hbm %s12252_s13, 128 }
  0xa6   :  { %p11680_p12 = scmp.ne.s32.totalorder %s11678_s9, %s11679_s16  ;;  %p11682_p13 = scmp.lt.s32.totalorder %s11678_s9, %s12252_s13 }
  0xa7   :  { %p11683_p0 = scmp.lt.s32.totalorder %s11681_s8, %s11679_s16 }
  0xa9   :  { %p11684_p1 = por %p11683_p0, %p11682_p13 }
  0xab   :  { %p11685_p2 = pnand %p11684_p1, %p11680_p12 }
  0xad   :  { %11688 = shalt.err (!%p11685_p2)
}
  0xae   :  { %328 = dma.hbm_to_vmem [thread:$0]  %s12353_s26, 2048, %s323_s11, [#allocation32], %s12103_s28, %s12103_s28, %s12104_s0  }
  0xaf   :  { %s12109_s18 = smov [#allocation34]   ;;  %s11701_s4 = sshra.s32 %s12363_s21, 4  ;;  %s11702_s4 = int_to_ptr.hbm [resolvable:$true] %s11701_s4 }
  0xb0   :  { %s354_s22 = sshll.u32 %s12109_s18, 4  ;;  %s11703_s23 = scalar_lea.hbm %s11702_s4, 256  ;;  %s355_s22 = int_to_ptr.vmem [resolvable:$true] %s354_s22 }
  0xb1   :  { %p11704_p3 = scmp.ne.s32.totalorder %s11702_s4, %s11703_s23  ;;  %s11705_s13 = scalar_lea.hbm %s12275_s20, 256 }
  0xb2   :  { %p11706_p4 = scmp.lt.s32.totalorder %s11702_s4, %s12275_s20  ;;  %p11707_p5 = scmp.lt.s32.totalorder %s11705_s13, %s11703_s23 }
  0xb4   :  { %p11708_p6 = por %p11707_p5, %p11706_p4 }
  0xb6   :  { %p11709_p7 = pnand %p11708_p6, %p11704_p3 }
  0xb8   :  { %11712 = shalt.err (!%p11709_p7)
}
  0xb9   :  { %s12110_s12 = smov 256   ;;  %s12111_s28 = smov 16  }
  0xba   :  { %360 = dma.hbm_to_vmem [thread:$0]  %s12363_s21, 4096, %s355_s22, [#allocation35], %s12110_s12, %s12110_s12, %s12111_s28  }
  0xbb   :  { %s95_s1 = sshll.u32 %s12157_s17, 4  ;;  %s12112_s19 = smov [#allocation4]   ;;  %s96_s1 = int_to_ptr.hbm [resolvable:$true] %s95_s1 }
  0xbc   :  { %s97_s29 = sshll.u32 %s12112_s19, 4  ;;  %s121_s26 = sshll.u32 %s12167_s25, 4  ;;  %s98_s29 = int_to_ptr.vmem [resolvable:$true] %s97_s29  ;;  %s122_s26 = int_to_ptr.hbm [resolvable:$true] %s121_s26 }
  0xbd   :  { %s11725_s27 = sshra.s32 %s96_s1, 4  ;;  %s11729_s2 = scalar_lea.hbm %s12157_s17, 64  ;;  %s11726_s27 = int_to_ptr.hbm [resolvable:$true] %s11725_s27 }
  0xbe   :  { %s11727_s20 = scalar_lea.hbm %s11726_s27, 64  ;;  %p11730_p9 = scmp.lt.s32.totalorder %s11726_s27, %s12157_s17 }
  0xbf   :  { %p11728_p8 = scmp.ne.s32.totalorder %s11726_s27, %s11727_s20  ;;  %p11731_p10 = scmp.lt.s32.totalorder %s11729_s2, %s11727_s20 }
  0xc1   :  { %p11732_p11 = por %p11731_p10, %p11730_p9 }
  0xc3   :  { %p11733_p12 = pnand %p11732_p11, %p11728_p8 }
  0xc5   :  { %11736 = shalt.err (!%p11733_p12)
}
  0xc6   :  { %103 = dma.hbm_to_vmem [thread:$0]  %s96_s1, 1024, %s98_s29, [#allocation5], %s12095_s10, %s12095_s10, %s12096_s7  }
  0xc7   :  { %s12113_s30 = smov [#allocation9]   ;;  %s147_s15 = sshll.u32 %s12177_s3, 4  ;;  %s12384_s15 = int_to_ptr.hbm [resolvable:$true] %s147_s15 }
  0xc8   :  { %s123_s21 = sshll.u32 %s12113_s30, 4  ;;  %s11749_s11 = sshra.s32 %s122_s26, 4  ;;  %s124_s21 = int_to_ptr.vmem [resolvable:$true] %s123_s21  ;;  %s11750_s11 = int_to_ptr.hbm [resolvable:$true] %s11749_s11 }
  0xc9   :  { %s11751_s17 = scalar_lea.hbm %s11750_s11, 64  ;;  %s11753_s9 = scalar_lea.hbm %s12167_s25, 64 }
  0xca   :  { %p11752_p13 = scmp.ne.s32.totalorder %s11750_s11, %s11751_s17  ;;  %p11754_p0 = scmp.lt.s32.totalorder %s11750_s11, %s12167_s25 }
  0xcb   :  { %p11755_p1 = scmp.lt.s32.totalorder %s11753_s9, %s11751_s17 }
  0xcd   :  { %p11756_p2 = por %p11755_p1, %p11754_p0 }
  0xcf   :  { %p11757_p3 = pnand %p11756_p2, %p11752_p13 }
  0xd1   :  { %11760 = shalt.err (!%p11757_p3)
}
  0xd2   :  { %129 = dma.hbm_to_vmem [thread:$0]  %s122_s26, 1024, %s124_s21, [#allocation8], %s12095_s10, %s12095_s10, %s12096_s7  }
  0xd3   :  { %s173_s16 = sshll.u32 %s12187_s14, 4  ;;  %s12114_s8 = smov [#allocation12]   ;;  %s12392_s16 = int_to_ptr.hbm [resolvable:$true] %s173_s16 }
  0xd4   :  { %s149_s18 = sshll.u32 %s12114_s8, 4  ;;  %s11773_s22 = sshra.s32 %s12384_s15, 4  ;;  %s150_s18 = int_to_ptr.vmem [resolvable:$true] %s149_s18  ;;  %s11774_s22 = int_to_ptr.hbm [resolvable:$true] %s11773_s22 }
  0xd5   :  { %s11775_s25 = scalar_lea.hbm %s11774_s22, 64  ;;  %s11777_s4 = scalar_lea.hbm %s12177_s3, 64 }
  0xd6   :  { %p11776_p4 = scmp.ne.s32.totalorder %s11774_s22, %s11775_s25  ;;  %p11778_p5 = scmp.lt.s32.totalorder %s11774_s22, %s12177_s3 }
  0xd7   :  { %p11779_p6 = scmp.lt.s32.totalorder %s11777_s4, %s11775_s25 }
  0xd9   :  { %p11780_p7 = por %p11779_p6, %p11778_p5 }
  0xdb   :  { %p11781_p8 = pnand %p11780_p7, %p11776_p4 }
  0xdd   :  { %11784 = shalt.err (!%p11781_p8)
}
  0xde   :  { %s16345_s23 = sld [smem:[#allocation56_spill]]  ;;  %s12115_s13 = smov [#allocation15]  }
  0xdf   :  { %155 = dma.hbm_to_vmem [thread:$0]  %s12384_s15, 1024, %s150_s18, [#allocation11], %s12095_s10, %s12095_s10, %s12096_s7  }
  0xe0   :  { %s175_s12 = sshll.u32 %s12115_s13, 4  ;;  %s11797_s3 = sshra.s32 %s12392_s16, 4  ;;  %s176_s12 = int_to_ptr.vmem [resolvable:$true] %s175_s12  ;;  %s11798_s3 = int_to_ptr.hbm [resolvable:$true] %s11797_s3 }
  0xe1   :  { %s11799_s1 = scalar_lea.hbm %s11798_s3, 128  ;;  %s11801_s19 = scalar_lea.hbm %s12187_s14, 128 }
  0xe2   :  { %p11800_p9 = scmp.ne.s32.totalorder %s11798_s3, %s11799_s1  ;;  %p11802_p10 = scmp.lt.s32.totalorder %s11798_s3, %s12187_s14 }
  0xe3   :  { %p11803_p11 = scmp.lt.s32.totalorder %s11801_s19, %s11799_s1 }
  0xe4   :  { %s199_s28 = sshll.u32 %s16345_s23, 4  ;;  %s12402_s28 = int_to_ptr.hbm [resolvable:$true] %s199_s28 }
  0xe5   :  { %p11804_p12 = por %p11803_p11, %p11802_p10 }
  0xe7   :  { %p11805_p13 = pnand %p11804_p12, %p11800_p9 }
  0xe9   :  { %11808 = shalt.err (!%p11805_p13)
}
  0xea   :  { %s16346_s29 = sld [smem:[#allocation57_spill]]  ;;  %s12116_s27 = smov [#allocation18]  }
  0xeb   :  { %181 = dma.hbm_to_vmem [thread:$0]  %s12392_s16, 2048, %s176_s12, [#allocation14], %s12095_s10, %s12095_s10, %s12096_s7  }
  0xec   :  { %s201_s20 = sshll.u32 %s12116_s27, 4  ;;  %s11821_s14 = sshra.s32 %s12402_s28, 4  ;;  %s202_s20 = int_to_ptr.vmem [resolvable:$true] %s201_s20  ;;  %s11822_s14 = int_to_ptr.hbm [resolvable:$true] %s11821_s14 }
  0xed   :  { %s11823_s2 = scalar_lea.hbm %s11822_s14, 128  ;;  %s11825_s30 = scalar_lea.hbm %s16345_s23, 128 }
  0xee   :  { %p11824_p0 = scmp.ne.s32.totalorder %s11822_s14, %s11823_s2  ;;  %p11826_p1 = scmp.lt.s32.totalorder %s11822_s14, %s16345_s23 }
  0xef   :  { %p11827_p2 = scmp.lt.s32.totalorder %s11825_s30, %s11823_s2 }
  0xf0   :  { %s225_s26 = sshll.u32 %s16346_s29, 4  ;;  %s12412_s26 = int_to_ptr.hbm [resolvable:$true] %s225_s26 }
  0xf1   :  { %p11828_p3 = por %p11827_p2, %p11826_p1 }
  0xf3   :  { %p11829_p4 = pnand %p11828_p3, %p11824_p0 }
  0xf5   :  { %11832 = shalt.err (!%p11829_p4)
}
  0xf6   :  { %s16347_s21 = sld [smem:[#allocation58_spill]]  ;;  %s12117_s15 = smov [#allocation21]  }
  0xf7   :  { %207 = dma.hbm_to_vmem [thread:$0]  %s12402_s28, 2048, %s202_s20, [#allocation17], %s12095_s10, %s12095_s10, %s12096_s7  }
  0xf8   :  { %s227_s11 = sshll.u32 %s12117_s15, 4  ;;  %s11845_s9 = sshra.s32 %s12412_s26, 4  ;;  %s228_s11 = int_to_ptr.vmem [resolvable:$true] %s227_s11  ;;  %s11846_s9 = int_to_ptr.hbm [resolvable:$true] %s11845_s9 }
  0xf9   :  { %s11847_s16 = scalar_lea.hbm %s11846_s9, 128  ;;  %s11849_s8 = scalar_lea.hbm %s16346_s29, 128 }
  0xfa   :  { %p11848_p5 = scmp.ne.s32.totalorder %s11846_s9, %s11847_s16  ;;  %p11850_p6 = scmp.lt.s32.totalorder %s11846_s9, %s16346_s29 }
  0xfb   :  { %p11851_p7 = scmp.lt.s32.totalorder %s11849_s8, %s11847_s16 }
  0xfc   :  { %s251_s17 = sshll.u32 %s16347_s21, 4  ;;  %s12422_s17 = int_to_ptr.hbm [resolvable:$true] %s251_s17 }
  0xfd   :  { %p11852_p8 = por %p11851_p7, %p11850_p6 }
  0xff   :  { %p11853_p9 = pnand %p11852_p8, %p11848_p5 }
 0x101   :  { %11856 = shalt.err (!%p11853_p9)
}
 0x102   :  { %s16348_s18 = sld [smem:[#allocation59_spill]]  ;;  %s12118_s25 = smov [#allocation24]  }
 0x103   :  { %233 = dma.hbm_to_vmem [thread:$0]  %s12412_s26, 2048, %s228_s11, [#allocation20], %s12095_s10, %s12095_s10, %s12096_s7  }
 0x104   :  { %s253_s4 = sshll.u32 %s12118_s25, 4  ;;  %s11869_s23 = sshra.s32 %s12422_s17, 4  ;;  %s254_s4 = int_to_ptr.vmem [resolvable:$true] %s253_s4  ;;  %s11870_s23 = int_to_ptr.hbm [resolvable:$true] %s11869_s23 }
 0x105   :  { %s11871_s13 = scalar_lea.hbm %s11870_s23, 128  ;;  %s11873_s12 = scalar_lea.hbm %s16347_s21, 128 }
 0x106   :  { %p11872_p10 = scmp.ne.s32.totalorder %s11870_s23, %s11871_s13  ;;  %p11874_p11 = scmp.lt.s32.totalorder %s11870_s23, %s16347_s21 }
 0x107   :  { %p11875_p12 = scmp.lt.s32.totalorder %s11873_s12, %s11871_s13 }
 0x108   :  { %s277_s22 = sshll.u32 %s16348_s18, 4  ;;  %s12432_s22 = int_to_ptr.hbm [resolvable:$true] %s277_s22 }
 0x109   :  { %p11876_p13 = por %p11875_p12, %p11874_p11 }
 0x10b   :  { %p11877_p0 = pnand %p11876_p13, %p11872_p10 }
 0x10d   :  { %11880 = shalt.err (!%p11877_p0)
}
 0x10e   :  { %s16349_s28 = sld [smem:[#allocation62_spill]]  ;;  %s12119_s3 = smov [#allocation27]  }
 0x10f   :  { %259 = dma.hbm_to_vmem [thread:$0]  %s12422_s17, 2048, %s254_s4, [#allocation23], %s12095_s10, %s12095_s10, %s12096_s7  }
 0x110   :  { %s279_s1 = sshll.u32 %s12119_s3, 4  ;;  %s11893_s29 = sshra.s32 %s12432_s22, 4  ;;  %s280_s1 = int_to_ptr.vmem [resolvable:$true] %s279_s1  ;;  %s11894_s29 = int_to_ptr.hbm [resolvable:$true] %s11893_s29 }
 0x111   :  { %s11895_s26 = scalar_lea.hbm %s11894_s29, 128  ;;  %s11897_s27 = scalar_lea.hbm %s16348_s18, 128 }
 0x112   :  { %p11896_p1 = scmp.ne.s32.totalorder %s11894_s29, %s11895_s26  ;;  %p11898_p2 = scmp.lt.s32.totalorder %s11894_s29, %s16348_s18 }
 0x113   :  { %p11899_p3 = scmp.lt.s32.totalorder %s11897_s27, %s11895_s26 }
 0x114   :  { %s307_s19 = sshll.u32 %s16349_s28, 4  ;;  %s12442_s19 = int_to_ptr.hbm [resolvable:$true] %s307_s19 }
 0x115   :  { %p11900_p4 = por %p11899_p3, %p11898_p2 }
 0x117   :  { %p11901_p5 = pnand %p11900_p4, %p11896_p1 }
 0x119   :  { %11904 = shalt.err (!%p11901_p5)
}
 0x11a   :  { %s16350_s20 = sld [smem:[#allocation63_spill]]  ;;  %s12120_s2 = smov [#allocation30]  }
 0x11b   :  { %285 = dma.hbm_to_vmem [thread:$0]  %s12432_s22, 2048, %s280_s1, [#allocation26], %s12095_s10, %s12095_s10, %s12096_s7  }
 0x11c   :  { %s309_s30 = sshll.u32 %s12120_s2, 4  ;;  %s11917_s21 = sshra.s32 %s12442_s19, 4  ;;  %s310_s30 = int_to_ptr.vmem [resolvable:$true] %s309_s30  ;;  %s11918_s21 = int_to_ptr.hbm [resolvable:$true] %s11917_s21 }
 0x11d   :  { %s11919_s15 = scalar_lea.hbm %s11918_s21, 256  ;;  %s11921_s11 = scalar_lea.hbm %s16349_s28, 256 }
 0x11e   :  { %p11920_p6 = scmp.ne.s32.totalorder %s11918_s21, %s11919_s15  ;;  %p11922_p7 = scmp.lt.s32.totalorder %s11918_s21, %s16349_s28 }
 0x11f   :  { %p11923_p8 = scmp.lt.s32.totalorder %s11921_s11, %s11919_s15 }
 0x120   :  { %s333_s14 = sshll.u32 %s16350_s20, 4  ;;  %s12452_s14 = int_to_ptr.hbm [resolvable:$true] %s333_s14 }
 0x121   :  { %p11924_p9 = por %p11923_p8, %p11922_p7 }
 0x123   :  { %p11925_p10 = pnand %p11924_p9, %p11920_p6 }
 0x125   :  { %11928 = shalt.err (!%p11925_p10)
}
 0x126   :  { %315 = dma.hbm_to_vmem [thread:$0]  %s12442_s19, 4096, %s310_s30, [#allocation29], %s12095_s10, %s12095_s10, %s12096_s7  }
 0x127   :  { %s12121_s17 = smov [#allocation33]   ;;  %s365_s16 = sshll.u32 %s12280_s5, 4  ;;  %s12462_s16 = int_to_ptr.hbm [resolvable:$true] %s365_s16 }
 0x128   :  { %s335_s9 = sshll.u32 %s12121_s17, 4  ;;  %s11941_s8 = sshra.s32 %s12452_s14, 4  ;;  %s336_s9 = int_to_ptr.vmem [resolvable:$true] %s335_s9  ;;  %s11942_s8 = int_to_ptr.hbm [resolvable:$true] %s11941_s8 }
 0x129   :  { %s11943_s18 = scalar_lea.hbm %s11942_s8, 256  ;;  %s11945_s22 = scalar_lea.hbm %s16350_s20, 256 }
 0x12a   :  { %p11944_p11 = scmp.ne.s32.totalorder %s11942_s8, %s11943_s18  ;;  %p11946_p12 = scmp.lt.s32.totalorder %s11942_s8, %s16350_s20 }
 0x12b   :  { %p11947_p13 = scmp.lt.s32.totalorder %s11945_s22, %s11943_s18 }
 0x12d   :  { %p11948_p0 = por %p11947_p13, %p11946_p12 }
 0x12f   :  { %p11949_p1 = pnand %p11948_p0, %p11944_p11 }
 0x131   :  { %11952 = shalt.err (!%p11949_p1)
}
 0x132   :  { %341 = dma.hbm_to_vmem [thread:$0]  %s12452_s14, 4096, %s336_s9, [#allocation32], %s12095_s10, %s12095_s10, %s12096_s7  }
 0x133   :  { %s378_s25 = sshll.u32 %s12285_s24, 4  ;;  %s12122_s4 = smov [#allocation36]   ;;  %s12472_s25 = int_to_ptr.hbm [resolvable:$true] %s378_s25 }
 0x134   :  { %s367_s23 = sshll.u32 %s12122_s4, 4  ;;  %s11965_s13 = sshra.s32 %s12462_s16, 4  ;;  %s368_s23 = int_to_ptr.vmem [resolvable:$true] %s367_s23  ;;  %s11966_s13 = int_to_ptr.hbm [resolvable:$true] %s11965_s13 }
 0x135   :  { %s11967_s12 = scalar_lea.hbm %s11966_s13, 128  ;;  %s11969_s28 = scalar_lea.hbm %s12280_s5, 128 }
 0x136   :  { %p11968_p2 = scmp.ne.s32.totalorder %s11966_s13, %s11967_s12  ;;  %p11970_p3 = scmp.lt.s32.totalorder %s11966_s13, %s12280_s5 }
 0x137   :  { %p11971_p4 = scmp.lt.s32.totalorder %s11969_s28, %s11967_s12 }
 0x139   :  { %p11972_p5 = por %p11971_p4, %p11970_p3 }
 0x13b   :  { %p11973_p6 = pnand %p11972_p5, %p11968_p2 }
 0x13d   :  { %11976 = shalt.err (!%p11973_p6)
}
 0x13e   :  { %373 = dma.hbm_to_vmem [thread:$0]  %s12462_s16, 2048, %s368_s23, [#allocation35], %s12095_s10, %s12095_s10, %s12096_s7  }
 0x13f   :  { %s12123_s3 = smov [#allocation37]   ;;  %s11989_s19 = sshra.s32 %s12472_s25, 4  ;;  %s11990_s19 = int_to_ptr.hbm [resolvable:$true] %s11989_s19 }
 0x140   :  { %s380_s1 = sshll.u32 %s12123_s3, 4  ;;  %s11991_s29 = scalar_lea.hbm %s11990_s19, 128  ;;  %s381_s1 = int_to_ptr.vmem [resolvable:$true] %s380_s1 }
 0x141   :  { %p11992_p7 = scmp.ne.s32.totalorder %s11990_s19, %s11991_s29  ;;  %s11993_s5 = scalar_lea.hbm %s12285_s24, 128 }
 0x142   :  { %p11994_p8 = scmp.lt.s32.totalorder %s11990_s19, %s12285_s24  ;;  %p11995_p9 = scmp.lt.s32.totalorder %s11993_s5, %s11991_s29 }
 0x144   :  { %p11996_p10 = por %p11995_p9, %p11994_p8 }
 0x146   :  { %p11997_p11 = pnand %p11996_p10, %p11992_p7 }
 0x148   :  { %12000 = shalt.err (!%p11997_p11)
}
 0x149   :  { %386 = dma.hbm_to_vmem [thread:$0]  %s12472_s25, 2048, %s381_s1, [#allocation38], %s12095_s10, %s12095_s10, %s12096_s7  }
 0x14a   :  { %12037 = dma.done.wait [#allocation5], 1024  }
 0x14b   :  { %12038 = vsyncadd [#allocation5], 4294966272 }
 0x14c   :  { %12039 = dma.done.wait [#allocation8], 2048  }
 0x14d   :  { %12040 = vsyncadd [#allocation8], 4294965248 }
 0x14e   :  { %12041 = dma.done.wait [#allocation11], 2048  }
 0x14f   :  { %12042 = vsyncadd [#allocation11], 4294965248 }
 0x150   :  { %12043 = dma.done.wait [#allocation14], 4096  }
 0x151   :  { %12044 = vsyncadd [#allocation14], 4294963200 }
 0x152   :  { %12045 = dma.done.wait [#allocation17], 5120  }
 0x153   :  { %12046 = vsyncadd [#allocation17], 4294962176 }
 0x154   :  { %12047 = dma.done.wait [#allocation20], 3072  }
 0x155   :  { %12048 = vsyncadd [#allocation20], 4294964224 }
 0x156   :  { %12049 = dma.done.wait [#allocation23], 5120  }
 0x157   :  { %12050 = vsyncadd [#allocation23], 4294962176 }
 0x158   :  { %12051 = dma.done.wait [#allocation26], 5120  }
 0x159   :  { %12052 = vsyncadd [#allocation26], 4294962176 }
 0x15a   :  { %12053 = dma.done.wait [#allocation29], 8192  }
 0x15b   :  { %12054 = vsyncadd [#allocation29], 4294959104 }
 0x15c   :  { %12055 = dma.done.wait [#allocation32], 6144  }
 0x15d   :  { %12056 = vsyncadd [#allocation32], 4294961152 }
 0x15e   :  { %12057 = dma.done.wait [#allocation35], 6144  }
 0x15f   :  { %12058 = vsyncadd [#allocation35], 4294961152 }
 0x160   :  { %12059 = dma.done.wait [#allocation38], 2048  }
 0x161   :  { %12060 = vsyncadd [#allocation38], 4294965248  ;;  %s16351_s24 = sld [smem:[#allocation53_spill]]  ;;  %v12124_v2 = vmov 0   ;;  %vm579_vm0 = vcmask 1045504   ;;  %v504_v21 = vld [vmem:[#allocation4 + $0x30] sm:$0xff]  ;;  %v696_v25 = vlaneseq }
 0x162   :  { %s16352_s10 = sld [smem:[#allocation54_spill]]  ;;  %10879 = vset.pattern.permute.xlu1 %v12124_v2  ;;  %10878 = vset.pattern.permute.xlu0 %v12124_v2  ;;  %v502_v22 = vld [vmem:[#allocation4 + $0x20] sm:$0xff]  ;;  %v500_v24 = vld [vmem:[#allocation4 + $0x10] sm:$0xff]  ;;  %v505_v32 = vld [vmem:[#allocation4 + $0x38] sm:$0xff]  ;;  %vm566_vm1 = vcmask 490496   ;;  %v16286_v42 = vmov 0.0  }
 0x163   :  { %10880 = vset.pattern.permute.xlu2 %v12124_v2  ;;  %538 = vperm.xlu0 %10878, %v504_v21   ;;  %s16353_s26 = sld [smem:[#allocation55_spill]]  ;;  %v503_v33 = vld [vmem:[#allocation4 + $0x28] sm:$0xff]  ;;  %v697_v34 = vand.u32 127, %v696_v25  ;;  %v501_v38 = vld [vmem:[#allocation4 + $0x18] sm:$0xff]  ;;  %v498_v41 = vld [vmem:[#allocation4] sm:$0xff]  ;;  %s12126_s27 = smov 1  }
 0x164   :  { %528 = vperm.xlu1 %10879, %v502_v22   ;;  %518 = vperm.xlu2 %10880, %v500_v24   ;;  %v499_v40 = vld [vmem:[#allocation4 + $0x8] sm:$0xff]  ;;  %s12127_s20 = smov 127   ;;  %s12128_s14 = smov 126   ;;  %vm801_vm4 = vcmask 1031168   ;;  %vm986_vm5 = vcmask 7168   ;;  %vm1007_vm6 = vcmask 523264  }
 0x165   :  { %v12506_v39 = vand.u32 63, %v697_v34  ;;  %s12129_s2 = smov 2   ;;  %s12130_s30 = smov 124   ;;  %vm1780_vm9 = vcmask 1014784   ;;  %vm2057_vm10 = vcmask 15360   ;;  %vm3206_vm13 = vcmask 982016  }
 0x166   :  { %s12131_s21 = smov 120   ;;  %vm3643_vm14 = vcmask 31744   ;;  %s16370_s15 = sld [smem:[#allocation60_spill]] }
 0x167   :  { %v484_v3 = vld [vmem:[%s16351_s24 + $0x30] sm:$0xff]  ;;  %v485_v4 = vld [vmem:[%s16351_s24 + $0x38] sm:$0xf]  ;;  %v482_v8 = vld [vmem:[%s16351_s24 + $0x20] sm:$0xff]  ;;  %16354 = vst [vmem:[#allocation66_spill] sm:$0xff] %v12506_v39  ;;  %vm726_vm2 = vcmp.lt.s32.totalorder %v12506_v39, 63 }
 0x168   :  { %v618_v5 = vld [vmem:[%s16352_s10 + $0x30] sm:$0xff]  ;;  %v497_v6 = vpack.c.bf16 %v485_v4, %v484_v3  ;;  %v619_v7 = vld [vmem:[%s16352_s10 + $0x38] sm:$0xf]  ;;  %v483_v9 = vld [vmem:[%s16351_s24 + $0x28] sm:$0xff]  ;;  %v9404_v43 = vsel %vm726_vm2, 1.0, %v16286_v42  ;;  %vm710_vm3 = vcmp.ge.s32.totalorder %v12506_v39, 1 }
 0x169   :  { %v623_v10 = vpack.c.bf16 %v619_v7, %v618_v5  ;;  %v616_v11 = vld [vmem:[%s16352_s10 + $0x20] sm:$0xff]  ;;  %v617_v12 = vld [vmem:[%s16352_s10 + $0x28] sm:$0xff]  ;;  %v496_v15 = vpack.c.bf16 %v483_v9, %v482_v8  ;;  %v480_v17 = vld [vmem:[%s16351_s24 + $0x10] sm:$0xff]  ;;  %vm1705_vm7 = vcmp.lt.s32.totalorder %v12506_v39, 62  ;;  %vm1689_vm8 = vcmp.ge.s32.totalorder %v12506_v39, 2  ;;  %s16457_s11 = sld [smem:[#allocation61_spill]] }
 0x16a   :  { %v581_v13 = vsel %vm579_vm0, %v497_v6, 0  ;;  %v622_v16 = vpack.c.bf16 %v617_v12, %v616_v11  ;;  %v481_v18 = vld [vmem:[%s16351_s24 + $0x18] sm:$0xff]  ;;  %v614_v19 = vld [vmem:[%s16352_s10 + $0x10] sm:$0xff]  ;;  %v478_v27 = vld [vmem:[%s16351_s24] sm:$0xff]  ;;  %vm3067_vm11 = vcmp.lt.s32.totalorder %v12506_v39, 60  ;;  %vm5947_vm2 = vcmask 64512  }
 0x16b   :  { %587 = vmatpush.bf16.msra.mxu0 %v581_v13  ;;  %10799 = vmatpush.bf16.msra.mxu3 %v581_v13  ;;  %v625_v14 = vsel %vm579_vm0, %v623_v10, 0  ;;  %v615_v20 = vld [vmem:[%s16352_s10 + $0x18] sm:$0xff]  ;;  %v495_v23 = vpack.c.bf16 %v481_v18, %v480_v17  ;;  %v479_v28 = vld [vmem:[%s16351_s24 + $0x8] sm:$0xff]  ;;  %v612_v29 = vld [vmem:[%s16352_s10] sm:$0xff]  ;;  %s16631_s17 = sld [smem:[#allocation65_spill]]  ;;  %s12133_s9 = smov [#allocation39]  }
 0x16c   :  { %631 = vmatpush.bf16.msra.mxu1 %v625_v14  ;;  %10803 = vmatpush.bf16.msra.mxu2 %v625_v14  ;;  %v621_v26 = vpack.c.bf16 %v615_v20, %v614_v19  ;;  %v613_v30 = vld [vmem:[%s16352_s10 + $0x8] sm:$0xff]  ;;  %v494_v31 = vpack.c.bf16 %v479_v28, %v478_v27  ;;  %v10523_v36 = vld [vmem:[%s16353_s26] sm:$0xff]  ;;  %v10525_v37 = vld [vmem:[%s16353_s26 + $0x10] sm:$0xff]  ;;  %s9325_s16 = sshll.u32 %s12133_s9, 4  ;;  %s9327_s8 = sshll.u32 %s12290_s6, 4  ;;  %s9326_s16 = int_to_ptr.vmem [resolvable:$true] %s9325_s16  ;;  %s9328_s8 = int_to_ptr.hbm [resolvable:$true] %s9327_s8 }
 0x16d   :  { %v620_v35 = vpack.c.bf16 %v613_v30, %v612_v29  ;;  %543 = vperm.xlu0 %10878, %v505_v32   ;;  %533 = vperm.xlu1 %10879, %v503_v33   ;;  %v10524_v44 = vld [vmem:[%s16353_s26 + $0x8] sm:$0xff]  ;;  %v10526_v45 = vld [vmem:[%s16353_s26 + $0x18] sm:$0xff]  ;;  %s12025_s18 = sshra.s32 %s9328_s8, 4  ;;  %s12029_s25 = scalar_lea.hbm %s12290_s6, 1  ;;  %s12026_s18 = int_to_ptr.hbm [resolvable:$true] %s12025_s18 }
 0x16e   :  { %523 = vperm.xlu2 %10880, %v501_v38   ;;  %s12027_s22 = scalar_lea.hbm %s12026_s18, 1  ;;  %p12030_p13 = scmp.lt.s32.totalorder %s12026_s18, %s12290_s6 }
 0x16f   :  { %588 = vmatpush.bf16.msra.mxu0 %v496_v15  ;;  %10800 = vmatpush.bf16.msra.mxu3 %v496_v15  ;;  %p12028_p12 = scmp.ne.s32.totalorder %s12026_s18, %s12027_s22  ;;  %p12031_p0 = scmp.lt.s32.totalorder %s12029_s25, %s12027_s22 }
 0x170   :  { %632 = vmatpush.bf16.msra.mxu1 %v622_v16  ;;  %10804 = vmatpush.bf16.msra.mxu2 %v622_v16 }
 0x171   :  { %p12032_p1 = por %p12031_p0, %p12030_p13 }
 0x173   :  { %589 = vmatpush.bf16.msra.mxu0 %v495_v23  ;;  %10801 = vmatpush.bf16.msra.mxu3 %v495_v23  ;;  %p12033_p2 = pnand %p12032_p1, %p12028_p12 }
 0x174   :  { %633 = vmatpush.bf16.msra.mxu1 %v621_v26  ;;  %10805 = vmatpush.bf16.msra.mxu2 %v621_v26 }
 0x175   :  { %513 = vperm.xlu1 %10879, %v499_v40   ;;  %508 = vperm.xlu0 %10878, %v498_v41  }
 0x176   :  { %730 = vrot.lane.b32.xlu2 %v9404_v43, %s12126_s27 }
 0x177   :  { %590 = vmatpush.bf16.msra.mxu0 %v494_v31  ;;  %10802 = vmatpush.bf16.msra.mxu3 %v494_v31 }
 0x178   :  { %634 = vmatpush.bf16.msra.mxu1 %v620_v35  ;;  %10806 = vmatpush.bf16.msra.mxu2 %v620_v35 }
 0x17a   :  { %9395 = vmatmul.msk.bf16.vlgmr.msra.gmra.mxu0 %vm566_vm1, %v10523_v36  ;;  %9397 = vmatmul.msk.bf16.vlgmr.msra.gmra.mxu3 %vm566_vm1, %v10525_v37 }
 0x17b   :  { %9399 = vmatmul.msk.bf16.vlgmr.msra.gmra.mxu1 %vm566_vm1, %v10523_v36  ;;  %9401 = vmatmul.msk.bf16.vlgmr.msra.gmra.mxu2 %vm566_vm1, %v10525_v37 }
 0x18a   :  { %9396 = vmatmul.msk.bf16.gmra.mxu0 %vm566_vm1, %v10524_v44  ;;  %9398 = vmatmul.msk.bf16.gmra.mxu3 %vm566_vm1, %v10526_v45 }
 0x18b   :  { %9400 = vmatmul.msk.bf16.gmra.mxu1 %vm566_vm1, %v10524_v44  ;;  %9402 = vmatmul.msk.bf16.gmra.mxu2 %vm566_vm1, %v10526_v45  ;;  %v9403_v45 = vsel %vm710_vm3, 1.0, %v16286_v42  ;;  %vm5254_vm1 = vcmask 916480  }
 0x1be   :  { %v519_v56 = vpop.permute.xlu2 %518 }
 0x1c8   :  { %v524_v16 = vpop.permute.xlu2 %523 }
 0x1d5   :  { %v539_v50 = vpop.permute.xlu0 %538 }
 0x1d6   :  { %v529_v48 = vpop.permute.xlu1 %528 }
 0x1df   :  { %v534_v59 = vpop.permute.xlu1 %533  ;;  %v544_v1 = vpop.permute.xlu0 %543 }
 0x1e7   :  { %v509_v27 = vpop.permute.xlu0 %508  ;;  %v514_v31 = vpop.permute.xlu1 %513 }
 0x1f7   :  { %v592_v46 = vpop.f32.mrf.mxu0 }
 0x1f8   :  { %v636_v47 = vpop.f32.mrf.mxu1  ;;  %v593_v34 = vadd.f32 %v592_v46, %v509_v27 }
 0x1f9   :  { %v637_v41 = vadd.f32 %v636_v47, %v509_v27  ;;  %v12539_v47 = vpop.permute.xlu2 %730 }
 0x1fd   :  { %v602_v49 = vpop.f32.mrf.mxu3 }
 0x1fe   :  { %v646_v51 = vpop.f32.mrf.mxu2  ;;  %v603_v54 = vadd.f32 %v602_v49, %v529_v48 }
 0x1ff   :  { %v594_v52 = vpop.f32.mrf.mxu0  ;;  %v647_v55 = vadd.f32 %v646_v51, %v529_v48 }
 0x200   :  { %v638_v53 = vpop.f32.mrf.mxu1  ;;  %v660_v57 = vmul.f32 0.1, %v603_v54  ;;  %v595_v40 = vadd.f32 %v594_v52, %v514_v31 }
 0x201   :  { %v676_v58 = vmul.f32 0.1, %v647_v55  ;;  %v639_v49 = vadd.f32 %v638_v53, %v514_v31 }
 0x202   :  { %v668_v4 = vmax.f32 %v603_v54, %v660_v57  ;;  %v672_v57 = vmul.f32 0.1, %v637_v41 }
 0x203   :  { %v684_v5 = vmax.f32 %v647_v55, %v676_v58 }
 0x205   :  { %v604_v60 = vpop.f32.mrf.mxu3  ;;  %v12521_v11 = vmax.f32 %v668_v4, %v684_v5 }
 0x206   :  { %v605_v61 = vadd.f32 %v604_v60, %v534_v59  ;;  %v648_v62 = vpop.f32.mrf.mxu2  ;;  %v673_v60 = vmul.f32 0.1, %v639_v49 }
 0x207   :  { %v649_v63 = vadd.f32 %v648_v62, %v534_v59  ;;  %v597_v0 = vpop.f32.mrf.mxu0  ;;  %v657_v59 = vmul.f32 0.1, %v595_v40 }
 0x208   :  { %v661_v2 = vmul.f32 0.1, %v605_v61  ;;  %v641_v3 = vpop.f32.mrf.mxu1  ;;  %v598_v9 = vadd.f32 %v597_v0, %v519_v56  ;;  %v734_v0 = vmul.f32 0.0, %v12539_v47  ;;  %v681_v5 = vmax.f32 %v639_v49, %v673_v60 }
 0x209   :  { %v677_v6 = vmul.f32 0.1, %v649_v63  ;;  %v642_v10 = vadd.f32 %v641_v3, %v519_v56  ;;  %v656_v56 = vmul.f32 0.1, %v593_v34  ;;  %v680_v3 = vmax.f32 %v637_v41, %v672_v57 }
 0x20a   :  { %v669_v7 = vmax.f32 %v605_v61, %v661_v2  ;;  %v658_v17 = vmul.f32 0.1, %v598_v9  ;;  %v665_v4 = vmax.f32 %v595_v40, %v657_v59 }
 0x20b   :  { %v685_v8 = vmax.f32 %v649_v63, %v677_v6  ;;  %v674_v18 = vmul.f32 0.1, %v642_v10  ;;  %v664_v2 = vmax.f32 %v593_v34, %v656_v56 }
 0x20c   :  { %v666_v29 = vmax.f32 %v598_v9, %v658_v17  ;;  %v12555_v9 = vmax.f32 %v665_v4, %v681_v5 }
 0x20d   :  { %v12523_v12 = vmax.f32 %v669_v7, %v685_v8  ;;  %v607_v13 = vpop.f32.mrf.mxu3  ;;  %v682_v30 = vmax.f32 %v642_v10, %v674_v18  ;;  %v12557_v10 = vmax.f32 %v664_v2, %v680_v3  ;;  %v738_v18 = vmul.f32 %v12539_v47, %v12521_v11 }
 0x20e   :  { %v608_v14 = vadd.f32 %v607_v13, %v539_v50  ;;  %v651_v15 = vpop.f32.mrf.mxu2 }
 0x20f   :  { %v652_v19 = vadd.f32 %v651_v15, %v539_v50  ;;  %v599_v20 = vpop.f32.mrf.mxu0  ;;  %v10881_v21 = vpack.i.bf16 %v12523_v12, %v12521_v11  ;;  %v12530_v48 = vmax.f32 %v666_v29, %v682_v30  ;;  %v739_v63 = vmul.f32 %v12539_v47, %v12523_v12 }
 0x210   :  { %v600_v22 = vadd.f32 %v599_v20, %v524_v16  ;;  %v643_v23 = vpop.f32.mrf.mxu1  ;;  %v662_v24 = vmul.f32 0.1, %v608_v14  ;;  %v733_v15 = vmul.f32 %v12539_v47, %v12557_v10  ;;  %v735_v20 = vmul.f32 %v12539_v47, %v12555_v9 }
 0x211   :  { %v678_v25 = vmul.f32 0.1, %v652_v19  ;;  %v644_v26 = vadd.f32 %v643_v23, %v524_v16  ;;  %10882 = vrot.lane.b32.xlu1 %v10881_v21, %s12127_s20  ;;  %v736_v61 = vmul.f32 %v12539_v47, %v12530_v48 }
 0x212   :  { %v659_v28 = vmul.f32 0.1, %v600_v22  ;;  %v670_v35 = vmax.f32 %v608_v14, %v662_v24  ;;  %v10896_v14 = vpack.i.bf16 %v12555_v9, %v12557_v10 }
 0x213   :  { %v675_v32 = vmul.f32 0.1, %v644_v26  ;;  %v686_v36 = vmax.f32 %v652_v19, %v678_v25  ;;  %v10911_v7 = vpack.i.bf16 %v736_v61, %v739_v63 }
 0x214   :  { %v667_v33 = vmax.f32 %v600_v22, %v659_v28 }
 0x215   :  { %v683_v37 = vmax.f32 %v644_v26, %v675_v32  ;;  %v609_v38 = vpop.f32.mrf.mxu3  ;;  %v12534_v55 = vmax.f32 %v670_v35, %v686_v36 }
 0x216   :  { %v610_v43 = vadd.f32 %v609_v38, %v544_v1  ;;  %v653_v44 = vpop.f32.mrf.mxu2 }
 0x217   :  { %v12532_v50 = vmax.f32 %v667_v33, %v683_v37  ;;  %v654_v51 = vadd.f32 %v653_v44, %v544_v1  ;;  %v740_v1 = vmul.f32 %v12539_v47, %v12534_v55 }
 0x218   :  { %v663_v54 = vmul.f32 0.1, %v610_v43 }
 0x219   :  { %v679_v46 = vmul.f32 0.1, %v654_v51  ;;  %714 = vrot.lane.b32.xlu1 %v9403_v45, %s12127_s20  ;;  %v10886_v52 = vpack.i.bf16 %v12532_v50, %v12530_v48  ;;  %v10901_v8 = vpack.i.bf16 %v740_v1, %v734_v0  ;;  %v737_v13 = vmul.f32 %v12539_v47, %v12532_v50 }
 0x21a   :  { %v671_v58 = vmax.f32 %v610_v43, %v663_v54 }
 0x21b   :  { %v687_v53 = vmax.f32 %v654_v51, %v679_v46  ;;  %10887 = vrot.lane.b32.xlu2 %v10886_v52, %s12127_s20  ;;  %v10916_v16 = vpack.i.bf16 %v733_v15, %v737_v13 }
 0x21d   :  { %v12544_v62 = vmax.f32 %v671_v58, %v687_v53 }
 0x21f   :  { %v10891_v6 = vpack.i.bf16 %v12544_v62, %v12534_v55  ;;  %v741_v17 = vmul.f32 %v12539_v47, %v12544_v62 }
 0x221   :  { %10892 = vrot.lane.b32.xlu0 %v10891_v6, %s12127_s20  ;;  %10912 = vrot.lane.b32.xlu1 %v10911_v7, %s12128_s14  ;;  %v10906_v19 = vpack.i.bf16 %v738_v18, %v741_v17  ;;  %v857_v18 = vld [vmem:[#allocation9 + $0x30] sm:$0xff] }
 0x223   :  { %10902 = vrot.lane.b32.xlu2 %v10901_v8, %s12128_s14 }
 0x229   :  { %10897 = vrot.lane.b32.xlu0 %v10896_v14, %s12127_s20 }
 0x22b   :  { %10917 = vrot.lane.b32.xlu2 %v10916_v16, %s12128_s14 }
 0x231   :  { %10907 = vrot.lane.b32.xlu0 %v10906_v19, %s12128_s14 }
 0x239   :  { %787 = vrot.lane.b32.xlu0 %v735_v20, %s12128_s14 }
 0x275   :  { %v10888_v28 = vpop.permute.xlu2 %10887 }
 0x276   :  { %v10890_v29 = vunpack.i.h.bf16 %v10888_v28  ;;  %v10889_v30 = vunpack.i.l.bf16 %v10888_v28 }
 0x278   :  { %v840_v34 = vpack.c.bf16 %v10890_v29, %v10889_v30  ;;  %v851_v30 = vld [vmem:[#allocation9] sm:$0xff] }
 0x27d   :  { %v10903_v49 = vpop.permute.xlu2 %10902 }
 0x27e   :  { %v12597_v58 = vunpack.i.l.bf16 %v10903_v49  ;;  %v10905_v2 = vunpack.i.h.bf16 %v10903_v49 }
 0x280   :  { %v808_v8 = vsel %vm801_vm4, %v10905_v2, %v12597_v58 }
 0x283   :  { %v10883_v21 = vpop.permute.xlu1 %10882 }
 0x284   :  { %v10885_v31 = vunpack.i.h.bf16 %v10883_v21  ;;  %v10884_v32 = vunpack.i.l.bf16 %v10883_v21 }
 0x285   :  { %v10918_v13 = vpop.permute.xlu2 %10917 }
 0x286   :  { %v841_v35 = vpack.c.bf16 %v10885_v31, %v10884_v32  ;;  %v10919_v16 = vunpack.i.l.bf16 %v10918_v13  ;;  %v855_v32 = vld [vmem:[#allocation9 + $0x20] sm:$0xff] }
 0x288   :  { %v805_v20 = vsel %vm801_vm4, %v10919_v16, %v12597_v58 }
 0x28b   :  { %v12576_v22 = vpop.permute.xlu1 %714 }
 0x28c   :  { %v724_v23 = vmul.f32 %v12576_v22, %v12534_v55  ;;  %v725_v24 = vmul.f32 %v12576_v22, %v12544_v62  ;;  %v717_v25 = vmul.f32 0.0, %v12576_v22  ;;  %v722_v36 = vmul.f32 %v12576_v22, %v12521_v11 }
 0x28d   :  { %v723_v37 = vmul.f32 %v12576_v22, %v12523_v12  ;;  %v720_v51 = vmul.f32 %v12576_v22, %v12530_v48  ;;  %v721_v56 = vmul.f32 %v12576_v22, %v12532_v50  ;;  %v718_v3 = vmul.f32 %v12576_v22, %v12557_v10 }
 0x28e   :  { %v838_v26 = vpack.c.bf16 %v725_v24, %v724_v23  ;;  %v834_v27 = vpack.c.bf16 %v717_v25, %v717_v25  ;;  %v719_v4 = vmul.f32 %v12576_v22, %v12555_v9  ;;  %v10920_v24 = vunpack.i.h.bf16 %v10918_v13 }
 0x28f   :  { %v837_v43 = vpack.c.bf16 %v723_v37, %v722_v36  ;;  %v836_v60 = vpack.c.bf16 %v721_v56, %v720_v51  ;;  %v852_v36 = vld [vmem:[#allocation9 + $0x8] sm:$0xff] }
 0x290   :  { %960 = vrot.lane.b32.xlu0 %v838_v26, %s12126_s27  ;;  %952 = vrot.lane.b32.xlu2 %v834_v27, %s12126_s27  ;;  %v835_v7 = vpack.c.bf16 %v719_v4, %v718_v3  ;;  %v856_v26 = vld [vmem:[#allocation9 + $0x28] sm:$0xff]  ;;  %v802_v28 = vsel %vm801_vm4, %v10920_v24, %v12597_v58 }
 0x291   :  { %v10528_v3 = vld [vmem:[#allocation7 + $0x4] sm:$0xf0] }
 0x293   :  { %v10893_v33 = vpop.permute.xlu0 %10892  ;;  %v10913_v45 = vpop.permute.xlu1 %10912 }
 0x294   :  { %v10895_v54 = vunpack.i.h.bf16 %v10893_v33  ;;  %v10894_v46 = vunpack.i.l.bf16 %v10893_v33  ;;  %v10914_v52 = vunpack.i.l.bf16 %v10913_v45  ;;  %v10915_v15 = vunpack.i.h.bf16 %v10913_v45  ;;  %v858_v33 = vld [vmem:[#allocation9 + $0x38] sm:$0xff] }
 0x296   :  { %v842_v53 = vpack.c.bf16 %v10895_v54, %v10894_v46  ;;  %v807_v63 = vsel %vm801_vm4, %v10914_v52, %v12597_v58  ;;  %v804_v17 = vsel %vm801_vm4, %v10915_v15, %v12597_v58  ;;  %v845_v27 = vpack.c.bf16 %v10919_v16, %v10915_v15  ;;  %v9415_v16 = vld [vmem:[#allocation7 + $0x10] sm:$0xf] }
 0x297   :  { %v846_v21 = vpack.c.bf16 %v805_v20, %v804_v17  ;;  %v10530_v17 = vld [vmem:[#allocation7 + $0x14] sm:$0xf0]  ;;  %v9417_v20 = vld [vmem:[#allocation7 + $0x18] sm:$0xf0] }
 0x298   :  { %964 = vrot.lane.b32.xlu0 %v840_v34, %s12126_s27  ;;  %966 = vrot.lane.b32.xlu2 %v841_v35, %s12126_s27  ;;  %v854_v34 = vld [vmem:[#allocation9 + $0x18] sm:$0xff]  ;;  %v853_v35 = vld [vmem:[#allocation9 + $0x10] sm:$0xff] }
 0x29b   :  { %v10898_v38 = vpop.permute.xlu0 %10897 }
 0x29c   :  { %v10900_v40 = vunpack.i.h.bf16 %v10898_v38  ;;  %v10899_v41 = vunpack.i.l.bf16 %v10898_v38 }
 0x29e   :  { %v839_v44 = vpack.c.bf16 %v10900_v40, %v10899_v41 }
 0x2a0   :  { %958 = vrot.lane.b32.xlu0 %v837_v43, %s12126_s27  ;;  %962 = vrot.lane.b32.xlu1 %v839_v44, %s12126_s27 }
 0x2a3   :  { %v10908_v57 = vpop.permute.xlu0 %10907 }
 0x2a4   :  { %v10910_v59 = vunpack.i.h.bf16 %v10908_v57  ;;  %v10909_v1 = vunpack.i.l.bf16 %v10908_v57 }
 0x2a6   :  { %v806_v61 = vsel %vm801_vm4, %v10910_v59, %v12597_v58  ;;  %v809_v5 = vsel %vm801_vm4, %v10909_v1, %v12597_v58  ;;  %v847_v6 = vpack.c.bf16 %v10914_v52, %v10910_v59  ;;  %v849_v19 = vpack.c.bf16 %v10909_v1, %v10905_v2  ;;  %v9407_v2 = vld [vmem:[#allocation7] sm:$0xf] }
 0x2a7   :  { %v848_v0 = vpack.c.bf16 %v807_v63, %v806_v61  ;;  %v850_v14 = vpack.c.bf16 %v809_v5, %v808_v8  ;;  %v9408_v5 = vor.u32 %v10528_v3, %v9407_v2 }
 0x2a8   :  { %956 = vrot.lane.b32.xlu0 %v836_v60, %s12126_s27  ;;  %968 = vrot.lane.b32.xlu1 %v842_v53, %s12126_s27 }
 0x2a9   :  { %980 = vrot.lane.b32.xlu2 %v848_v0, %s12126_s27 }
 0x2ab   :  { %v788_v23 = vpop.permute.xlu0 %787 }
 0x2ac   :  { %v803_v25 = vsel %vm801_vm4, %v788_v23, %v12597_v58  ;;  %v843_v31 = vpack.c.bf16 %v788_v23, %v10920_v24  ;;  %v9423_v23 = vld [vmem:[#allocation7 + $0x20] sm:$0xf]  ;;  %v10532_v24 = vld [vmem:[#allocation7 + $0x24] sm:$0xf0] }
 0x2ad   :  { %v844_v29 = vpack.c.bf16 %v803_v25, %v802_v28  ;;  %v9424_v25 = vor.u32 %v10532_v24, %v9423_v23 }
 0x2b0   :  { %978 = vrot.lane.b32.xlu1 %v847_v6, %s12126_s27  ;;  %954 = vrot.lane.b32.xlu0 %v835_v7, %s12126_s27  ;;  %v10527_v6 = vld [vmem:[#allocation7 + $0x4] sm:$0xf]  ;;  %v9409_v7 = vld [vmem:[#allocation7 + $0x8] sm:$0xf0] }
 0x2b1   :  { %984 = vrot.lane.b32.xlu2 %v850_v14, %s12126_s27  ;;  %v9412_v15 = vor.u32 %v10527_v6, %v9409_v7 }
 0x2b8   :  { %982 = vrot.lane.b32.xlu1 %v849_v19, %s12126_s27  ;;  %891 = vperm.xlu0 %10878, %v857_v18   ;;  %v9416_v18 = vor.u32 %v10530_v17, %v9415_v16  ;;  %v10529_v19 = vld [vmem:[#allocation7 + $0x14] sm:$0xf] }
 0x2b9   :  { %976 = vrot.lane.b32.xlu2 %v846_v21, %s12126_s27  ;;  %v9420_v21 = vor.u32 %v10529_v19, %v9417_v20 }
 0x2c0   :  { %974 = vrot.lane.b32.xlu1 %v845_v27, %s12126_s27  ;;  %886 = vperm.xlu0 %10878, %v856_v26   ;;  %v10531_v26 = vld [vmem:[#allocation7 + $0x24] sm:$0xf]  ;;  %v9425_v27 = vld [vmem:[#allocation7 + $0x28] sm:$0xf0] }
 0x2c1   :  { %972 = vrot.lane.b32.xlu2 %v844_v29, %s12126_s27  ;;  %v9428_v28 = vor.u32 %v10531_v26, %v9425_v27  ;;  %v9431_v29 = vld [vmem:[#allocation7 + $0x30] sm:$0xf] }
 0x2c8   :  { %970 = vrot.lane.b32.xlu1 %v843_v31, %s12126_s27  ;;  %861 = vperm.xlu0 %10878, %v851_v30   ;;  %v10534_v30 = vld [vmem:[#allocation7 + $0x34] sm:$0xf0] }
 0x2c9   :  { %881 = vperm.xlu2 %10880, %v855_v32   ;;  %v9432_v31 = vor.u32 %v10534_v30, %v9431_v29  ;;  %v10533_v32 = vld [vmem:[#allocation7 + $0x34] sm:$0xf] }
 0x2d0   :  { %896 = vperm.xlu1 %10879, %v858_v33   ;;  %v9433_v33 = vld [vmem:[#allocation7 + $0x38] sm:$0xf0] }
 0x2d1   :  { %876 = vperm.xlu2 %10880, %v854_v34   ;;  %v9436_v34 = vor.u32 %v10533_v32, %v9433_v33 }
 0x2d8   :  { %871 = vperm.xlu1 %10879, %v853_v35  }
 0x2e0   :  { %866 = vperm.xlu1 %10879, %v852_v36  }
 0x2ea   :  { %v12630_v37 = vpop.permute.xlu2 %952 }
 0x2f2   :  { %v967_v41 = vpop.permute.xlu2 %966 }
 0x302   :  { %v961_v38 = vpop.permute.xlu0 %960 }
 0x303   :  { %v981_v45 = vpop.permute.xlu2 %980  ;;  %v990_v56 = vsel %vm986_vm5, %v12630_v37, %v961_v38 }
 0x30a   :  { %v965_v43 = vpop.permute.xlu0 %964 }
 0x30b   :  { %v985_v54 = vpop.permute.xlu2 %984 }
 0x312   :  { %v963_v40 = vpop.permute.xlu1 %962  ;;  %v959_v49 = vpop.permute.xlu0 %958 }
 0x313   :  { %v989_v59 = vsel %vm986_vm5, %v12630_v37, %v959_v49  ;;  %v977_v53 = vpop.permute.xlu2 %976 }
 0x31a   :  { %v969_v44 = vpop.permute.xlu1 %968  ;;  %v957_v46 = vpop.permute.xlu0 %956 }
 0x31b   :  { %1020 = vmatpush.bf16.msrb.mxu2 %v969_v44  ;;  %v988_v63 = vsel %vm986_vm5, %v12630_v37, %v957_v46  ;;  %v973_v8 = vpop.permute.xlu2 %972 }
 0x31f   :  { %1021 = vmatpush.bf16.msrb.mxu2 %v967_v41 }
 0x322   :  { %v979_v51 = vpop.permute.xlu1 %978  ;;  %v955_v0 = vpop.permute.xlu0 %954 }
 0x323   :  { %1022 = vmatpush.bf16.msrb.mxu2 %v965_v43  ;;  %v993_v60 = vsel %vm986_vm5, %v979_v51, %v981_v45  ;;  %v987_v4 = vsel %vm986_vm5, %v12630_v37, %v955_v0 }
 0x327   :  { %1023 = vmatpush.bf16.msrb.mxu2 %v963_v40 }
 0x32a   :  { %v983_v52 = vpop.permute.xlu1 %982  ;;  %v892_v35 = vpop.permute.xlu0 %891 }
 0x32b   :  { %1024 = vmatpush.bf16.msrb.mxu2 %v990_v56  ;;  %v994_v57 = vsel %vm986_vm5, %v983_v52, %v985_v54 }
 0x32c   :  { %1053 = vmatpush.bf16.msrb.mxu3 %v994_v57 }
 0x32f   :  { %1025 = vmatpush.bf16.msrb.mxu2 %v989_v59 }
 0x330   :  { %1054 = vmatpush.bf16.msrb.mxu3 %v993_v60 }
 0x332   :  { %v975_v61 = vpop.permute.xlu1 %974  ;;  %v887_v38 = vpop.permute.xlu0 %886 }
 0x333   :  { %1026 = vmatpush.bf16.msrb.mxu2 %v988_v63  ;;  %v992_v1 = vsel %vm986_vm5, %v975_v61, %v977_v53  ;;  %v882_v61 = vpop.permute.xlu2 %881 }
 0x334   :  { %1055 = vmatpush.bf16.msrb.mxu3 %v992_v1 }
 0x337   :  { %1027 = vmatpush.bf16.msrb.mxu2 %v987_v4 }
 0x33a   :  { %v971_v13 = vpop.permute.xlu1 %970  ;;  %1028 = vmatmul.bf16.vlgmr.msrb.gmra.mxu2 %v9408_v5  ;;  %v862_v43 = vpop.permute.xlu0 %861 }
 0x33b   :  { %v991_v14 = vsel %vm986_vm5, %v971_v13, %v973_v8  ;;  %v877_v7 = vpop.permute.xlu2 %876 }
 0x33c   :  { %1056 = vmatpush.bf16.msrb.mxu3 %v991_v14 }
 0x33f   :  { %9437 = vmatmul.msk.bf16.vlgmr.msrb.gmra.mxu3 %vm1007_vm6, %v9412_v15 }
 0x342   :  { %v12648_v36 = vpop.permute.xlu1 %896 }
 0x34a   :  { %1033 = vmatmul.bf16.gmra.mxu2 %v9416_v18  ;;  %v872_v41 = vpop.permute.xlu1 %871 }
 0x34f   :  { %9438 = vmatmul.msk.bf16.gmra.mxu3 %vm1007_vm6, %v9420_v21 }
 0x352   :  { %v867_v54 = vpop.permute.xlu1 %866 }
 0x35a   :  { %1038 = vmatmul.bf16.gmra.mxu2 %v9424_v25 }
 0x35f   :  { %9439 = vmatmul.msk.bf16.gmra.mxu3 %vm1007_vm6, %v9428_v28 }
 0x36a   :  { %1043 = vmatmul.bf16.gmra.mxu2 %v9432_v31 }
 0x36f   :  { %9440 = vmatmul.msk.bf16.gmra.mxu3 %vm1007_vm6, %v9436_v34 }
 0x3bd   :  { %v1029_v40 = vpop.f32.mrf.mxu2 }
 0x3be   :  { %v1030_v44 = vadd.f32 %v1029_v40, %v862_v43 }
 0x3c2   :  { %v1058_v45 = vpop.f32.mrf.mxu3 }
 0x3c3   :  { %v1059_v49 = vadd.f32 %v1058_v45, %v1030_v44 }
 0x3c5   :  { %v1031_v51 = vpop.f32.mrf.mxu2  ;;  %v1078_v46 = vmul.f32 0.1, %v1059_v49 }
 0x3c6   :  { %v1032_v52 = vadd.f32 %v1031_v51, %v867_v54 }
 0x3c7   :  { %v12650_v59 = vmax.f32 %v1059_v49, %v1078_v46 }
 0x3c9   :  { %v12656_v0 = vmul.f32 %v12650_v59, %v12576_v22 }
 0x3ca   :  { %v1060_v56 = vpop.f32.mrf.mxu3 }
 0x3cb   :  { %v1061_v57 = vadd.f32 %v1060_v56, %v1032_v52 }
 0x3cd   :  { %v1079_v60 = vmul.f32 0.1, %v1061_v57  ;;  %v1034_v53 = vpop.f32.mrf.mxu2 }
 0x3ce   :  { %v1035_v3 = vadd.f32 %v1034_v53, %v872_v41 }
 0x3cf   :  { %v12652_v63 = vmax.f32 %v1061_v57, %v1079_v60 }
 0x3d1   :  { %v12660_v1 = vmul.f32 %v12652_v63, %v12576_v22 }
 0x3d2   :  { %v1063_v2 = vpop.f32.mrf.mxu3 }
 0x3d3   :  { %v1198_v4 = vpack.c.bf16 %v12660_v1, %v12656_v0  ;;  %v1064_v5 = vadd.f32 %v1063_v2, %v1035_v3 }
 0x3d5   :  { %v1036_v6 = vpop.f32.mrf.mxu2  ;;  %v1080_v8 = vmul.f32 0.1, %v1064_v5 }
 0x3d6   :  { %v1037_v13 = vadd.f32 %v1036_v6, %v877_v7 }
 0x3d7   :  { %v1088_v16 = vmax.f32 %v1064_v5, %v1080_v8 }
 0x3d9   :  { %v12665_v21 = vmul.f32 %v1088_v16, %v12576_v22 }
 0x3da   :  { %v1065_v14 = vpop.f32.mrf.mxu3 }
 0x3db   :  { %v1066_v15 = vadd.f32 %v1065_v14, %v1037_v13  ;;  %v1103_v14 = vmul.f32 %v12652_v63, %v12539_v47 }
 0x3dd   :  { %v1081_v17 = vmul.f32 0.1, %v1066_v15  ;;  %v1039_v18 = vpop.f32.mrf.mxu2 }
 0x3de   :  { %v1040_v24 = vadd.f32 %v1039_v18, %v882_v61 }
 0x3df   :  { %v1089_v19 = vmax.f32 %v1066_v15, %v1081_v17  ;;  %v1102_v15 = vmul.f32 %v12650_v59, %v12539_v47 }
 0x3e1   :  { %v10931_v20 = vpack.i.bf16 %v1089_v19, %v1088_v16  ;;  %v12668_v23 = vmul.f32 %v1089_v19, %v12576_v22  ;;  %v10956_v17 = vpack.i.bf16 %v1103_v14, %v1102_v15  ;;  %v1105_v18 = vmul.f32 %v1089_v19, %v12539_v47  ;;  %v1220_v14 = vld [vmem:[#allocation12 + $0x30] sm:$0xff] }
 0x3e2   :  { %v1068_v25 = vpop.f32.mrf.mxu3 }
 0x3e3   :  { %10932 = vrot.lane.b32.xlu1 %v10931_v20, %s12127_s20  ;;  %v1199_v26 = vpack.c.bf16 %v12668_v23, %v12665_v21  ;;  %v1069_v27 = vadd.f32 %v1068_v25, %v1040_v24  ;;  %v1104_v20 = vmul.f32 %v1088_v16, %v12539_v47 }
 0x3e5   :  { %v1041_v28 = vpop.f32.mrf.mxu2  ;;  %v1082_v29 = vmul.f32 0.1, %v1069_v27  ;;  %v10951_v24 = vpack.i.bf16 %v1105_v18, %v1104_v20  ;;  %v1221_v18 = vld [vmem:[#allocation12 + $0x38] sm:$0xff]  ;;  %v1218_v20 = vld [vmem:[#allocation12 + $0x20] sm:$0xff] }
 0x3e6   :  { %v1042_v30 = vadd.f32 %v1041_v28, %v887_v38 }
 0x3e7   :  { %v1090_v33 = vmax.f32 %v1069_v27, %v1082_v29 }
 0x3e9   :  { %v1106_v43 = vmul.f32 %v1090_v33, %v12539_v47  ;;  %v1098_v49 = vmul.f32 %v1090_v33, %v12576_v22 }
 0x3ea   :  { %v1070_v31 = vpop.f32.mrf.mxu3 }
 0x3eb   :  { %v1071_v32 = vadd.f32 %v1070_v31, %v1042_v30 }
 0x3ed   :  { %v1083_v34 = vmul.f32 0.1, %v1071_v32  ;;  %v1044_v40 = vpop.f32.mrf.mxu2 }
 0x3ee   :  { %v1045_v46 = vadd.f32 %v1044_v40, %v892_v35 }
 0x3ef   :  { %v1091_v41 = vmax.f32 %v1071_v32, %v1083_v34 }
 0x3f1   :  { %v10926_v44 = vpack.i.bf16 %v1091_v41, %v1090_v33  ;;  %v1107_v45 = vmul.f32 %v1091_v41, %v12539_v47  ;;  %v1099_v51 = vmul.f32 %v1091_v41, %v12576_v22 }
 0x3f2   :  { %v1073_v54 = vpop.f32.mrf.mxu3 }
 0x3f3   :  { %10927 = vrot.lane.b32.xlu0 %v10926_v44, %s12127_s20  ;;  %v10946_v38 = vpack.i.bf16 %v1107_v45, %v1106_v43  ;;  %v1200_v52 = vpack.c.bf16 %v1099_v51, %v1098_v49  ;;  %v1074_v56 = vadd.f32 %v1073_v54, %v1045_v46 }
 0x3f5   :  { %10947 = vrot.lane.b32.xlu1 %v10946_v38, %s12128_s14  ;;  %v1046_v57 = vpop.f32.mrf.mxu2  ;;  %v1084_v60 = vmul.f32 0.1, %v1074_v56 }
 0x3f6   :  { %v1047_v53 = vadd.f32 %v1046_v57, %v12648_v36  ;;  %v10936_v36 = vpack.i.bf16 %v12652_v63, %v12650_v59 }
 0x3f7   :  { %v1092_v3 = vmax.f32 %v1074_v56, %v1084_v60 }
 0x3f9   :  { %v1108_v8 = vmul.f32 %v1092_v3, %v12539_v47  ;;  %v1100_v27 = vmul.f32 %v1092_v3, %v12576_v22 }
 0x3fa   :  { %v1075_v61 = vpop.f32.mrf.mxu3 }
 0x3fb   :  { %v1076_v2 = vadd.f32 %v1075_v61, %v1047_v53 }
 0x3fd   :  { %v1085_v5 = vmul.f32 0.1, %v1076_v2 }
 0x3ff   :  { %v1093_v6 = vmax.f32 %v1076_v2, %v1085_v5 }
 0x401   :  { %v10921_v7 = vpack.i.bf16 %v1093_v6, %v1092_v3  ;;  %v1109_v35 = vmul.f32 %v1093_v6, %v12539_v47  ;;  %v1101_v25 = vmul.f32 %v1093_v6, %v12576_v22 }
 0x403   :  { %10922 = vrot.lane.b32.xlu2 %v10921_v7, %s12127_s20  ;;  %v10941_v13 = vpack.i.bf16 %v1109_v35, %v1108_v8  ;;  %v1201_v63 = vpack.c.bf16 %v1101_v25, %v1100_v27  ;;  %v1216_v25 = vld [vmem:[#allocation12 + $0x10] sm:$0xff]  ;;  %v1217_v27 = vld [vmem:[#allocation12 + $0x18] sm:$0xff] }
 0x405   :  { %10942 = vrot.lane.b32.xlu0 %v10941_v13, %s12128_s14 }
 0x40b   :  { %10937 = vrot.lane.b32.xlu2 %v10936_v36, %s12127_s20 }
 0x40d   :  { %10957 = vrot.lane.b32.xlu0 %v10956_v17, %s12128_s14 }
 0x413   :  { %10952 = vrot.lane.b32.xlu2 %v10951_v24, %s12128_s14  ;;  %v1214_v24 = vld [vmem:[#allocation12] sm:$0xff] }
 0x41b   :  { %1320 = vrot.lane.b32.xlu2 %v1201_v63, %s12126_s27  ;;  %v1215_v63 = vld [vmem:[#allocation12 + $0x8] sm:$0xff] }
 0x455   :  { %v10933_v59 = vpop.permute.xlu1 %10932 }
 0x456   :  { %v10935_v28 = vunpack.i.h.bf16 %v10933_v59  ;;  %v10934_v29 = vunpack.i.l.bf16 %v10933_v59 }
 0x458   :  { %v1203_v30 = vpack.c.bf16 %v10935_v28, %v10934_v29 }
 0x45a   :  { %1324 = vrot.lane.b32.xlu0 %v1203_v30, %s12126_s27 }
 0x45d   :  { %v10923_v31 = vpop.permute.xlu2 %10922 }
 0x45e   :  { %v10925_v49 = vunpack.i.h.bf16 %v10923_v31  ;;  %v10924_v51 = vunpack.i.l.bf16 %v10923_v31 }
 0x460   :  { %v1205_v54 = vpack.c.bf16 %v10925_v49, %v10924_v51 }
 0x465   :  { %v10938_v19 = vpop.permute.xlu2 %10937  ;;  %v10928_v32 = vpop.permute.xlu0 %10927 }
 0x466   :  { %v10940_v47 = vunpack.i.h.bf16 %v10938_v19  ;;  %v10939_v16 = vunpack.i.l.bf16 %v10938_v19  ;;  %v10930_v33 = vunpack.i.h.bf16 %v10928_v32  ;;  %v10929_v34 = vunpack.i.l.bf16 %v10928_v32 }
 0x467   :  { %v10948_v40 = vpop.permute.xlu1 %10947 }
 0x468   :  { %v10950_v41 = vunpack.i.h.bf16 %v10948_v40  ;;  %v10949_v43 = vunpack.i.l.bf16 %v10948_v40  ;;  %v1202_v22 = vpack.c.bf16 %v10940_v47, %v10939_v16  ;;  %v1204_v44 = vpack.c.bf16 %v10930_v33, %v10929_v34 }
 0x46a   :  { %1322 = vrot.lane.b32.xlu1 %v1202_v22, %s12126_s27  ;;  %1326 = vrot.lane.b32.xlu2 %v1204_v44, %s12126_s27  ;;  %v1210_v45 = vpack.c.bf16 %v10950_v41, %v10949_v43  ;;  %v1170_v46 = vsel %vm801_vm4, %v10949_v43, %v12597_v58  ;;  %v1171_v38 = vsel %vm801_vm4, %v10950_v41, %v12597_v58  ;;  %v9518_v44 = vsel %vm1705_vm7, 1.0, %v16286_v42 }
 0x46b   :  { %v1211_v53 = vpack.c.bf16 %v1171_v38, %v1170_v46  ;;  %v9443_v46 = vld [vmem:[#allocation10] sm:$0xf]  ;;  %v10536_v38 = vld [vmem:[#allocation10 + $0x4] sm:$0xf0]  ;;  %vm9318_vm7 = vcmask 8192  }
 0x46c   :  { %1338 = vrot.lane.b32.xlu0 %v1210_v45, %s12126_s27 }
 0x46d   :  { %v10953_v2 = vpop.permute.xlu2 %10952 }
 0x46e   :  { %v10955_v5 = vunpack.i.h.bf16 %v10953_v2  ;;  %v10954_v6 = vunpack.i.l.bf16 %v10953_v2 }
 0x470   :  { %v1208_v21 = vpack.c.bf16 %v10955_v5, %v10954_v6  ;;  %v1169_v8 = vsel %vm801_vm4, %v10955_v5, %v12597_v58  ;;  %v9451_v5 = vld [vmem:[#allocation10 + $0x10] sm:$0xf] }
 0x472   :  { %1328 = vrot.lane.b32.xlu1 %v1205_v54, %s12126_s27  ;;  %1318 = vrot.lane.b32.xlu2 %v1200_v52, %s12126_s27 }
 0x475   :  { %v1321_v59 = vpop.permute.xlu2 %1320 }
 0x476   :  { %v1349_v34 = vsel %vm986_vm5, %v12630_v37, %v1321_v59 }
 0x477   :  { %v10943_v56 = vpop.permute.xlu0 %10942 }
 0x478   :  { %v10945_v57 = vunpack.i.h.bf16 %v10943_v56  ;;  %v10944_v60 = vunpack.i.l.bf16 %v10943_v56 }
 0x47a   :  { %1340 = vrot.lane.b32.xlu1 %v1211_v53, %s12126_s27  ;;  %1316 = vrot.lane.b32.xlu2 %v1199_v26, %s12126_s27  ;;  %v1212_v61 = vpack.c.bf16 %v10945_v57, %v10944_v60  ;;  %v1172_v52 = vsel %vm801_vm4, %v10944_v60, %v12597_v58  ;;  %v1173_v3 = vsel %vm801_vm4, %v10945_v57, %v12597_v58  ;;  %v10535_v60 = vld [vmem:[#allocation10 + $0x4] sm:$0xf]  ;;  %v9445_v53 = vld [vmem:[#allocation10 + $0x8] sm:$0xf0] }
 0x47b   :  { %v1213_v7 = vpack.c.bf16 %v1173_v3, %v1172_v52  ;;  %v1168_v26 = vsel %vm801_vm4, %v10954_v6, %v12597_v58  ;;  %v9444_v57 = vor.u32 %v10536_v38, %v9443_v46  ;;  %v9448_v3 = vor.u32 %v10535_v60, %v9445_v53  ;;  %v10538_v6 = vld [vmem:[#allocation10 + $0x14] sm:$0xf0] }
 0x47c   :  { %1342 = vrot.lane.b32.xlu0 %v1212_v61, %s12126_s27  ;;  %v1209_v36 = vpack.c.bf16 %v1169_v8, %v1168_v26  ;;  %v9459_v26 = vld [vmem:[#allocation10 + $0x20] sm:$0xf]  ;;  %v10540_v8 = vld [vmem:[#allocation10 + $0x24] sm:$0xf0] }
 0x47f   :  { %v10958_v23 = vpop.permute.xlu0 %10957 }
 0x480   :  { %v10960_v35 = vunpack.i.h.bf16 %v10958_v23  ;;  %v10959_v13 = vunpack.i.l.bf16 %v10958_v23  ;;  %v9453_v23 = vld [vmem:[#allocation10 + $0x18] sm:$0xf0] }
 0x482   :  { %1344 = vrot.lane.b32.xlu1 %v1213_v7, %s12126_s27  ;;  %1314 = vrot.lane.b32.xlu2 %v1198_v4, %s12126_s27  ;;  %v1206_v15 = vpack.c.bf16 %v10960_v35, %v10959_v13  ;;  %v1166_v0 = vsel %vm801_vm4, %v10959_v13, %v12597_v58  ;;  %v1167_v1 = vsel %vm801_vm4, %v10960_v35, %v12597_v58  ;;  %v1219_v4 = vld [vmem:[#allocation12 + $0x28] sm:$0xff]  ;;  %v10539_v13 = vld [vmem:[#allocation10 + $0x24] sm:$0xf] }
 0x483   :  { %v1207_v17 = vpack.c.bf16 %v1167_v1, %v1166_v0  ;;  %v9452_v7 = vor.u32 %v10538_v6, %v9451_v5  ;;  %v9460_v35 = vor.u32 %v10540_v8, %v9459_v26  ;;  %v10542_v0 = vld [vmem:[#allocation10 + $0x34] sm:$0xf0] }
 0x484   :  { %1334 = vrot.lane.b32.xlu0 %v1208_v21, %s12126_s27  ;;  %v10537_v21 = vld [vmem:[#allocation10 + $0x14] sm:$0xf] }
 0x48a   :  { %1336 = vrot.lane.b32.xlu1 %v1209_v36, %s12126_s27  ;;  %1254 = vperm.xlu2 %10880, %v1220_v14   ;;  %v9461_v14 = vld [vmem:[#allocation10 + $0x28] sm:$0xf0] }
 0x48b   :  { %v9464_v36 = vor.u32 %v10539_v13, %v9461_v14 }
 0x48c   :  { %1330 = vrot.lane.b32.xlu0 %v1206_v15, %s12126_s27  ;;  %v9467_v15 = vld [vmem:[#allocation10 + $0x30] sm:$0xf] }
 0x48d   :  { %v9468_v1 = vor.u32 %v10542_v0, %v9467_v15 }
 0x492   :  { %1332 = vrot.lane.b32.xlu1 %v1207_v17, %s12126_s27  ;;  %1249 = vperm.xlu2 %10880, %v1219_v4   ;;  %v10541_v4 = vld [vmem:[#allocation10 + $0x34] sm:$0xf]  ;;  %v9469_v17 = vld [vmem:[#allocation10 + $0x38] sm:$0xf0] }
 0x494   :  { %1259 = vperm.xlu0 %10878, %v1221_v18   ;;  %v9472_v18 = vor.u32 %v10541_v4, %v9469_v17 }
 0x49a   :  { %1244 = vperm.xlu1 %10879, %v1218_v20   ;;  %1224 = vperm.xlu2 %10880, %v1214_v24  }
 0x49c   :  { %1234 = vperm.xlu0 %10878, %v1216_v25  }
 0x4a2   :  { %1239 = vperm.xlu1 %10879, %v1217_v27  }
 0x4a4   :  { %1229 = vperm.xlu0 %10878, %v1215_v63  }
 0x4aa   :  { %1709 = vrot.lane.b32.xlu1 %v9518_v44, %s12129_s2 }
 0x4c4   :  { %v1327_v58 = vpop.permute.xlu2 %1326 }
 0x4cc   :  { %v1325_v29 = vpop.permute.xlu0 %1324  ;;  %v1319_v19 = vpop.permute.xlu2 %1318 }
 0x4cd   :  { %v1348_v41 = vsel %vm986_vm5, %v12630_v37, %v1319_v19 }
 0x4d4   :  { %v1317_v16 = vpop.permute.xlu2 %1316 }
 0x4d5   :  { %v1347_v49 = vsel %vm986_vm5, %v12630_v37, %v1317_v16 }
 0x4dc   :  { %v1323_v28 = vpop.permute.xlu1 %1322  ;;  %v1315_v51 = vpop.permute.xlu2 %1314 }
 0x4dd   :  { %v1346_v56 = vsel %vm986_vm5, %v12630_v37, %v1315_v51  ;;  %v9456_v37 = vor.u32 %v10537_v21, %v9453_v23 }
 0x4de   :  { %v1339_v31 = vpop.permute.xlu0 %1338 }
 0x4e4   :  { %v1329_v30 = vpop.permute.xlu1 %1328 }
 0x4e5   :  { %1378 = vmatpush.bf16.msrb.mxu0 %v1329_v30 }
 0x4e9   :  { %1379 = vmatpush.bf16.msrb.mxu0 %v1327_v58 }
 0x4ec   :  { %v1341_v32 = vpop.permute.xlu1 %1340 }
 0x4ed   :  { %1380 = vmatpush.bf16.msrb.mxu0 %v1325_v29  ;;  %v1352_v43 = vsel %vm986_vm5, %v1339_v31, %v1341_v32 }
 0x4ee   :  { %v1343_v47 = vpop.permute.xlu0 %1342 }
 0x4f1   :  { %1381 = vmatpush.bf16.msrb.mxu0 %v1323_v28 }
 0x4f4   :  { %v1345_v33 = vpop.permute.xlu1 %1344 }
 0x4f5   :  { %1382 = vmatpush.bf16.msrb.mxu0 %v1349_v34  ;;  %v1353_v40 = vsel %vm986_vm5, %v1343_v47, %v1345_v33 }
 0x4f6   :  { %1411 = vmatpush.bf16.msrb.mxu1 %v1353_v40  ;;  %v1335_v22 = vpop.permute.xlu0 %1334  ;;  %v1255_v40 = vpop.permute.xlu2 %1254 }
 0x4f9   :  { %1383 = vmatpush.bf16.msrb.mxu0 %v1348_v41 }
 0x4fa   :  { %1412 = vmatpush.bf16.msrb.mxu1 %v1352_v43 }
 0x4fc   :  { %v1337_v45 = vpop.permute.xlu1 %1336 }
 0x4fd   :  { %1384 = vmatpush.bf16.msrb.mxu0 %v1347_v49  ;;  %v1351_v54 = vsel %vm986_vm5, %v1335_v22, %v1337_v45 }
 0x4fe   :  { %1413 = vmatpush.bf16.msrb.mxu1 %v1351_v54  ;;  %v1331_v61 = vpop.permute.xlu0 %1330 }
 0x501   :  { %1385 = vmatpush.bf16.msrb.mxu0 %v1346_v56  ;;  %v1250_v56 = vpop.permute.xlu2 %1249 }
 0x504   :  { %v1333_v2 = vpop.permute.xlu1 %1332  ;;  %1386 = vmatmul.bf16.vlgmr.msrb.gmra.mxu0 %v9444_v57 }
 0x505   :  { %v1350_v52 = vsel %vm986_vm5, %v1331_v61, %v1333_v2 }
 0x506   :  { %1414 = vmatpush.bf16.msrb.mxu1 %v1350_v52  ;;  %v1260_v27 = vpop.permute.xlu0 %1259 }
 0x509   :  { %9473 = vmatmul.msk.bf16.vlgmr.msrb.gmra.mxu1 %vm1007_vm6, %v9448_v3  ;;  %v1225_v5 = vpop.permute.xlu2 %1224 }
 0x50c   :  { %v1245_v28 = vpop.permute.xlu1 %1244 }
 0x50e   :  { %v1235_v58 = vpop.permute.xlu0 %1234 }
 0x514   :  { %1391 = vmatmul.bf16.gmra.mxu0 %v9452_v7  ;;  %v1240_v32 = vpop.permute.xlu1 %1239 }
 0x519   :  { %9474 = vmatmul.msk.bf16.gmra.mxu1 %vm1007_vm6, %v9456_v37 }
 0x51c   :  { %v12775_v15 = vpop.permute.xlu1 %1709 }
 0x51d   :  { %v1713_v17 = vmul.f32 0.0, %v12775_v15 }
 0x524   :  { %1396 = vmatmul.bf16.gmra.mxu0 %v9460_v35 }
 0x529   :  { %9475 = vmatmul.msk.bf16.gmra.mxu1 %vm1007_vm6, %v9464_v36  ;;  %v1230_v36 = vpop.permute.xlu0 %1229 }
 0x534   :  { %1401 = vmatmul.bf16.gmra.mxu0 %v9468_v1 }
 0x539   :  { %9476 = vmatmul.msk.bf16.gmra.mxu1 %vm1007_vm6, %v9472_v18 }
 0x581   :  { %v1387_v20 = vpop.f32.mrf.mxu0 }
 0x582   :  { %v1388_v6 = vadd.f32 %v1387_v20, %v1225_v5 }
 0x586   :  { %v1416_v24 = vpop.f32.mrf.mxu1 }
 0x587   :  { %v1417_v26 = vadd.f32 %v1416_v24, %v1388_v6 }
 0x589   :  { %v1389_v25 = vpop.f32.mrf.mxu0  ;;  %v1436_v13 = vadd.f32 %v1417_v26, %v12557_v10 }
 0x58a   :  { %v1390_v0 = vadd.f32 %v1389_v25, %v1230_v36 }
 0x58b   :  { %v1444_v20 = vmul.f32 0.1, %v1436_v13 }
 0x58d   :  { %v12785_v25 = vmax.f32 %v1436_v13, %v1444_v20 }
 0x58e   :  { %v1418_v63 = vpop.f32.mrf.mxu1 }
 0x58f   :  { %v1419_v24 = vadd.f32 %v1418_v63, %v1390_v0 }
 0x591   :  { %v1392_v59 = vpop.f32.mrf.mxu0 }
 0x592   :  { %v1393_v30 = vadd.f32 %v1392_v59, %v1235_v58 }
 0x596   :  { %v1421_v29 = vpop.f32.mrf.mxu1 }
 0x597   :  { %v1422_v31 = vadd.f32 %v1421_v29, %v1393_v30 }
 0x599   :  { %v1394_v19 = vpop.f32.mrf.mxu0  ;;  %v1438_v47 = vadd.f32 %v1422_v31, %v12530_v48 }
 0x59a   :  { %v1395_v16 = vadd.f32 %v1394_v19, %v1240_v32 }
 0x59b   :  { %v1446_v41 = vmul.f32 0.1, %v1438_v47 }
 0x59d   :  { %v12756_v45 = vmax.f32 %v1438_v47, %v1446_v41 }
 0x59e   :  { %v1423_v33 = vpop.f32.mrf.mxu1 }
 0x59f   :  { %v1424_v34 = vadd.f32 %v1423_v33, %v1395_v16 }
 0x5a1   :  { %v1439_v43 = vadd.f32 %v1424_v34, %v12532_v50  ;;  %v1397_v22 = vpop.f32.mrf.mxu0 }
 0x5a2   :  { %v1398_v54 = vadd.f32 %v1397_v22, %v1245_v28 }
 0x5a3   :  { %v1447_v44 = vmul.f32 0.1, %v1439_v43 }
 0x5a5   :  { %v12758_v49 = vmax.f32 %v1439_v43, %v1447_v44 }
 0x5a6   :  { %v1426_v51 = vpop.f32.mrf.mxu1 }
 0x5a7   :  { %v10971_v46 = vpack.i.bf16 %v12758_v49, %v12756_v45  ;;  %v1427_v38 = vadd.f32 %v1426_v51, %v1398_v54  ;;  %v1716_v31 = vmul.f32 %v12775_v15, %v12758_v49  ;;  %v1477_v41 = vpack.c.bf16 %v12758_v49, %v12756_v45 }
 0x5a9   :  { %v1399_v48 = vpop.f32.mrf.mxu0  ;;  %10972 = vrot.lane.b32.xlu1 %v10971_v46, %s12128_s14  ;;  %v1440_v57 = vadd.f32 %v1427_v38, %v12521_v11 }
 0x5aa   :  { %v1400_v60 = vadd.f32 %v1399_v48, %v1250_v56 }
 0x5ab   :  { %v1448_v61 = vmul.f32 0.1, %v1440_v57 }
 0x5ad   :  { %v12765_v7 = vmax.f32 %v1440_v57, %v1448_v61 }
 0x5ae   :  { %v1428_v50 = vpop.f32.mrf.mxu1 }
 0x5af   :  { %v1429_v53 = vadd.f32 %v1428_v50, %v1400_v60  ;;  %v1717_v51 = vmul.f32 %v12775_v15, %v12765_v7 }
 0x5b1   :  { %v1441_v2 = vadd.f32 %v1429_v53, %v12523_v12  ;;  %v1402_v52 = vpop.f32.mrf.mxu0 }
 0x5b2   :  { %v1403_v23 = vadd.f32 %v1402_v52, %v1255_v40 }
 0x5b3   :  { %v1449_v3 = vmul.f32 0.1, %v1441_v2 }
 0x5b5   :  { %v12767_v21 = vmax.f32 %v1441_v2, %v1449_v3 }
 0x5b6   :  { %v1431_v37 = vpop.f32.mrf.mxu1 }
 0x5b7   :  { %v1432_v8 = vadd.f32 %v1431_v37, %v1403_v23  ;;  %v10966_v11 = vpack.i.bf16 %v12767_v21, %v12765_v7  ;;  %v1718_v63 = vmul.f32 %v12775_v15, %v12767_v21  ;;  %v1478_v40 = vpack.c.bf16 %v12767_v21, %v12765_v7 }
 0x5b9   :  { %v1442_v35 = vadd.f32 %v1432_v8, %v12534_v55  ;;  %10967 = vrot.lane.b32.xlu0 %v10966_v11, %s12128_s14  ;;  %v1404_v12 = vpop.f32.mrf.mxu0  ;;  %v9517_v55 = vsel %vm1689_vm8, 1.0, %v16286_v42 }
 0x5ba   :  { %v1405_v4 = vadd.f32 %v1404_v12, %v1260_v27  ;;  %v1437_v27 = vadd.f32 %v1419_v24, %v12555_v9  ;;  %v1712_v9 = vmul.f32 %v12775_v15, %v12785_v25 }
 0x5bb   :  { %v1450_v14 = vmul.f32 0.1, %v1442_v35 }
 0x5bc   :  { %v1445_v19 = vmul.f32 0.1, %v1437_v27  ;;  %v10996_v33 = vpack.i.bf16 %v1712_v9, %v1716_v31 }
 0x5bd   :  { %v12777_v1 = vmax.f32 %v1442_v35, %v1450_v14 }
 0x5be   :  { %v1433_v18 = vpop.f32.mrf.mxu1  ;;  %v12801_v34 = vmax.f32 %v1437_v27, %v1445_v19 }
 0x5bf   :  { %v1434_v59 = vadd.f32 %v1433_v18, %v1405_v4  ;;  %v1719_v10 = vmul.f32 %v12775_v15, %v12777_v1 }
 0x5c0   :  { %v10976_v43 = vpack.i.bf16 %v12801_v34, %v12785_v25  ;;  %v1476_v22 = vpack.c.bf16 %v12801_v34, %v12785_v25  ;;  %v1714_v46 = vmul.f32 %v12775_v15, %v12801_v34 }
 0x5c1   :  { %v1443_v28 = vadd.f32 %v1434_v59, %v12544_v62  ;;  %1693 = vrot.lane.b32.xlu0 %v9517_v55, %s12128_s14  ;;  %v10981_v58 = vpack.i.bf16 %v1719_v10, %v1713_v17  ;;  %v1715_v62 = vmul.f32 %v12775_v15, %v12756_v45 }
 0x5c3   :  { %v1451_v29 = vmul.f32 0.1, %v1443_v28  ;;  %10982 = vrot.lane.b32.xlu1 %v10981_v58, %s12130_s30  ;;  %v10991_v16 = vpack.i.bf16 %v1715_v62, %v1718_v63 }
 0x5c5   :  { %v1459_v30 = vmax.f32 %v1443_v28, %v1451_v29 }
 0x5c7   :  { %v10961_v32 = vpack.i.bf16 %v1459_v30, %v12777_v1  ;;  %v1479_v47 = vpack.c.bf16 %v1459_v30, %v12777_v1  ;;  %v1720_v44 = vmul.f32 %v12775_v15, %v1459_v30 }
 0x5c9   :  { %10962 = vrot.lane.b32.xlu2 %v10961_v32, %s12128_s14  ;;  %1644 = vmatpush.bf16.msra.mxu3 %v1479_v47  ;;  %v10986_v54 = vpack.i.bf16 %v1717_v51, %v1720_v44 }
 0x5ca   :  { %10992 = vrot.lane.b32.xlu0 %v10991_v16, %s12130_s30 }
 0x5cb   :  { %10997 = vrot.lane.b32.xlu1 %v10996_v33, %s12130_s30 }
 0x5cd   :  { %1645 = vmatpush.bf16.msra.mxu3 %v1478_v40 }
 0x5d1   :  { %1646 = vmatpush.bf16.msra.mxu3 %v1477_v41  ;;  %10977 = vrot.lane.b32.xlu2 %v10976_v43, %s12128_s14 }
 0x5d5   :  { %1647 = vmatpush.bf16.msra.mxu3 %v1476_v22 }
 0x5d9   :  { %10987 = vrot.lane.b32.xlu2 %v10986_v54, %s12130_s30  ;;  %v1852_v54 = vld [vmem:[#allocation15 + $0x70] sm:$0xff] }
 0x5e1   :  { %1766 = vrot.lane.b32.xlu2 %v1714_v46, %s12130_s30 }
 0x61b   :  { %v10973_v38 = vpop.permute.xlu1 %10972 }
 0x61c   :  { %v10975_v48 = vunpack.i.h.bf16 %v10973_v38  ;;  %v10974_v56 = vunpack.i.l.bf16 %v10973_v38  ;;  %v1853_v38 = vld [vmem:[#allocation15 + $0x78] sm:$0xff] }
 0x61e   :  { %v1827_v57 = vpack.c.bf16 %v10975_v48, %v10974_v56  ;;  %v1850_v48 = vld [vmem:[#allocation15 + $0x60] sm:$0xff]  ;;  %v1851_v56 = vld [vmem:[#allocation15 + $0x68] sm:$0xff] }
 0x620   :  { %2035 = vrot.lane.b32.xlu2 %v1827_v57, %s12129_s2  ;;  %v1848_v57 = vld [vmem:[#allocation15 + $0x50] sm:$0xff] }
 0x623   :  { %v10963_v60 = vpop.permute.xlu2 %10962 }
 0x624   :  { %v10965_v50 = vunpack.i.h.bf16 %v10963_v60  ;;  %v10964_v53 = vunpack.i.l.bf16 %v10963_v60  ;;  %v1849_v60 = vld [vmem:[#allocation15 + $0x58] sm:$0xff] }
 0x626   :  { %v1829_v61 = vpack.c.bf16 %v10965_v50, %v10964_v53  ;;  %v1846_v50 = vld [vmem:[#allocation15 + $0x40] sm:$0xff]  ;;  %v1847_v53 = vld [vmem:[#allocation15 + $0x48] sm:$0xff] }
 0x628   :  { %2039 = vrot.lane.b32.xlu0 %v1829_v61, %s12129_s2  ;;  %v1844_v61 = vld [vmem:[#allocation15 + $0x30] sm:$0xff] }
 0x62b   :  { %v10968_v2 = vpop.permute.xlu0 %10967  ;;  %v10978_v52 = vpop.permute.xlu2 %10977 }
 0x62c   :  { %v10970_v3 = vunpack.i.h.bf16 %v10968_v2  ;;  %v10969_v5 = vunpack.i.l.bf16 %v10968_v2  ;;  %v10980_v6 = vunpack.i.h.bf16 %v10978_v52  ;;  %v10979_v23 = vunpack.i.l.bf16 %v10978_v52  ;;  %v1845_v2 = vld [vmem:[#allocation15 + $0x38] sm:$0xff]  ;;  %v1842_v52 = vld [vmem:[#allocation15 + $0x20] sm:$0xff] }
 0x62e   :  { %v1828_v37 = vpack.c.bf16 %v10970_v3, %v10969_v5  ;;  %v1826_v26 = vpack.c.bf16 %v10980_v6, %v10979_v23  ;;  %v1843_v3 = vld [vmem:[#allocation15 + $0x28] sm:$0xff]  ;;  %v1840_v5 = vld [vmem:[#allocation15 + $0x10] sm:$0xff]  ;;  %v1841_v6 = vld [vmem:[#allocation15 + $0x18] sm:$0xff] }
 0x62f   :  { %v1838_v23 = vld [vmem:[#allocation15] sm:$0xff] }
 0x630   :  { %2037 = vrot.lane.b32.xlu1 %v1828_v37, %s12129_s2  ;;  %2033 = vrot.lane.b32.xlu0 %v1826_v26, %s12129_s2  ;;  %v1839_v37 = vld [vmem:[#allocation15 + $0x8] sm:$0xff] }
 0x633   :  { %v12824_v8 = vpop.permute.xlu0 %1693  ;;  %v10988_v18 = vpop.permute.xlu2 %10987 }
 0x634   :  { %v1703_v11 = vmul.f32 %v12824_v8, %v12777_v1  ;;  %v1704_v35 = vmul.f32 %v12824_v8, %v1459_v30  ;;  %v1696_v12 = vmul.f32 0.0, %v12824_v8  ;;  %v1701_v13 = vmul.f32 %v12824_v8, %v12765_v7 }
 0x635   :  { %v1702_v14 = vmul.f32 %v12824_v8, %v12767_v21  ;;  %v10983_v36 = vpop.permute.xlu1 %10982  ;;  %v10989_v1 = vunpack.i.l.bf16 %v10988_v18  ;;  %v1699_v7 = vmul.f32 %v12824_v8, %v12756_v45  ;;  %v1700_v21 = vmul.f32 %v12824_v8, %v12758_v49 }
 0x636   :  { %v1825_v0 = vpack.c.bf16 %v1704_v35, %v1703_v11  ;;  %v1821_v4 = vpack.c.bf16 %v1696_v12, %v1696_v12  ;;  %v10985_v55 = vunpack.i.h.bf16 %v10983_v36  ;;  %v12835_v20 = vunpack.i.l.bf16 %v10983_v36 }
 0x637   :  { %v1824_v17 = vpack.c.bf16 %v1702_v14, %v1701_v13  ;;  %v10990_v59 = vunpack.i.h.bf16 %v10988_v18  ;;  %v1823_v27 = vpack.c.bf16 %v1700_v21, %v1699_v7  ;;  %v1697_v45 = vmul.f32 %v12824_v8, %v12785_v25 }
 0x638   :  { %2031 = vrot.lane.b32.xlu2 %v1825_v0, %s12129_s2  ;;  %2023 = vrot.lane.b32.xlu1 %v1821_v4, %s12129_s2  ;;  %v1787_v28 = vsel %vm1780_vm9, %v10985_v55, %v12835_v20  ;;  %v1788_v58 = vsel %vm1780_vm9, %v10989_v1, %v12835_v20  ;;  %v1698_v49 = vmul.f32 %v12824_v8, %v12801_v34 }
 0x639   :  { %2029 = vrot.lane.b32.xlu0 %v1824_v17, %s12129_s2  ;;  %v1837_v63 = vpack.c.bf16 %v1788_v58, %v1787_v28  ;;  %v1836_v19 = vpack.c.bf16 %v10989_v1, %v10985_v55  ;;  %v1785_v32 = vsel %vm1780_vm9, %v10990_v59, %v12835_v20 }
 0x63a   :  { %v1822_v62 = vpack.c.bf16 %v1698_v49, %v1697_v45 }
 0x63b   :  { %v1767_v40 = vpop.permute.xlu2 %1766 }
 0x63c   :  { %v10993_v24 = vpop.permute.xlu0 %10992  ;;  %v1782_v51 = vsel %vm1780_vm9, %v1767_v40, %v12835_v20 }
 0x63d   :  { %v10994_v10 = vunpack.i.l.bf16 %v10993_v24  ;;  %v10998_v30 = vpop.permute.xlu1 %10997  ;;  %v10995_v16 = vunpack.i.h.bf16 %v10993_v24  ;;  %v9521_v24 = vld [vmem:[#allocation13] sm:$0xf] }
 0x63e   :  { %v10999_v47 = vunpack.i.l.bf16 %v10998_v30  ;;  %v11000_v25 = vunpack.i.h.bf16 %v10998_v30  ;;  %v9529_v30 = vld [vmem:[#allocation13 + $0x10] sm:$0xf] }
 0x63f   :  { %v1834_v29 = vpack.c.bf16 %v10994_v10, %v10990_v59  ;;  %v1786_v31 = vsel %vm1780_vm9, %v10994_v10, %v12835_v20  ;;  %v1783_v34 = vsel %vm1780_vm9, %v10995_v16, %v12835_v20  ;;  %v10552_v59 = vld [vmem:[#allocation13 + $0x4] sm:$0xf0] }
 0x640   :  { %2027 = vrot.lane.b32.xlu1 %v1823_v27, %s12129_s2  ;;  %v1835_v9 = vpack.c.bf16 %v1786_v31, %v1785_v32  ;;  %v1784_v33 = vsel %vm1780_vm9, %v10999_v47, %v12835_v20  ;;  %v1832_v41 = vpack.c.bf16 %v10999_v47, %v10995_v16  ;;  %v1830_v22 = vpack.c.bf16 %v1767_v40, %v11000_v25  ;;  %v10554_v31 = vld [vmem:[#allocation13 + $0x14] sm:$0xf0]  ;;  %v10553_v40 = vld [vmem:[#allocation13 + $0x14] sm:$0xf] }
 0x641   :  { %2049 = vrot.lane.b32.xlu2 %v1834_v29, %s12129_s2  ;;  %2055 = vrot.lane.b32.xlu0 %v1837_v63, %s12129_s2  ;;  %v1833_v43 = vpack.c.bf16 %v1784_v33, %v1783_v34  ;;  %v1781_v44 = vsel %vm1780_vm9, %v11000_v25, %v12835_v20  ;;  %v9522_v27 = vor.u32 %v10552_v59, %v9521_v24  ;;  %v9537_v33 = vld [vmem:[#allocation13 + $0x20] sm:$0xf]  ;;  %v10556_v34 = vld [vmem:[#allocation13 + $0x24] sm:$0xf0] }
 0x642   :  { %v1831_v46 = vpack.c.bf16 %v1782_v51, %v1781_v44  ;;  %v9530_v16 = vor.u32 %v10554_v31, %v9529_v30  ;;  %v9545_v44 = vld [vmem:[#allocation13 + $0x30] sm:$0xf]  ;;  %v10558_v51 = vld [vmem:[#allocation13 + $0x34] sm:$0xf0] }
 0x648   :  { %2025 = vrot.lane.b32.xlu1 %v1822_v62, %s12129_s2  ;;  %v10551_v62 = vld [vmem:[#allocation13 + $0x4] sm:$0xf] }
 0x649   :  { %2053 = vrot.lane.b32.xlu2 %v1836_v19, %s12129_s2  ;;  %2051 = vrot.lane.b32.xlu0 %v1835_v9, %s12129_s2  ;;  %v9523_v19 = vld [vmem:[#allocation13 + $0x8] sm:$0xf0] }
 0x64a   :  { %v9526_v25 = vor.u32 %v10551_v62, %v9523_v19 }
 0x650   :  { %2045 = vrot.lane.b32.xlu1 %v1832_v41, %s12129_s2  ;;  %v9531_v41 = vld [vmem:[#allocation13 + $0x18] sm:$0xf0] }
 0x651   :  { %2047 = vrot.lane.b32.xlu2 %v1833_v43, %s12129_s2  ;;  %2041 = vrot.lane.b32.xlu0 %v1830_v22, %s12129_s2  ;;  %v9538_v43 = vor.u32 %v10556_v34, %v9537_v33  ;;  %v9534_v22 = vor.u32 %v10553_v40, %v9531_v41 }
 0x658   :  { %2043 = vrot.lane.b32.xlu1 %v1831_v46, %s12129_s2  ;;  %v9539_v46 = vld [vmem:[#allocation13 + $0x28] sm:$0xf0] }
 0x659   :  { %1926 = vperm.xlu2 %10880, %v1852_v54   ;;  %1931 = vperm.xlu0 %10878, %v1853_v38   ;;  %v10555_v54 = vld [vmem:[#allocation13 + $0x24] sm:$0xf]  ;;  %v9546_v38 = vor.u32 %v10558_v51, %v9545_v44 }
 0x660   :  { %1916 = vperm.xlu1 %10879, %v1850_v48   ;;  %v9542_v48 = vor.u32 %v10555_v54, %v9539_v46 }
 0x661   :  { %1921 = vperm.xlu2 %10880, %v1851_v56   ;;  %1906 = vperm.xlu0 %10878, %v1848_v57   ;;  %v9553_v56 = vld [vmem:[#allocation13 + $0x40] sm:$0xf]  ;;  %v10560_v57 = vld [vmem:[#allocation13 + $0x44] sm:$0xf0] }
 0x668   :  { %1911 = vperm.xlu1 %10879, %v1849_v60   ;;  %v10557_v60 = vld [vmem:[#allocation13 + $0x34] sm:$0xf] }
 0x669   :  { %1896 = vperm.xlu2 %10880, %v1846_v50   ;;  %1901 = vperm.xlu0 %10878, %v1847_v53   ;;  %v9547_v50 = vld [vmem:[#allocation13 + $0x38] sm:$0xf0]  ;;  %v9554_v53 = vor.u32 %v10560_v57, %v9553_v56 }
 0x670   :  { %1886 = vperm.xlu1 %10879, %v1844_v61   ;;  %v9550_v61 = vor.u32 %v10557_v60, %v9547_v50 }
 0x671   :  { %1891 = vperm.xlu2 %10880, %v1845_v2   ;;  %1876 = vperm.xlu0 %10878, %v1842_v52   ;;  %v9561_v2 = vld [vmem:[#allocation13 + $0x50] sm:$0xf]  ;;  %v10562_v52 = vld [vmem:[#allocation13 + $0x54] sm:$0xf0] }
 0x678   :  { %1881 = vperm.xlu1 %10879, %v1843_v3   ;;  %v10559_v3 = vld [vmem:[#allocation13 + $0x44] sm:$0xf] }
 0x679   :  { %1866 = vperm.xlu2 %10880, %v1840_v5   ;;  %1871 = vperm.xlu0 %10878, %v1841_v6   ;;  %v9555_v5 = vld [vmem:[#allocation13 + $0x48] sm:$0xf0]  ;;  %v9562_v6 = vor.u32 %v10562_v52, %v9561_v2 }
 0x67a   :  { %v2036_v26 = vpop.permute.xlu2 %2035 }
 0x680   :  { %1856 = vperm.xlu1 %10879, %v1838_v23   ;;  %v9558_v23 = vor.u32 %v10559_v3, %v9555_v5 }
 0x681   :  { %1861 = vperm.xlu2 %10880, %v1839_v37   ;;  %v9569_v37 = vld [vmem:[#allocation13 + $0x60] sm:$0xf] }
 0x692   :  { %v2032_v35 = vpop.permute.xlu2 %2031 }
 0x69a   :  { %v2040_v11 = vpop.permute.xlu0 %2039 }
 0x69b   :  { %2102 = vmatpush.bf16.msra.mxu2 %v2040_v11  ;;  %v2050_v14 = vpop.permute.xlu2 %2049  ;;  %v10561_v11 = vld [vmem:[#allocation13 + $0x54] sm:$0xf] }
 0x6a2   :  { %v2038_v12 = vpop.permute.xlu1 %2037  ;;  %v2034_v13 = vpop.permute.xlu0 %2033 }
 0x6a3   :  { %2103 = vmatpush.bf16.msra.mxu2 %v2038_v12  ;;  %v2054_v55 = vpop.permute.xlu2 %2053 }
 0x6a7   :  { %2104 = vmatpush.bf16.msra.mxu2 %v2036_v26  ;;  %v10564_v26 = vld [vmem:[#allocation13 + $0x64] sm:$0xf0] }
 0x6a8   :  { %v9570_v12 = vor.u32 %v10564_v26, %v9569_v37 }
 0x6aa   :  { %v12873_v36 = vpop.permute.xlu1 %2023 }
 0x6ab   :  { %2105 = vmatpush.bf16.msra.mxu2 %v2034_v13  ;;  %v2030_v0 = vpop.permute.xlu0 %2029  ;;  %v2061_v4 = vsel %vm2057_vm10, %v12873_v36, %v2032_v35  ;;  %v2048_v63 = vpop.permute.xlu2 %2047  ;;  %v9563_v35 = vld [vmem:[#allocation13 + $0x58] sm:$0xf0] }
 0x6ac   :  { %v2060_v17 = vsel %vm2057_vm10, %v12873_v36, %v2030_v0  ;;  %v9566_v13 = vor.u32 %v10561_v11, %v9563_v35 }
 0x6af   :  { %2106 = vmatpush.bf16.msra.mxu2 %v2061_v4  ;;  %v9577_v4 = vld [vmem:[#allocation13 + $0x70] sm:$0xf] }
 0x6b2   :  { %v2028_v18 = vpop.permute.xlu1 %2027 }
 0x6b3   :  { %2107 = vmatpush.bf16.msra.mxu2 %v2060_v17  ;;  %v2056_v1 = vpop.permute.xlu0 %2055  ;;  %v2059_v21 = vsel %vm2057_vm10, %v12873_v36, %v2028_v18  ;;  %v10566_v17 = vld [vmem:[#allocation13 + $0x74] sm:$0xf0]  ;;  %v10563_v18 = vld [vmem:[#allocation13 + $0x64] sm:$0xf] }
 0x6b4   :  { %v2065_v7 = vsel %vm2057_vm10, %v2054_v55, %v2056_v1  ;;  %v9571_v55 = vld [vmem:[#allocation13 + $0x68] sm:$0xf0] }
 0x6b5   :  { %2155 = vmatpush.bf16.msra.mxu0 %v2065_v7  ;;  %v9578_v7 = vor.u32 %v10566_v17, %v9577_v4 }
 0x6b7   :  { %2108 = vmatpush.bf16.msra.mxu2 %v2059_v21  ;;  %v9574_v21 = vor.u32 %v10563_v18, %v9571_v55 }
 0x6ba   :  { %v2026_v10 = vpop.permute.xlu1 %2025 }
 0x6bb   :  { %v2052_v28 = vpop.permute.xlu0 %2051  ;;  %v2058_v58 = vsel %vm2057_vm10, %v12873_v36, %v2026_v10 }
 0x6bc   :  { %2109 = vmatpush.bf16.msra.mxu2 %v2058_v58  ;;  %v2064_v29 = vsel %vm2057_vm10, %v2050_v14, %v2052_v28  ;;  %v12893_v14 = vpop.permute.xlu2 %1926  ;;  %v10565_v28 = vld [vmem:[#allocation13 + $0x74] sm:$0xf]  ;;  %v9579_v58 = vld [vmem:[#allocation13 + $0x78] sm:$0xf0] }
 0x6bd   :  { %2156 = vmatpush.bf16.msra.mxu0 %v2064_v29  ;;  %v9582_v29 = vor.u32 %v10565_v28, %v9579_v58 }
 0x6bf   :  { %2110 = vmatmul.bf16.vlgmr.msra.gmra.mxu2 %v9522_v27 }
 0x6c2   :  { %v2046_v45 = vpop.permute.xlu1 %2045 }
 0x6c3   :  { %v2063_v49 = vsel %vm2057_vm10, %v2046_v45, %v2048_v63  ;;  %v2042_v32 = vpop.permute.xlu0 %2041 }
 0x6c4   :  { %2157 = vmatpush.bf16.msra.mxu0 %v2063_v49  ;;  %v12897_v1 = vpop.permute.xlu2 %1921 }
 0x6ca   :  { %v2044_v47 = vpop.permute.xlu1 %2043 }
 0x6cb   :  { %v2062_v9 = vsel %vm2057_vm10, %v2042_v32, %v2044_v47  ;;  %v12906_v27 = vpop.permute.xlu0 %1931 }
 0x6cc   :  { %2158 = vmatpush.bf16.msra.mxu0 %v2062_v9  ;;  %v12902_v59 = vpop.permute.xlu2 %1896 }
 0x6cf   :  { %2115 = vmatmul.bf16.gmra.mxu2 %v9530_v16  ;;  %9583 = vmatmul.msk.bf16.vlgmr.msra.gmra.mxu0 %vm1007_vm6, %v9526_v25 }
 0x6d2   :  { %v12895_v0 = vpop.permute.xlu1 %1916 }
 0x6d3   :  { %v12911_v30 = vpop.permute.xlu0 %1906 }
 0x6d4   :  { %v12908_v63 = vpop.permute.xlu2 %1891 }
 0x6da   :  { %v12899_v24 = vpop.permute.xlu1 %1911 }
 0x6db   :  { %v12913_v9 = vpop.permute.xlu0 %1901 }
 0x6dc   :  { %v1867_v31 = vpop.permute.xlu2 %1866 }
 0x6df   :  { %2120 = vmatmul.bf16.gmra.mxu2 %v9538_v43  ;;  %9584 = vmatmul.msk.bf16.gmra.mxu0 %vm1007_vm6, %v9534_v22 }
 0x6e2   :  { %v12904_v10 = vpop.permute.xlu1 %1886 }
 0x6e3   :  { %v1877_v51 = vpop.permute.xlu0 %1876 }
 0x6e4   :  { %v1862_v25 = vpop.permute.xlu2 %1861 }
 0x6ea   :  { %v1882_v45 = vpop.permute.xlu1 %1881 }
 0x6eb   :  { %v1872_v3 = vpop.permute.xlu0 %1871 }
 0x6ef   :  { %2125 = vmatmul.bf16.gmra.mxu2 %v9546_v38  ;;  %9585 = vmatmul.msk.bf16.gmra.mxu0 %vm1007_vm6, %v9542_v48 }
 0x6f2   :  { %v1857_v19 = vpop.permute.xlu1 %1856 }
 0x6ff   :  { %2130 = vmatmul.bf16.gmra.mxu2 %v9554_v53  ;;  %9586 = vmatmul.msk.bf16.gmra.mxu0 %vm1007_vm6, %v9550_v61 }
 0x70f   :  { %2135 = vmatmul.bf16.gmra.mxu2 %v9562_v6  ;;  %9587 = vmatmul.msk.bf16.gmra.mxu0 %vm1007_vm6, %v9558_v23 }
 0x71f   :  { %2140 = vmatmul.bf16.gmra.mxu2 %v9570_v12  ;;  %9588 = vmatmul.msk.bf16.gmra.mxu0 %vm1007_vm6, %v9566_v13 }
 0x72f   :  { %2145 = vmatmul.bf16.gmra.mxu2 %v9578_v7  ;;  %9589 = vmatmul.msk.bf16.gmra.mxu0 %vm1007_vm6, %v9574_v21 }
 0x73f   :  { %9590 = vmatmul.msk.bf16.gmra.mxu0 %vm1007_vm6, %v9582_v29 }
 0x742   :  { %v2111_v49 = vpop.f32.mrf.mxu2 }
 0x743   :  { %v2112_v32 = vadd.f32 %v2111_v49, %v1857_v19 }
 0x74a   :  { %v2113_v62 = vpop.f32.mrf.mxu2 }
 0x74b   :  { %v2114_v40 = vadd.f32 %v2113_v62, %v1862_v25 }
 0x74c   :  { %v2160_v47 = vpop.f32.mrf.mxu0 }
 0x74d   :  { %v2161_v16 = vadd.f32 %v2160_v47, %v2112_v32 }
 0x74f   :  { %v2200_v33 = vmul.f32 0.1, %v2161_v16 }
 0x751   :  { %v2216_v22 = vmax.f32 %v2161_v16, %v2200_v33 }
 0x752   :  { %v2116_v34 = vpop.f32.mrf.mxu2 }
 0x753   :  { %v12916_v46 = vmul.f32 %v2216_v22, %v12824_v8  ;;  %v2248_v57 = vmul.f32 %v2216_v22, %v12775_v15  ;;  %v2117_v50 = vadd.f32 %v2116_v34, %v1867_v31 }
 0x754   :  { %v2162_v41 = vpop.f32.mrf.mxu0 }
 0x755   :  { %v2163_v43 = vadd.f32 %v2162_v41, %v2114_v40 }
 0x757   :  { %v2201_v44 = vmul.f32 0.1, %v2163_v43 }
 0x759   :  { %v2217_v54 = vmax.f32 %v2163_v43, %v2201_v44 }
 0x75a   :  { %v2118_v38 = vpop.f32.mrf.mxu2 }
 0x75b   :  { %v12919_v48 = vmul.f32 %v2217_v54, %v12824_v8  ;;  %v11001_v56 = vpack.i.bf16 %v2217_v54, %v2216_v22  ;;  %v2249_v60 = vmul.f32 %v2217_v54, %v12775_v15  ;;  %v2119_v23 = vadd.f32 %v2118_v38, %v1872_v3 }
 0x75c   :  { %v2165_v53 = vpop.f32.mrf.mxu0 }
 0x75d   :  { %11002 = vrot.lane.b32.xlu2 %v11001_v56, %s12128_s14  ;;  %v11006_v61 = vpack.i.bf16 %v2249_v60, %v2248_v57  ;;  %v2456_v2 = vpack.c.bf16 %v12919_v48, %v12916_v46  ;;  %v2166_v52 = vadd.f32 %v2165_v53, %v2117_v50  ;;  %v1490_v46 = vld [vmem:[#allocation21 + $0x50] sm:$0xff]  ;;  %v1491_v48 = vld [vmem:[#allocation21 + $0x58] sm:$0xff] }
 0x75f   :  { %11007 = vrot.lane.b32.xlu0 %v11006_v61, %s12130_s30  ;;  %v2202_v5 = vmul.f32 0.1, %v2166_v52 }
 0x761   :  { %v2218_v11 = vmax.f32 %v2166_v52, %v2202_v5 }
 0x762   :  { %v2121_v6 = vpop.f32.mrf.mxu2 }
 0x763   :  { %v12928_v13 = vmul.f32 %v2218_v11, %v12824_v8  ;;  %v2250_v55 = vmul.f32 %v2218_v11, %v12775_v15  ;;  %v2122_v21 = vadd.f32 %v2121_v6, %v1877_v51 }
 0x764   :  { %v2167_v37 = vpop.f32.mrf.mxu0 }
 0x765   :  { %v2168_v26 = vadd.f32 %v2167_v37, %v2119_v23 }
 0x767   :  { %v2203_v35 = vmul.f32 0.1, %v2168_v26 }
 0x769   :  { %v2219_v12 = vmax.f32 %v2168_v26, %v2203_v35 }
 0x76a   :  { %v2123_v4 = vpop.f32.mrf.mxu2 }
 0x76b   :  { %v12931_v17 = vmul.f32 %v2219_v12, %v12824_v8  ;;  %v11011_v18 = vpack.i.bf16 %v2219_v12, %v2218_v11  ;;  %v2251_v7 = vmul.f32 %v2219_v12, %v12775_v15  ;;  %v2124_v19 = vadd.f32 %v2123_v4, %v1882_v45 }
 0x76c   :  { %v2170_v28 = vpop.f32.mrf.mxu0 }
 0x76d   :  { %11012 = vrot.lane.b32.xlu0 %v11011_v18, %s12128_s14  ;;  %v11016_v58 = vpack.i.bf16 %v2251_v7, %v2250_v55  ;;  %v2457_v29 = vpack.c.bf16 %v12931_v17, %v12928_v13  ;;  %v2171_v49 = vadd.f32 %v2170_v28, %v2122_v21  ;;  %v2503_v13 = vld [vmem:[#allocation18 + $0x78] sm:$0xff]  ;;  %v1494_v17 = vld [vmem:[#allocation21 + $0x70] sm:$0xff] }
 0x76f   :  { %11017 = vrot.lane.b32.xlu1 %v11016_v58, %s12130_s30  ;;  %v2204_v31 = vmul.f32 0.1, %v2171_v49 }
 0x771   :  { %v2220_v16 = vmax.f32 %v2171_v49, %v2204_v31 }
 0x772   :  { %v2126_v62 = vpop.f32.mrf.mxu2 }
 0x773   :  { %v12940_v34 = vmul.f32 %v2220_v16, %v12824_v8  ;;  %v2252_v22 = vmul.f32 %v2220_v16, %v12775_v15  ;;  %v2127_v45 = vadd.f32 %v2126_v62, %v12904_v10 }
 0x774   :  { %v2172_v32 = vpop.f32.mrf.mxu0 }
 0x775   :  { %v2173_v47 = vadd.f32 %v2172_v32, %v2124_v19 }
 0x777   :  { %v2205_v25 = vmul.f32 0.1, %v2173_v47 }
 0x779   :  { %v2221_v33 = vmax.f32 %v2173_v47, %v2205_v25 }
 0x77a   :  { %v2128_v40 = vpop.f32.mrf.mxu2 }
 0x77b   :  { %v12943_v41 = vmul.f32 %v2221_v33, %v12824_v8  ;;  %v11021_v43 = vpack.i.bf16 %v2221_v33, %v2220_v16  ;;  %v2253_v44 = vmul.f32 %v2221_v33, %v12775_v15  ;;  %v2129_v60 = vadd.f32 %v2128_v40, %v12908_v63 }
 0x77c   :  { %v2175_v51 = vpop.f32.mrf.mxu0 }
 0x77d   :  { %11022 = vrot.lane.b32.xlu1 %v11021_v43, %s12128_s14  ;;  %v11026_v54 = vpack.i.bf16 %v2253_v44, %v2252_v22  ;;  %v2458_v38 = vpack.c.bf16 %v12943_v41, %v12940_v34  ;;  %v2176_v56 = vadd.f32 %v2175_v51, %v2127_v45 }
 0x77f   :  { %11027 = vrot.lane.b32.xlu2 %v11026_v54, %s12130_s30  ;;  %v2206_v50 = vmul.f32 0.1, %v2176_v56 }
 0x781   :  { %v2222_v52 = vmax.f32 %v2176_v56, %v2206_v50 }
 0x782   :  { %v2131_v57 = vpop.f32.mrf.mxu2 }
 0x783   :  { %v2254_v23 = vmul.f32 %v2222_v52, %v12775_v15  ;;  %v2132_v11 = vadd.f32 %v2131_v57, %v12902_v59  ;;  %v2238_v4 = vmul.f32 %v2222_v52, %v12824_v8 }
 0x784   :  { %v2177_v53 = vpop.f32.mrf.mxu0 }
 0x785   :  { %v2178_v61 = vadd.f32 %v2177_v53, %v2129_v60 }
 0x787   :  { %v2207_v3 = vmul.f32 0.1, %v2178_v61 }
 0x789   :  { %v2223_v5 = vmax.f32 %v2178_v61, %v2207_v3 }
 0x78a   :  { %v2133_v6 = vpop.f32.mrf.mxu2 }
 0x78b   :  { %v11031_v10 = vpack.i.bf16 %v2223_v5, %v2222_v52  ;;  %v2255_v37 = vmul.f32 %v2223_v5, %v12775_v15  ;;  %v2239_v63 = vmul.f32 %v2223_v5, %v12824_v8  ;;  %v2134_v55 = vadd.f32 %v2133_v6, %v12913_v9 }
 0x78c   :  { %v2180_v26 = vpop.f32.mrf.mxu0 }
 0x78d   :  { %11032 = vrot.lane.b32.xlu2 %v11031_v10, %s12128_s14  ;;  %v11036_v35 = vpack.i.bf16 %v2255_v37, %v2254_v23  ;;  %v2181_v12 = vadd.f32 %v2180_v26, %v2132_v11  ;;  %v2459_v21 = vpack.c.bf16 %v2239_v63, %v2238_v4 }
 0x78f   :  { %11037 = vrot.lane.b32.xlu0 %v11036_v35, %s12130_s30  ;;  %v2208_v7 = vmul.f32 0.1, %v2181_v12 }
 0x791   :  { %v2224_v59 = vmax.f32 %v2181_v12, %v2208_v7  ;;  %v10543_v12 = vld [vmem:[#allocation19] sm:$0xff] }
 0x792   :  { %v2136_v18 = vpop.f32.mrf.mxu2  ;;  %9509 = vmatmul.msk.bf16.vlgmr.msra.gmra.mxu3 %vm1007_vm6, %v10543_v12  ;;  %v10548_v12 = vld [vmem:[#allocation19 + $0x28] sm:$0xff] }
 0x793   :  { %v2256_v32 = vmul.f32 %v2224_v59, %v12775_v15  ;;  %v2137_v25 = vadd.f32 %v2136_v18, %v12911_v30  ;;  %v2240_v51 = vmul.f32 %v2224_v59, %v12824_v8 }
 0x794   :  { %v2182_v28 = vpop.f32.mrf.mxu0 }
 0x795   :  { %v2183_v58 = vadd.f32 %v2182_v28, %v2134_v55  ;;  %2750 = vrot.lane.b32.xlu2 %v2459_v21, %s12129_s2 }
 0x797   :  { %v2209_v49 = vmul.f32 0.1, %v2183_v58 }
 0x799   :  { %v2225_v31 = vmax.f32 %v2183_v58, %v2209_v49 }
 0x79a   :  { %v2138_v62 = vpop.f32.mrf.mxu2 }
 0x79b   :  { %v11041_v19 = vpack.i.bf16 %v2225_v31, %v2224_v59  ;;  %v2257_v47 = vmul.f32 %v2225_v31, %v12775_v15  ;;  %v2241_v40 = vmul.f32 %v2225_v31, %v12824_v8  ;;  %v2139_v22 = vadd.f32 %v2138_v62, %v12899_v24 }
 0x79c   :  { %v2185_v16 = vpop.f32.mrf.mxu0 }
 0x79d   :  { %11042 = vrot.lane.b32.xlu0 %v11041_v19, %s12128_s14  ;;  %v11046_v9 = vpack.i.bf16 %v2257_v47, %v2256_v32  ;;  %v2186_v33 = vadd.f32 %v2185_v16, %v2137_v25  ;;  %v2460_v56 = vpack.c.bf16 %v2241_v40, %v2240_v51 }
 0x79f   :  { %11047 = vrot.lane.b32.xlu1 %v11046_v9, %s12130_s30  ;;  %v2210_v44 = vmul.f32 0.1, %v2186_v33  ;;  %v10544_v9 = vld [vmem:[#allocation19 + $0x8] sm:$0xff] }
 0x7a1   :  { %v2226_v57 = vmax.f32 %v2186_v33, %v2210_v44 }
 0x7a2   :  { %v2141_v43 = vpop.f32.mrf.mxu2  ;;  %9510 = vmatmul.msk.bf16.gmra.mxu3 %vm1007_vm6, %v10544_v9 }
 0x7a3   :  { %v2258_v50 = vmul.f32 %v2226_v57, %v12775_v15  ;;  %v2242_v61 = vmul.f32 %v2226_v57, %v12824_v8  ;;  %v2142_v5 = vadd.f32 %v2141_v43, %v12895_v0 }
 0x7a4   :  { %v2187_v45 = vpop.f32.mrf.mxu0 }
 0x7a5   :  { %v2188_v54 = vadd.f32 %v2187_v45, %v2139_v22 }
 0x7a7   :  { %v2211_v60 = vmul.f32 0.1, %v2188_v54  ;;  %2752 = vrot.lane.b32.xlu1 %v2460_v56, %s12129_s2 }
 0x7a9   :  { %v2227_v30 = vmax.f32 %v2188_v54, %v2211_v60  ;;  %v10545_v54 = vld [vmem:[#allocation19 + $0x10] sm:$0xff] }
 0x7aa   :  { %v2143_v24 = vpop.f32.mrf.mxu2 }
 0x7ab   :  { %v2259_v53 = vmul.f32 %v2227_v30, %v12775_v15  ;;  %v2243_v52 = vmul.f32 %v2227_v30, %v12824_v8  ;;  %v11051_v23 = vpack.i.bf16 %v2227_v30, %v2226_v57  ;;  %v2144_v26 = vadd.f32 %v2143_v24, %v12897_v1 }
 0x7ac   :  { %v2190_v3 = vpop.f32.mrf.mxu0 }
 0x7ad   :  { %v11056_v6 = vpack.i.bf16 %v2259_v53, %v2258_v50  ;;  %v2461_v10 = vpack.c.bf16 %v2243_v52, %v2242_v61  ;;  %v2191_v37 = vadd.f32 %v2190_v3, %v2142_v5 }
 0x7af   :  { %11057 = vrot.lane.b32.xlu2 %v11056_v6, %s12130_s30  ;;  %2754 = vrot.lane.b32.xlu0 %v2461_v10, %s12129_s2  ;;  %v2212_v11 = vmul.f32 0.1, %v2191_v37 }
 0x7b0   :  { %11052 = vrot.lane.b32.xlu1 %v11051_v23, %s12128_s14 }
 0x7b1   :  { %v2228_v0 = vmax.f32 %v2191_v37, %v2212_v11 }
 0x7b2   :  { %v2146_v4 = vpop.f32.mrf.mxu2  ;;  %9511 = vmatmul.msk.bf16.gmra.mxu3 %vm1007_vm6, %v10545_v54  ;;  %v10550_v54 = vld [vmem:[#allocation19 + $0x38] sm:$0xff] }
 0x7b3   :  { %v2260_v21 = vmul.f32 %v2228_v0, %v12775_v15  ;;  %v2147_v59 = vadd.f32 %v2146_v4, %v12893_v14  ;;  %v2244_v19 = vmul.f32 %v2228_v0, %v12824_v8 }
 0x7b4   :  { %v2192_v35 = vpop.f32.mrf.mxu0 }
 0x7b5   :  { %v2193_v63 = vadd.f32 %v2192_v35, %v2144_v26 }
 0x7b7   :  { %v2213_v18 = vmul.f32 0.1, %v2193_v63  ;;  %v12998_v60 = vpop.permute.xlu2 %11002 }
 0x7b9   :  { %v2229_v55 = vmax.f32 %v2193_v63, %v2213_v18 }
 0x7ba   :  { %v2148_v62 = vpop.f32.mrf.mxu2 }
 0x7bb   :  { %v11061_v7 = vpack.i.bf16 %v2229_v55, %v2228_v0  ;;  %v2261_v28 = vmul.f32 %v2229_v55, %v12775_v15  ;;  %v2245_v31 = vmul.f32 %v2229_v55, %v12824_v8  ;;  %v2149_v32 = vadd.f32 %v2148_v62, %v12906_v27  ;;  %v10549_v62 = vld [vmem:[#allocation19 + $0x30] sm:$0xff] }
 0x7bc   :  { %v2195_v58 = vpop.f32.mrf.mxu0 }
 0x7bd   :  { %11062 = vrot.lane.b32.xlu2 %v11061_v7, %s12128_s14  ;;  %v11066_v1 = vpack.i.bf16 %v2261_v28, %v2260_v21  ;;  %v2196_v49 = vadd.f32 %v2195_v58, %v2147_v59  ;;  %v2462_v16 = vpack.c.bf16 %v2245_v31, %v2244_v19 }
 0x7bf   :  { %11067 = vrot.lane.b32.xlu0 %v11066_v1, %s12130_s30  ;;  %v2214_v47 = vmul.f32 0.1, %v2196_v49 }
 0x7c1   :  { %v2230_v14 = vmax.f32 %v2196_v49, %v2214_v47 }
 0x7c3   :  { %v2262_v44 = vmul.f32 %v2230_v14, %v12775_v15  ;;  %v2246_v56 = vmul.f32 %v2230_v14, %v12824_v8 }
 0x7c4   :  { %v2197_v25 = vpop.f32.mrf.mxu0 }
 0x7c5   :  { %v2198_v33 = vadd.f32 %v2197_v25, %v2149_v32  ;;  %2756 = vrot.lane.b32.xlu2 %v2462_v16, %s12129_s2 }
 0x7c7   :  { %v2215_v40 = vmul.f32 0.1, %v2198_v33 }
 0x7c9   :  { %v2231_v43 = vmax.f32 %v2198_v33, %v2215_v40 }
 0x7cb   :  { %v11071_v22 = vpack.i.bf16 %v2231_v43, %v2230_v14  ;;  %v2263_v51 = vmul.f32 %v2231_v43, %v12775_v15  ;;  %v2247_v45 = vmul.f32 %v2231_v43, %v12824_v8  ;;  %v10546_v15 = vld [vmem:[#allocation19 + $0x18] sm:$0xff]  ;;  %v10547_v8 = vld [vmem:[#allocation19 + $0x20] sm:$0xff] }
 0x7cc   :  { %9512 = vmatmul.msk.bf16.gmra.mxu3 %vm1007_vm6, %v10546_v15 }
 0x7cd   :  { %11072 = vrot.lane.b32.xlu0 %v11071_v22, %s12128_s14  ;;  %v11076_v27 = vpack.i.bf16 %v2263_v51, %v2262_v44  ;;  %v2463_v57 = vpack.c.bf16 %v2247_v45, %v2246_v56 }
 0x7cf   :  { %11077 = vrot.lane.b32.xlu1 %v11076_v27, %s12130_s30 }
 0x7d1   :  { %v13005_v24 = vpop.permute.xlu0 %11007 }
 0x7d7   :  { %2758 = vrot.lane.b32.xlu1 %v2463_v57, %s12129_s2 }
 0x7d9   :  { %v13001_v30 = vpop.permute.xlu2 %11027 }
 0x7dc   :  { %9513 = vmatmul.msk.bf16.gmra.mxu3 %vm1007_vm6, %v10547_v8 }
 0x7df   :  { %v13008_v3 = vpop.permute.xlu0 %11012 }
 0x7e1   :  { %v13010_v5 = vpop.permute.xlu1 %11017 }
 0x7e7   :  { %v11033_v50 = vpop.permute.xlu2 %11032 }
 0x7e8   :  { %v11035_v53 = vunpack.i.h.bf16 %v11033_v50  ;;  %v11034_v61 = vunpack.i.l.bf16 %v11033_v50 }
 0x7ea   :  { %v2467_v52 = vpack.c.bf16 %v11035_v53, %v11034_v61 }
 0x7ec   :  { %2766 = vrot.lane.b32.xlu2 %v2467_v52, %s12129_s2  ;;  %9514 = vmatmul.msk.bf16.gmra.mxu3 %vm1007_vm6, %v10548_v12 }
 0x7ef   :  { %v13019_v63 = vpop.permute.xlu1 %11022  ;;  %v13021_v4 = vpop.permute.xlu2 %2750 }
 0x7fc   :  { %9515 = vmatmul.msk.bf16.gmra.mxu3 %vm1007_vm6, %v10549_v62 }
 0x801   :  { %v11038_v6 = vpop.permute.xlu0 %11037 }
 0x802   :  { %v11040_v10 = vunpack.i.h.bf16 %v11038_v6  ;;  %v11039_v23 = vunpack.i.l.bf16 %v11038_v6 }
 0x804   :  { %v2478_v37 = vpack.c.bf16 %v11040_v10, %v11039_v23  ;;  %v2382_v26 = vsel %vm1780_vm9, %v11039_v23, %v12835_v20  ;;  %v2383_v11 = vsel %vm1780_vm9, %v11040_v10, %v12835_v20 }
 0x805   :  { %v2479_v35 = vpack.c.bf16 %v2383_v11, %v2382_v26 }
 0x806   :  { %2788 = vrot.lane.b32.xlu0 %v2478_v37, %s12129_s2 }
 0x807   :  { %2790 = vrot.lane.b32.xlu1 %v2479_v35, %s12129_s2 }
 0x809   :  { %v11058_v21 = vpop.permute.xlu2 %11057 }
 0x80a   :  { %v11060_v19 = vunpack.i.h.bf16 %v11058_v21  ;;  %v11059_v32 = vunpack.i.l.bf16 %v11058_v21  ;;  %v11029_v21 = vunpack.i.l.bf16 %v13001_v30 }
 0x80c   :  { %v2387_v16 = vsel %vm1780_vm9, %v11060_v19, %v12835_v20  ;;  %v2386_v25 = vsel %vm1780_vm9, %v11059_v32, %v12835_v20  ;;  %v2482_v33 = vpack.c.bf16 %v11060_v19, %v11059_v32  ;;  %9516 = vmatmul.msk.bf16.gmra.mxu3 %vm1007_vm6, %v10550_v54  ;;  %v11009_v54 = vunpack.i.l.bf16 %v13005_v24 }
 0x80d   :  { %v2483_v14 = vpack.c.bf16 %v2387_v16, %v2386_v25  ;;  %v11015_v16 = vunpack.i.h.bf16 %v13008_v3  ;;  %v11014_v25 = vunpack.i.l.bf16 %v13008_v3 }
 0x80f   :  { %v11043_v0 = vpop.permute.xlu0 %11042 }
 0x810   :  { %v11045_v18 = vunpack.i.h.bf16 %v11043_v0  ;;  %v11044_v55 = vunpack.i.l.bf16 %v11043_v0 }
 0x811   :  { %v11048_v7 = vpop.permute.xlu1 %11047 }
 0x812   :  { %v11050_v28 = vunpack.i.h.bf16 %v11048_v7  ;;  %v11049_v58 = vunpack.i.l.bf16 %v11048_v7  ;;  %v2468_v59 = vpack.c.bf16 %v11045_v18, %v11044_v55  ;;  %v11030_v7 = vunpack.i.h.bf16 %v13001_v30 }
 0x814   :  { %2768 = vrot.lane.b32.xlu1 %v2468_v59, %s12129_s2  ;;  %v2480_v1 = vpack.c.bf16 %v11050_v28, %v11049_v58  ;;  %v2384_v49 = vsel %vm1780_vm9, %v11049_v58, %v12835_v20  ;;  %v2385_v31 = vsel %vm1780_vm9, %v11050_v28, %v12835_v20  ;;  %v2381_v58 = vsel %vm1780_vm9, %v11030_v7, %v12835_v20 }
 0x815   :  { %v2481_v47 = vpack.c.bf16 %v2385_v31, %v2384_v49  ;;  %v2380_v59 = vsel %vm1780_vm9, %v11029_v21, %v12835_v20  ;;  %v11024_v49 = vunpack.i.l.bf16 %v13019_v63  ;;  %v2476_v62 = vpack.c.bf16 %v11030_v7, %v11029_v21  ;;  %v2495_v7 = vld [vmem:[#allocation18 + $0x38] sm:$0xff] }
 0x816   :  { %2792 = vrot.lane.b32.xlu2 %v2480_v1, %s12129_s2  ;;  %v11025_v1 = vunpack.i.h.bf16 %v13019_v63  ;;  %v2477_v32 = vpack.c.bf16 %v2381_v58, %v2380_v59  ;;  %v2493_v58 = vld [vmem:[#allocation18 + $0x28] sm:$0xff]  ;;  %v1484_v59 = vld [vmem:[#allocation21 + $0x20] sm:$0xff] }
 0x817   :  { %2794 = vrot.lane.b32.xlu0 %v2481_v47, %s12129_s2  ;;  %v11063_v40 = vpop.permute.xlu2 %11062 }
 0x818   :  { %v11065_v43 = vunpack.i.h.bf16 %v11063_v40  ;;  %v11064_v22 = vunpack.i.l.bf16 %v11063_v40  ;;  %v2466_v47 = vpack.c.bf16 %v11025_v1, %v11024_v49  ;;  %v2465_v40 = vpack.c.bf16 %v11015_v16, %v11014_v25  ;;  %v2492_v1 = vld [vmem:[#allocation18 + $0x20] sm:$0xff]  ;;  %v1483_v25 = vld [vmem:[#allocation21 + $0x18] sm:$0xff] }
 0x819   :  { %v13035_v9 = vpop.permute.xlu1 %2752 }
 0x81a   :  { %v2470_v45 = vpack.c.bf16 %v11065_v43, %v11064_v22  ;;  %v2812_v3 = vsel %vm2057_vm10, %v12873_v36, %v13035_v9  ;;  %v2811_v9 = vsel %vm2057_vm10, %v12873_v36, %v13021_v4 }
 0x81c   :  { %2796 = vrot.lane.b32.xlu1 %v2482_v33, %s12129_s2  ;;  %v11020_v33 = vunpack.i.h.bf16 %v13010_v5 }
 0x81e   :  { %2798 = vrot.lane.b32.xlu2 %v2483_v14, %s12129_s2  ;;  %v11019_v14 = vunpack.i.l.bf16 %v13010_v5  ;;  %v11005_v5 = vunpack.i.h.bf16 %v12998_v60 }
 0x81f   :  { %v2757_v19 = vpop.permute.xlu2 %2756 }
 0x820   :  { %v2814_v63 = vsel %vm2057_vm10, %v12873_v36, %v2757_v19  ;;  %v2474_v22 = vpack.c.bf16 %v11020_v33, %v11019_v14  ;;  %v2491_v19 = vld [vmem:[#allocation18 + $0x18] sm:$0xff] }
 0x821   :  { %v2755_v57 = vpop.permute.xlu0 %2754 }
 0x822   :  { %v11053_v44 = vpop.permute.xlu1 %11052  ;;  %v2813_v43 = vsel %vm2057_vm10, %v12873_v36, %v2755_v57  ;;  %v1495_v57 = vld [vmem:[#allocation21 + $0x78] sm:$0xff] }
 0x823   :  { %v11055_v51 = vunpack.i.h.bf16 %v11053_v44  ;;  %v11054_v27 = vunpack.i.l.bf16 %v11053_v44  ;;  %v11004_v44 = vunpack.i.l.bf16 %v12998_v60  ;;  %v2376_v60 = vsel %vm1780_vm9, %v11009_v54, %v12835_v20 }
 0x825   :  { %v2469_v56 = vpack.c.bf16 %v11055_v51, %v11054_v27  ;;  %v2379_v51 = vsel %vm1780_vm9, %v11020_v33, %v12835_v20  ;;  %v2378_v27 = vsel %vm1780_vm9, %v11019_v14, %v12835_v20  ;;  %v2464_v34 = vpack.c.bf16 %v11005_v5, %v11004_v44  ;;  %v2488_v33 = vld [vmem:[#allocation18] sm:$0xff]  ;;  %v1482_v14 = vld [vmem:[#allocation21 + $0x10] sm:$0xff]  ;;  %v1481_v5 = vld [vmem:[#allocation21 + $0x8] sm:$0xff] }
 0x826   :  { %2772 = vrot.lane.b32.xlu2 %v2470_v45, %s12129_s2  ;;  %v11010_v45 = vunpack.i.h.bf16 %v13005_v24  ;;  %v2475_v41 = vpack.c.bf16 %v2379_v51, %v2378_v27  ;;  %v13124_v51 = vpop.f32.mrf.mxu3  ;;  %v2489_v27 = vld [vmem:[#allocation18 + $0x8] sm:$0xff] }
 0x827   :  { %2770 = vrot.lane.b32.xlu0 %v2469_v56, %s12129_s2  ;;  %v2501_v56 = vld [vmem:[#allocation18 + $0x68] sm:$0xff] }
 0x828   :  { %v2472_v24 = vpack.c.bf16 %v11010_v45, %v11009_v54 }
 0x831   :  { %v11068_v15 = vpop.permute.xlu0 %11067 }
 0x832   :  { %v11070_v50 = vunpack.i.h.bf16 %v11068_v15  ;;  %v11069_v53 = vunpack.i.l.bf16 %v11068_v15  ;;  %v1493_v15 = vld [vmem:[#allocation21 + $0x68] sm:$0xff] }
 0x834   :  { %v2389_v61 = vsel %vm1780_vm9, %v11070_v50, %v12835_v20  ;;  %v2388_v52 = vsel %vm1780_vm9, %v11069_v53, %v12835_v20  ;;  %v2484_v8 = vpack.c.bf16 %v11070_v50, %v11069_v53  ;;  %v2498_v50 = vld [vmem:[#allocation18 + $0x50] sm:$0xff]  ;;  %v1492_v53 = vld [vmem:[#allocation21 + $0x60] sm:$0xff] }
 0x835   :  { %v2485_v6 = vpack.c.bf16 %v2389_v61, %v2388_v52  ;;  %v2499_v61 = vld [vmem:[#allocation18 + $0x58] sm:$0xff]  ;;  %v2497_v52 = vld [vmem:[#allocation18 + $0x48] sm:$0xff] }
 0x836   :  { %2800 = vrot.lane.b32.xlu0 %v2484_v8, %s12129_s2  ;;  %v9688_v8 = vsel %vm3067_vm11, 1.0, %v16286_v42 }
 0x837   :  { %2802 = vrot.lane.b32.xlu1 %v2485_v6, %s12129_s2 }
 0x83f   :  { %v11073_v10 = vpop.permute.xlu0 %11072 }
 0x840   :  { %v11075_v23 = vunpack.i.h.bf16 %v11073_v10  ;;  %v11074_v37 = vunpack.i.l.bf16 %v11073_v10  ;;  %v2496_v10 = vld [vmem:[#allocation18 + $0x40] sm:$0xff] }
 0x841   :  { %v11078_v26 = vpop.permute.xlu1 %11077 }
 0x842   :  { %v2471_v11 = vpack.c.bf16 %v11075_v23, %v11074_v37  ;;  %v11080_v35 = vunpack.i.h.bf16 %v11078_v26  ;;  %v11079_v12 = vunpack.i.l.bf16 %v11078_v26  ;;  %v1489_v23 = vld [vmem:[#allocation21 + $0x48] sm:$0xff]  ;;  %v2494_v37 = vld [vmem:[#allocation18 + $0x30] sm:$0xff] }
 0x844   :  { %v2391_v0 = vsel %vm1780_vm9, %v11080_v35, %v12835_v20  ;;  %v2390_v18 = vsel %vm1780_vm9, %v11079_v12, %v12835_v20  ;;  %v2486_v55 = vpack.c.bf16 %v11080_v35, %v11079_v12  ;;  %2774 = vrot.lane.b32.xlu1 %v2471_v11, %s12129_s2  ;;  %v1488_v11 = vld [vmem:[#allocation21 + $0x40] sm:$0xff] }
 0x845   :  { %v2487_v28 = vpack.c.bf16 %v2391_v0, %v2390_v18  ;;  %v1486_v0 = vld [vmem:[#allocation21 + $0x30] sm:$0xff]  ;;  %v1487_v18 = vld [vmem:[#allocation21 + $0x38] sm:$0xff] }
 0x846   :  { %2804 = vrot.lane.b32.xlu2 %v2486_v55, %s12129_s2 }
 0x847   :  { %2806 = vrot.lane.b32.xlu0 %v2487_v28, %s12129_s2 }
 0x849   :  { %v2759_v31 = vpop.permute.xlu1 %2758 }
 0x84a   :  { %v2815_v30 = vsel %vm2057_vm10, %v12873_v36, %v2759_v31 }
 0x84b   :  { %2848 = vmatpush.bf16.msra.mxu1 %v2815_v30  ;;  %v2490_v30 = vld [vmem:[#allocation18 + $0x10] sm:$0xff] }
 0x84c   :  { %2784 = vrot.lane.b32.xlu1 %v2476_v62, %s12129_s2 }
 0x84e   :  { %2786 = vrot.lane.b32.xlu2 %v2477_v32, %s12129_s2  ;;  %v1485_v32 = vld [vmem:[#allocation21 + $0x28] sm:$0xff] }
 0x84f   :  { %2849 = vmatpush.bf16.msra.mxu1 %v2814_v63  ;;  %2764 = vrot.lane.b32.xlu0 %v2466_v47, %s12129_s2 }
 0x853   :  { %2850 = vmatpush.bf16.msra.mxu1 %v2813_v43 }
 0x854   :  { %2762 = vrot.lane.b32.xlu1 %v2465_v40, %s12129_s2 }
 0x856   :  { %2780 = vrot.lane.b32.xlu2 %v2474_v22, %s12129_s2  ;;  %v1480_v22 = vld [vmem:[#allocation21] sm:$0xff] }
 0x857   :  { %2851 = vmatpush.bf16.msra.mxu1 %v2812_v3  ;;  %2748 = vrot.lane.b32.xlu0 %v2458_v38, %s12129_s2  ;;  %v2377_v38 = vsel %vm1780_vm9, %v11010_v45, %v12835_v20  ;;  %v2500_v20 = vld [vmem:[#allocation18 + $0x60] sm:$0xff] }
 0x858   :  { %v2473_v4 = vpack.c.bf16 %v2377_v38, %v2376_v60 }
 0x85b   :  { %2852 = vmatpush.bf16.msra.mxu1 %v2811_v9 }
 0x85c   :  { %2746 = vrot.lane.b32.xlu1 %v2457_v29, %s12129_s2  ;;  %v2502_v29 = vld [vmem:[#allocation18 + $0x70] sm:$0xff] }
 0x85e   :  { %2760 = vrot.lane.b32.xlu2 %v2464_v34, %s12129_s2 }
 0x85f   :  { %2782 = vrot.lane.b32.xlu0 %v2475_v41, %s12129_s2 }
 0x864   :  { %2778 = vrot.lane.b32.xlu1 %v2473_v4, %s12129_s2  ;;  %v13130_v4 = vpop.f32.mrf.mxu3 }
 0x866   :  { %2744 = vrot.lane.b32.xlu2 %v2456_v2, %s12129_s2  ;;  %v13112_v2 = vpop.permute.xlu2 %2766 }
 0x867   :  { %2776 = vrot.lane.b32.xlu0 %v2472_v24, %s12129_s2 }
 0x86c   :  { %2581 = vperm.xlu1 %10879, %v2503_v13  }
 0x86e   :  { %1568 = vperm.xlu2 %10880, %v1494_v17  }
 0x86f   :  { %2576 = vperm.xlu0 %10878, %v2502_v29  }
 0x870   :  { %v13116_v6 = vpop.permute.xlu2 %2792 }
 0x874   :  { %2566 = vperm.xlu1 %10879, %v2500_v20  }
 0x876   :  { %2571 = vperm.xlu2 %10880, %v2501_v56  }
 0x877   :  { %1573 = vperm.xlu0 %10878, %v1495_v57   ;;  %v10567_v57 = vld [vmem:[#allocation16 + $0x4] sm:$0xf] }
 0x878   :  { %v2799_v35 = vpop.permute.xlu2 %2798  ;;  %v13121_v12 = vpop.permute.xlu0 %2788 }
 0x879   :  { %v13119_v26 = vpop.permute.xlu1 %2790 }
 0x87a   :  { %v2819_v17 = vsel %vm2057_vm10, %v13121_v12, %v13119_v26 }
 0x87c   :  { %1563 = vperm.xlu1 %10879, %v1493_v15   ;;  %v9595_v15 = vld [vmem:[#allocation16 + $0xc] sm:$0xf0] }
 0x87e   :  { %2556 = vperm.xlu2 %10880, %v2498_v50  }
 0x87f   :  { %1558 = vperm.xlu0 %10878, %v1492_v53   ;;  %v9593_v53 = vld [vmem:[#allocation16] sm:$0xf] }
 0x880   :  { %v2773_v21 = vpop.permute.xlu2 %2772 }
 0x884   :  { %1548 = vperm.xlu1 %10879, %v1490_v46   ;;  %v10568_v46 = vld [vmem:[#allocation16 + $0x8] sm:$0xf0] }
 0x886   :  { %1553 = vperm.xlu2 %10880, %v1491_v48   ;;  %v2769_v55 = vpop.permute.xlu1 %2768  ;;  %v13141_v48 = vpop.f32.mrf.mxu3 }
 0x887   :  { %2561 = vperm.xlu0 %10878, %v2499_v61  }
 0x889   :  { %v2795_v28 = vpop.permute.xlu0 %2794 }
 0x88a   :  { %v2820_v60 = vsel %vm2057_vm10, %v13116_v6, %v2795_v28  ;;  %v9594_v6 = vor.u32 %v10568_v46, %v9593_v53  ;;  %v9649_v46 = vld [vmem:[#allocation16 + $0x68] sm:$0xf] }
 0x88c   :  { %2551 = vperm.xlu1 %10879, %v2497_v52   ;;  %v9598_v52 = vor.u32 %v10567_v57, %v9595_v15 }
 0x88e   :  { %3071 = vrot.lane.b32.xlu2 %v9688_v8, %s12104_s0  ;;  %v2797_v49 = vpop.permute.xlu1 %2796  ;;  %v13147_v12 = vpop.f32.mrf.mxu3 }
 0x88f   :  { %2546 = vperm.xlu0 %10878, %v2496_v10   ;;  %v2821_v34 = vsel %vm2057_vm10, %v2797_v49, %v2799_v35  ;;  %v9601_v10 = vld [vmem:[#allocation16 + $0x8] sm:$0xf] }
 0x894   :  { %1543 = vperm.xlu1 %10879, %v1489_v23   ;;  %v10569_v23 = vld [vmem:[#allocation16 + $0x10] sm:$0xf0] }
 0x895   :  { %v9602_v35 = vor.u32 %v10569_v23, %v9601_v10  ;;  %v9655_v10 = vld [vmem:[#allocation16 + $0x84] sm:$0xf0]  ;;  %v9653_v23 = vld [vmem:[#allocation16 + $0x78] sm:$0xf] }
 0x896   :  { %2536 = vperm.xlu2 %10880, %v2494_v37   ;;  %v13149_v28 = vpop.f32.mrf.mxu3 }
 0x897   :  { %1538 = vperm.xlu0 %10878, %v1488_v11  }
 0x899   :  { %v2771_v62 = vpop.permute.xlu0 %2770 }
 0x89c   :  { %1528 = vperm.xlu1 %10879, %v1486_v0   ;;  %v10570_v0 = vld [vmem:[#allocation16 + $0x1c] sm:$0xf] }
 0x89e   :  { %1533 = vperm.xlu2 %10880, %v1487_v18   ;;  %v9607_v18 = vld [vmem:[#allocation16 + $0x24] sm:$0xf0]  ;;  %v13151_v49 = vpop.f32.mrf.mxu3 }
 0x89f   :  { %2541 = vperm.xlu0 %10878, %v2495_v7   ;;  %v9610_v7 = vor.u32 %v10570_v0, %v9607_v18 }
 0x8a0   :  { %v2805_v31 = vpop.permute.xlu2 %2804 }
 0x8a4   :  { %2531 = vperm.xlu1 %10879, %v2493_v58   ;;  %v9613_v58 = vld [vmem:[#allocation16 + $0x20] sm:$0xf] }
 0x8a6   :  { %1518 = vperm.xlu2 %10880, %v1484_v59   ;;  %v10572_v59 = vld [vmem:[#allocation16 + $0x28] sm:$0xf0] }
 0x8a7   :  { %2526 = vperm.xlu0 %10878, %v2492_v1   ;;  %v9614_v1 = vor.u32 %v10572_v59, %v9613_v58 }
 0x8a8   :  { %v2801_v16 = vpop.permute.xlu0 %2800  ;;  %v2787_v63 = vpop.permute.xlu2 %2786 }
 0x8a9   :  { %v2803_v47 = vpop.permute.xlu1 %2802 }
 0x8aa   :  { %v2822_v45 = vsel %vm2057_vm10, %v2801_v16, %v2803_v47  ;;  %v9625_v16 = vld [vmem:[#allocation16 + $0x38] sm:$0xf] }
 0x8ac   :  { %2516 = vperm.xlu1 %10879, %v2490_v30   ;;  %v9617_v30 = vld [vmem:[#allocation16 + $0x30] sm:$0xf] }
 0x8ae   :  { %2521 = vperm.xlu2 %10880, %v2491_v19   ;;  %v10574_v19 = vld [vmem:[#allocation16 + $0x38] sm:$0xf0] }
 0x8af   :  { %1523 = vperm.xlu0 %10878, %v1485_v32   ;;  %v9618_v47 = vor.u32 %v10574_v19, %v9617_v30  ;;  %v9665_v30 = vld [vmem:[#allocation16 + $0x90] sm:$0xf]  ;;  %v10586_v19 = vld [vmem:[#allocation16 + $0x98] sm:$0xf0] }
 0x8b0   :  { %v2781_v44 = vpop.permute.xlu2 %2780 }
 0x8b4   :  { %1513 = vperm.xlu1 %10879, %v1483_v25   ;;  %v10575_v25 = vld [vmem:[#allocation16 + $0x40] sm:$0xf0] }
 0x8b6   :  { %2506 = vperm.xlu2 %10880, %v2488_v33   ;;  %v2775_v40 = vpop.permute.xlu1 %2774  ;;  %v9626_v33 = vor.u32 %v10575_v25, %v9625_v16  ;;  %v9666_v16 = vor.u32 %v10586_v19, %v9665_v30 }
 0x8b7   :  { %2897 = vmatpush.bf16.msrb.mxu3 %v2775_v40  ;;  %1508 = vperm.xlu0 %10878, %v1482_v14   ;;  %v10576_v14 = vld [vmem:[#allocation16 + $0x4c] sm:$0xf]  ;;  %v9631_v40 = vld [vmem:[#allocation16 + $0x54] sm:$0xf0] }
 0x8b8   :  { %v2761_v41 = vpop.permute.xlu2 %2760 }
 0x8b9   :  { %v2807_v43 = vpop.permute.xlu0 %2806 }
 0x8ba   :  { %v2823_v3 = vsel %vm2057_vm10, %v2805_v31, %v2807_v43  ;;  %v10573_v31 = vld [vmem:[#allocation16 + $0x34] sm:$0xf]  ;;  %v9629_v43 = vld [vmem:[#allocation16 + $0x48] sm:$0xf] }
 0x8bb   :  { %2898 = vmatpush.bf16.msrb.mxu3 %v2773_v21  ;;  %2946 = vmatpush.bf16.msrb.mxu2 %v2823_v3 }
 0x8bc   :  { %1498 = vperm.xlu1 %10879, %v1480_v22   ;;  %v10577_v22 = vld [vmem:[#allocation16 + $0x50] sm:$0xf0] }
 0x8be   :  { %1503 = vperm.xlu2 %10880, %v1481_v5   ;;  %v2785_v9 = vpop.permute.xlu1 %2784  ;;  %v9634_v5 = vor.u32 %v10576_v14, %v9631_v40  ;;  %v9673_v40 = vld [vmem:[#allocation16 + $0x98] sm:$0xf] }
 0x8bf   :  { %2899 = vmatpush.bf16.msrb.mxu3 %v2771_v62  ;;  %2947 = vmatpush.bf16.msrb.mxu2 %v2822_v45  ;;  %v2818_v20 = vsel %vm2057_vm10, %v2785_v9, %v2787_v63  ;;  %v9619_v62 = vld [vmem:[#allocation16 + $0x3c] sm:$0xf0]  ;;  %v13153_v63 = vpop.f32.mrf.mxu3  ;;  %v9630_v9 = vor.u32 %v10577_v22, %v9629_v43  ;;  %v9637_v45 = vld [vmem:[#allocation16 + $0x50] sm:$0xf]  ;;  %v10587_v43 = vld [vmem:[#allocation16 + $0xa0] sm:$0xf0] }
 0x8c0   :  { %2511 = vperm.xlu0 %10878, %v2489_v27   ;;  %v2745_v50 = vpop.permute.xlu2 %2744  ;;  %v9622_v32 = vor.u32 %v10573_v31, %v9619_v62  ;;  %v10585_v31 = vld [vmem:[#allocation16 + $0x94] sm:$0xf]  ;;  %v9667_v62 = vld [vmem:[#allocation16 + $0x9c] sm:$0xf0]  ;;  %v9674_v22 = vor.u32 %v10587_v43, %v9673_v40 }
 0x8c1   :  { %v2765_v54 = vpop.permute.xlu0 %2764  ;;  %v2808_v8 = vsel %vm2057_vm10, %v12873_v36, %v2745_v50 }
 0x8c3   :  { %2900 = vmatpush.bf16.msrb.mxu3 %v2769_v55  ;;  %2948 = vmatpush.bf16.msrb.mxu2 %v2821_v34  ;;  %v9605_v55 = vld [vmem:[#allocation16 + $0x18] sm:$0xf] }
 0x8c6   :  { %v2763_v38 = vpop.permute.xlu1 %2762 }
 0x8c7   :  { %2901 = vmatpush.bf16.msrb.mxu3 %v13112_v2  ;;  %2949 = vmatpush.bf16.msrb.mxu2 %v2820_v60 }
 0x8c8   :  { %v13159_v27 = vpop.permute.xlu2 %1568 }
 0x8c9   :  { %v2749_v24 = vpop.permute.xlu0 %2748 }
 0x8ca   :  { %v2810_v13 = vsel %vm2057_vm10, %v12873_v36, %v2749_v24 }
 0x8cb   :  { %2853 = vmatpush.bf16.msra.mxu1 %v2810_v13  ;;  %2902 = vmatpush.bf16.msrb.mxu3 %v2765_v54  ;;  %v10578_v54 = vld [vmem:[#allocation16 + $0x58] sm:$0xf0]  ;;  %v10579_v13 = vld [vmem:[#allocation16 + $0x64] sm:$0xf] }
 0x8cc   :  { %2950 = vmatpush.bf16.msrb.mxu2 %v2819_v17  ;;  %v9638_v34 = vor.u32 %v10578_v54, %v9637_v45  ;;  %v9643_v17 = vld [vmem:[#allocation16 + $0x6c] sm:$0xf0]  ;;  %v10588_v54 = vld [vmem:[#allocation16 + $0xac] sm:$0xf] }
 0x8ce   :  { %v2747_v29 = vpop.permute.xlu1 %2746 }
 0x8cf   :  { %2903 = vmatpush.bf16.msrb.mxu3 %v2763_v38  ;;  %v2809_v56 = vsel %vm2057_vm10, %v12873_v36, %v2747_v29  ;;  %v10571_v36 = vld [vmem:[#allocation16 + $0x20] sm:$0xf0]  ;;  %v9641_v29 = vld [vmem:[#allocation16 + $0x60] sm:$0xf] }
 0x8d0   :  { %2951 = vmatpush.bf16.msrb.mxu2 %v2818_v20  ;;  %2854 = vmatpush.bf16.msra.mxu1 %v2809_v56  ;;  %v9606_v21 = vor.u32 %v10571_v36, %v9605_v55  ;;  %v13165_v60 = vpop.permute.xlu2 %2571  ;;  %v10580_v20 = vld [vmem:[#allocation16 + $0x68] sm:$0xf0]  ;;  %v9646_v56 = vor.u32 %v10579_v13, %v9643_v17  ;;  %v9661_v55 = vld [vmem:[#allocation16 + $0x80] sm:$0xf]  ;;  %v9677_v17 = vld [vmem:[#allocation16 + $0xa8] sm:$0xf] }
 0x8d1   :  { %v2783_v2 = vpop.permute.xlu0 %2782  ;;  %v9642_v57 = vor.u32 %v10580_v20, %v9641_v29  ;;  %v10584_v36 = vld [vmem:[#allocation16 + $0x88] sm:$0xf0]  ;;  %v10589_v29 = vld [vmem:[#allocation16 + $0xb0] sm:$0xf0] }
 0x8d2   :  { %v2817_v61 = vsel %vm2057_vm10, %v2781_v44, %v2783_v2  ;;  %v13157_v44 = vpop.f32.mrf.mxu3  ;;  %v10581_v2 = vld [vmem:[#allocation16 + $0x70] sm:$0xf0] }
 0x8d3   :  { %2904 = vmatpush.bf16.msrb.mxu3 %v2761_v41 }
 0x8d4   :  { %2952 = vmatpush.bf16.msrb.mxu2 %v2817_v61  ;;  %2855 = vmatpush.bf16.msra.mxu1 %v2808_v8 }
 0x8d6   :  { %2905 = vmatmul.bf16.vlgmr.msrb.gmra.mxu3 %v9598_v52  ;;  %v2779_v37 = vpop.permute.xlu1 %2778  ;;  %v9650_v52 = vor.u32 %v10581_v2, %v9649_v46  ;;  %v9685_v46 = vld [vmem:[#allocation16 + $0xb0] sm:$0xf]  ;;  %v10590_v2 = vld [vmem:[#allocation16 + $0xb8] sm:$0xf0] }
 0x8d7   :  { %2856 = vmatmul.bf16.vlgmr.msra.gmra.mxu1 %v9594_v6  ;;  %v10582_v6 = vld [vmem:[#allocation16 + $0x7c] sm:$0xf] }
 0x8d8   :  { %v13173_v53 = vpop.permute.xlu2 %2556  ;;  %v9658_v0 = vor.u32 %v10582_v6, %v9655_v10 }
 0x8d9   :  { %v2777_v26 = vpop.permute.xlu0 %2776 }
 0x8da   :  { %v2816_v11 = vsel %vm2057_vm10, %v2777_v26, %v2779_v37  ;;  %v13163_v38 = vpop.f32.mrf.mxu3  ;;  %v10583_v37 = vld [vmem:[#allocation16 + $0x80] sm:$0xf0] }
 0x8db   :  { %2953 = vmatpush.bf16.msrb.mxu2 %v2816_v11  ;;  %v9654_v18 = vor.u32 %v10583_v37, %v9653_v23  ;;  %v9686_v23 = vor.u32 %v10590_v2, %v9685_v46 }
 0x8de   :  { %2954 = vmatmul.bf16.vlgmr.msrb.gmra.mxu2 %v9602_v35  ;;  %v13167_v24 = vpop.permute.xlu1 %2581 }
 0x8df   :  { %16356 = vst [vmem:[#allocation68_spill] sm:$0xff] %v13167_v24 }
 0x8e0   :  { %v13181_v11 = vpop.permute.xlu2 %1553 }
 0x8e1   :  { %v13155_v3 = vpop.permute.xlu0 %2576 }
 0x8e2   :  { %v13171_v50 = vpop.f32.mrf.mxu3 }
 0x8e6   :  { %2910 = vmatmul.bf16.gmra.mxu3 %v9610_v7  ;;  %v13175_v61 = vpop.permute.xlu1 %2566 }
 0x8e7   :  { %2861 = vmatmul.bf16.gmra.mxu1 %v9606_v21  ;;  %v9662_v21 = vor.u32 %v10584_v36, %v9661_v55 }
 0x8e8   :  { %v13189_v59 = vpop.permute.xlu2 %3071 }
 0x8e9   :  { %v13161_v41 = vpop.permute.xlu0 %1573 }
 0x8ea   :  { %16355 = vst [vmem:[#allocation67_spill] sm:$0xff] %v13161_v41  ;;  %v13179_v26 = vpop.f32.mrf.mxu3 }
 0x8ee   :  { %2959 = vmatmul.bf16.gmra.mxu2 %v9614_v1  ;;  %v13183_v35 = vpop.permute.xlu1 %1563 }
 0x8f1   :  { %v13169_v15 = vpop.permute.xlu0 %1558 }
 0x8f2   :  { %16357 = vst [vmem:[#allocation69_spill] sm:$0xff] %v13169_v15  ;;  %v13187_v58 = vpop.f32.mrf.mxu3 }
 0x8f6   :  { %2915 = vmatmul.bf16.gmra.mxu3 %v9622_v32  ;;  %v13191_v1 = vpop.permute.xlu1 %1548  ;;  %v9670_v32 = vor.u32 %v10585_v31, %v9667_v62 }
 0x8f7   :  { %2866 = vmatmul.bf16.gmra.mxu1 %v9618_v47 }
 0x8f9   :  { %v13177_v8 = vpop.permute.xlu0 %2561 }
 0x8fa   :  { %v13195_v25 = vpop.f32.mrf.mxu3 }
 0x8fb   :  { %16358 = vst [vmem:[#allocation70_spill] sm:$0xff] %v13195_v25 }
 0x8fe   :  { %2964 = vmatmul.bf16.gmra.mxu2 %v9626_v33  ;;  %v13197_v33 = vpop.permute.xlu2 %2536  ;;  %v13199_v14 = vpop.permute.xlu1 %2551 }
 0x901   :  { %v13185_v7 = vpop.permute.xlu0 %2546 }
 0x906   :  { %2920 = vmatmul.bf16.gmra.mxu3 %v9634_v5  ;;  %v13205_v45 = vpop.permute.xlu2 %1533  ;;  %v13207_v13 = vpop.permute.xlu1 %1543 }
 0x907   :  { %2871 = vmatmul.bf16.gmra.mxu1 %v9630_v9  ;;  %v13203_v9 = vpop.f32.mrf.mxu3 }
 0x909   :  { %v13193_v47 = vpop.permute.xlu0 %1538 }
 0x90e   :  { %2969 = vmatmul.bf16.gmra.mxu2 %v9638_v34  ;;  %v9679_v34 = vld [vmem:[#allocation16 + $0xb4] sm:$0xf0]  ;;  %v13213_v6 = vpop.permute.xlu2 %1518  ;;  %v13215_v10 = vpop.permute.xlu1 %1528 }
 0x90f   :  { %v9682_v20 = vor.u32 %v10588_v54, %v9679_v34 }
 0x911   :  { %v13201_v5 = vpop.permute.xlu0 %2541 }
 0x916   :  { %2925 = vmatmul.bf16.gmra.mxu3 %v9646_v56  ;;  %v9678_v56 = vor.u32 %v10589_v29, %v9677_v17  ;;  %v2532_v55 = vpop.permute.xlu1 %2531 }
 0x917   :  { %2876 = vmatmul.bf16.gmra.mxu1 %v9642_v57 }
 0x919   :  { %v13209_v57 = vpop.permute.xlu0 %2526 }
 0x91e   :  { %2974 = vmatmul.bf16.gmra.mxu2 %v9650_v52  ;;  %v13211_v52 = vpop.f32.mrf.mxu3  ;;  %v2517_v19 = vpop.permute.xlu1 %2516 }
 0x926   :  { %2930 = vmatmul.bf16.gmra.mxu3 %v9658_v0  ;;  %v13217_v37 = vpop.f32.mrf.mxu3  ;;  %v13219_v0 = vpop.permute.xlu0 %1523 }
 0x927   :  { %2881 = vmatmul.bf16.gmra.mxu1 %v9654_v18  ;;  %16359 = vst [vmem:[#allocation71_spill] sm:$0xff] %v13217_v37  ;;  %v2522_v18 = vpop.permute.xlu2 %2521  ;;  %v1514_v34 = vpop.permute.xlu1 %1513 }
 0x92e   :  { %2979 = vmatmul.bf16.gmra.mxu2 %v9662_v21  ;;  %v1509_v31 = vpop.permute.xlu0 %1508 }
 0x92f   :  { %v2507_v30 = vpop.permute.xlu2 %2506 }
 0x936   :  { %2935 = vmatmul.bf16.gmra.mxu3 %v9670_v32  ;;  %v2512_v43 = vpop.permute.xlu0 %2511 }
 0x937   :  { %2886 = vmatmul.bf16.gmra.mxu1 %v9666_v16  ;;  %v1504_v54 = vpop.permute.xlu2 %1503 }
 0x93e   :  { %2984 = vmatmul.bf16.gmra.mxu2 %v9674_v22 }
 0x946   :  { %2940 = vmatmul.bf16.gmra.mxu3 %v9682_v20 }
 0x947   :  { %2891 = vmatmul.bf16.gmra.mxu1 %v9678_v56  ;;  %v1652_v56 = vadd.f32 %v13130_v4, %v1504_v54 }
 0x94e   :  { %2989 = vmatmul.bf16.gmra.mxu2 %v9686_v23 }
 0x954   :  { %v2857_v36 = vpop.f32.mrf.mxu1 }
 0x955   :  { %v2858_v37 = vadd.f32 %v2857_v36, %v2507_v30 }
 0x959   :  { %v2906_v21 = vpop.f32.mrf.mxu3 }
 0x95a   :  { %v2907_v15 = vadd.f32 %v2906_v21, %v2858_v37  ;;  %v1657_v37 = vadd.f32 %v13147_v12, %v1514_v34  ;;  %v1655_v12 = vadd.f32 %v13141_v48, %v1509_v31 }
 0x95c   :  { %v2859_v62 = vpop.f32.mrf.mxu1 }
 0x95d   :  { %v2860_v22 = vadd.f32 %v2859_v62, %v2512_v43 }
 0x961   :  { %v2908_v32 = vpop.f32.mrf.mxu3  ;;  %v2955_v16 = vpop.f32.mrf.mxu2 }
 0x962   :  { %v2909_v17 = vadd.f32 %v2908_v32, %v2860_v22  ;;  %v1499_v32 = vpop.permute.xlu1 %1498  ;;  %v2956_v43 = vadd.f32 %v2955_v16, %v2907_v15 }
 0x963   :  { %v1650_v4 = vadd.f32 %v13124_v51, %v1499_v32 }
 0x964   :  { %v2862_v40 = vpop.f32.mrf.mxu1 }
 0x965   :  { %v2863_v15 = vadd.f32 %v2862_v40, %v2517_v19 }
 0x969   :  { %v2911_v29 = vpop.f32.mrf.mxu3  ;;  %v2957_v20 = vpop.f32.mrf.mxu2 }
 0x96a   :  { %v2958_v46 = vadd.f32 %v2957_v20, %v2909_v17  ;;  %v2912_v51 = vadd.f32 %v2911_v29, %v2863_v15  ;;  %v1660_v15 = vadd.f32 %v13149_v28, %v13213_v6 }
 0x96c   :  { %v2996_v2 = vadd.f32 %v2958_v46, %v1652_v56  ;;  %v2864_v23 = vpop.f32.mrf.mxu1 }
 0x96d   :  { %v2865_v36 = vadd.f32 %v2864_v23, %v2522_v18 }
 0x96e   :  { %v3012_v42 = vmul.f32 0.1, %v2996_v2 }
 0x970   :  { %v13222_v41 = vmax.f32 %v2996_v2, %v3012_v42  ;;  %v2995_v42 = vadd.f32 %v2956_v43, %v1650_v4 }
 0x971   :  { %v2913_v24 = vpop.f32.mrf.mxu3  ;;  %v2960_v25 = vpop.f32.mrf.mxu2 }
 0x972   :  { %16360 = vst [vmem:[#allocation72_spill] sm:$0xff] %v13222_v41  ;;  %3109 = vrot.lane.b32.xlu2 %v13222_v41, %s12130_s30  ;;  %v3076_v62 = vmul.f32 %v13189_v59, %v13222_v41  ;;  %v2914_v30 = vadd.f32 %v2913_v24, %v2865_v36  ;;  %v3011_v20 = vmul.f32 0.1, %v2995_v42  ;;  %v2961_v18 = vadd.f32 %v2960_v25, %v2912_v51 }
 0x973   :  { %v1662_v36 = vadd.f32 %v13151_v49, %v13219_v0 }
 0x974   :  { %v2867_v22 = vpop.f32.mrf.mxu1  ;;  %3176 = vrot.lane.b32.xlu0 %v3076_v62, %s12131_s21  ;;  %v13231_v41 = vmax.f32 %v2995_v42, %v3011_v20  ;;  %v2997_v43 = vadd.f32 %v2961_v18, %v1655_v12 }
 0x975   :  { %v2868_v31 = vadd.f32 %v2867_v22, %v13209_v57 }
 0x976   :  { %v3074_v40 = vmul.f32 %v13189_v59, %v13231_v41 }
 0x979   :  { %v2916_v54 = vpop.f32.mrf.mxu3  ;;  %v2962_v17 = vpop.f32.mrf.mxu2 }
 0x97a   :  { %v2963_v21 = vadd.f32 %v2962_v17, %v2914_v30  ;;  %v3013_v30 = vmul.f32 0.1, %v2997_v43 }
 0x97c   :  { %v2998_v56 = vadd.f32 %v2963_v21, %v1657_v37  ;;  %v2869_v46 = vpop.f32.mrf.mxu1 }
 0x97d   :  { %v2870_v34 = vadd.f32 %v2869_v46, %v2532_v55  ;;  %v13246_v55 = vmax.f32 %v2997_v43, %v3013_v30  ;;  %v2917_v46 = vadd.f32 %v2916_v54, %v2868_v31  ;;  %v1665_v30 = vadd.f32 %v13153_v63, %v13215_v10 }
 0x97e   :  { %v3014_v2 = vmul.f32 0.1, %v2998_v56 }
 0x97f   :  { %v3077_v54 = vmul.f32 %v13189_v59, %v13246_v55 }
 0x980   :  { %v13233_v16 = vmax.f32 %v2998_v56, %v3014_v2 }
 0x981   :  { %v2918_v62 = vpop.f32.mrf.mxu3  ;;  %v2965_v39 = vpop.f32.mrf.mxu2 }
 0x982   :  { %v11081_v24 = vpack.i.bf16 %v13231_v41, %v13233_v16  ;;  %v3078_v32 = vmul.f32 %v13189_v59, %v13233_v16  ;;  %v2919_v19 = vadd.f32 %v2918_v62, %v2870_v34  ;;  %v2966_v0 = vadd.f32 %v2965_v39, %v2917_v46 }
 0x983   :  { %v1667_v39 = vadd.f32 %v13157_v44, %v13205_v45 }
 0x984   :  { %v2872_v23 = vpop.f32.mrf.mxu1  ;;  %11082 = vrot.lane.b32.xlu1 %v11081_v24, %s12130_s30  ;;  %v11086_v42 = vpack.i.bf16 %v3074_v40, %v3078_v32  ;;  %v2999_v22 = vadd.f32 %v2966_v0, %v1660_v15 }
 0x986   :  { %v3015_v32 = vmul.f32 0.1, %v2999_v22 }
 0x988   :  { %v13264_v6 = vmax.f32 %v2999_v22, %v3015_v32 }
 0x989   :  { %v2921_v4 = vpop.f32.mrf.mxu3  ;;  %v2967_v29 = vpop.f32.mrf.mxu2 }
 0x98a   :  { %v2968_v25 = vadd.f32 %v2967_v29, %v2919_v19  ;;  %v2873_v19 = vadd.f32 %v2872_v23, %v13197_v33 }
 0x98c   :  { %v3000_v17 = vadd.f32 %v2968_v25, %v1662_v36  ;;  %v2874_v37 = vpop.f32.mrf.mxu1  ;;  %11087 = vrot.lane.b32.xlu1 %v11086_v42, %s12131_s21  ;;  %v2922_v25 = vadd.f32 %v2921_v4, %v2873_v19  ;;  %v3079_v4 = vmul.f32 %v13189_v59, %v13264_v6 }
 0x98d   :  { %v2875_v62 = vadd.f32 %v2874_v37, %v13201_v5 }
 0x98e   :  { %v3016_v48 = vmul.f32 0.1, %v3000_v17 }
 0x990   :  { %v13249_v21 = vmax.f32 %v3000_v17, %v3016_v48 }
 0x991   :  { %v2923_v20 = vpop.f32.mrf.mxu3  ;;  %v2970_v56 = vpop.f32.mrf.mxu2 }
 0x992   :  { %v11091_v49 = vpack.i.bf16 %v13246_v55, %v13249_v21  ;;  %v3080_v57 = vmul.f32 %v13189_v59, %v13249_v21  ;;  %v2924_v51 = vadd.f32 %v2923_v20, %v2875_v62  ;;  %v2971_v45 = vadd.f32 %v2970_v56, %v2922_v25 }
 0x993   :  { %v1672_v20 = vadd.f32 %v13171_v50, %v13207_v13 }
 0x994   :  { %v2877_v2 = vpop.f32.mrf.mxu1  ;;  %11092 = vrot.lane.b32.xlu2 %v11091_v49, %s12130_s30  ;;  %v11096_v34 = vpack.i.bf16 %v3077_v54, %v3080_v57  ;;  %v3001_v23 = vadd.f32 %v2971_v45, %v1665_v30 }
 0x995   :  { %v2878_v15 = vadd.f32 %v2877_v2, %v13185_v7 }
 0x996   :  { %v3017_v49 = vmul.f32 0.1, %v3001_v23 }
 0x998   :  { %v13282_v10 = vmax.f32 %v3001_v23, %v3017_v49  ;;  %v1675_v23 = vadd.f32 %v13179_v26, %v13191_v1 }
 0x999   :  { %v2926_v24 = vpop.f32.mrf.mxu3  ;;  %v2972_v18 = vpop.f32.mrf.mxu2 }
 0x99a   :  { %v2973_v12 = vadd.f32 %v2972_v18, %v2924_v51  ;;  %v2927_v51 = vadd.f32 %v2926_v24, %v2878_v15  ;;  %v1670_v18 = vadd.f32 %v13163_v38, %v13193_v47  ;;  %v3081_v24 = vmul.f32 %v13189_v59, %v13282_v10 }
 0x99c   :  { %v3002_v43 = vadd.f32 %v2973_v12, %v1667_v39  ;;  %v2879_v28 = vpop.f32.mrf.mxu1  ;;  %11097 = vrot.lane.b32.xlu2 %v11096_v34, %s12131_s21 }
 0x99d   :  { %v2880_v17 = vadd.f32 %v2879_v28, %v13199_v14  ;;  %v1677_v28 = vadd.f32 %v13187_v58, %v13181_v11 }
 0x99e   :  { %v3018_v5 = vmul.f32 0.1, %v3002_v43 }
 0x9a0   :  { %v13267_v40 = vmax.f32 %v3002_v43, %v3018_v5 }
 0x9a1   :  { %v2928_v29 = vpop.f32.mrf.mxu3  ;;  %v2975_v36 = vpop.f32.mrf.mxu2 }
 0x9a2   :  { %v11101_v44 = vpack.i.bf16 %v13264_v6, %v13267_v40  ;;  %v3082_v33 = vmul.f32 %v13189_v59, %v13267_v40  ;;  %v2929_v37 = vadd.f32 %v2928_v29, %v2880_v17  ;;  %v2976_v13 = vadd.f32 %v2975_v36, %v2927_v51 }
 0x9a4   :  { %v2882_v42 = vpop.f32.mrf.mxu1  ;;  %11102 = vrot.lane.b32.xlu0 %v11101_v44, %s12130_s30  ;;  %v11106_v46 = vpack.i.bf16 %v3079_v4, %v3082_v33  ;;  %v3003_v2 = vadd.f32 %v2976_v13, %v1670_v18  ;;  %v16361_v13 = vld [vmem:[#allocation66_spill] sm:$0xff]  ;;  %v16362_v18 = vmov 0.0  }
 0x9a5   :  { %vm3043_vm12 = vcmp.ge.s32.totalorder %v16361_v13, 4  ;;  %vm5115_vm15 = vcmp.lt.s32.totalorder %v16361_v13, 56  ;;  %vm5091_vm0 = vcmp.ge.s32.totalorder %v16361_v13, 8 }
 0x9a6   :  { %v3019_v47 = vmul.f32 0.1, %v3003_v2 }
 0x9a8   :  { %v13301_v36 = vmax.f32 %v3003_v2, %v3019_v47 }
 0x9a9   :  { %v2931_v48 = vpop.f32.mrf.mxu3  ;;  %v2977_v31 = vpop.f32.mrf.mxu2 }
 0x9aa   :  { %v2978_v56 = vadd.f32 %v2977_v31, %v2929_v37 }
 0x9ac   :  { %v3004_v0 = vadd.f32 %v2978_v56, %v1672_v20  ;;  %v2884_v63 = vpop.f32.mrf.mxu1  ;;  %11107 = vrot.lane.b32.xlu0 %v11106_v46, %s12131_s21  ;;  %v1682_v20 = vadd.f32 %v13203_v9, %v13183_v35  ;;  %v1685_v35 = vadd.f32 %v13211_v52, %v13159_v27 }
 0x9ad   :  { %v2885_v39 = vadd.f32 %v2884_v63, %v13177_v8 }
 0x9ae   :  { %v3020_v14 = vmul.f32 0.1, %v3004_v0 }
 0x9b0   :  { %v13285_v62 = vmax.f32 %v3004_v0, %v3020_v14 }
 0x9b1   :  { %v2933_v57 = vpop.f32.mrf.mxu3  ;;  %v2980_v22 = vpop.f32.mrf.mxu2 }
 0x9b2   :  { %v11111_v50 = vpack.i.bf16 %v13282_v10, %v13285_v62  ;;  %v3084_v7 = vmul.f32 %v13189_v59, %v13285_v62  ;;  %v2934_v12 = vadd.f32 %v2933_v57, %v2885_v39  ;;  %v9687_v39 = vsel %vm3043_vm12, 1.0, %v16362_v18 }
 0x9b4   :  { %11112 = vrot.lane.b32.xlu1 %v11111_v50, %s12130_s30  ;;  %v2887_v54 = vpop.f32.mrf.mxu1  ;;  %v11116_v38 = vpack.i.bf16 %v3081_v24, %v3084_v7 }
 0x9b5   :  { %v2888_v34 = vadd.f32 %v2887_v54, %v13175_v61  ;;  %v2883_v61 = vadd.f32 %v2882_v42, %v13173_v53 }
 0x9b7   :  { %v2932_v30 = vadd.f32 %v2931_v48, %v2883_v61  ;;  %v3083_v48 = vmul.f32 %v13189_v59, %v13301_v36 }
 0x9b9   :  { %v2936_v32 = vpop.f32.mrf.mxu3  ;;  %v2982_v43 = vpop.f32.mrf.mxu2  ;;  %v2981_v33 = vadd.f32 %v2980_v22, %v2932_v30 }
 0x9ba   :  { %v2937_v5 = vadd.f32 %v2936_v32, %v2888_v34  ;;  %v2983_v19 = vadd.f32 %v2982_v43, %v2934_v12  ;;  %v16363_v43 = vld [vmem:[#allocation69_spill] sm:$0xff] }
 0x9bb   :  { %v3005_v42 = vadd.f32 %v2981_v33, %v1675_v23 }
 0x9bc   :  { %v3006_v8 = vadd.f32 %v2983_v19, %v1677_v28  ;;  %11117 = vrot.lane.b32.xlu1 %v11116_v38, %s12131_s21  ;;  %v2889_v44 = vpop.f32.mrf.mxu1  ;;  %v16364_v28 = vld [vmem:[#allocation70_spill] sm:$0xff] }
 0x9bd   :  { %v2890_v37 = vadd.f32 %v2889_v44, %v13165_v60  ;;  %v3021_v0 = vmul.f32 0.1, %v3005_v42  ;;  %v16365_v44 = vld [vmem:[#allocation68_spill] sm:$0xff] }
 0x9be   :  { %v3022_v29 = vmul.f32 0.1, %v3006_v8 }
 0x9bf   :  { %v13320_v14 = vmax.f32 %v3005_v42, %v3021_v0 }
 0x9c0   :  { %v13304_v25 = vmax.f32 %v3006_v8, %v3022_v29 }
 0x9c1   :  { %v2985_v45 = vpop.f32.mrf.mxu2  ;;  %v2938_v58 = vpop.f32.mrf.mxu3  ;;  %v3085_v27 = vmul.f32 %v13189_v59, %v13320_v14 }
 0x9c2   :  { %v2986_v17 = vadd.f32 %v2985_v45, %v2937_v5  ;;  %v11121_v11 = vpack.i.bf16 %v13301_v36, %v13304_v25  ;;  %v3086_v53 = vmul.f32 %v13189_v59, %v13304_v25  ;;  %v2939_v4 = vadd.f32 %v2938_v58, %v2890_v37 }
 0x9c3   :  { %v1680_v5 = vadd.f32 %v16364_v28, %v16363_v43 }
 0x9c4   :  { %11122 = vrot.lane.b32.xlu2 %v11121_v11, %s12130_s30  ;;  %v11126_v46 = vpack.i.bf16 %v3083_v48, %v3086_v53  ;;  %v2892_v49 = vpop.f32.mrf.mxu1 }
 0x9c5   :  { %v2893_v26 = vadd.f32 %v2892_v49, %v13155_v3  ;;  %v3007_v38 = vadd.f32 %v2986_v17, %v1680_v5 }
 0x9c7   :  { %v3023_v29 = vmul.f32 0.1, %v3007_v38 }
 0x9c9   :  { %v2987_v31 = vpop.f32.mrf.mxu2  ;;  %v2941_v60 = vpop.f32.mrf.mxu3  ;;  %v13357_v33 = vmax.f32 %v3007_v38, %v3023_v29 }
 0x9ca   :  { %v2988_v56 = vadd.f32 %v2987_v31, %v2939_v4  ;;  %v2942_v15 = vadd.f32 %v2941_v60, %v2893_v26 }
 0x9cc   :  { %v3008_v63 = vadd.f32 %v2988_v56, %v1682_v20  ;;  %11127 = vrot.lane.b32.xlu2 %v11126_v46, %s12131_s21  ;;  %v13340_v12 = vpop.permute.xlu2 %3109  ;;  %v2894_v47 = vpop.f32.mrf.mxu1  ;;  %v16366_v56 = vld [vmem:[#allocation67_spill] sm:$0xff] }
 0x9cd   :  { %v2895_v45 = vadd.f32 %v2894_v47, %v16365_v44  ;;  %v16367_v46 = vld [vmem:[#allocation71_spill] sm:$0xff] }
 0x9ce   :  { %v3024_v1 = vmul.f32 0.1, %v3008_v63  ;;  %v1687_v49 = vadd.f32 %v16367_v46, %v16366_v56 }
 0x9d0   :  { %v13322_v57 = vmax.f32 %v3008_v63, %v3024_v1 }
 0x9d1   :  { %v2990_v22 = vpop.f32.mrf.mxu2  ;;  %v2943_v61 = vpop.f32.mrf.mxu3 }
 0x9d2   :  { %v2991_v9 = vadd.f32 %v2990_v22, %v2942_v15  ;;  %v11131_v51 = vpack.i.bf16 %v13320_v14, %v13322_v57  ;;  %v3088_v54 = vmul.f32 %v13189_v59, %v13322_v57  ;;  %v2944_v11 = vadd.f32 %v2943_v61, %v2895_v45 }
 0x9d4   :  { %v3009_v50 = vadd.f32 %v2991_v9, %v1685_v35  ;;  %11132 = vrot.lane.b32.xlu0 %v11131_v51, %s12130_s30  ;;  %v11136_v52 = vpack.i.bf16 %v3085_v27, %v3088_v54 }
 0x9d6   :  { %v3025_v3 = vmul.f32 0.1, %v3009_v50 }
 0x9d8   :  { %v13333_v7 = vmax.f32 %v3009_v50, %v3025_v3  ;;  %v3075_v50 = vmul.f32 0.0, %v13189_v59 }
 0x9d9   :  { %v2992_v30 = vpop.f32.mrf.mxu2 }
 0x9da   :  { %v11141_v2 = vpack.i.bf16 %v13333_v7, %v9687_v39  ;;  %v2993_v37 = vadd.f32 %v2992_v30, %v2944_v11  ;;  %v3089_v1 = vmul.f32 %v13189_v59, %v13333_v7 }
 0x9dc   :  { %11137 = vrot.lane.b32.xlu0 %v11136_v52, %s12131_s21  ;;  %11142 = vrot.lane.b32.xlu2 %v11141_v2, %s12130_s30  ;;  %v3010_v26 = vadd.f32 %v2993_v37, %v1687_v49  ;;  %v11146_v54 = vpack.i.bf16 %v3089_v1, %v3075_v50  ;;  %v3087_v37 = vmul.f32 %v13189_v59, %v13357_v33 }
 0x9de   :  { %v3026_v51 = vmul.f32 0.1, %v3010_v26 }
 0x9e0   :  { %v13395_v2 = vmax.f32 %v3010_v26, %v3026_v51 }
 0x9e2   :  { %v11151_v44 = vpack.i.bf16 %v13357_v33, %v13395_v2  ;;  %v3090_v30 = vmul.f32 %v13189_v59, %v13395_v2 }
 0x9e6   :  { %v13352_v8 = vpop.permute.xlu0 %3176 }
 0x9ee   :  { %v13342_v34 = vpop.permute.xlu2 %11092 }
 0x9f6   :  { %v13344_v24 = vpop.permute.xlu2 %11097  ;;  %v13362_v53 = vpop.permute.xlu1 %11082 }
 0x9f7   :  { %v11099_v38 = vunpack.i.l.bf16 %v13344_v24 }
 0x9fe   :  { %v13391_v3 = vpop.permute.xlu1 %11087 }
 0xa16   :  { %v13371_v31 = vpop.permute.xlu0 %11102 }
 0xa1e   :  { %v13346_v32 = vpop.permute.xlu2 %11122  ;;  %v13393_v27 = vpop.permute.xlu0 %11107 }
 0xa1f   :  { %v11110_v43 = vunpack.i.h.bf16 %v13393_v27  ;;  %v11125_v11 = vunpack.i.h.bf16 %v13346_v32  ;;  %v11109_v46 = vunpack.i.l.bf16 %v13393_v27 }
 0xa21   :  { %v3308_v61 = vpack.c.bf16 %v11099_v38, %v11110_v43 }
 0xa26   :  { %v13350_v19 = vpop.permute.xlu2 %11127  ;;  %v13406_v47 = vpop.permute.xlu1 %11112 }
 0xa27   :  { %v11114_v45 = vunpack.i.l.bf16 %v13406_v47  ;;  %v11130_v56 = vunpack.i.h.bf16 %v13350_v19 }
 0xa36   :  { %v13355_v58 = vpop.permute.xlu2 %11142 }
 0xa37   :  { %v13360_v23 = vunpack.i.l.bf16 %v13355_v58 }
 0xa39   :  { %v3059_v17 = vmul.f32 %v13360_v23, %v13301_v36  ;;  %v3060_v42 = vmul.f32 %v13360_v23, %v13285_v62  ;;  %v3050_v4 = vmul.f32 0.0, %v13360_v23  ;;  %v3063_v48 = vmul.f32 %v13360_v23, %v13357_v33 }
 0xa3a   :  { %v3064_v20 = vmul.f32 %v13360_v23, %v13322_v57  ;;  %v3061_v15 = vmul.f32 %v13360_v23, %v13320_v14  ;;  %v3062_v22 = vmul.f32 %v13360_v23, %v13304_v25  ;;  %v3057_v35 = vmul.f32 %v13360_v23, %v13282_v10 }
 0xa3b   :  { %v3292_v0 = vpack.c.bf16 %v3060_v42, %v3059_v17  ;;  %v3287_v63 = vpack.c.bf16 %v3050_v4, %v3050_v4  ;;  %v3058_v9 = vmul.f32 %v13360_v23, %v13267_v40  ;;  %v3065_v28 = vmul.f32 %v13360_v23, %v13333_v7  ;;  %v11118_v42 = vpop.permute.xlu1 %11117 }
 0xa3c   :  { %v3294_v60 = vpack.c.bf16 %v3064_v20, %v3063_v48  ;;  %v3293_v39 = vpack.c.bf16 %v3062_v22, %v3061_v15  ;;  %v3066_v5 = vmul.f32 %v13360_v23, %v13395_v2  ;;  %v3300_v17 = vpack.c.bf16 %v11114_v45, %v11125_v11 }
 0xa3d   :  { %3587 = vrot.lane.b32.xlu0 %v3292_v0, %s12104_s0  ;;  %3577 = vrot.lane.b32.xlu2 %v3287_v63, %s12104_s0  ;;  %v3291_v52 = vpack.c.bf16 %v3058_v9, %v3057_v35  ;;  %v11156_v4 = vpack.i.bf16 %v3087_v37, %v3090_v30  ;;  %v11119_v48 = vunpack.i.l.bf16 %v11118_v42  ;;  %v11120_v20 = vunpack.i.h.bf16 %v11118_v42 }
 0xa3e   :  { %3591 = vrot.lane.b32.xlu1 %v3294_v60, %s12104_s0  ;;  %v3295_v29 = vpack.c.bf16 %v3066_v5, %v3065_v28  ;;  %v11129_v9 = vunpack.i.l.bf16 %v13350_v19  ;;  %v11124_v11 = vunpack.i.l.bf16 %v13346_v32  ;;  %v11145_v42 = vunpack.i.h.bf16 %v13355_v58 }
 0xa3f   :  { %v3312_v49 = vpack.c.bf16 %v11119_v48, %v11130_v56  ;;  %v3310_v0 = vpack.c.bf16 %v11109_v46, %v11120_v20  ;;  %v3055_v27 = vmul.f32 %v13360_v23, %v13264_v6 }
 0xa45   :  { %11147 = vrot.lane.b32.xlu0 %v11146_v54, %s12131_s21  ;;  %3589 = vrot.lane.b32.xlu2 %v3293_v39, %s12104_s0 }
 0xa46   :  { %3585 = vrot.lane.b32.xlu1 %v3291_v52, %s12104_s0  ;;  %v11133_v63 = vpop.permute.xlu0 %11132 }
 0xa47   :  { %v11135_v45 = vunpack.i.h.bf16 %v11133_v63 }
 0xa4d   :  { %3593 = vrot.lane.b32.xlu0 %v3295_v29, %s12104_s0  ;;  %3619 = vrot.lane.b32.xlu2 %v3308_v61, %s12104_s0 }
 0xa4e   :  { %11152 = vrot.lane.b32.xlu1 %v11151_v44, %s12130_s30  ;;  %v13429_v60 = vpop.permute.xlu0 %11137 }
 0xa4f   :  { %v11140_v51 = vunpack.i.h.bf16 %v13429_v60 }
 0xa55   :  { %3603 = vrot.lane.b32.xlu0 %v3300_v17, %s12104_s0 }
 0xa56   :  { %11157 = vrot.lane.b32.xlu1 %v11156_v4, %s12131_s21  ;;  %v11134_v4 = vunpack.i.l.bf16 %v11133_v63  ;;  %v11139_v63 = vunpack.i.l.bf16 %v13429_v60 }
 0xa5d   :  { %3627 = vrot.lane.b32.xlu0 %v3312_v49, %s12104_s0 }
 0xa5e   :  { %3623 = vrot.lane.b32.xlu1 %v3310_v0, %s12104_s0 }
 0xa97   :  { %v13444_v52 = vpop.permute.xlu2 %3577 }
 0xaaf   :  { %v3588_v26 = vpop.permute.xlu0 %3587 }
 0xab0   :  { %v3592_v1 = vpop.permute.xlu1 %3591 }
 0xab1   :  { %v3650_v0 = vsel %vm3643_vm14, %v13444_v52, %v3592_v1  ;;  %v3314_v1 = vpack.c.bf16 %v11129_v9, %v11140_v51 }
 0xab7   :  { %v13431_v15 = vpop.permute.xlu0 %11147 }
 0xab8   :  { %v13434_v22 = vunpack.i.l.bf16 %v13431_v15  ;;  %v3586_v35 = vpop.permute.xlu1 %3585 }
 0xab9   :  { %v3647_v60 = vsel %vm3643_vm14, %v13444_v52, %v3586_v35 }
 0xaba   :  { %v3213_v50 = vsel %vm3206_vm13, %v11120_v20, %v13434_v22  ;;  %v3214_v54 = vsel %vm3206_vm13, %v11109_v46, %v13434_v22  ;;  %v3215_v39 = vsel %vm3206_vm13, %v11130_v56, %v13434_v22  ;;  %v3216_v5 = vsel %vm3206_vm13, %v11119_v48, %v13434_v22 }
 0xabb   :  { %v3311_v28 = vpack.c.bf16 %v3214_v54, %v3213_v50  ;;  %v3217_v19 = vsel %vm3206_vm13, %v11140_v51, %v13434_v22  ;;  %v3218_v29 = vsel %vm3206_vm13, %v11129_v9, %v13434_v22  ;;  %v3313_v61 = vpack.c.bf16 %v3216_v5, %v3215_v39  ;;  %v3590_v50 = vpop.permute.xlu2 %3589 }
 0xabc   :  { %v3315_v44 = vpack.c.bf16 %v3218_v29, %v3217_v19  ;;  %v3301_v56 = vpack.c.bf16 %v11124_v11, %v11135_v45  ;;  %v3649_v58 = vsel %vm3643_vm14, %v13444_v52, %v3590_v50  ;;  %v11150_v54 = vunpack.i.h.bf16 %v13431_v15 }
 0xabd   :  { %3625 = vrot.lane.b32.xlu2 %v3311_v28, %s12104_s0  ;;  %3629 = vrot.lane.b32.xlu1 %v3313_v61, %s12104_s0  ;;  %v3648_v29 = vsel %vm3643_vm14, %v13444_v52, %v3588_v26  ;;  %v3211_v26 = vsel %vm3206_vm13, %v11110_v43, %v13434_v22  ;;  %v3212_v51 = vsel %vm3206_vm13, %v11099_v38, %v13434_v22  ;;  %v11089_v38 = vunpack.i.l.bf16 %v13391_v3 }
 0xabe   :  { %3633 = vrot.lane.b32.xlu0 %v3315_v44, %s12104_s0  ;;  %v3220_v35 = vsel %vm3206_vm13, %v11139_v63, %v13434_v22  ;;  %v3221_v44 = vsel %vm3206_vm13, %v11150_v54, %v13434_v22  ;;  %v3056_v43 = vmul.f32 %v13360_v23, %v13249_v21  ;;  %v11115_v11 = vunpack.i.h.bf16 %v13406_v47 }
 0xabf   :  { %v3594_v30 = vpop.permute.xlu0 %3593  ;;  %v3054_v47 = vmul.f32 %v13360_v23, %v13233_v16 }
 0xac0   :  { %v3651_v37 = vsel %vm3643_vm14, %v13444_v52, %v3594_v30  ;;  %v11153_v17 = vpop.permute.xlu1 %11152  ;;  %v3309_v30 = vpack.c.bf16 %v3212_v51, %v3211_v26  ;;  %v3333_v26 = vld [vmem:[#allocation24 + $0x68] sm:$0xff]  ;;  %v3335_v51 = vld [vmem:[#allocation24 + $0x78] sm:$0xff] }
 0xac1   :  { %v11155_v48 = vunpack.i.h.bf16 %v11153_v17  ;;  %v11154_v20 = vunpack.i.l.bf16 %v11153_v17  ;;  %3684 = vmatpush.bf16.msrb.mxu0 %v3651_v37  ;;  %v11100_v37 = vunpack.i.h.bf16 %v13344_v24  ;;  %v11104_v17 = vunpack.i.l.bf16 %v13371_v31 }
 0xac2   :  { %v11094_v24 = vunpack.i.l.bf16 %v13342_v34 }
 0xac3   :  { %v3302_v46 = vpack.c.bf16 %v11134_v4, %v11155_v48  ;;  %v3303_v49 = vpack.c.bf16 %v11154_v20, %v11145_v42  ;;  %v3290_v42 = vpack.c.bf16 %v3056_v43, %v3055_v27  ;;  %v3299_v4 = vpack.c.bf16 %v11104_v17, %v11115_v11  ;;  %v3325_v27 = vld [vmem:[#allocation24 + $0x28] sm:$0xff]  ;;  %v3322_v43 = vld [vmem:[#allocation24 + $0x10] sm:$0xff] }
 0xac4   :  { %v3306_v48 = vpack.c.bf16 %v11089_v38, %v11100_v37  ;;  %v11105_v20 = vunpack.i.h.bf16 %v13371_v31  ;;  %v11090_v31 = vunpack.i.h.bf16 %v13391_v3  ;;  %v11085_v3 = vunpack.i.h.bf16 %v13362_v53  ;;  %v3321_v17 = vld [vmem:[#allocation24 + $0x8] sm:$0xff] }
 0xac5   :  { %3685 = vmatpush.bf16.msrb.mxu0 %v3650_v0  ;;  %3605 = vrot.lane.b32.xlu2 %v3301_v56, %s12104_s0  ;;  %v3053_v56 = vmul.f32 %v13360_v23, %v13246_v55 }
 0xac6   :  { %3607 = vrot.lane.b32.xlu1 %v3302_v46, %s12104_s0  ;;  %3609 = vrot.lane.b32.xlu0 %v3303_v49, %s12104_s0  ;;  %v3209_v46 = vsel %vm3206_vm13, %v11100_v37, %v13434_v22  ;;  %v3210_v49 = vsel %vm3206_vm13, %v11089_v38, %v13434_v22  ;;  %v3298_v0 = vpack.c.bf16 %v11094_v24, %v11105_v20  ;;  %v3324_v38 = vld [vmem:[#allocation24 + $0x20] sm:$0xff] }
 0xac7   :  { %v3289_v50 = vpack.c.bf16 %v3054_v47, %v3053_v56  ;;  %v3320_v37 = vld [vmem:[#allocation24] sm:$0xff] }
 0xac8   :  { %v11158_v32 = vpop.permute.xlu1 %11157 }
 0xac9   :  { %v11160_v39 = vunpack.i.h.bf16 %v11158_v32  ;;  %v11159_v28 = vunpack.i.l.bf16 %v11158_v32  ;;  %3686 = vmatpush.bf16.msrb.mxu0 %v3649_v58  ;;  %v3307_v32 = vpack.c.bf16 %v3210_v49, %v3209_v46  ;;  %v11084_v58 = vunpack.i.l.bf16 %v13362_v53  ;;  %v3331_v53 = vld [vmem:[#allocation24 + $0x58] sm:$0xff] }
 0xacb   :  { %v3316_v5 = vpack.c.bf16 %v11139_v63, %v11160_v39  ;;  %v3318_v19 = vpack.c.bf16 %v11159_v28, %v11150_v54  ;;  %v3219_v15 = vsel %vm3206_vm13, %v11160_v39, %v13434_v22  ;;  %v3222_v9 = vsel %vm3206_vm13, %v11159_v28, %v13434_v22 }
 0xacc   :  { %v3317_v61 = vpack.c.bf16 %v3220_v35, %v3219_v15  ;;  %v3319_v45 = vpack.c.bf16 %v3222_v9, %v3221_v44  ;;  %v3208_v63 = vsel %vm3206_vm13, %v13352_v8, %v13434_v22  ;;  %v3207_v54 = vsel %vm3206_vm13, %v11090_v31, %v13434_v22  ;;  %v3334_v15 = vld [vmem:[#allocation24 + $0x70] sm:$0xff]  ;;  %v3328_v35 = vld [vmem:[#allocation24 + $0x40] sm:$0xff]  ;;  %v3327_v44 = vld [vmem:[#allocation24 + $0x38] sm:$0xff] }
 0xacd   :  { %3687 = vmatpush.bf16.msrb.mxu0 %v3648_v29  ;;  %3631 = vrot.lane.b32.xlu2 %v3314_v1, %s12104_s0  ;;  %v11095_v39 = vunpack.i.h.bf16 %v13342_v34  ;;  %v3305_v28 = vpack.c.bf16 %v3208_v63, %v3207_v54  ;;  %v16368_v29 = vld [vmem:[#allocation72_spill] sm:$0xff]  ;;  %v3296_v34 = vpack.c.bf16 %v13340_v12, %v11085_v3 }
 0xace   :  { %3635 = vrot.lane.b32.xlu1 %v3316_v5, %s12104_s0  ;;  %3639 = vrot.lane.b32.xlu0 %v3318_v19, %s12104_s0  ;;  %v3304_v5 = vpack.c.bf16 %v13352_v8, %v11090_v31  ;;  %v3051_v19 = vmul.f32 %v13360_v23, %v13231_v41  ;;  %v3332_v8 = vld [vmem:[#allocation24 + $0x60] sm:$0xff]  ;;  %v3326_v12 = vld [vmem:[#allocation24 + $0x30] sm:$0xff] }
 0xacf   :  { %v3297_v1 = vpack.c.bf16 %v11084_v58, %v11095_v39 }
 0xad0   :  { %v3624_v56 = vpop.permute.xlu1 %3623 }
 0xad1   :  { %3688 = vmatpush.bf16.msrb.mxu0 %v3647_v60  ;;  %v3052_v60 = vmul.f32 %v13360_v23, %v16368_v29 }
 0xad3   :  { %v3288_v9 = vpack.c.bf16 %v3052_v60, %v3051_v19 }
 0xad5   :  { %3637 = vrot.lane.b32.xlu2 %v3317_v61, %s12104_s0  ;;  %v3330_v61 = vld [vmem:[#allocation24 + $0x50] sm:$0xff] }
 0xad6   :  { %3641 = vrot.lane.b32.xlu1 %v3319_v45, %s12104_s0  ;;  %3621 = vrot.lane.b32.xlu0 %v3309_v30, %s12104_s0  ;;  %v3329_v45 = vld [vmem:[#allocation24 + $0x48] sm:$0xff]  ;;  %v3620_v30 = vpop.permute.xlu2 %3619 }
 0xadd   :  { %3583 = vrot.lane.b32.xlu2 %v3290_v42, %s12104_s0  ;;  %v3323_v42 = vld [vmem:[#allocation24 + $0x18] sm:$0xff] }
 0xade   :  { %3601 = vrot.lane.b32.xlu1 %v3299_v4, %s12104_s0  ;;  %3615 = vrot.lane.b32.xlu0 %v3306_v48, %s12104_s0  ;;  %v3604_v4 = vpop.permute.xlu0 %3603 }
 0xae5   :  { %3599 = vrot.lane.b32.xlu2 %v3298_v0, %s12104_s0 }
 0xae6   :  { %3581 = vrot.lane.b32.xlu0 %v3289_v50, %s12104_s0  ;;  %3617 = vrot.lane.b32.xlu1 %v3307_v32, %s12104_s0  ;;  %v3628_v47 = vpop.permute.xlu0 %3627 }
 0xaed   :  { %3613 = vrot.lane.b32.xlu2 %v3305_v28, %s12104_s0 }
 0xaee   :  { %3597 = vrot.lane.b32.xlu0 %v3297_v1, %s12104_s0  ;;  %3611 = vrot.lane.b32.xlu1 %v3304_v5, %s12104_s0 }
 0xaf5   :  { %3595 = vrot.lane.b32.xlu2 %v3296_v34, %s12104_s0 }
 0xaf6   :  { %3408 = vperm.xlu0 %10878, %v3334_v15   ;;  %3579 = vrot.lane.b32.xlu1 %v3288_v9, %s12104_s0 }
 0xafd   :  { %3398 = vperm.xlu2 %10880, %v3332_v8  }
 0xafe   :  { %3403 = vperm.xlu0 %10878, %v3333_v26   ;;  %3413 = vperm.xlu1 %10879, %v3335_v51  }
 0xb05   :  { %3393 = vperm.xlu2 %10880, %v3331_v53  }
 0xb06   :  { %3378 = vperm.xlu0 %10878, %v3328_v35   ;;  %3388 = vperm.xlu1 %10879, %v3330_v61  }
 0xb0d   :  { %3368 = vperm.xlu2 %10880, %v3326_v12  }
 0xb0e   :  { %3373 = vperm.xlu0 %10878, %v3327_v44   ;;  %3383 = vperm.xlu1 %10879, %v3329_v45   ;;  %v10591_v44 = vld [vmem:[#allocation22 + $0x4] sm:$0xf]  ;;  %v9693_v45 = vld [vmem:[#allocation22 + $0xc] sm:$0xf0] }
 0xb15   :  { %3363 = vperm.xlu2 %10880, %v3325_v27   ;;  %v9699_v27 = vld [vmem:[#allocation22 + $0x8] sm:$0xf] }
 0xb16   :  { %3348 = vperm.xlu0 %10878, %v3322_v43   ;;  %3358 = vperm.xlu1 %10879, %v3324_v38   ;;  %v10593_v43 = vld [vmem:[#allocation22 + $0x10] sm:$0xf0] }
 0xb17   :  { %v3626_v11 = vpop.permute.xlu2 %3625 }
 0xb18   :  { %v3655_v26 = vsel %vm3643_vm14, %v3624_v56, %v3626_v11  ;;  %v10594_v56 = vld [vmem:[#allocation22 + $0x1c] sm:$0xf] }
 0xb1d   :  { %3338 = vperm.xlu2 %10880, %v3320_v37   ;;  %v9696_v37 = vor.u32 %v10591_v44, %v9693_v45  ;;  %v9747_v44 = vld [vmem:[#allocation22 + $0x68] sm:$0xf]  ;;  %v10605_v45 = vld [vmem:[#allocation22 + $0x70] sm:$0xf0] }
 0xb1e   :  { %3343 = vperm.xlu0 %10878, %v3321_v17   ;;  %3353 = vperm.xlu1 %10879, %v3323_v42   ;;  %v9700_v17 = vor.u32 %v10593_v43, %v9699_v27  ;;  %v9691_v42 = vld [vmem:[#allocation22] sm:$0xf]  ;;  %v9748_v43 = vor.u32 %v10605_v45, %v9747_v44 }
 0xb1f   :  { %v3606_v48 = vpop.permute.xlu2 %3605 }
 0xb27   :  { %v3632_v20 = vpop.permute.xlu2 %3631 }
 0xb2f   :  { %v3638_v24 = vpop.permute.xlu2 %3637  ;;  %v3630_v46 = vpop.permute.xlu1 %3629 }
 0xb30   :  { %v3634_v49 = vpop.permute.xlu0 %3633  ;;  %v3656_v34 = vsel %vm3643_vm14, %v3628_v47, %v3630_v46  ;;  %v9705_v47 = vld [vmem:[#allocation22 + $0x24] sm:$0xf0]  ;;  %v10596_v46 = vld [vmem:[#allocation22 + $0x28] sm:$0xf0] }
 0xb31   :  { %v3657_v60 = vsel %vm3643_vm14, %v3632_v20, %v3634_v49  ;;  %v9708_v49 = vor.u32 %v10594_v56, %v9705_v47  ;;  %v9751_v56 = vld [vmem:[#allocation22 + $0x78] sm:$0xf]  ;;  %v10607_v47 = vld [vmem:[#allocation22 + $0x80] sm:$0xf0] }
 0xb37   :  { %v3584_v0 = vpop.permute.xlu2 %3583 }
 0xb38   :  { %v3608_v50 = vpop.permute.xlu1 %3607  ;;  %v3610_v32 = vpop.permute.xlu0 %3609  ;;  %v3646_v31 = vsel %vm3643_vm14, %v13444_v52, %v3584_v0 }
 0xb39   :  { %3733 = vmatpush.bf16.msrb.mxu1 %v3610_v32  ;;  %3689 = vmatpush.bf16.msrb.mxu0 %v3646_v31  ;;  %v10595_v32 = vld [vmem:[#allocation22 + $0x20] sm:$0xf0] }
 0xb3d   :  { %3734 = vmatpush.bf16.msrb.mxu1 %v3608_v50  ;;  %v9703_v50 = vld [vmem:[#allocation22 + $0x18] sm:$0xf] }
 0xb3e   :  { %v9704_v31 = vor.u32 %v10595_v32, %v9703_v50  ;;  %v9771_v32 = vld [vmem:[#allocation22 + $0x98] sm:$0xf] }
 0xb3f   :  { %v3600_v5 = vpop.permute.xlu2 %3599 }
 0xb40   :  { %v3636_v58 = vpop.permute.xlu1 %3635  ;;  %v3640_v63 = vpop.permute.xlu0 %3639 }
 0xb41   :  { %3735 = vmatpush.bf16.msrb.mxu1 %v3606_v48  ;;  %v3658_v1 = vsel %vm3643_vm14, %v3636_v58, %v3638_v24  ;;  %v9711_v24 = vld [vmem:[#allocation22 + $0x20] sm:$0xf]  ;;  %v10597_v58 = vld [vmem:[#allocation22 + $0x34] sm:$0xf] }
 0xb42   :  { %v9712_v0 = vor.u32 %v10596_v46, %v9711_v24  ;;  %v9752_v24 = vor.u32 %v10607_v47, %v9751_v56 }
 0xb45   :  { %3736 = vmatpush.bf16.msrb.mxu1 %v3604_v4 }
 0xb47   :  { %v3614_v51 = vpop.permute.xlu2 %3613 }
 0xb48   :  { %v3642_v54 = vpop.permute.xlu1 %3641  ;;  %v3622_v39 = vpop.permute.xlu0 %3621 }
 0xb49   :  { %v3659_v28 = vsel %vm3643_vm14, %v3640_v63, %v3642_v54  ;;  %v3654_v53 = vsel %vm3643_vm14, %v3620_v30, %v3622_v39  ;;  %v10592_v30 = vld [vmem:[#allocation22 + $0x8] sm:$0xf0]  ;;  %v9717_v63 = vld [vmem:[#allocation22 + $0x3c] sm:$0xf0]  ;;  %v9723_v54 = vld [vmem:[#allocation22 + $0x38] sm:$0xf] }
 0xb4a   :  { %3782 = vmatpush.bf16.msra.mxu3 %v3659_v28  ;;  %v9692_v20 = vor.u32 %v10592_v30, %v9691_v42  ;;  %v10599_v39 = vld [vmem:[#allocation22 + $0x40] sm:$0xf0]  ;;  %v9720_v28 = vor.u32 %v10597_v58, %v9717_v63  ;;  %v9753_v42 = vld [vmem:[#allocation22 + $0x84] sm:$0xf0]  ;;  %v9759_v30 = vld [vmem:[#allocation22 + $0x80] sm:$0xf] }
 0xb4e   :  { %3783 = vmatpush.bf16.msra.mxu3 %v3658_v1  ;;  %v9724_v1 = vor.u32 %v10599_v39, %v9723_v54  ;;  %v9763_v54 = vld [vmem:[#allocation22 + $0x90] sm:$0xf]  ;;  %v10610_v39 = vld [vmem:[#allocation22 + $0x98] sm:$0xf0] }
 0xb4f   :  { %v3596_v38 = vpop.permute.xlu2 %3595 }
 0xb50   :  { %v3602_v3 = vpop.permute.xlu1 %3601  ;;  %v3616_v19 = vpop.permute.xlu0 %3615 }
 0xb51   :  { %3737 = vmatpush.bf16.msrb.mxu1 %v3602_v3  ;;  %v10598_v3 = vld [vmem:[#allocation22 + $0x38] sm:$0xf0] }
 0xb52   :  { %3784 = vmatpush.bf16.msra.mxu3 %v3657_v60  ;;  %v10600_v60 = vld [vmem:[#allocation22 + $0x4c] sm:$0xf] }
 0xb55   :  { %3738 = vmatpush.bf16.msrb.mxu1 %v3600_v5  ;;  %v9715_v5 = vld [vmem:[#allocation22 + $0x30] sm:$0xf] }
 0xb56   :  { %3785 = vmatpush.bf16.msra.mxu3 %v3656_v34  ;;  %v9729_v34 = vld [vmem:[#allocation22 + $0x54] sm:$0xf0] }
 0xb57   :  { %v13554_v50 = vpop.permute.xlu2 %3398 }
 0xb58   :  { %v3582_v15 = vpop.permute.xlu0 %3581  ;;  %v3618_v9 = vpop.permute.xlu1 %3617 }
 0xb59   :  { %v3645_v8 = vsel %vm3643_vm14, %v13444_v52, %v3582_v15  ;;  %v3653_v12 = vsel %vm3643_vm14, %v3616_v19, %v3618_v9  ;;  %v9716_v19 = vor.u32 %v10598_v3, %v9715_v5  ;;  %v9735_v15 = vld [vmem:[#allocation22 + $0x50] sm:$0xf]  ;;  %v10602_v9 = vld [vmem:[#allocation22 + $0x58] sm:$0xf0]  ;;  %v10612_v3 = vld [vmem:[#allocation22 + $0xac] sm:$0xf] }
 0xb5a   :  { %3690 = vmatpush.bf16.msrb.mxu0 %v3645_v8  ;;  %3786 = vmatpush.bf16.msra.mxu3 %v3655_v26  ;;  %v9732_v8 = vor.u32 %v10600_v60, %v9729_v34  ;;  %v9736_v26 = vor.u32 %v10602_v9, %v9735_v15  ;;  %v9783_v60 = vld [vmem:[#allocation22 + $0xb0] sm:$0xf]  ;;  %v10614_v34 = vld [vmem:[#allocation22 + $0xb8] sm:$0xf0] }
 0xb5e   :  { %3787 = vmatpush.bf16.msra.mxu3 %v3654_v53  ;;  %v10601_v53 = vld [vmem:[#allocation22 + $0x50] sm:$0xf0] }
 0xb5f   :  { %v13558_v5 = vpop.permute.xlu2 %3393 }
 0xb60   :  { %v3598_v35 = vpop.permute.xlu0 %3597  ;;  %v3612_v61 = vpop.permute.xlu1 %3611 }
 0xb61   :  { %3739 = vmatpush.bf16.msrb.mxu1 %v3598_v35  ;;  %v3652_v11 = vsel %vm3643_vm14, %v3612_v61, %v3614_v51  ;;  %v9727_v51 = vld [vmem:[#allocation22 + $0x48] sm:$0xf]  ;;  %v10603_v61 = vld [vmem:[#allocation22 + $0x64] sm:$0xf] }
 0xb62   :  { %3788 = vmatpush.bf16.msra.mxu3 %v3653_v12  ;;  %v9728_v35 = vor.u32 %v10601_v53, %v9727_v51  ;;  %v9741_v12 = vld [vmem:[#allocation22 + $0x6c] sm:$0xf0]  ;;  %v9775_v51 = vld [vmem:[#allocation22 + $0xa8] sm:$0xf]  ;;  %v10613_v53 = vld [vmem:[#allocation22 + $0xb0] sm:$0xf0] }
 0xb63   :  { %v9744_v27 = vor.u32 %v10603_v61, %v9741_v12 }
 0xb65   :  { %3740 = vmatpush.bf16.msrb.mxu1 %v3596_v38  ;;  %v9739_v38 = vld [vmem:[#allocation22 + $0x60] sm:$0xf] }
 0xb66   :  { %3789 = vmatpush.bf16.msra.mxu3 %v3652_v11 }
 0xb68   :  { %3741 = vmatmul.bf16.vlgmr.msrb.gmra.mxu1 %v9696_v37  ;;  %v3580_v4 = vpop.permute.xlu1 %3579  ;;  %v10604_v37 = vld [vmem:[#allocation22 + $0x68] sm:$0xf0]  ;;  %v13552_v46 = vpop.permute.xlu0 %3408 }
 0xb69   :  { %3790 = vmatmul.bf16.vlgmr.msra.gmra.mxu3 %v9700_v17  ;;  %v3644_v48 = vsel %vm3643_vm14, %v13444_v52, %v3580_v4  ;;  %v9740_v11 = vor.u32 %v10604_v37, %v9739_v38  ;;  %v10606_v17 = vld [vmem:[#allocation22 + $0x7c] sm:$0xf]  ;;  %v10608_v4 = vld [vmem:[#allocation22 + $0x88] sm:$0xf0] }
 0xb6a   :  { %3691 = vmatpush.bf16.msrb.mxu0 %v3644_v48  ;;  %v9756_v48 = vor.u32 %v10606_v17, %v9753_v42 }
 0xb6d   :  { %3692 = vmatmul.bf16.vlgmr.msrb.gmra.mxu0 %v9692_v20  ;;  %v9760_v20 = vor.u32 %v10608_v4, %v9759_v30 }
 0xb70   :  { %v13564_v61 = vpop.permute.xlu1 %3413 }
 0xb78   :  { %3746 = vmatmul.bf16.gmra.mxu1 %v9708_v49  ;;  %v10609_v49 = vld [vmem:[#allocation22 + $0x94] sm:$0xf]  ;;  %v13570_v45 = vpop.permute.xlu1 %3388 }
 0xb79   :  { %3795 = vmatmul.bf16.gmra.mxu3 %v9712_v0  ;;  %v9765_v0 = vld [vmem:[#allocation22 + $0x9c] sm:$0xf0] }
 0xb7a   :  { %v9768_v58 = vor.u32 %v10609_v49, %v9765_v0 }
 0xb7d   :  { %3697 = vmatmul.bf16.gmra.mxu0 %v9704_v31  ;;  %v10611_v31 = vld [vmem:[#allocation22 + $0xa0] sm:$0xf0] }
 0xb7e   :  { %v9772_v63 = vor.u32 %v10611_v31, %v9771_v32 }
 0xb80   :  { %v13572_v4 = vpop.permute.xlu1 %3383 }
 0xb88   :  { %3751 = vmatmul.bf16.gmra.mxu1 %v9720_v28  ;;  %v9764_v28 = vor.u32 %v10610_v39, %v9763_v54 }
 0xb89   :  { %3800 = vmatmul.bf16.gmra.mxu3 %v9724_v1  ;;  %v13556_v1 = vpop.permute.xlu0 %3403 }
 0xb8d   :  { %3702 = vmatmul.bf16.gmra.mxu0 %v9716_v19  ;;  %v9777_v19 = vld [vmem:[#allocation22 + $0xb4] sm:$0xf0] }
 0xb8e   :  { %v9780_v9 = vor.u32 %v10612_v3, %v9777_v19 }
 0xb91   :  { %v13560_v15 = vpop.permute.xlu0 %3378 }
 0xb98   :  { %3756 = vmatmul.bf16.gmra.mxu1 %v9732_v8  ;;  %v9784_v8 = vor.u32 %v10614_v34, %v9783_v60 }
 0xb99   :  { %3805 = vmatmul.bf16.gmra.mxu3 %v9736_v26  ;;  %v13562_v26 = vpop.permute.xlu2 %3368  ;;  %v13566_v12 = vpop.permute.xlu0 %3373 }
 0xb9d   :  { %3707 = vmatmul.bf16.gmra.mxu0 %v9728_v35  ;;  %v9776_v35 = vor.u32 %v10613_v53, %v9775_v51 }
 0xba1   :  { %v13568_v44 = vpop.permute.xlu2 %3363 }
 0xba8   :  { %3761 = vmatmul.bf16.gmra.mxu1 %v9744_v27 }
 0xba9   :  { %3810 = vmatmul.bf16.gmra.mxu3 %v9748_v43  ;;  %v3349_v43 = vpop.permute.xlu0 %3348  ;;  %v3339_v38 = vpop.permute.xlu2 %3338 }
 0xbad   :  { %3712 = vmatmul.bf16.gmra.mxu0 %v9740_v11 }
 0xbb8   :  { %3766 = vmatmul.bf16.gmra.mxu1 %v9756_v48 }
 0xbb9   :  { %3815 = vmatmul.bf16.gmra.mxu3 %v9760_v20  ;;  %v3344_v20 = vpop.permute.xlu0 %3343 }
 0xbbd   :  { %3717 = vmatmul.bf16.gmra.mxu0 %v9752_v24 }
 0xbc8   :  { %3771 = vmatmul.bf16.gmra.mxu1 %v9768_v58  ;;  %v3359_v58 = vpop.permute.xlu1 %3358 }
 0xbc9   :  { %3820 = vmatmul.bf16.gmra.mxu3 %v9772_v63 }
 0xbcd   :  { %3722 = vmatmul.bf16.gmra.mxu0 %v9764_v28 }
 0xbd8   :  { %3776 = vmatmul.bf16.gmra.mxu1 %v9780_v9 }
 0xbd9   :  { %3825 = vmatmul.bf16.gmra.mxu3 %v9784_v8 }
 0xbdd   :  { %3727 = vmatmul.bf16.gmra.mxu0 %v9776_v35 }
 0xbe5   :  { %v3742_v27 = vpop.f32.mrf.mxu1 }
 0xbea   :  { %v3693_v37 = vpop.f32.mrf.mxu0 }
 0xbeb   :  { %v3694_v11 = vadd.f32 %v3693_v37, %v3339_v38  ;;  %v3354_v37 = vpop.permute.xlu1 %3353 }
 0xbec   :  { %v3791_v17 = vpop.f32.mrf.mxu3 }
 0xbed   :  { %v3743_v42 = vadd.f32 %v3742_v27, %v3694_v11  ;;  %v3744_v30 = vpop.f32.mrf.mxu1 }
 0xbef   :  { %v3792_v48 = vadd.f32 %v3791_v17, %v3743_v42 }
 0xbf1   :  { %v3831_v24 = vmul.f32 0.1, %v3792_v48 }
 0xbf2   :  { %v3695_v56 = vpop.f32.mrf.mxu0 }
 0xbf3   :  { %v3696_v47 = vadd.f32 %v3695_v56, %v3344_v20  ;;  %v3847_v63 = vmax.f32 %v3792_v48, %v3831_v24 }
 0xbf4   :  { %v3793_v49 = vpop.f32.mrf.mxu3 }
 0xbf5   :  { %v3745_v0 = vadd.f32 %v3744_v30, %v3696_v47  ;;  %v3747_v32 = vpop.f32.mrf.mxu1  ;;  %v3879_v19 = vmul.f32 %v3847_v63, %v13189_v59  ;;  %v13576_v34 = vmul.f32 %v13360_v23, %v3847_v63 }
 0xbf7   :  { %v3794_v31 = vadd.f32 %v3793_v49, %v3745_v0 }
 0xbf9   :  { %v3832_v54 = vmul.f32 0.1, %v3794_v31 }
 0xbfa   :  { %v3698_v39 = vpop.f32.mrf.mxu0 }
 0xbfb   :  { %v3848_v28 = vmax.f32 %v3794_v31, %v3832_v54  ;;  %v3699_v3 = vadd.f32 %v3698_v39, %v3349_v43 }
 0xbfc   :  { %v3796_v60 = vpop.f32.mrf.mxu3 }
 0xbfd   :  { %v3880_v9 = vmul.f32 %v3848_v28, %v13189_v59  ;;  %v3748_v8 = vadd.f32 %v3747_v32, %v3699_v3  ;;  %v3749_v51 = vpop.f32.mrf.mxu1  ;;  %v11161_v53 = vpack.i.bf16 %v3848_v28, %v3847_v63  ;;  %v13580_v35 = vmul.f32 %v13360_v23, %v3848_v28 }
 0xbff   :  { %11162 = vrot.lane.b32.xlu0 %v11161_v53, %s12130_s30  ;;  %v11166_v27 = vpack.i.bf16 %v3880_v9, %v3879_v19  ;;  %v4087_v43 = vpack.c.bf16 %v13580_v35, %v13576_v34  ;;  %v3797_v38 = vadd.f32 %v3796_v60, %v3748_v8 }
 0xc01   :  { %11167 = vrot.lane.b32.xlu1 %v11166_v27, %s12131_s21  ;;  %v3833_v42 = vmul.f32 0.1, %v3797_v38 }
 0xc02   :  { %v3700_v11 = vpop.f32.mrf.mxu0 }
 0xc03   :  { %v3701_v17 = vadd.f32 %v3700_v11, %v3354_v37  ;;  %v3849_v47 = vmax.f32 %v3797_v38, %v3833_v42 }
 0xc04   :  { %v3798_v30 = vpop.f32.mrf.mxu3 }
 0xc05   :  { %v3750_v48 = vadd.f32 %v3749_v51, %v3701_v17  ;;  %v3752_v20 = vpop.f32.mrf.mxu1  ;;  %v3881_v31 = vmul.f32 %v3849_v47, %v13189_v59  ;;  %v13588_v54 = vmul.f32 %v13360_v23, %v3849_v47 }
 0xc07   :  { %v3799_v56 = vadd.f32 %v3798_v30, %v3750_v48 }
 0xc09   :  { %v3834_v24 = vmul.f32 0.1, %v3799_v56 }
 0xc0a   :  { %v3703_v49 = vpop.f32.mrf.mxu0 }
 0xc0b   :  { %v3850_v0 = vmax.f32 %v3799_v56, %v3834_v24  ;;  %v3704_v32 = vadd.f32 %v3703_v49, %v3359_v58 }
 0xc0c   :  { %v3801_v63 = vpop.f32.mrf.mxu3 }
 0xc0d   :  { %v3882_v39 = vmul.f32 %v3850_v0, %v13189_v59  ;;  %v3753_v28 = vadd.f32 %v3752_v20, %v3704_v32  ;;  %v3754_v3 = vpop.f32.mrf.mxu1  ;;  %v11171_v19 = vpack.i.bf16 %v3850_v0, %v3849_v47  ;;  %v13592_v60 = vmul.f32 %v13360_v23, %v3850_v0 }
 0xc0f   :  { %11172 = vrot.lane.b32.xlu1 %v11171_v19, %s12130_s30  ;;  %v11176_v9 = vpack.i.bf16 %v3882_v39, %v3881_v31  ;;  %v4088_v58 = vpack.c.bf16 %v13592_v60, %v13588_v54  ;;  %v3802_v8 = vadd.f32 %v3801_v63, %v3753_v28 }
 0xc11   :  { %11177 = vrot.lane.b32.xlu2 %v11176_v9, %s12131_s21  ;;  %v3835_v27 = vmul.f32 0.1, %v3802_v8 }
 0xc12   :  { %v3705_v51 = vpop.f32.mrf.mxu0 }
 0xc13   :  { %v3706_v53 = vadd.f32 %v3705_v51, %v13568_v44  ;;  %v3851_v42 = vmax.f32 %v3802_v8, %v3835_v27 }
 0xc14   :  { %v3803_v38 = vpop.f32.mrf.mxu3 }
 0xc15   :  { %v3755_v37 = vadd.f32 %v3754_v3, %v3706_v53  ;;  %v3757_v11 = vpop.f32.mrf.mxu1  ;;  %v3883_v47 = vmul.f32 %v3851_v42, %v13189_v59  ;;  %v13602_v49 = vmul.f32 %v13360_v23, %v3851_v42 }
 0xc17   :  { %v3804_v17 = vadd.f32 %v3803_v38, %v3755_v37 }
 0xc19   :  { %v3836_v30 = vmul.f32 0.1, %v3804_v17 }
 0xc1a   :  { %v3708_v48 = vpop.f32.mrf.mxu0 }
 0xc1b   :  { %v3852_v20 = vmax.f32 %v3804_v17, %v3836_v30  ;;  %v3709_v56 = vadd.f32 %v3708_v48, %v13562_v26 }
 0xc1c   :  { %v3806_v24 = vpop.f32.mrf.mxu3 }
 0xc1d   :  { %v3884_v0 = vmul.f32 %v3852_v20, %v13189_v59  ;;  %v3758_v44 = vadd.f32 %v3757_v11, %v3709_v56  ;;  %v3759_v32 = vpop.f32.mrf.mxu1  ;;  %v11181_v31 = vpack.i.bf16 %v3852_v20, %v3851_v42  ;;  %v13606_v63 = vmul.f32 %v13360_v23, %v3852_v20 }
 0xc1f   :  { %11182 = vrot.lane.b32.xlu2 %v11181_v31, %s12130_s30  ;;  %v11186_v39 = vpack.i.bf16 %v3884_v0, %v3883_v47  ;;  %v4089_v26 = vpack.c.bf16 %v13606_v63, %v13602_v49  ;;  %v3807_v28 = vadd.f32 %v3806_v24, %v3758_v44 }
 0xc21   :  { %11187 = vrot.lane.b32.xlu0 %v11186_v39, %s12131_s21  ;;  %v3837_v8 = vmul.f32 0.1, %v3807_v28 }
 0xc22   :  { %v3710_v3 = vpop.f32.mrf.mxu0 }
 0xc23   :  { %v3711_v19 = vadd.f32 %v3710_v3, %v13566_v12  ;;  %v3853_v38 = vmax.f32 %v3807_v28, %v3837_v8 }
 0xc24   :  { %v3808_v9 = vpop.f32.mrf.mxu3 }
 0xc25   :  { %v3760_v51 = vadd.f32 %v3759_v32, %v3711_v19  ;;  %v3762_v53 = vpop.f32.mrf.mxu1  ;;  %v3885_v48 = vmul.f32 %v3853_v38, %v13189_v59 }
 0xc27   :  { %v3809_v27 = vadd.f32 %v3808_v9, %v3760_v51 }
 0xc29   :  { %v3838_v37 = vmul.f32 0.1, %v3809_v27 }
 0xc2a   :  { %v3713_v11 = vpop.f32.mrf.mxu0 }
 0xc2b   :  { %v3854_v17 = vmax.f32 %v3809_v27, %v3838_v37  ;;  %v3714_v42 = vadd.f32 %v3713_v11, %v13560_v15  ;;  %v3869_v15 = vmul.f32 %v13360_v23, %v3853_v38 }
 0xc2c   :  { %v3811_v30 = vpop.f32.mrf.mxu3 }
 0xc2d   :  { %v3886_v20 = vmul.f32 %v3854_v17, %v13189_v59  ;;  %v3763_v56 = vadd.f32 %v3762_v53, %v3714_v42  ;;  %v3764_v47 = vpop.f32.mrf.mxu1  ;;  %v11191_v24 = vpack.i.bf16 %v3854_v17, %v3853_v38  ;;  %v3870_v44 = vmul.f32 %v13360_v23, %v3854_v17 }
 0xc2f   :  { %11192 = vrot.lane.b32.xlu0 %v11191_v24, %s12130_s30  ;;  %v11196_v12 = vpack.i.bf16 %v3886_v20, %v3885_v48  ;;  %v3812_v0 = vadd.f32 %v3811_v30, %v3763_v56  ;;  %v4090_v9 = vpack.c.bf16 %v3870_v44, %v3869_v15 }
 0xc31   :  { %11197 = vrot.lane.b32.xlu1 %v11196_v12, %s12131_s21  ;;  %v3839_v28 = vmul.f32 0.1, %v3812_v0 }
 0xc32   :  { %v3715_v32 = vpop.f32.mrf.mxu0 }
 0xc33   :  { %v3716_v31 = vadd.f32 %v3715_v32, %v13572_v4  ;;  %v3855_v51 = vmax.f32 %v3812_v0, %v3839_v28 }
 0xc34   :  { %v3813_v39 = vpop.f32.mrf.mxu3 }
 0xc35   :  { %v3765_v3 = vadd.f32 %v3764_v47, %v3716_v31  ;;  %v3767_v19 = vpop.f32.mrf.mxu1  ;;  %v3887_v42 = vmul.f32 %v3855_v51, %v13189_v59  ;;  %v3871_v32 = vmul.f32 %v13360_v23, %v3855_v51 }
 0xc37   :  { %v3814_v8 = vadd.f32 %v3813_v39, %v3765_v3  ;;  %4381 = vrot.lane.b32.xlu0 %v4090_v9, %s12104_s0 }
 0xc39   :  { %v3840_v53 = vmul.f32 0.1, %v3814_v8 }
 0xc3a   :  { %v3718_v27 = vpop.f32.mrf.mxu0 }
 0xc3b   :  { %v3856_v37 = vmax.f32 %v3814_v8, %v3840_v53  ;;  %v3719_v11 = vadd.f32 %v3718_v27, %v13570_v45 }
 0xc3c   :  { %v3816_v17 = vpop.f32.mrf.mxu3 }
 0xc3d   :  { %v3888_v4 = vmul.f32 %v3856_v37, %v13189_v59  ;;  %v3768_v38 = vadd.f32 %v3767_v19, %v3719_v11  ;;  %v3769_v30 = vpop.f32.mrf.mxu1  ;;  %v11201_v48 = vpack.i.bf16 %v3856_v37, %v3855_v51  ;;  %v3872_v12 = vmul.f32 %v13360_v23, %v3856_v37 }
 0xc3f   :  { %11202 = vrot.lane.b32.xlu1 %v11201_v48, %s12130_s30  ;;  %v11206_v20 = vpack.i.bf16 %v3888_v4, %v3887_v42  ;;  %v3817_v56 = vadd.f32 %v3816_v17, %v3768_v38  ;;  %v4091_v39 = vpack.c.bf16 %v3872_v12, %v3871_v32 }
 0xc41   :  { %11207 = vrot.lane.b32.xlu2 %v11206_v20, %s12131_s21  ;;  %v3841_v45 = vmul.f32 0.1, %v3817_v56 }
 0xc42   :  { %v3720_v47 = vpop.f32.mrf.mxu0 }
 0xc43   :  { %v3721_v24 = vadd.f32 %v3720_v47, %v13558_v5  ;;  %v3857_v28 = vmax.f32 %v3817_v56, %v3841_v45 }
 0xc44   :  { %v3818_v0 = vpop.f32.mrf.mxu3 }
 0xc45   :  { %v3770_v44 = vadd.f32 %v3769_v30, %v3721_v24  ;;  %v3772_v31 = vpop.f32.mrf.mxu1  ;;  %v3889_v5 = vmul.f32 %v3857_v28, %v13189_v59  ;;  %v3873_v11 = vmul.f32 %v13360_v23, %v3857_v28 }
 0xc47   :  { %v3819_v15 = vadd.f32 %v3818_v0, %v3770_v44 }
 0xc49   :  { %v3842_v3 = vmul.f32 0.1, %v3819_v15  ;;  %4383 = vrot.lane.b32.xlu2 %v4091_v39, %s12104_s0 }
 0xc4a   :  { %v3723_v19 = vpop.f32.mrf.mxu0 }
 0xc4b   :  { %v3858_v9 = vmax.f32 %v3819_v15, %v3842_v3  ;;  %v3724_v8 = vadd.f32 %v3723_v19, %v13554_v50 }
 0xc4c   :  { %v3821_v53 = vpop.f32.mrf.mxu3 }
 0xc4d   :  { %v3890_v27 = vmul.f32 %v3858_v9, %v13189_v59  ;;  %v3773_v37 = vadd.f32 %v3772_v31, %v3724_v8  ;;  %v3874_v51 = vmul.f32 %v13360_v23, %v3858_v9  ;;  %v3774_v4 = vpop.f32.mrf.mxu1  ;;  %v11211_v38 = vpack.i.bf16 %v3858_v9, %v3857_v28 }
 0xc4f   :  { %v11216_v17 = vpack.i.bf16 %v3890_v27, %v3889_v5  ;;  %v4092_v42 = vpack.c.bf16 %v3874_v51, %v3873_v11  ;;  %v3822_v30 = vadd.f32 %v3821_v53, %v3773_v37 }
 0xc51   :  { %11217 = vrot.lane.b32.xlu0 %v11216_v17, %s12131_s21  ;;  %4385 = vrot.lane.b32.xlu1 %v4092_v42, %s12104_s0  ;;  %v3843_v56 = vmul.f32 0.1, %v3822_v30 }
 0xc52   :  { %11212 = vrot.lane.b32.xlu2 %v11211_v38, %s12130_s30  ;;  %v3725_v50 = vpop.f32.mrf.mxu0 }
 0xc53   :  { %v3726_v48 = vadd.f32 %v3725_v50, %v13556_v1  ;;  %v3859_v45 = vmax.f32 %v3822_v30, %v3843_v56 }
 0xc54   :  { %v3823_v20 = vpop.f32.mrf.mxu3 }
 0xc55   :  { %v3775_v47 = vadd.f32 %v3774_v4, %v3726_v48  ;;  %v3777_v12 = vpop.f32.mrf.mxu1  ;;  %v3891_v39 = vmul.f32 %v3859_v45, %v13189_v59 }
 0xc57   :  { %v3824_v24 = vadd.f32 %v3823_v20, %v3775_v47 }
 0xc59   :  { %v3844_v0 = vmul.f32 0.1, %v3824_v24 }
 0xc5a   :  { %4377 = vrot.lane.b32.xlu2 %v4088_v58, %s12104_s0  ;;  %v3728_v44 = vpop.f32.mrf.mxu0 }
 0xc5b   :  { %v3860_v32 = vmax.f32 %v3824_v24, %v3844_v0  ;;  %v3729_v31 = vadd.f32 %v3728_v44, %v13552_v46  ;;  %v3875_v46 = vmul.f32 %v13360_v23, %v3859_v45 }
 0xc5c   :  { %v3826_v15 = vpop.f32.mrf.mxu3 }
 0xc5d   :  { %v3892_v1 = vmul.f32 %v3860_v32, %v13189_v59  ;;  %v3778_v28 = vadd.f32 %v3777_v12, %v3729_v31  ;;  %v11221_v3 = vpack.i.bf16 %v3860_v32, %v3859_v45  ;;  %v3876_v54 = vmul.f32 %v13360_v23, %v3860_v32  ;;  %v3779_v58 = vpop.f32.mrf.mxu1 }
 0xc5f   :  { %11222 = vrot.lane.b32.xlu0 %v11221_v3, %s12130_s30  ;;  %v11226_v19 = vpack.i.bf16 %v3892_v1, %v3891_v39  ;;  %v3827_v9 = vadd.f32 %v3826_v15, %v3778_v28  ;;  %v4093_v37 = vpack.c.bf16 %v3876_v54, %v3875_v46 }
 0xc61   :  { %11227 = vrot.lane.b32.xlu1 %v11226_v19, %s12131_s21  ;;  %v3845_v53 = vmul.f32 0.1, %v3827_v9 }
 0xc62   :  { %v3730_v60 = vpop.f32.mrf.mxu0 }
 0xc63   :  { %v3731_v8 = vadd.f32 %v3730_v60, %v13564_v61  ;;  %v3861_v51 = vmax.f32 %v3827_v9, %v3845_v53 }
 0xc64   :  { %v3828_v5 = vpop.f32.mrf.mxu3 }
 0xc65   :  { %v3780_v27 = vadd.f32 %v3779_v58, %v3731_v8  ;;  %v3893_v4 = vmul.f32 %v3861_v51, %v13189_v59  ;;  %v3877_v48 = vmul.f32 %v13360_v23, %v3861_v51 }
 0xc67   :  { %v3829_v11 = vadd.f32 %v3828_v5, %v3780_v27  ;;  %4387 = vrot.lane.b32.xlu0 %v4093_v37, %s12104_s0 }
 0xc69   :  { %v3846_v17 = vmul.f32 0.1, %v3829_v11 }
 0xc6b   :  { %v3862_v42 = vmax.f32 %v3829_v11, %v3846_v17  ;;  %v13664_v56 = vpop.permute.xlu2 %11177 }
 0xc6d   :  { %v3894_v38 = vmul.f32 %v3862_v42, %v13189_v59  ;;  %v11231_v30 = vpack.i.bf16 %v3862_v42, %v3861_v51  ;;  %v3878_v50 = vmul.f32 %v13360_v23, %v3862_v42 }
 0xc6f   :  { %11232 = vrot.lane.b32.xlu1 %v11231_v30, %s12130_s30  ;;  %v11236_v61 = vpack.i.bf16 %v3894_v38, %v3893_v4  ;;  %v4094_v20 = vpack.c.bf16 %v3878_v50, %v3877_v48 }
 0xc71   :  { %11237 = vrot.lane.b32.xlu2 %v11236_v61, %s12131_s21  ;;  %v13666_v59 = vpop.permute.xlu0 %11162 }
 0xc73   :  { %v13670_v24 = vpop.permute.xlu1 %11167 }
 0xc77   :  { %4379 = vrot.lane.b32.xlu1 %v4089_v26, %s12104_s0 }
 0xc79   :  { %4389 = vrot.lane.b32.xlu2 %v4094_v20, %s12104_s0  ;;  %v13668_v47 = vpop.permute.xlu2 %11182 }
 0xc81   :  { %v13678_v44 = vpop.permute.xlu1 %11172 }
 0xc93   :  { %v13672_v12 = vpop.permute.xlu0 %11187 }
 0xc9b   :  { %v11208_v45 = vpop.permute.xlu2 %11207 }
 0xc9c   :  { %v11210_v23 = vunpack.i.h.bf16 %v11208_v45  ;;  %v11209_v0 = vunpack.i.l.bf16 %v11208_v45 }
 0xc9e   :  { %v4015_v49 = vsel %vm3206_vm13, %v11209_v0, %v13434_v22  ;;  %v4016_v63 = vsel %vm3206_vm13, %v11210_v23, %v13434_v22  ;;  %v4111_v19 = vpack.c.bf16 %v11210_v23, %v11209_v0 }
 0xc9f   :  { %v4112_v26 = vpack.c.bf16 %v4016_v63, %v4015_v49 }
 0xca1   :  { %v11193_v32 = vpop.permute.xlu0 %11192  ;;  %4425 = vrot.lane.b32.xlu1 %v4112_v26, %s12104_s0 }
 0xca2   :  { %v11195_v31 = vunpack.i.h.bf16 %v11193_v32  ;;  %v11194_v15 = vunpack.i.l.bf16 %v11193_v32 }
 0xca3   :  { %v13681_v39 = vpop.permute.xlu2 %4383  ;;  %v13684_v28 = vpop.permute.xlu1 %11197 }
 0xca4   :  { %v4098_v1 = vpack.c.bf16 %v11195_v31, %v11194_v15 }
 0xca6   :  { %4397 = vrot.lane.b32.xlu0 %v4098_v1, %s12104_s0 }
 0xca9   :  { %v4382_v53 = vpop.permute.xlu0 %4381 }
 0xcac   :  { %v11213_v3 = vpop.permute.xlu2 %11212 }
 0xcad   :  { %v11215_v9 = vunpack.i.h.bf16 %v11213_v3  ;;  %v11214_v54 = vunpack.i.l.bf16 %v11213_v3 }
 0xcae   :  { %4423 = vrot.lane.b32.xlu0 %v4111_v19, %s12104_s0 }
 0xcaf   :  { %v4100_v60 = vpack.c.bf16 %v11215_v9, %v11214_v54 }
 0xcb1   :  { %4401 = vrot.lane.b32.xlu1 %v4100_v60, %s12104_s0  ;;  %v11203_v58 = vpop.permute.xlu1 %11202 }
 0xcb2   :  { %v11205_v8 = vunpack.i.h.bf16 %v11203_v58  ;;  %v11204_v46 = vunpack.i.l.bf16 %v11203_v58 }
 0xcb4   :  { %v4099_v5 = vpack.c.bf16 %v11205_v8, %v11204_v46  ;;  %v13689_v27 = vpop.permute.xlu2 %4377 }
 0xcb6   :  { %4399 = vrot.lane.b32.xlu2 %v4099_v5, %s12104_s0 }
 0xcc3   :  { %v11218_v37 = vpop.permute.xlu0 %11217  ;;  %v4386_v30 = vpop.permute.xlu1 %4385 }
 0xcc4   :  { %v11220_v11 = vunpack.i.h.bf16 %v11218_v37  ;;  %v11219_v51 = vunpack.i.l.bf16 %v11218_v37  ;;  %v4444_v46 = vsel %vm3643_vm14, %v13444_v52, %v4386_v30  ;;  %v11200_v37 = vunpack.i.h.bf16 %v13684_v28 }
 0xcc5   :  { %v11189_v30 = vunpack.i.l.bf16 %v13672_v12 }
 0xcc6   :  { %v4113_v17 = vpack.c.bf16 %v11220_v11, %v11219_v51  ;;  %v4017_v42 = vsel %vm3206_vm13, %v11219_v51, %v13434_v22  ;;  %v4018_v4 = vsel %vm3206_vm13, %v11220_v11, %v13434_v22  ;;  %v11199_v51 = vunpack.i.l.bf16 %v13684_v28 }
 0xcc7   :  { %v4114_v38 = vpack.c.bf16 %v4018_v4, %v4017_v42  ;;  %v4443_v4 = vsel %vm3643_vm14, %v13444_v52, %v13681_v39  ;;  %v4442_v28 = vsel %vm3643_vm14, %v13444_v52, %v4382_v53  ;;  %v4014_v35 = vsel %vm3206_vm13, %v11200_v37, %v13434_v22 }
 0xcc8   :  { %4427 = vrot.lane.b32.xlu2 %v4113_v17, %s12104_s0  ;;  %v4013_v34 = vsel %vm3206_vm13, %v11199_v51, %v13434_v22  ;;  %v11184_v53 = vunpack.i.l.bf16 %v13668_v47 }
 0xcc9   :  { %4429 = vrot.lane.b32.xlu0 %v4114_v38, %s12104_s0 }
 0xccb   :  { %v11238_v61 = vpop.permute.xlu2 %11237 }
 0xccc   :  { %v11240_v1 = vunpack.i.h.bf16 %v11238_v61  ;;  %v11239_v3 = vunpack.i.l.bf16 %v11238_v61  ;;  %v11190_v61 = vunpack.i.h.bf16 %v13672_v12 }
 0xcce   :  { %v4021_v60 = vsel %vm3206_vm13, %v11239_v3, %v13434_v22  ;;  %v4022_v58 = vsel %vm3206_vm13, %v11240_v1, %v13434_v22  ;;  %v4117_v8 = vpack.c.bf16 %v11240_v1, %v11239_v3  ;;  %v4012_v12 = vsel %vm3206_vm13, %v11190_v61, %v13434_v22 }
 0xccf   :  { %v4118_v5 = vpack.c.bf16 %v4022_v58, %v4021_v60  ;;  %v4107_v1 = vpack.c.bf16 %v11190_v61, %v11189_v30  ;;  %v11170_v3 = vunpack.i.h.bf16 %v13670_v24  ;;  %v11164_v60 = vunpack.i.l.bf16 %v13666_v59  ;;  %v4125_v61 = vld [vmem:[#allocation27 + $0x30] sm:$0xff] }
 0xcd1   :  { %v11223_v50 = vpop.permute.xlu0 %11222 }
 0xcd2   :  { %v11225_v48 = vunpack.i.h.bf16 %v11223_v50  ;;  %v11224_v20 = vunpack.i.l.bf16 %v11223_v50  ;;  %v4109_v50 = vpack.c.bf16 %v11200_v37, %v11199_v51  ;;  %v4133_v37 = vld [vmem:[#allocation27 + $0x70] sm:$0xff]  ;;  %v4132_v51 = vld [vmem:[#allocation27 + $0x68] sm:$0xff] }
 0xcd3   :  { %v4390_v45 = vpop.permute.xlu2 %4389  ;;  %v11228_v23 = vpop.permute.xlu1 %11227 }
 0xcd4   :  { %v4446_v0 = vsel %vm3643_vm14, %v13444_v52, %v4390_v45  ;;  %v11230_v49 = vunpack.i.h.bf16 %v11228_v23  ;;  %v11229_v63 = vunpack.i.l.bf16 %v11228_v23  ;;  %v4101_v26 = vpack.c.bf16 %v11225_v48, %v11224_v20 }
 0xcd5   :  { %4479 = vmatpush.bf16.msra.mxu2 %v4446_v0  ;;  %v4011_v48 = vsel %vm3206_vm13, %v11189_v30, %v13434_v22  ;;  %v4110_v23 = vpack.c.bf16 %v4014_v35, %v4013_v34  ;;  %v11180_v0 = vunpack.i.h.bf16 %v13664_v56  ;;  %v4126_v30 = vld [vmem:[#allocation27 + $0x38] sm:$0xff] }
 0xcd6   :  { %4403 = vrot.lane.b32.xlu0 %v4101_v26, %s12104_s0  ;;  %v4115_v32 = vpack.c.bf16 %v11230_v49, %v11229_v63  ;;  %v4019_v31 = vsel %vm3206_vm13, %v11229_v63, %v13434_v22  ;;  %v4020_v15 = vsel %vm3206_vm13, %v11230_v49, %v13434_v22  ;;  %v4108_v45 = vpack.c.bf16 %v4012_v12, %v4011_v48  ;;  %v4121_v48 = vld [vmem:[#allocation27 + $0x10] sm:$0xff]  ;;  %v4119_v12 = vld [vmem:[#allocation27] sm:$0xff] }
 0xcd7   :  { %v4116_v19 = vpack.c.bf16 %v4020_v15, %v4019_v31  ;;  %v11179_v49 = vunpack.i.l.bf16 %v13664_v56  ;;  %v4440_v63 = vsel %vm3643_vm14, %v13444_v52, %v13689_v27  ;;  %v11175_v56 = vunpack.i.h.bf16 %v13678_v44 }
 0xcd8   :  { %4431 = vrot.lane.b32.xlu1 %v4115_v32, %s12104_s0  ;;  %v4010_v32 = vsel %vm3206_vm13, %v11180_v0, %v13434_v22  ;;  %v11174_v31 = vunpack.i.l.bf16 %v13678_v44  ;;  %v11169_v27 = vunpack.i.l.bf16 %v13670_v24  ;;  %v11165_v44 = vunpack.i.h.bf16 %v13666_v59  ;;  %v4129_v59 = vld [vmem:[#allocation27 + $0x50] sm:$0xff] }
 0xcd9   :  { %v4388_v9 = vpop.permute.xlu0 %4387  ;;  %4433 = vrot.lane.b32.xlu2 %v4116_v19, %s12104_s0  ;;  %v4105_v58 = vpack.c.bf16 %v11180_v0, %v11179_v49 }
 0xcda   :  { %v4445_v54 = vsel %vm3643_vm14, %v13444_v52, %v4388_v9  ;;  %v4096_v19 = vpack.c.bf16 %v11175_v56, %v11174_v31  ;;  %v4007_v9 = vsel %vm3206_vm13, %v11169_v27, %v13434_v22  ;;  %v4095_v24 = vpack.c.bf16 %v11165_v44, %v11164_v60 }
 0xcdb   :  { %4480 = vmatpush.bf16.msra.mxu2 %v4445_v54  ;;  %v4008_v54 = vsel %vm3206_vm13, %v11170_v3, %v13434_v22 }
 0xcde   :  { %4435 = vrot.lane.b32.xlu0 %v4117_v8, %s12104_s0  ;;  %v4104_v8 = vpack.c.bf16 %v4008_v54, %v4007_v9 }
 0xcdf   :  { %4481 = vmatpush.bf16.msra.mxu2 %v4444_v46  ;;  %v4131_v46 = vld [vmem:[#allocation27 + $0x60] sm:$0xff] }
 0xce0   :  { %4437 = vrot.lane.b32.xlu1 %v4118_v5, %s12104_s0  ;;  %v4103_v5 = vpack.c.bf16 %v11170_v3, %v11169_v27 }
 0xce1   :  { %v11233_v11 = vpop.permute.xlu1 %11232 }
 0xce2   :  { %v11235_v17 = vunpack.i.h.bf16 %v11233_v11  ;;  %v11234_v42 = vunpack.i.l.bf16 %v11233_v11  ;;  %v4130_v11 = vld [vmem:[#allocation27 + $0x58] sm:$0xff] }
 0xce3   :  { %4482 = vmatpush.bf16.msra.mxu2 %v4443_v4  ;;  %v4128_v4 = vld [vmem:[#allocation27 + $0x48] sm:$0xff] }
 0xce4   :  { %v4102_v38 = vpack.c.bf16 %v11235_v17, %v11234_v42  ;;  %v9946_v17 = vsel %vm5115_vm15, 1.0, %v16362_v18  ;;  %v4127_v42 = vld [vmem:[#allocation27 + $0x40] sm:$0xff] }
 0xce6   :  { %4375 = vrot.lane.b32.xlu0 %v4087_v43, %s12104_s0  ;;  %4405 = vrot.lane.b32.xlu2 %v4102_v38, %s12104_s0  ;;  %v11185_v43 = vunpack.i.h.bf16 %v13668_v47  ;;  %v4009_v47 = vsel %vm3206_vm13, %v11179_v49, %v13434_v22  ;;  %v4134_v22 = vld [vmem:[#allocation27 + $0x78] sm:$0xff]  ;;  %v4123_v38 = vld [vmem:[#allocation27 + $0x20] sm:$0xff] }
 0xce7   :  { %4483 = vmatpush.bf16.msra.mxu2 %v4442_v28  ;;  %v4106_v15 = vpack.c.bf16 %v4010_v32, %v4009_v47  ;;  %v4122_v28 = vld [vmem:[#allocation27 + $0x18] sm:$0xff] }
 0xce8   :  { %4419 = vrot.lane.b32.xlu1 %v4109_v50, %s12104_s0  ;;  %v4097_v26 = vpack.c.bf16 %v11185_v43, %v11184_v53  ;;  %v4124_v50 = vld [vmem:[#allocation27 + $0x28] sm:$0xff] }
 0xce9   :  { %v4380_v39 = vpop.permute.xlu1 %4379  ;;  %v4120_v43 = vld [vmem:[#allocation27 + $0x8] sm:$0xff] }
 0xcea   :  { %v4441_v20 = vsel %vm3643_vm14, %v13444_v52, %v4380_v39 }
 0xceb   :  { %4484 = vmatpush.bf16.msra.mxu2 %v4441_v20 }
 0xcee   :  { %4417 = vrot.lane.b32.xlu0 %v4108_v45, %s12104_s0  ;;  %4421 = vrot.lane.b32.xlu2 %v4110_v23, %s12104_s0 }
 0xcef   :  { %4485 = vmatpush.bf16.msra.mxu2 %v4440_v63 }
 0xcf0   :  { %4395 = vrot.lane.b32.xlu1 %v4097_v26, %s12104_s0 }
 0xcf6   :  { %4413 = vrot.lane.b32.xlu0 %v4106_v15, %s12104_s0  ;;  %4415 = vrot.lane.b32.xlu2 %v4107_v1, %s12104_s0  ;;  %v9787_v15 = vld [vmem:[#allocation25] sm:$0xf]  ;;  %v10616_v1 = vld [vmem:[#allocation25 + $0x8] sm:$0xf0] }
 0xcf7   :  { %v9788_v9 = vor.u32 %v10616_v1, %v9787_v15  ;;  %v9813_v15 = vld [vmem:[#allocation25 + $0x3c] sm:$0xf0] }
 0xcf8   :  { %4393 = vrot.lane.b32.xlu1 %v4096_v19, %s12104_s0 }
 0xcfe   :  { %4411 = vrot.lane.b32.xlu2 %v4105_v58, %s12104_s0  ;;  %4409 = vrot.lane.b32.xlu0 %v4104_v8, %s12104_s0 }
 0xd00   :  { %4391 = vrot.lane.b32.xlu1 %v4095_v24, %s12104_s0 }
 0xd06   :  { %4407 = vrot.lane.b32.xlu2 %v4103_v5, %s12104_s0  ;;  %4197 = vperm.xlu0 %10878, %v4131_v46   ;;  %s12132_s0 = smov 112  }
 0xd08   :  { %4207 = vperm.xlu1 %10879, %v4133_v37   ;;  %v9799_v37 = vld [vmem:[#allocation25 + $0x18] sm:$0xf] }
 0xd0e   :  { %4212 = vperm.xlu2 %10880, %v4134_v22   ;;  %4192 = vperm.xlu0 %10878, %v4130_v11  }
 0xd10   :  { %4202 = vperm.xlu1 %10879, %v4132_v51   ;;  %v4400_v39 = vpop.permute.xlu2 %4399 }
 0xd13   :  { %v4426_v45 = vpop.permute.xlu1 %4425 }
 0xd16   :  { %4187 = vperm.xlu2 %10880, %v4129_v59   ;;  %5119 = vrot.lane.b32.xlu0 %v9946_v17, %s12096_s7 }
 0xd18   :  { %4177 = vperm.xlu1 %10879, %v4127_v42   ;;  %v4398_v34 = vpop.permute.xlu0 %4397  ;;  %v9795_v42 = vld [vmem:[#allocation25 + $0x8] sm:$0xf] }
 0xd1e   :  { %4182 = vperm.xlu2 %10880, %v4128_v4   ;;  %4157 = vperm.xlu0 %10878, %v4123_v38   ;;  %v10617_v4 = vld [vmem:[#allocation25 + $0x10] sm:$0xf0]  ;;  %v10615_v38 = vld [vmem:[#allocation25 + $0x4] sm:$0xf] }
 0xd20   :  { %4167 = vperm.xlu1 %10879, %v4125_v61   ;;  %v4424_v53 = vpop.permute.xlu0 %4423  ;;  %v9789_v61 = vld [vmem:[#allocation25 + $0xc] sm:$0xf0] }
 0xd21   :  { %v4451_v58 = vsel %vm3643_vm14, %v4424_v53, %v4426_v45  ;;  %v9807_v53 = vld [vmem:[#allocation25 + $0x20] sm:$0xf]  ;;  %v10618_v45 = vld [vmem:[#allocation25 + $0x1c] sm:$0xf] }
 0xd22   :  { %v4428_v35 = vpop.permute.xlu2 %4427 }
 0xd23   :  { %v4402_v49 = vpop.permute.xlu1 %4401 }
 0xd26   :  { %4172 = vperm.xlu2 %10880, %v4126_v30   ;;  %4152 = vperm.xlu0 %10878, %v4122_v28  }
 0xd28   :  { %4162 = vperm.xlu1 %10879, %v4124_v50  }
 0xd2e   :  { %4147 = vperm.xlu2 %10880, %v4121_v48  }
 0xd30   :  { %4137 = vperm.xlu1 %10879, %v4119_v12   ;;  %v9792_v12 = vor.u32 %v10615_v38, %v9789_v61  ;;  %v9855_v61 = vld [vmem:[#allocation25 + $0x80] sm:$0xf] }
 0xd33   :  { %v4434_v20 = vpop.permute.xlu2 %4433 }
 0xd36   :  { %4142 = vperm.xlu2 %10880, %v4120_v43  }
 0xd3b   :  { %v4430_v23 = vpop.permute.xlu0 %4429 }
 0xd3c   :  { %v4452_v44 = vsel %vm3643_vm14, %v4428_v35, %v4430_v23  ;;  %v10622_v35 = vld [vmem:[#allocation25 + $0x38] sm:$0xf0]  ;;  %v9801_v23 = vld [vmem:[#allocation25 + $0x24] sm:$0xf0] }
 0xd40   :  { %v4406_v0 = vpop.permute.xlu2 %4405 }
 0xd41   :  { %4528 = vmatpush.bf16.msra.mxu0 %v4406_v0 }
 0xd48   :  { %v4404_v63 = vpop.permute.xlu0 %4403  ;;  %v4422_v32 = vpop.permute.xlu2 %4421 }
 0xd49   :  { %4529 = vmatpush.bf16.msra.mxu0 %v4404_v63  ;;  %v9823_v63 = vld [vmem:[#allocation25 + $0x48] sm:$0xf] }
 0xd4a   :  { %v4432_v26 = vpop.permute.xlu1 %4431 }
 0xd4b   :  { %v4453_v3 = vsel %vm3643_vm14, %v4432_v26, %v4434_v20  ;;  %v10620_v20 = vld [vmem:[#allocation25 + $0x28] sm:$0xf0]  ;;  %v10625_v26 = vld [vmem:[#allocation25 + $0x50] sm:$0xf0] }
 0xd4c   :  { %v9808_v0 = vor.u32 %v10620_v20, %v9807_v53  ;;  %v9867_v20 = vld [vmem:[#allocation25 + $0x98] sm:$0xf] }
 0xd4d   :  { %4530 = vmatpush.bf16.msra.mxu0 %v4402_v49  ;;  %v9804_v49 = vor.u32 %v10618_v45, %v9801_v23  ;;  %v10635_v45 = vld [vmem:[#allocation25 + $0xa0] sm:$0xf0]  ;;  %v10633_v23 = vld [vmem:[#allocation25 + $0x94] sm:$0xf] }
 0xd50   :  { %v4436_v47 = vpop.permute.xlu0 %4435  ;;  %v4416_v60 = vpop.permute.xlu2 %4415 }
 0xd51   :  { %4531 = vmatpush.bf16.msra.mxu0 %v4400_v39  ;;  %v9796_v39 = vor.u32 %v10617_v4, %v9795_v42  ;;  %v9859_v42 = vld [vmem:[#allocation25 + $0x90] sm:$0xf]  ;;  %v10634_v4 = vld [vmem:[#allocation25 + $0x98] sm:$0xf0] }
 0xd52   :  { %v4438_v56 = vpop.permute.xlu1 %4437  ;;  %v9860_v38 = vor.u32 %v10634_v4, %v9859_v42 }
 0xd53   :  { %v4454_v31 = vsel %vm3643_vm14, %v4436_v47, %v4438_v56  ;;  %v9824_v47 = vor.u32 %v10625_v26, %v9823_v63  ;;  %v10623_v56 = vld [vmem:[#allocation25 + $0x40] sm:$0xf0]  ;;  %v9868_v63 = vor.u32 %v10635_v45, %v9867_v20 }
 0xd54   :  { %4577 = vmatpush.bf16.msra.mxu1 %v4454_v31  ;;  %v10621_v31 = vld [vmem:[#allocation25 + $0x34] sm:$0xf] }
 0xd55   :  { %4532 = vmatpush.bf16.msra.mxu0 %v4398_v34  ;;  %v9811_v34 = vld [vmem:[#allocation25 + $0x30] sm:$0xf] }
 0xd56   :  { %v9812_v43 = vor.u32 %v10622_v35, %v9811_v34  ;;  %v10637_v34 = vld [vmem:[#allocation25 + $0xb0] sm:$0xf0] }
 0xd58   :  { %v4376_v27 = vpop.permute.xlu0 %4375  ;;  %4578 = vmatpush.bf16.msra.mxu1 %v4453_v3  ;;  %v4412_v5 = vpop.permute.xlu2 %4411  ;;  %v9816_v3 = vor.u32 %v10621_v31, %v9813_v15  ;;  %v10638_v31 = vld [vmem:[#allocation25 + $0xb8] sm:$0xf0]  ;;  %v10636_v15 = vld [vmem:[#allocation25 + $0xac] sm:$0xf] }
 0xd59   :  { %v4439_v19 = vsel %vm3643_vm14, %v13444_v52, %v4376_v27  ;;  %v10619_v52 = vld [vmem:[#allocation25 + $0x20] sm:$0xf0]  ;;  %v9835_v27 = vld [vmem:[#allocation25 + $0x60] sm:$0xf] }
 0xd5a   :  { %4486 = vmatpush.bf16.msra.mxu2 %v4439_v19  ;;  %v4420_v54 = vpop.permute.xlu1 %4419  ;;  %v9800_v51 = vor.u32 %v10619_v52, %v9799_v37  ;;  %v10628_v19 = vld [vmem:[#allocation25 + $0x68] sm:$0xf0]  ;;  %v9843_v52 = vld [vmem:[#allocation25 + $0x68] sm:$0xf] }
 0xd5b   :  { %v4450_v46 = vsel %vm3643_vm14, %v4420_v54, %v4422_v32  ;;  %v9819_v32 = vld [vmem:[#allocation25 + $0x38] sm:$0xf]  ;;  %v9831_v54 = vld [vmem:[#allocation25 + $0x50] sm:$0xf] }
 0xd5c   :  { %4579 = vmatpush.bf16.msra.mxu1 %v4452_v44  ;;  %v9820_v1 = vor.u32 %v10623_v56, %v9819_v32  ;;  %v10626_v44 = vld [vmem:[#allocation25 + $0x58] sm:$0xf0]  ;;  %v9879_v56 = vld [vmem:[#allocation25 + $0xb0] sm:$0xf] }
 0xd5d   :  { %4487 = vmatmul.bf16.vlgmr.msra.gmra.mxu2 %v9788_v9  ;;  %v9836_v9 = vor.u32 %v10628_v19, %v9835_v27 }
 0xd60   :  { %v4418_v8 = vpop.permute.xlu0 %4417  ;;  %4580 = vmatpush.bf16.msra.mxu1 %v4451_v58  ;;  %v4408_v30 = vpop.permute.xlu2 %4407  ;;  %v9825_v58 = vld [vmem:[#allocation25 + $0x54] sm:$0xf0] }
 0xd61   :  { %v4449_v22 = vsel %vm3643_vm14, %v4416_v60, %v4418_v8  ;;  %v10624_v60 = vld [vmem:[#allocation25 + $0x4c] sm:$0xf]  ;;  %v9832_v8 = vor.u32 %v10626_v44, %v9831_v54 }
 0xd62   :  { %v4396_v24 = vpop.permute.xlu1 %4395 }
 0xd63   :  { %4533 = vmatpush.bf16.msra.mxu0 %v4396_v24  ;;  %v9828_v24 = vor.u32 %v10624_v60, %v9825_v58 }
 0xd64   :  { %4581 = vmatpush.bf16.msra.mxu1 %v4450_v46  ;;  %v9847_v46 = vld [vmem:[#allocation25 + $0x78] sm:$0xf] }
 0xd68   :  { %v4414_v11 = vpop.permute.xlu0 %4413  ;;  %4582 = vmatpush.bf16.msra.mxu1 %v4449_v22  ;;  %v10629_v22 = vld [vmem:[#allocation25 + $0x70] sm:$0xf0]  ;;  %v13785_v35 = vpop.permute.xlu2 %4212 }
 0xd69   :  { %v4448_v17 = vsel %vm3643_vm14, %v4412_v5, %v4414_v11  ;;  %v10631_v5 = vld [vmem:[#allocation25 + $0x80] sm:$0xf0] }
 0xd6a   :  { %v4394_v59 = vpop.permute.xlu1 %4393  ;;  %v9848_v37 = vor.u32 %v10631_v5, %v9847_v46  ;;  %v10627_v11 = vld [vmem:[#allocation25 + $0x64] sm:$0xf] }
 0xd6b   :  { %4534 = vmatpush.bf16.msra.mxu0 %v4394_v59  ;;  %v9844_v59 = vor.u32 %v10629_v22, %v9843_v52 }
 0xd6c   :  { %4583 = vmatpush.bf16.msra.mxu1 %v4448_v17 }
 0xd6d   :  { %4492 = vmatmul.bf16.gmra.mxu2 %v9800_v51  ;;  %v9837_v51 = vld [vmem:[#allocation25 + $0x6c] sm:$0xf0] }
 0xd6e   :  { %v9840_v17 = vor.u32 %v10627_v11, %v9837_v51 }
 0xd70   :  { %v4410_v28 = vpop.permute.xlu0 %4409 }
 0xd71   :  { %v4447_v50 = vsel %vm3643_vm14, %v4408_v30, %v4410_v28  ;;  %v10632_v30 = vld [vmem:[#allocation25 + $0x88] sm:$0xf0]  ;;  %v10630_v28 = vld [vmem:[#allocation25 + $0x7c] sm:$0xf] }
 0xd72   :  { %v4392_v48 = vpop.permute.xlu1 %4391  ;;  %4584 = vmatpush.bf16.msra.mxu1 %v4447_v50  ;;  %v9849_v50 = vld [vmem:[#allocation25 + $0x84] sm:$0xf0] }
 0xd73   :  { %4535 = vmatpush.bf16.msra.mxu0 %v4392_v48  ;;  %v9852_v48 = vor.u32 %v10630_v28, %v9849_v50 }
 0xd75   :  { %4585 = vmatmul.bf16.vlgmr.msra.gmra.mxu1 %v9796_v39  ;;  %v9856_v39 = vor.u32 %v10632_v30, %v9855_v61 }
 0xd76   :  { %4536 = vmatmul.bf16.vlgmr.msra.gmra.mxu0 %v9792_v12  ;;  %v9871_v12 = vld [vmem:[#allocation25 + $0xa8] sm:$0xf] }
 0xd78   :  { %v13795_v27 = vpop.permute.xlu0 %4197 }
 0xd7a   :  { %v13787_v53 = vpop.permute.xlu1 %4207 }
 0xd7d   :  { %4497 = vmatmul.bf16.gmra.mxu2 %v9812_v43  ;;  %v9872_v43 = vor.u32 %v10637_v34, %v9871_v12 }
 0xd80   :  { %v13801_v58 = vpop.permute.xlu0 %4192 }
 0xd85   :  { %4590 = vmatmul.bf16.gmra.mxu1 %v9808_v0  ;;  %v9861_v0 = vld [vmem:[#allocation25 + $0x9c] sm:$0xf0] }
 0xd86   :  { %4541 = vmatmul.bf16.gmra.mxu0 %v9804_v49  ;;  %v13789_v49 = vpop.permute.xlu2 %4187  ;;  %v9864_v26 = vor.u32 %v10633_v23, %v9861_v0 }
 0xd88   :  { %v13805_v52 = vpop.permute.xlu0 %5119 }
 0xd8d   :  { %4502 = vmatmul.bf16.gmra.mxu2 %v9824_v47  ;;  %v13791_v47 = vpop.permute.xlu1 %4202 }
 0xd8e   :  { %v13793_v32 = vpop.permute.xlu2 %4182 }
 0xd90   :  { %v4158_v61 = vpop.permute.xlu0 %4157 }
 0xd95   :  { %4595 = vmatmul.bf16.gmra.mxu1 %v9820_v1  ;;  %v9873_v1 = vld [vmem:[#allocation25 + $0xb4] sm:$0xf0]  ;;  %v13797_v19 = vpop.permute.xlu1 %4177 }
 0xd96   :  { %4546 = vmatmul.bf16.gmra.mxu0 %v9816_v3  ;;  %v9876_v54 = vor.u32 %v10636_v15, %v9873_v1  ;;  %v13799_v44 = vpop.permute.xlu2 %4172 }
 0xd9d   :  { %4507 = vmatmul.bf16.gmra.mxu2 %v9836_v9  ;;  %v9880_v9 = vor.u32 %v10638_v31, %v9879_v56 }
 0xda5   :  { %4600 = vmatmul.bf16.gmra.mxu1 %v9832_v8  ;;  %v13803_v8 = vpop.permute.xlu1 %4167 }
 0xda6   :  { %4551 = vmatmul.bf16.gmra.mxu0 %v9828_v24  ;;  %v4148_v24 = vpop.permute.xlu2 %4147 }
 0xdad   :  { %4512 = vmatmul.bf16.gmra.mxu2 %v9848_v37  ;;  %v4163_v22 = vpop.permute.xlu1 %4162 }
 0xdae   :  { %v4143_v51 = vpop.permute.xlu2 %4142 }
 0xdb5   :  { %4605 = vmatmul.bf16.gmra.mxu1 %v9844_v59  ;;  %v4138_v30 = vpop.permute.xlu1 %4137 }
 0xdb6   :  { %4556 = vmatmul.bf16.gmra.mxu0 %v9840_v17 }
 0xdbd   :  { %4517 = vmatmul.bf16.gmra.mxu2 %v9860_v38 }
 0xdc5   :  { %4610 = vmatmul.bf16.gmra.mxu1 %v9856_v39 }
 0xdc6   :  { %4561 = vmatmul.bf16.gmra.mxu0 %v9852_v48 }
 0xdcd   :  { %4522 = vmatmul.bf16.gmra.mxu2 %v9872_v43 }
 0xdd5   :  { %4615 = vmatmul.bf16.gmra.mxu1 %v9868_v63  ;;  %v4153_v63 = vpop.permute.xlu0 %4152 }
 0xdd6   :  { %4566 = vmatmul.bf16.gmra.mxu0 %v9864_v26 }
 0xde0   :  { %v4488_v3 = vpop.f32.mrf.mxu2 }
 0xde1   :  { %v4489_v28 = vadd.f32 %v4488_v3, %v4138_v30 }
 0xde5   :  { %4620 = vmatmul.bf16.gmra.mxu1 %v9880_v9 }
 0xde6   :  { %4571 = vmatmul.bf16.gmra.mxu0 %v9876_v54 }
 0xde8   :  { %v4490_v60 = vpop.f32.mrf.mxu2 }
 0xde9   :  { %v4491_v59 = vadd.f32 %v4490_v60, %v4143_v51 }
 0xdf0   :  { %v4493_v46 = vpop.f32.mrf.mxu2 }
 0xdf1   :  { %v4494_v9 = vadd.f32 %v4493_v46, %v4148_v24 }
 0xdf2   :  { %v4586_v5 = vpop.f32.mrf.mxu1 }
 0xdf3   :  { %v4537_v37 = vpop.f32.mrf.mxu0 }
 0xdf4   :  { %v4538_v48 = vadd.f32 %v4537_v37, %v4489_v28 }
 0xdf6   :  { %v4587_v45 = vadd.f32 %v4586_v5, %v4538_v48 }
 0xdf8   :  { %v4495_v11 = vpop.f32.mrf.mxu2 }
 0xdf9   :  { %v4496_v26 = vadd.f32 %v4495_v11, %v4153_v63 }
 0xdfa   :  { %v4588_v17 = vpop.f32.mrf.mxu1 }
 0xdfb   :  { %v4539_v42 = vpop.f32.mrf.mxu0 }
 0xdfc   :  { %v4540_v4 = vadd.f32 %v4539_v42, %v4491_v59 }
 0xdfe   :  { %v4589_v38 = vadd.f32 %v4588_v17, %v4540_v4 }
 0xe00   :  { %v4627_v50 = vadd.f32 %v4589_v38, %v16368_v29  ;;  %v4498_v39 = vpop.f32.mrf.mxu2  ;;  %v4626_v29 = vadd.f32 %v4587_v45, %v13231_v41 }
 0xe02   :  { %v4643_v12 = vmul.f32 0.1, %v4627_v50  ;;  %v4591_v34 = vpop.f32.mrf.mxu1  ;;  %v4642_v1 = vmul.f32 0.1, %v4626_v29 }
 0xe03   :  { %v4542_v43 = vpop.f32.mrf.mxu0 }
 0xe04   :  { %v13808_v20 = vmax.f32 %v4627_v50, %v4643_v12  ;;  %v13817_v5 = vmax.f32 %v4626_v29, %v4642_v1  ;;  %v4543_v37 = vadd.f32 %v4542_v43, %v4494_v9  ;;  %v4499_v43 = vadd.f32 %v4498_v39, %v4158_v61 }
 0xe06   :  { %5157 = vrot.lane.b32.xlu1 %v13808_v20, %s12131_s21  ;;  %v5124_v23 = vmul.f32 %v13805_v52, %v13808_v20  ;;  %v4592_v4 = vadd.f32 %v4591_v34, %v4543_v37  ;;  %v5122_v11 = vmul.f32 %v13805_v52, %v13817_v5 }
 0xe08   :  { %v4500_v0 = vpop.f32.mrf.mxu2  ;;  %5224 = vrot.lane.b32.xlu2 %v5124_v23, %s12132_s0  ;;  %v4628_v38 = vadd.f32 %v4592_v4, %v13246_v55 }
 0xe09   :  { %v4501_v30 = vadd.f32 %v4500_v0, %v4163_v22 }
 0xe0a   :  { %v4593_v56 = vpop.f32.mrf.mxu1  ;;  %v4644_v12 = vmul.f32 0.1, %v4628_v38 }
 0xe0b   :  { %v4544_v31 = vpop.f32.mrf.mxu0 }
 0xe0c   :  { %v4545_v15 = vadd.f32 %v4544_v31, %v4496_v26  ;;  %v13831_v63 = vmax.f32 %v4628_v38, %v4644_v12 }
 0xe0e   :  { %v4594_v3 = vadd.f32 %v4593_v56, %v4545_v15  ;;  %v5125_v0 = vmul.f32 %v13805_v52, %v13831_v63 }
 0xe10   :  { %v4629_v54 = vadd.f32 %v4594_v3, %v13233_v16  ;;  %v4503_v60 = vpop.f32.mrf.mxu2 }
 0xe12   :  { %v4645_v51 = vmul.f32 0.1, %v4629_v54  ;;  %v4596_v59 = vpop.f32.mrf.mxu1 }
 0xe13   :  { %v4547_v17 = vpop.f32.mrf.mxu0 }
 0xe14   :  { %v13819_v42 = vmax.f32 %v4629_v54, %v4645_v51  ;;  %v4548_v29 = vadd.f32 %v4547_v17, %v4499_v43  ;;  %v4504_v17 = vadd.f32 %v4503_v60, %v13803_v8 }
 0xe16   :  { %v11241_v41 = vpack.i.bf16 %v13817_v5, %v13819_v42  ;;  %v5126_v24 = vmul.f32 %v13805_v52, %v13819_v42  ;;  %v4597_v55 = vadd.f32 %v4596_v59, %v4548_v29 }
 0xe18   :  { %v4505_v16 = vpop.f32.mrf.mxu2  ;;  %11242 = vrot.lane.b32.xlu2 %v11241_v41, %s12131_s21  ;;  %v11246_v46 = vpack.i.bf16 %v5122_v11, %v5126_v24  ;;  %v4630_v39 = vadd.f32 %v4597_v55, %v13264_v6 }
 0xe19   :  { %v4506_v1 = vadd.f32 %v4505_v16, %v13799_v44 }
 0xe1a   :  { %v4598_v28 = vpop.f32.mrf.mxu1  ;;  %11247 = vrot.lane.b32.xlu0 %v11246_v46, %s12132_s0  ;;  %v4646_v51 = vmul.f32 0.1, %v4630_v39 }
 0xe1b   :  { %v4549_v50 = vpop.f32.mrf.mxu0 }
 0xe1c   :  { %v4550_v48 = vadd.f32 %v4549_v50, %v4501_v30  ;;  %v13847_v41 = vmax.f32 %v4630_v39, %v4646_v51 }
 0xe1e   :  { %v4599_v34 = vadd.f32 %v4598_v28, %v4550_v48  ;;  %v5127_v28 = vmul.f32 %v13805_v52, %v13847_v41 }
 0xe20   :  { %v4631_v45 = vadd.f32 %v4599_v34, %v13249_v21  ;;  %v4508_v23 = vpop.f32.mrf.mxu2 }
 0xe22   :  { %v4647_v26 = vmul.f32 0.1, %v4631_v45  ;;  %v4601_v56 = vpop.f32.mrf.mxu1 }
 0xe23   :  { %v4552_v31 = vpop.f32.mrf.mxu0 }
 0xe24   :  { %v13833_v15 = vmax.f32 %v4631_v45, %v4647_v26  ;;  %v4553_v11 = vadd.f32 %v4552_v31, %v4504_v17  ;;  %v4509_v26 = vadd.f32 %v4508_v23, %v13797_v19 }
 0xe26   :  { %v11251_v22 = vpack.i.bf16 %v13831_v63, %v13833_v15  ;;  %v5128_v61 = vmul.f32 %v13805_v52, %v13833_v15  ;;  %v4602_v16 = vadd.f32 %v4601_v56, %v4553_v11 }
 0xe28   :  { %11252 = vrot.lane.b32.xlu0 %v11251_v22, %s12131_s21  ;;  %v11256_v21 = vpack.i.bf16 %v5125_v0, %v5128_v61  ;;  %v4510_v9 = vpop.f32.mrf.mxu2  ;;  %v4632_v60 = vadd.f32 %v4602_v16, %v13282_v10 }
 0xe29   :  { %v4511_v50 = vadd.f32 %v4510_v9, %v13793_v32 }
 0xe2a   :  { %v4603_v3 = vpop.f32.mrf.mxu1  ;;  %11257 = vrot.lane.b32.xlu1 %v11256_v21, %s12132_s0  ;;  %v4648_v43 = vmul.f32 0.1, %v4632_v60 }
 0xe2b   :  { %v4554_v54 = vpop.f32.mrf.mxu0 }
 0xe2c   :  { %v4555_v37 = vadd.f32 %v4554_v54, %v4506_v1  ;;  %v13863_v31 = vmax.f32 %v4632_v60, %v4648_v43 }
 0xe2e   :  { %v4604_v59 = vadd.f32 %v4603_v3, %v4555_v37  ;;  %v5129_v39 = vmul.f32 %v13805_v52, %v13863_v31 }
 0xe30   :  { %v4633_v4 = vadd.f32 %v4604_v59, %v13267_v40  ;;  %v4513_v44 = vpop.f32.mrf.mxu2 }
 0xe31   :  { %v4514_v17 = vadd.f32 %v4513_v44, %v13789_v49 }
 0xe32   :  { %v4649_v24 = vmul.f32 0.1, %v4633_v4  ;;  %v4606_v46 = vpop.f32.mrf.mxu1 }
 0xe33   :  { %v4557_v6 = vpop.f32.mrf.mxu0 }
 0xe34   :  { %v13849_v38 = vmax.f32 %v4633_v4, %v4649_v24  ;;  %v4558_v55 = vadd.f32 %v4557_v6, %v4509_v26 }
 0xe36   :  { %v11261_v30 = vpack.i.bf16 %v13847_v41, %v13849_v38  ;;  %v5130_v8 = vmul.f32 %v13805_v52, %v13849_v38  ;;  %v4607_v32 = vadd.f32 %v4606_v46, %v4558_v55 }
 0xe38   :  { %11262 = vrot.lane.b32.xlu1 %v11261_v30, %s12131_s21  ;;  %v11266_v40 = vpack.i.bf16 %v5127_v28, %v5130_v8  ;;  %v4515_v29 = vpop.f32.mrf.mxu2  ;;  %v4634_v1 = vadd.f32 %v4607_v32, %v13301_v36 }
 0xe39   :  { %v4516_v3 = vadd.f32 %v4515_v29, %v13801_v58 }
 0xe3a   :  { %v4608_v48 = vpop.f32.mrf.mxu1  ;;  %11267 = vrot.lane.b32.xlu2 %v11266_v40, %s12132_s0  ;;  %v4650_v51 = vmul.f32 0.1, %v4634_v1 }
 0xe3b   :  { %v4559_v12 = vpop.f32.mrf.mxu0 }
 0xe3c   :  { %v4560_v34 = vadd.f32 %v4559_v12, %v4511_v50  ;;  %v13879_v11 = vmax.f32 %v4634_v1, %v4650_v51 }
 0xe3e   :  { %v4609_v45 = vadd.f32 %v4608_v48, %v4560_v34  ;;  %v5131_v8 = vmul.f32 %v13805_v52, %v13879_v11 }
 0xe40   :  { %v4635_v56 = vadd.f32 %v4609_v45, %v13285_v62  ;;  %v4518_v23 = vpop.f32.mrf.mxu2 }
 0xe42   :  { %v4651_v22 = vmul.f32 0.1, %v4635_v56  ;;  %v4611_v0 = vpop.f32.mrf.mxu1 }
 0xe43   :  { %v4562_v10 = vpop.f32.mrf.mxu0 }
 0xe44   :  { %v13865_v61 = vmax.f32 %v4635_v56, %v4651_v22  ;;  %v4563_v24 = vadd.f32 %v4562_v10, %v4514_v17 }
 0xe46   :  { %v11271_v21 = vpack.i.bf16 %v13863_v31, %v13865_v61  ;;  %v5132_v19 = vmul.f32 %v13805_v52, %v13865_v61  ;;  %v4612_v58 = vadd.f32 %v4611_v0, %v4563_v24 }
 0xe48   :  { %11272 = vrot.lane.b32.xlu2 %v11271_v21, %s12131_s21  ;;  %v11276_v62 = vpack.i.bf16 %v5129_v39, %v5132_v19  ;;  %v4520_v16 = vpop.f32.mrf.mxu2  ;;  %v4636_v44 = vadd.f32 %v4612_v58, %v13320_v14  ;;  %v4707_v58 = vpack.c.bf16 %v13819_v42, %v13831_v63 }
 0xe49   :  { %v4521_v40 = vadd.f32 %v4520_v16, %v13791_v47  ;;  %v4519_v47 = vadd.f32 %v4518_v23, %v13795_v27 }
 0xe4a   :  { %v4613_v9 = vpop.f32.mrf.mxu1  ;;  %11277 = vrot.lane.b32.xlu0 %v11276_v62, %s12132_s0  ;;  %v4652_v34 = vmul.f32 0.1, %v4636_v44 }
 0xe4b   :  { %v4564_v54 = vpop.f32.mrf.mxu0 }
 0xe4c   :  { %v4565_v37 = vadd.f32 %v4564_v54, %v4516_v3  ;;  %v13894_v29 = vmax.f32 %v4636_v44, %v4652_v34  ;;  %v9945_v3 = vsel %vm5091_vm0, 1.0, %v16362_v18 }
 0xe4e   :  { %v4614_v59 = vadd.f32 %v4613_v9, %v4565_v37  ;;  %v5133_v21 = vmul.f32 %v13805_v52, %v13894_v29 }
 0xe50   :  { %v4637_v4 = vadd.f32 %v4614_v59, %v13304_v25  ;;  %v4523_v12 = vpop.f32.mrf.mxu2 }
 0xe51   :  { %v4524_v26 = vadd.f32 %v4523_v12, %v13787_v53 }
 0xe52   :  { %v4653_v46 = vmul.f32 0.1, %v4637_v4  ;;  %v4616_v6 = vpop.f32.mrf.mxu1 }
 0xe53   :  { %v4567_v36 = vpop.f32.mrf.mxu0 }
 0xe54   :  { %v13881_v30 = vmax.f32 %v4637_v4, %v4653_v46  ;;  %v4568_v19 = vadd.f32 %v4567_v36, %v4519_v47  ;;  %v4708_v36 = vpack.c.bf16 %v13833_v15, %v13847_v41 }
 0xe56   :  { %v11281_v28 = vpack.i.bf16 %v13879_v11, %v13881_v30  ;;  %v5134_v49 = vmul.f32 %v13805_v52, %v13881_v30  ;;  %v4617_v9 = vadd.f32 %v4616_v6, %v4568_v19  ;;  %v4711_v16 = vpack.c.bf16 %v13881_v30, %v13894_v29 }
 0xe57   :  { %v5123_v19 = vmul.f32 0.0, %v13805_v52 }
 0xe58   :  { %11282 = vrot.lane.b32.xlu0 %v11281_v28, %s12131_s21  ;;  %v11286_v25 = vpack.i.bf16 %v5131_v8, %v5134_v49  ;;  %v4638_v17 = vadd.f32 %v4617_v9, %v13357_v33  ;;  %v4710_v33 = vpack.c.bf16 %v13865_v61, %v13879_v11  ;;  %v4706_v28 = vpack.c.bf16 %v13808_v20, %v13817_v5 }
 0xe5a   :  { %v4618_v60 = vpop.f32.mrf.mxu1  ;;  %11287 = vrot.lane.b32.xlu1 %v11286_v25, %s12132_s0  ;;  %v4654_v4 = vmul.f32 0.1, %v4638_v17 }
 0xe5b   :  { %v4569_v50 = vpop.f32.mrf.mxu0 }
 0xe5c   :  { %v4570_v48 = vadd.f32 %v4569_v50, %v4521_v40  ;;  %v4670_v46 = vmax.f32 %v4638_v17, %v4654_v4 }
 0xe5e   :  { %v4619_v43 = vadd.f32 %v4618_v60, %v4570_v48 }
 0xe60   :  { %v4639_v45 = vadd.f32 %v4619_v43, %v13322_v57  ;;  %v4525_v57 = vpop.f32.mrf.mxu2 }
 0xe61   :  { %v4526_v1 = vadd.f32 %v4525_v57, %v13785_v35 }
 0xe62   :  { %v4655_v56 = vmul.f32 0.1, %v4639_v45  ;;  %v4621_v55 = vpop.f32.mrf.mxu1  ;;  %v13938_v40 = vpop.permute.xlu2 %5224 }
 0xe63   :  { %v4572_v22 = vpop.f32.mrf.mxu0 }
 0xe64   :  { %v4671_v14 = vmax.f32 %v4639_v45, %v4655_v56  ;;  %v4573_v0 = vadd.f32 %v4572_v22, %v4524_v26 }
 0xe66   :  { %v4622_v10 = vadd.f32 %v4621_v55, %v4573_v0  ;;  %v11291_v32 = vpack.i.bf16 %v13894_v29, %v4671_v14  ;;  %v5136_v39 = vmul.f32 %v13805_v52, %v4671_v14  ;;  %v4712_v6 = vpack.c.bf16 %v4671_v14, %v4670_v46 }
 0xe68   :  { %v4640_v62 = vadd.f32 %v4622_v10, %v13333_v7  ;;  %11292 = vrot.lane.b32.xlu1 %v11291_v32, %s12131_s21  ;;  %v11296_v53 = vpack.i.bf16 %v5133_v21, %v5136_v39 }
 0xe6a   :  { %v4656_v27 = vmul.f32 0.1, %v4640_v62  ;;  %11297 = vrot.lane.b32.xlu2 %v11296_v53, %s12132_s0  ;;  %v4623_v51 = vpop.f32.mrf.mxu1 }
 0xe6b   :  { %v4574_v23 = vpop.f32.mrf.mxu0 }
 0xe6c   :  { %v13908_v54 = vmax.f32 %v4640_v62, %v4656_v27  ;;  %v4575_v37 = vadd.f32 %v4574_v23, %v4526_v1  ;;  %v5135_v62 = vmul.f32 %v13805_v52, %v4670_v46 }
 0xe6e   :  { %v4624_v59 = vadd.f32 %v4623_v51, %v4575_v37  ;;  %v11301_v7 = vpack.i.bf16 %v13908_v54, %v9945_v3 }
 0xe70   :  { %v4641_v13 = vadd.f32 %v4624_v59, %v13395_v2  ;;  %11302 = vrot.lane.b32.xlu0 %v11301_v7, %s12131_s21  ;;  %v4709_v2 = vpack.c.bf16 %v13849_v38, %v13863_v31 }
 0xe72   :  { %v4657_v35 = vmul.f32 0.1, %v4641_v13  ;;  %v13956_v0 = vpop.permute.xlu2 %11242 }
 0xe74   :  { %v13914_v24 = vmax.f32 %v4641_v13, %v4657_v35 }
 0xe76   :  { %v4713_v18 = vpack.c.bf16 %v13914_v24, %v13908_v54  ;;  %v11311_v10 = vpack.i.bf16 %v4670_v46, %v13914_v24  ;;  %v5138_v57 = vmul.f32 %v13805_v52, %v13914_v24 }
 0xe78   :  { %5002 = vmatpush.bf16.msrb.mxu3 %v4713_v18  ;;  %v13952_v55 = vpop.permute.xlu1 %5157  ;;  %v11316_v23 = vpack.i.bf16 %v5135_v62, %v5138_v57 }
 0xe7c   :  { %5003 = vmatpush.bf16.msrb.mxu3 %v4712_v6 }
 0xe80   :  { %5004 = vmatpush.bf16.msrb.mxu3 %v4711_v16 }
 0xe84   :  { %5005 = vmatpush.bf16.msrb.mxu3 %v4710_v33 }
 0xe88   :  { %5006 = vmatpush.bf16.msrb.mxu3 %v4709_v2 }
 0xe8c   :  { %5007 = vmatpush.bf16.msrb.mxu3 %v4708_v36  ;;  %v13930_v8 = vpop.permute.xlu0 %11247 }
 0xe90   :  { %5008 = vmatpush.bf16.msrb.mxu3 %v4707_v58 }
 0xe94   :  { %5009 = vmatpush.bf16.msrb.mxu3 %v4706_v28 }
 0xe9a   :  { %v13932_v49 = vpop.permute.xlu0 %11252 }
 0xe9c   :  { %v13968_v21 = vpop.permute.xlu1 %11257 }
 0xeaa   :  { %v13985_v27 = vpop.permute.xlu1 %11262 }
 0xebc   :  { %v13934_v25 = vpop.permute.xlu0 %11277 }
 0xeca   :  { %v13936_v44 = vpop.permute.xlu0 %11282 }
 0xecc   :  { %v11288_v13 = vpop.permute.xlu1 %11287 }
 0xecd   :  { %v11290_v4 = vunpack.i.h.bf16 %v11288_v13  ;;  %v11289_v6 = vunpack.i.l.bf16 %v11288_v13 }
 0xeda   :  { %v11293_v58 = vpop.permute.xlu1 %11292 }
 0xee2   :  { %v13940_v60 = vpop.permute.xlu0 %11302 }
 0xee3   :  { %v13943_v50 = vunpack.i.l.bf16 %v13940_v60  ;;  %v11305_v13 = vunpack.i.h.bf16 %v13940_v60 }
 0xee5   :  { %v5111_v48 = vmul.f32 %v13943_v50, %v4670_v46  ;;  %v5112_v12 = vmul.f32 %v13943_v50, %v4671_v14  ;;  %v5107_v34 = vmul.f32 %v13943_v50, %v13879_v11  ;;  %v5108_v43 = vmul.f32 %v13943_v50, %v13865_v61 }
 0xee6   :  { %v5098_v45 = vmul.f32 0.0, %v13943_v50  ;;  %v5105_v11 = vmul.f32 %v13943_v50, %v13863_v31  ;;  %v5106_v61 = vmul.f32 %v13943_v50, %v13849_v38  ;;  %v5109_v14 = vmul.f32 %v13943_v50, %v13894_v29  ;;  %v13972_v31 = vpop.permute.xlu2 %11267 }
 0xee7   :  { %v5374_v26 = vpack.c.bf16 %v5112_v12, %v5111_v48  ;;  %v5372_v56 = vpack.c.bf16 %v5108_v43, %v5107_v34  ;;  %v5110_v47 = vmul.f32 %v13943_v50, %v13881_v30  ;;  %v5137_v38 = vmul.f32 %v13805_v52, %v13908_v54 }
 0xee8   :  { %v5367_v22 = vpack.c.bf16 %v5098_v45, %v5098_v45  ;;  %v5371_v32 = vpack.c.bf16 %v5106_v61, %v5105_v11  ;;  %v5101_v30 = vmul.f32 %v13943_v50, %v13831_v63  ;;  %v5102_v29 = vmul.f32 %v13943_v50, %v13819_v42 }
 0xee9   :  { %5895 = vrot.lane.b32.xlu2 %v5374_v26, %s12096_s7  ;;  %5891 = vrot.lane.b32.xlu1 %v5372_v56, %s12096_s7  ;;  %v5373_v39 = vpack.c.bf16 %v5110_v47, %v5109_v14  ;;  %v11306_v53 = vpack.i.bf16 %v5137_v38, %v5123_v19  ;;  %v11264_v42 = vunpack.i.l.bf16 %v13985_v27  ;;  %v5113_v3 = vmul.f32 %v13943_v50, %v13908_v54 }
 0xeea   :  { %5881 = vrot.lane.b32.xlu0 %v5367_v22, %s12096_s7  ;;  %v5369_v1 = vpack.c.bf16 %v5102_v29, %v5101_v30  ;;  %v5114_v9 = vmul.f32 %v13943_v50, %v13914_v24  ;;  %v5103_v37 = vmul.f32 %v13943_v50, %v13847_v41  ;;  %v5104_v51 = vmul.f32 %v13943_v50, %v13833_v15 }
 0xeeb   :  { %v11285_v54 = vunpack.i.h.bf16 %v13936_v44  ;;  %v11279_v41 = vunpack.i.l.bf16 %v13934_v25  ;;  %v11295_v11 = vunpack.i.h.bf16 %v11293_v58  ;;  %v11284_v14 = vunpack.i.l.bf16 %v13936_v44 }
 0xeec   :  { %v5375_v17 = vpack.c.bf16 %v5114_v9, %v5113_v3  ;;  %v5370_v35 = vpack.c.bf16 %v5104_v51, %v5103_v37  ;;  %v5099_v37 = vmul.f32 %v13943_v50, %v13817_v5  ;;  %v5100_v51 = vmul.f32 %v13943_v50, %v13808_v20 }
 0xeed   :  { %v5392_v46 = vpack.c.bf16 %v11279_v41, %v11290_v4  ;;  %v5381_v47 = vpack.c.bf16 %v11284_v14, %v11295_v11  ;;  %v11270_v5 = vunpack.i.h.bf16 %v13972_v31  ;;  %v11269_v60 = vunpack.i.l.bf16 %v13972_v31 }
 0xeee   :  { %v11273_v63 = vpop.permute.xlu2 %11272 }
 0xeef   :  { %v11275_v59 = vunpack.i.h.bf16 %v11273_v63  ;;  %v11274_v24 = vunpack.i.l.bf16 %v11273_v63 }
 0xef1   :  { %11312 = vrot.lane.b32.xlu1 %v11311_v10, %s12131_s21  ;;  %5889 = vrot.lane.b32.xlu2 %v5371_v32, %s12096_s7  ;;  %v5379_v7 = vpack.c.bf16 %v11264_v42, %v11275_v59  ;;  %v5380_v18 = vpack.c.bf16 %v11274_v24, %v11285_v54  ;;  %v11294_v32 = vunpack.i.l.bf16 %v11293_v58  ;;  %v5368_v54 = vpack.c.bf16 %v5100_v51, %v5099_v37  ;;  %v5411_v37 = vld [vmem:[#allocation28 + $0x58] sm:$0xff]  ;;  %v5424_v51 = vld [vmem:[#allocation28 + $0xc0] sm:$0xff] }
 0xef2   :  { %5893 = vrot.lane.b32.xlu0 %v5373_v39, %s12096_s7 }
 0xef6   :  { %v11298_v15 = vpop.permute.xlu2 %11297 }
 0xef7   :  { %v11300_v16 = vunpack.i.h.bf16 %v11298_v15  ;;  %v11299_v19 = vunpack.i.l.bf16 %v11298_v15 }
 0xef9   :  { %11307 = vrot.lane.b32.xlu2 %v11306_v53, %s12132_s0  ;;  %5885 = vrot.lane.b32.xlu1 %v5369_v1, %s12096_s7  ;;  %v5394_v33 = vpack.c.bf16 %v11289_v6, %v11300_v16 }
 0xefa   :  { %11317 = vrot.lane.b32.xlu0 %v11316_v23, %s12132_s0 }
 0xf01   :  { %5905 = vrot.lane.b32.xlu2 %v5379_v7, %s12096_s7  ;;  %5897 = vrot.lane.b32.xlu1 %v5375_v17, %s12096_s7 }
 0xf02   :  { %5887 = vrot.lane.b32.xlu0 %v5370_v35, %s12096_s7 }
 0xf09   :  { %5907 = vrot.lane.b32.xlu1 %v5380_v18, %s12096_s7  ;;  %5931 = vrot.lane.b32.xlu2 %v5392_v46, %s12096_s7  ;;  %v11280_v18 = vunpack.i.h.bf16 %v13934_v25 }
 0xf0b   :  { %v5390_v31 = vpack.c.bf16 %v11269_v60, %v11280_v18 }
 0xf11   :  { %5935 = vrot.lane.b32.xlu1 %v5394_v33, %s12096_s7 }
 0xf43   :  { %v5896_v2 = vpop.permute.xlu2 %5895 }
 0xf4b   :  { %v14007_v36 = vpop.permute.xlu2 %5889 }
 0xf53   :  { %v11308_v28 = vpop.permute.xlu2 %11307 }
 0xf54   :  { %v14009_v48 = vunpack.i.l.bf16 %v11308_v28  ;;  %v11310_v62 = vunpack.i.h.bf16 %v11308_v28  ;;  %v11249_v28 = vunpack.i.l.bf16 %v13930_v8 }
 0xf56   :  { %16369 = vst [vmem:[#allocation66_spill] sm:$0xff] %v14009_v48  ;;  %v5265_v12 = vsel %vm5254_vm1, %v11300_v16, %v14009_v48  ;;  %v5266_v34 = vsel %vm5254_vm1, %v11289_v6, %v14009_v48  ;;  %v5263_v43 = vsel %vm5254_vm1, %v11290_v4, %v14009_v48  ;;  %v5264_v26 = vsel %vm5254_vm1, %v11279_v41, %v14009_v48 }
 0xf57   :  { %v5395_v45 = vpack.c.bf16 %v5266_v34, %v5265_v12  ;;  %v5393_v56 = vpack.c.bf16 %v5264_v26, %v5263_v43  ;;  %v5268_v42 = vsel %vm5254_vm1, %v11299_v19, %v14009_v48  ;;  %v5269_v35 = vsel %vm5254_vm1, %v11310_v62, %v14009_v48 }
 0xf58   :  { %v11259_v41 = vunpack.i.l.bf16 %v13968_v21  ;;  %v5259_v46 = vsel %vm5254_vm1, %v11270_v5, %v14009_v48  ;;  %v5261_v16 = vsel %vm5254_vm1, %v11280_v18, %v14009_v48  ;;  %v5262_v33 = vsel %vm5254_vm1, %v11269_v60, %v14009_v48  ;;  %v5421_v60 = vld [vmem:[#allocation28 + $0xa8] sm:$0xff]  ;;  %v5423_v18 = vld [vmem:[#allocation28 + $0xb8] sm:$0xff] }
 0xf59   :  { %5937 = vrot.lane.b32.xlu2 %v5395_v45, %s12096_s7  ;;  %5933 = vrot.lane.b32.xlu0 %v5393_v56, %s12096_s7  ;;  %v5391_v58 = vpack.c.bf16 %v5262_v33, %v5261_v16  ;;  %v11260_v12 = vunpack.i.h.bf16 %v13968_v21  ;;  %v11265_v34 = vunpack.i.h.bf16 %v13985_v27  ;;  %v5258_v45 = vsel %vm5254_vm1, %v11249_v28, %v14009_v48 }
 0xf5a   :  { %v5260_v15 = vsel %vm5254_vm1, %v11259_v41, %v14009_v48  ;;  %v11254_v26 = vunpack.i.l.bf16 %v13932_v49  ;;  %v5388_v14 = vpack.c.bf16 %v11259_v41, %v11270_v5  ;;  %v5422_v41 = vld [vmem:[#allocation28 + $0xb0] sm:$0xff] }
 0xf5b   :  { %v5892_v22 = vpop.permute.xlu1 %5891  ;;  %v5257_v43 = vsel %vm5254_vm1, %v11260_v12, %v14009_v48 }
 0xf5c   :  { %v14021_v61 = vpop.permute.xlu0 %5881  ;;  %v5378_v21 = vpack.c.bf16 %v11254_v26, %v11265_v34  ;;  %v5387_v11 = vpack.c.bf16 %v5258_v45, %v5257_v43  ;;  %v5402_v43 = vld [vmem:[#allocation28 + $0x10] sm:$0xff]  ;;  %v5401_v45 = vld [vmem:[#allocation28 + $0x8] sm:$0xff]  ;;  %v5403_v26 = vld [vmem:[#allocation28 + $0x18] sm:$0xff] }
 0xf5d   :  { %v5954_v20 = vsel %vm5947_vm2, %v14021_v61, %v5896_v2  ;;  %v5389_v2 = vpack.c.bf16 %v5260_v15, %v5259_v46  ;;  %v5952_v25 = vsel %vm5947_vm2, %v14021_v61, %v5892_v22  ;;  %v5951_v56 = vsel %vm5947_vm2, %v14021_v61, %v14007_v36  ;;  %v9949_v15 = vld [vmem:[%s16370_s15] sm:$0xf] }
 0xf5e   :  { %v5256_v36 = vsel %vm5254_vm1, %v13938_v40, %v14009_v48 }
 0xf61   :  { %5909 = vrot.lane.b32.xlu0 %v5381_v47, %s12096_s7  ;;  %v11250_v47 = vunpack.i.h.bf16 %v13930_v8 }
 0xf63   :  { %v11313_v10 = vpop.permute.xlu1 %11312 }
 0xf64   :  { %v11315_v39 = vunpack.i.h.bf16 %v11313_v10  ;;  %v5894_v38 = vpop.permute.xlu0 %5893  ;;  %v11314_v59 = vunpack.i.l.bf16 %v11313_v10  ;;  %v11255_v10 = vunpack.i.h.bf16 %v13932_v49  ;;  %v11245_v49 = vunpack.i.h.bf16 %v13956_v0 }
 0xf65   :  { %v5953_v6 = vsel %vm5947_vm2, %v14021_v61, %v5894_v38 }
 0xf66   :  { %v5382_v30 = vpack.c.bf16 %v11294_v32, %v11315_v39  ;;  %v5383_v24 = vpack.c.bf16 %v11314_v59, %v11305_v13  ;;  %v5255_v32 = vsel %vm5254_vm1, %v11250_v47, %v14009_v48  ;;  %v11244_v39 = vunpack.i.l.bf16 %v13956_v0  ;;  %v14105_v0 = vpop.permute.xlu2 %5905  ;;  %v5426_v59 = vld [vmem:[#allocation28 + $0xd0] sm:$0xff]  ;;  %v5407_v13 = vld [vmem:[#allocation28 + $0x38] sm:$0xff] }
 0xf68   :  { %5911 = vrot.lane.b32.xlu2 %v5382_v30, %s12096_s7  ;;  %v5377_v8 = vpack.c.bf16 %v11244_v39, %v11255_v10  ;;  %v5385_v30 = vpack.c.bf16 %v5256_v36, %v5255_v32  ;;  %v5416_v39 = vld [vmem:[#allocation28 + $0x80] sm:$0xff] }
 0xf6b   :  { %v14026_v29 = vpop.permute.xlu1 %5885 }
 0xf6c   :  { %v11318_v57 = vpop.permute.xlu0 %11317  ;;  %v5949_v38 = vsel %vm5947_vm2, %v14021_v61, %v14026_v29  ;;  %v5414_v29 = vld [vmem:[#allocation28 + $0x70] sm:$0xff] }
 0xf6d   :  { %v11320_v53 = vunpack.i.h.bf16 %v11318_v57  ;;  %v11319_v1 = vunpack.i.l.bf16 %v11318_v57  ;;  %v5386_v57 = vpack.c.bf16 %v11249_v28, %v11260_v12  ;;  %v5420_v28 = vld [vmem:[#allocation28 + $0xa0] sm:$0xff] }
 0xf6f   :  { %v5398_v23 = vpack.c.bf16 %v11319_v1, %v11310_v62  ;;  %v5396_v63 = vpack.c.bf16 %v11299_v19, %v11320_v53  ;;  %v5267_v44 = vsel %vm5254_vm1, %v11320_v53, %v14009_v48  ;;  %v5270_v17 = vsel %vm5254_vm1, %v11319_v1, %v14009_v48  ;;  %v5430_v19 = vld [vmem:[#allocation28 + $0xf0] sm:$0xff]  ;;  %v5413_v1 = vld [vmem:[#allocation28 + $0x68] sm:$0xff] }
 0xf70   :  { %v5397_v3 = vpack.c.bf16 %v5268_v42, %v5267_v44  ;;  %v5399_v4 = vpack.c.bf16 %v5270_v17, %v5269_v35  ;;  %v5376_v62 = vpack.c.bf16 %v13952_v55, %v11245_v49  ;;  %v5384_v53 = vpack.c.bf16 %v13938_v40, %v11250_v47  ;;  %v5410_v44 = vld [vmem:[#allocation28 + $0x50] sm:$0xff]  ;;  %v5412_v42 = vld [vmem:[#allocation28 + $0x60] sm:$0xff]  ;;  %v5427_v55 = vld [vmem:[#allocation28 + $0xd8] sm:$0xff] }
 0xf71   :  { %5943 = vrot.lane.b32.xlu2 %v5398_v23, %s12096_s7  ;;  %5939 = vrot.lane.b32.xlu0 %v5396_v63, %s12096_s7  ;;  %v5415_v23 = vld [vmem:[#allocation28 + $0x78] sm:$0xff]  ;;  %v5428_v40 = vld [vmem:[#allocation28 + $0xe0] sm:$0xff]  ;;  %v5409_v35 = vld [vmem:[#allocation28 + $0x48] sm:$0xff] }
 0xf72   :  { %5941 = vrot.lane.b32.xlu1 %v5397_v3, %s12096_s7  ;;  %v5431_v63 = vld [vmem:[#allocation28 + $0xf8] sm:$0xff]  ;;  %v5429_v3 = vld [vmem:[#allocation28 + $0xe8] sm:$0xff]  ;;  %v5408_v17 = vld [vmem:[#allocation28 + $0x40] sm:$0xff] }
 0xf73   :  { %v5898_v9 = vpop.permute.xlu1 %5897  ;;  %v5400_v47 = vld [vmem:[#allocation28] sm:$0xff] }
 0xf74   :  { %v5955_v7 = vsel %vm5947_vm2, %v14021_v61, %v5898_v9  ;;  %v5888_v22 = vpop.permute.xlu0 %5887  ;;  %v14107_v9 = vpop.permute.xlu2 %5931  ;;  %v10101_v48 = vld [vmem:[%s16370_s15 + $0x128] sm:$0xf] }
 0xf75   :  { %5988 = vmatpush.bf16.msrb.mxu2 %v5955_v7  ;;  %v5950_v27 = vsel %vm5947_vm2, %v14021_v61, %v5888_v22  ;;  %v10659_v22 = vld [vmem:[%s16370_s15 + $0x20] sm:$0xf0] }
 0xf79   :  { %5883 = vrot.lane.b32.xlu2 %v5368_v54, %s12096_s7  ;;  %5945 = vrot.lane.b32.xlu0 %v5399_v4, %s12096_s7  ;;  %v5425_v4 = vld [vmem:[#allocation28 + $0xc8] sm:$0xff] }
 0xf7a   :  { %5989 = vmatpush.bf16.msrb.mxu2 %v5954_v20  ;;  %5913 = vrot.lane.b32.xlu1 %v5383_v24, %s12096_s7  ;;  %v5404_v24 = vld [vmem:[#allocation28 + $0x20] sm:$0xff]  ;;  %v5406_v20 = vld [vmem:[#allocation28 + $0x30] sm:$0xff] }
 0xf7b   :  { %v5908_v16 = vpop.permute.xlu1 %5907 }
 0xf7e   :  { %5990 = vmatpush.bf16.msrb.mxu2 %v5953_v6  ;;  %v10656_v6 = vld [vmem:[%s16370_s15 + $0x8] sm:$0xf0] }
 0xf81   :  { %5925 = vrot.lane.b32.xlu2 %v5389_v2, %s12096_s7  ;;  %5927 = vrot.lane.b32.xlu0 %v5390_v31, %s12096_s7  ;;  %v9950_v31 = vor.u32 %v10656_v6, %v9949_v15  ;;  %v9963_v15 = vld [vmem:[%s16370_s15 + $0x24] sm:$0xf0]  ;;  %v9969_v6 = vld [vmem:[%s16370_s15 + $0x20] sm:$0xf] }
 0xf82   :  { %5991 = vmatpush.bf16.msrb.mxu2 %v5952_v25  ;;  %5929 = vrot.lane.b32.xlu1 %v5391_v58, %s12096_s7  ;;  %v5405_v58 = vld [vmem:[#allocation28 + $0x28] sm:$0xff]  ;;  %v5418_v25 = vld [vmem:[#allocation28 + $0x90] sm:$0xff] }
 0xf83   :  { %v5936_v34 = vpop.permute.xlu1 %5935 }
 0xf86   :  { %5992 = vmatpush.bf16.msrb.mxu2 %v5951_v56  ;;  %v9961_v56 = vld [vmem:[%s16370_s15 + $0x18] sm:$0xf] }
 0xf89   :  { %5903 = vrot.lane.b32.xlu0 %v5378_v21, %s12096_s7  ;;  %5921 = vrot.lane.b32.xlu2 %v5387_v11, %s12096_s7 }
 0xf8a   :  { %5993 = vmatpush.bf16.msrb.mxu2 %v5950_v27  ;;  %5923 = vrot.lane.b32.xlu1 %v5388_v14, %s12096_s7  ;;  %v9962_v14 = vor.u32 %v10659_v22, %v9961_v56  ;;  %v5419_v27 = vld [vmem:[#allocation28 + $0x98] sm:$0xff]  ;;  %v10021_v22 = vld [vmem:[%s16370_s15 + $0x90] sm:$0xf] }
 0xf8e   :  { %5994 = vmatpush.bf16.msrb.mxu2 %v5949_v38  ;;  %v5417_v38 = vld [vmem:[#allocation28 + $0x88] sm:$0xff] }
 0xf91   :  { %5901 = vrot.lane.b32.xlu0 %v5377_v8, %s12096_s7  ;;  %5917 = vrot.lane.b32.xlu2 %v5385_v30, %s12096_s7  ;;  %v9973_v30 = vld [vmem:[%s16370_s15 + $0x30] sm:$0xf] }
 0xf92   :  { %5919 = vrot.lane.b32.xlu1 %v5386_v57, %s12096_s7  ;;  %v10662_v57 = vld [vmem:[%s16370_s15 + $0x38] sm:$0xf0] }
 0xf99   :  { %5899 = vrot.lane.b32.xlu0 %v5376_v62, %s12096_s7  ;;  %5584 = vperm.xlu2 %10880, %v5430_v19  }
 0xf9a   :  { %5915 = vrot.lane.b32.xlu1 %v5384_v53, %s12096_s7  ;;  %v9974_v53 = vor.u32 %v10662_v57, %v9973_v30  ;;  %v10677_v30 = vld [vmem:[%s16370_s15 + $0xb0] sm:$0xf0] }
 0xfa1   :  { %5504 = vperm.xlu0 %10878, %v5414_v29   ;;  %5499 = vperm.xlu2 %10880, %v5413_v1  }
 0xfa2   :  { %5509 = vperm.xlu1 %10879, %v5415_v23  }
 0xfa9   :  { %5589 = vperm.xlu0 %10878, %v5431_v63   ;;  %5484 = vperm.xlu2 %10880, %v5410_v44  }
 0xfaa   :  { %5494 = vperm.xlu1 %10879, %v5412_v42  }
 0xfb1   :  { %5574 = vperm.xlu0 %10878, %v5428_v40   ;;  %5569 = vperm.xlu2 %10880, %v5427_v55   ;;  %v9985_v40 = vld [vmem:[%s16370_s15 + $0x48] sm:$0xf]  ;;  %v10665_v55 = vld [vmem:[%s16370_s15 + $0x50] sm:$0xf0] }
 0xfb2   :  { %5579 = vperm.xlu1 %10879, %v5429_v3  }
 0xfb3   :  { %v14109_v7 = vpop.permute.xlu2 %5937 }
 0xfb4   :  { %v5961_v62 = vsel %vm5947_vm2, %v5936_v34, %v14109_v7  ;;  %v9951_v7 = vld [vmem:[%s16370_s15 + $0xc] sm:$0xf0]  ;;  %v9981_v34 = vld [vmem:[%s16370_s15 + $0x38] sm:$0xf] }
 0xfb9   :  { %5489 = vperm.xlu0 %10878, %v5411_v37   ;;  %5554 = vperm.xlu2 %10880, %v5424_v51   ;;  %v9986_v51 = vor.u32 %v10665_v55, %v9985_v40  ;;  %v10045_v55 = vld [vmem:[%s16370_s15 + $0xc0] sm:$0xf] }
 0xfba   :  { %5564 = vperm.xlu1 %10879, %v5426_v59  }
 0xfc1   :  { %5474 = vperm.xlu0 %10878, %v5408_v17   ;;  %5469 = vperm.xlu2 %10880, %v5407_v13   ;;  %v9957_v17 = vld [vmem:[%s16370_s15 + $0x8] sm:$0xf]  ;;  %v10657_v13 = vld [vmem:[%s16370_s15 + $0x10] sm:$0xf0] }
 0xfc2   :  { %5479 = vperm.xlu1 %10879, %v5409_v35   ;;  %v5912_v54 = vpop.permute.xlu2 %5911 }
 0xfc9   :  { %5559 = vperm.xlu0 %10878, %v5425_v4   ;;  %5454 = vperm.xlu2 %10880, %v5404_v24  }
 0xfca   :  { %5464 = vperm.xlu1 %10879, %v5406_v20  }
 0xfcb   :  { %v5944_v5 = vpop.permute.xlu2 %5943  ;;  %v5934_v46 = vpop.permute.xlu0 %5933 }
 0xfcc   :  { %v5960_v1 = vsel %vm5947_vm2, %v14107_v9, %v5934_v46  ;;  %v10658_v46 = vld [vmem:[%s16370_s15 + $0x1c] sm:$0xf] }
 0xfd1   :  { %5544 = vperm.xlu0 %10878, %v5422_v41   ;;  %5539 = vperm.xlu2 %10880, %v5421_v60   ;;  %v9997_v41 = vld [vmem:[%s16370_s15 + $0x60] sm:$0xf]  ;;  %v10668_v60 = vld [vmem:[%s16370_s15 + $0x68] sm:$0xf0] }
 0xfd2   :  { %5549 = vperm.xlu1 %10879, %v5423_v18   ;;  %v9998_v18 = vor.u32 %v10668_v60, %v9997_v41  ;;  %v10057_v41 = vld [vmem:[%s16370_s15 + $0xd8] sm:$0xf]  ;;  %v10683_v60 = vld [vmem:[%s16370_s15 + $0xe0] sm:$0xf0] }
 0xfd3   :  { %v5884_v33 = vpop.permute.xlu2 %5883  ;;  %v5910_v12 = vpop.permute.xlu0 %5909 }
 0xfd4   :  { %v5948_v2 = vsel %vm5947_vm2, %v14021_v61, %v5884_v33  ;;  %v9966_v33 = vor.u32 %v10658_v46, %v9963_v15  ;;  %v10058_v46 = vor.u32 %v10683_v60, %v10057_v41 }
 0xfd5   :  { %5995 = vmatpush.bf16.msrb.mxu2 %v5948_v2 }
 0xfd8   :  { %5996 = vmatmul.bf16.vlgmr.msrb.gmra.mxu2 %v9950_v31  ;;  %v10009_v31 = vld [vmem:[%s16370_s15 + $0x78] sm:$0xf] }
 0xfd9   :  { %5459 = vperm.xlu0 %10878, %v5405_v58   ;;  %5524 = vperm.xlu2 %10880, %v5418_v25   ;;  %v10671_v58 = vld [vmem:[%s16370_s15 + $0x80] sm:$0xf0] }
 0xfda   :  { %5534 = vperm.xlu1 %10879, %v5420_v28   ;;  %v10010_v25 = vor.u32 %v10671_v58, %v10009_v31  ;;  %v10661_v28 = vld [vmem:[%s16370_s15 + $0x34] sm:$0xf]  ;;  %v10029_v31 = vld [vmem:[%s16370_s15 + $0x98] sm:$0xf]  ;;  %v10675_v58 = vld [vmem:[%s16370_s15 + $0xa0] sm:$0xf0] }
 0xfdb   :  { %v5926_v29 = vpop.permute.xlu2 %5925 }
 0xfe1   :  { %5444 = vperm.xlu0 %10878, %v5402_v43   ;;  %5439 = vperm.xlu2 %10880, %v5401_v45   ;;  %v10663_v43 = vld [vmem:[%s16370_s15 + $0x40] sm:$0xf0] }
 0xfe2   :  { %5449 = vperm.xlu1 %10879, %v5403_v26   ;;  %v9982_v26 = vor.u32 %v10663_v43, %v9981_v34  ;;  %v10069_v34 = vld [vmem:[%s16370_s15 + $0xf0] sm:$0xf]  ;;  %v10686_v43 = vld [vmem:[%s16370_s15 + $0xf8] sm:$0xf0] }
 0xfe3   :  { %v5940_v21 = vpop.permute.xlu0 %5939  ;;  %v5922_v3 = vpop.permute.xlu2 %5921 }
 0xfe4   :  { %v5942_v11 = vpop.permute.xlu1 %5941 }
 0xfe5   :  { %v5962_v8 = vsel %vm5947_vm2, %v5940_v21, %v5942_v11  ;;  %v10674_v21 = vld [vmem:[%s16370_s15 + $0x98] sm:$0xf0] }
 0xfe6   :  { %v10022_v11 = vor.u32 %v10674_v21, %v10021_v22 }
 0xfe8   :  { %6001 = vmatmul.bf16.gmra.mxu2 %v9962_v14 }
 0xfe9   :  { %5529 = vperm.xlu0 %10878, %v5419_v27  }
 0xfea   :  { %5434 = vperm.xlu1 %10879, %v5400_v47   ;;  %v10664_v47 = vld [vmem:[%s16370_s15 + $0x4c] sm:$0xf] }
 0xfeb   :  { %v5946_v10 = vpop.permute.xlu0 %5945  ;;  %v5918_v4 = vpop.permute.xlu2 %5917 }
 0xfec   :  { %v5963_v36 = vsel %vm5947_vm2, %v5944_v5, %v5946_v10  ;;  %v5914_v32 = vpop.permute.xlu1 %5913  ;;  %v9958_v5 = vor.u32 %v10657_v13, %v9957_v17  ;;  %v9987_v10 = vld [vmem:[%s16370_s15 + $0x54] sm:$0xf0]  ;;  %v10017_v17 = vld [vmem:[%s16370_s15 + $0x80] sm:$0xf]  ;;  %v10672_v13 = vld [vmem:[%s16370_s15 + $0x88] sm:$0xf0] }
 0xfed   :  { %6077 = vmatpush.bf16.msrb.mxu0 %v5914_v32  ;;  %6166 = vmatpush.bf16.msrb.mxu1 %v5963_v36  ;;  %v9993_v36 = vld [vmem:[%s16370_s15 + $0x50] sm:$0xf]  ;;  %v10666_v32 = vld [vmem:[%s16370_s15 + $0x58] sm:$0xf0] }
 0xff1   :  { %6078 = vmatpush.bf16.msrb.mxu0 %v5912_v54  ;;  %6167 = vmatpush.bf16.msrb.mxu1 %v5962_v8  ;;  %v10033_v8 = vld [vmem:[%s16370_s15 + $0xa8] sm:$0xf] }
 0xff2   :  { %5514 = vperm.xlu0 %10878, %v5416_v39   ;;  %5519 = vperm.xlu1 %10879, %v5417_v38   ;;  %v9990_v39 = vor.u32 %v10664_v47, %v9987_v10  ;;  %v9994_v38 = vor.u32 %v10666_v32, %v9993_v36  ;;  %v10676_v47 = vld [vmem:[%s16370_s15 + $0xac] sm:$0xf]  ;;  %v10035_v10 = vld [vmem:[%s16370_s15 + $0xb4] sm:$0xf0]  ;;  %v10041_v36 = vld [vmem:[%s16370_s15 + $0xb0] sm:$0xf] }
 0xff3   :  { %v5928_v49 = vpop.permute.xlu0 %5927  ;;  %v14152_v14 = vpop.permute.xlu2 %5584  ;;  %v10678_v32 = vld [vmem:[%s16370_s15 + $0xb8] sm:$0xf0] }
 0xff4   :  { %v5930_v19 = vpop.permute.xlu1 %5929 }
 0xff5   :  { %6079 = vmatpush.bf16.msrb.mxu0 %v5910_v12  ;;  %6168 = vmatpush.bf16.msrb.mxu1 %v5961_v62  ;;  %v5959_v44 = vsel %vm5947_vm2, %v5928_v49, %v5930_v19  ;;  %v9975_v12 = vld [vmem:[%s16370_s15 + $0x3c] sm:$0xf0]  ;;  %v10034_v19 = vor.u32 %v10677_v30, %v10033_v8  ;;  %v10667_v62 = vld [vmem:[%s16370_s15 + $0x64] sm:$0xf]  ;;  %v10042_v30 = vor.u32 %v10678_v32, %v10041_v36 }
 0xff6   :  { %v9978_v45 = vor.u32 %v10661_v28, %v9975_v12  ;;  %v10030_v12 = vor.u32 %v10675_v58, %v10029_v31  ;;  %v10093_v58 = vld [vmem:[%s16370_s15 + $0x120] sm:$0xf] }
 0xff8   :  { %6006 = vmatmul.bf16.gmra.mxu2 %v9974_v53  ;;  %v9999_v53 = vld [vmem:[%s16370_s15 + $0x6c] sm:$0xf0] }
 0xff9   :  { %6080 = vmatpush.bf16.msrb.mxu0 %v5908_v16  ;;  %6169 = vmatpush.bf16.msrb.mxu1 %v5960_v1  ;;  %v10660_v16 = vld [vmem:[%s16370_s15 + $0x28] sm:$0xf0]  ;;  %v10005_v1 = vld [vmem:[%s16370_s15 + $0x68] sm:$0xf] }
 0xffa   :  { %v9970_v2 = vor.u32 %v10660_v16, %v9969_v6  ;;  %v10673_v6 = vld [vmem:[%s16370_s15 + $0x94] sm:$0xf]  ;;  %v10023_v16 = vld [vmem:[%s16370_s15 + $0x9c] sm:$0xf0] }
 0xffb   :  { %v5904_v23 = vpop.permute.xlu0 %5903  ;;  %v14162_v57 = vpop.permute.xlu2 %5499  ;;  %v10026_v28 = vor.u32 %v10673_v6, %v10023_v16 }
 0xffc   :  { %v5924_v63 = vpop.permute.xlu1 %5923 }
 0xffd   :  { %6081 = vmatpush.bf16.msrb.mxu0 %v14105_v0  ;;  %6170 = vmatpush.bf16.msrb.mxu1 %v5959_v44  ;;  %v5958_v42 = vsel %vm5947_vm2, %v5924_v63, %v5926_v29  ;;  %v10655_v0 = vld [vmem:[%s16370_s15 + $0x4] sm:$0xf]  ;;  %v10002_v63 = vor.u32 %v10667_v62, %v9999_v53  ;;  %v10081_v53 = vld [vmem:[%s16370_s15 + $0x108] sm:$0xf] }
 0xffe   :  { %v9954_v54 = vor.u32 %v10655_v0, %v9951_v7  ;;  %v10670_v0 = vld [vmem:[%s16370_s15 + $0x7c] sm:$0xf]  ;;  %v10011_v7 = vld [vmem:[%s16370_s15 + $0x84] sm:$0xf0] }
0x1001   :  { %6082 = vmatpush.bf16.msrb.mxu0 %v5904_v23  ;;  %6171 = vmatpush.bf16.msrb.mxu1 %v5958_v42  ;;  %v10669_v23 = vld [vmem:[%s16370_s15 + $0x70] sm:$0xf0] }
0x1002   :  { %v10006_v40 = vor.u32 %v10669_v23, %v10005_v1  ;;  %v10689_v1 = vld [vmem:[%s16370_s15 + $0x110] sm:$0xf0] }
0x1003   :  { %v5902_v9 = vpop.permute.xlu0 %5901  ;;  %v14172_v44 = vpop.permute.xlu2 %5484 }
0x1004   :  { %v5920_v37 = vpop.permute.xlu1 %5919 }
0x1005   :  { %6083 = vmatpush.bf16.msrb.mxu0 %v5902_v9  ;;  %v5957_v59 = vsel %vm5947_vm2, %v5920_v37, %v5922_v3  ;;  %v10680_v3 = vld [vmem:[%s16370_s15 + $0xc8] sm:$0xf0] }
0x1006   :  { %6172 = vmatpush.bf16.msrb.mxu1 %v5957_v59  ;;  %v10046_v37 = vor.u32 %v10680_v3, %v10045_v55 }
0x1008   :  { %6011 = vmatmul.bf16.gmra.mxu2 %v9986_v51 }
0x100b   :  { %v5900_v35 = vpop.permute.xlu0 %5899  ;;  %v14180_v51 = vpop.permute.xlu2 %5569 }
0x100c   :  { %6084 = vmatpush.bf16.msrb.mxu0 %v5900_v35  ;;  %v5916_v24 = vpop.permute.xlu1 %5915 }
0x100d   :  { %v5956_v20 = vsel %vm5947_vm2, %v5916_v24, %v5918_v4  ;;  %v10018_v4 = vor.u32 %v10672_v13, %v10017_v17  ;;  %v10681_v17 = vld [vmem:[%s16370_s15 + $0xd0] sm:$0xf0] }
0x100e   :  { %6173 = vmatpush.bf16.msrb.mxu1 %v5956_v20 }
0x100f   :  { %6085 = vmatmul.bf16.vlgmr.msrb.gmra.mxu0 %v9954_v54  ;;  %v10014_v54 = vor.u32 %v10670_v0, %v10011_v7  ;;  %v10047_v0 = vld [vmem:[%s16370_s15 + $0xcc] sm:$0xf0]  ;;  %v10053_v7 = vld [vmem:[%s16370_s15 + $0xc8] sm:$0xf] }
0x1011   :  { %6174 = vmatmul.bf16.vlgmr.msrb.gmra.mxu1 %v9958_v5 }
0x1013   :  { %v14168_v29 = vpop.permute.xlu0 %5504  ;;  %v14190_v20 = vpop.permute.xlu2 %5554 }
0x1014   :  { %v14148_v56 = vpop.permute.xlu1 %5509 }
0x1018   :  { %6016 = vmatmul.bf16.gmra.mxu2 %v9998_v18 }
0x101b   :  { %v14178_v9 = vpop.permute.xlu0 %5589 }
0x101c   :  { %v14154_v27 = vpop.permute.xlu1 %5494 }
0x101f   :  { %6090 = vmatmul.bf16.gmra.mxu0 %v9966_v33  ;;  %v14200_v33 = vpop.permute.xlu2 %5469 }
0x1021   :  { %6179 = vmatmul.bf16.gmra.mxu1 %v9970_v2 }
0x1023   :  { %v14188_v24 = vpop.permute.xlu0 %5574 }
0x1024   :  { %v14164_v49 = vpop.permute.xlu1 %5579 }
0x1027   :  { %v14214_v22 = vpop.permute.xlu2 %5454 }
0x1028   :  { %6021 = vmatmul.bf16.gmra.mxu2 %v10010_v25 }
0x102b   :  { %v14196_v15 = vpop.permute.xlu0 %5489 }
0x102c   :  { %v14174_v42 = vpop.permute.xlu1 %5564 }
0x102f   :  { %6095 = vmatmul.bf16.gmra.mxu0 %v9978_v45 }
0x1031   :  { %6184 = vmatmul.bf16.gmra.mxu1 %v9982_v26 }
0x1033   :  { %v14210_v45 = vpop.permute.xlu0 %5474 }
0x1034   :  { %v14182_v59 = vpop.permute.xlu1 %5479 }
0x1038   :  { %6026 = vmatmul.bf16.gmra.mxu2 %v10022_v11  ;;  %v10070_v11 = vor.u32 %v10686_v43, %v10069_v34 }
0x103b   :  { %v14224_v8 = vpop.permute.xlu0 %5559 }
0x103c   :  { %v14192_v5 = vpop.permute.xlu1 %5464 }
0x103f   :  { %6100 = vmatmul.bf16.gmra.mxu0 %v9990_v39 }
0x1041   :  { %6189 = vmatmul.bf16.gmra.mxu1 %v9994_v38  ;;  %v10038_v38 = vor.u32 %v10676_v47, %v10035_v10 }
0x1044   :  { %v14202_v2 = vpop.permute.xlu1 %5549 }
0x1048   :  { %6031 = vmatmul.bf16.gmra.mxu2 %v10034_v19  ;;  %v14226_v19 = vpop.permute.xlu2 %5539 }
0x104c   :  { %v14216_v21 = vpop.permute.xlu1 %5534 }
0x104f   :  { %6105 = vmatmul.bf16.gmra.mxu0 %v10002_v63  ;;  %v10082_v63 = vor.u32 %v10689_v1, %v10081_v53  ;;  %v10059_v53 = vld [vmem:[%s16370_s15 + $0xe4] sm:$0xf0] }
0x1050   :  { %v14236_v55 = vpop.permute.xlu2 %5524 }
0x1051   :  { %6194 = vmatmul.bf16.gmra.mxu1 %v10006_v40  ;;  %v14234_v40 = vpop.permute.xlu0 %5544 }
0x1054   :  { %v14228_v62 = vpop.permute.xlu1 %5449 }
0x1058   :  { %6036 = vmatmul.bf16.gmra.mxu2 %v10046_v37  ;;  %v10679_v37 = vld [vmem:[%s16370_s15 + $0xc4] sm:$0xf] }
0x1059   :  { %v14244_v31 = vpop.permute.xlu0 %5459 }
0x105b   :  { %v5997_v35 = vpop.f32.mrf.mxu2 }
0x105c   :  { %v5435_v3 = vpop.permute.xlu1 %5434 }
0x105d   :  { %v5998_v13 = vadd.f32 %v5997_v35, %v5435_v3  ;;  %v10684_v3 = vld [vmem:[%s16370_s15 + $0xe8] sm:$0xf0] }
0x105f   :  { %6110 = vmatmul.bf16.gmra.mxu0 %v10014_v54 }
0x1061   :  { %6199 = vmatmul.bf16.gmra.mxu1 %v10018_v4  ;;  %v10050_v4 = vor.u32 %v10679_v37, %v10047_v0  ;;  %v5445_v37 = vpop.permute.xlu0 %5444 }
0x1063   :  { %v5999_v18 = vpop.f32.mrf.mxu2 }
0x1068   :  { %6041 = vmatmul.bf16.gmra.mxu2 %v10058_v46  ;;  %v10054_v46 = vor.u32 %v10681_v17, %v10053_v7 }
0x106b   :  { %v14206_v25 = vpop.f32.mrf.mxu2 }
0x106c   :  { %v6003_v0 = vadd.f32 %v14206_v25, %v5445_v37  ;;  %v10685_v37 = vld [vmem:[%s16370_s15 + $0xf4] sm:$0xf] }
0x106f   :  { %6115 = vmatmul.bf16.gmra.mxu0 %v10026_v28  ;;  %v10692_v28 = vld [vmem:[%s16370_s15 + $0x128] sm:$0xf0] }
0x1070   :  { %v10094_v47 = vor.u32 %v10692_v28, %v10093_v58 }
0x1071   :  { %6204 = vmatmul.bf16.gmra.mxu1 %v10030_v12  ;;  %v5440_v12 = vpop.permute.xlu2 %5439 }
0x1072   :  { %v6000_v35 = vadd.f32 %v5999_v18, %v5440_v12 }
0x1073   :  { %v14212_v26 = vpop.f32.mrf.mxu2 }
0x1078   :  { %6046 = vmatmul.bf16.gmra.mxu2 %v10070_v11 }
0x107b   :  { %v14222_v39 = vpop.f32.mrf.mxu2 }
0x107f   :  { %6120 = vmatmul.bf16.gmra.mxu0 %v10038_v38 }
0x1081   :  { %6209 = vmatmul.bf16.gmra.mxu1 %v10042_v30  ;;  %v10682_v30 = vld [vmem:[%s16370_s15 + $0xdc] sm:$0xf] }
0x1082   :  { %v10062_v17 = vor.u32 %v10682_v30, %v10059_v53 }
0x1083   :  { %v14232_v23 = vpop.f32.mrf.mxu2 }
0x1088   :  { %6051 = vmatmul.bf16.gmra.mxu2 %v10082_v63  ;;  %v10065_v63 = vld [vmem:[%s16370_s15 + $0xe0] sm:$0xf] }
0x108b   :  { %v14242_v54 = vpop.f32.mrf.mxu2 }
0x108c   :  { %v6086_v41 = vpop.f32.mrf.mxu0  ;;  %v6013_v12 = vadd.f32 %v14242_v54, %v14192_v5 }
0x108d   :  { %v6087_v60 = vadd.f32 %v6086_v41, %v5998_v13  ;;  %v10066_v41 = vor.u32 %v10684_v3, %v10065_v63 }
0x108e   :  { %v6175_v6 = vpop.f32.mrf.mxu1 }
0x108f   :  { %v6176_v16 = vadd.f32 %v6175_v6, %v6087_v60  ;;  %6125 = vmatmul.bf16.gmra.mxu0 %v10050_v4 }
0x1091   :  { %6214 = vmatmul.bf16.gmra.mxu1 %v10054_v46  ;;  %v6255_v43 = vmul.f32 0.1, %v6176_v16 }
0x1093   :  { %v14248_v34 = vpop.f32.mrf.mxu2  ;;  %v14250_v38 = vmax.f32 %v6176_v16, %v6255_v43  ;;  %v10105_v43 = vld [vmem:[%s16370_s15 + $0x138] sm:$0xf] }
0x1094   :  { %v6088_v11 = vpop.f32.mrf.mxu0 }
0x1095   :  { %v6089_v10 = vadd.f32 %v6088_v11, %v6000_v35  ;;  %16371 = vst [vmem:[#allocation69_spill] sm:$0xff] %v14250_v38  ;;  %v14263_v13 = vmul.f32 %v14250_v38, %v13805_v52  ;;  %v14267_v60 = vmul.f32 %v13943_v50, %v14250_v38  ;;  %v10695_v11 = vld [vmem:[%s16370_s15 + $0x140] sm:$0xf0]  ;;  %v10688_v35 = vld [vmem:[%s16370_s15 + $0x10c] sm:$0xf] }
0x1096   :  { %v6177_v36 = vpop.f32.mrf.mxu1  ;;  %v10106_v30 = vor.u32 %v10695_v11, %v10105_v43  ;;  %v10693_v38 = vld [vmem:[%s16370_s15 + $0x130] sm:$0xf0] }
0x1097   :  { %v6178_v32 = vadd.f32 %v6177_v36, %v6089_v10  ;;  %16373 = vst [vmem:[#allocation68_spill] sm:$0xff] %v14263_v13 }
0x1098   :  { %6056 = vmatmul.bf16.gmra.mxu2 %v10094_v47  ;;  %v6005_v47 = vadd.f32 %v14212_v26, %v14228_v62 }
0x1099   :  { %v6256_v1 = vmul.f32 0.1, %v6178_v32 }
0x109b   :  { %v14257_v18 = vmax.f32 %v6178_v32, %v6256_v1  ;;  %v14259_v7 = vpop.f32.mrf.mxu2 }
0x109c   :  { %v6091_v4 = vpop.f32.mrf.mxu0 }
0x109d   :  { %16372 = vst [vmem:[#allocation70_spill] sm:$0xff] %v14257_v18  ;;  %v14271_v25 = vmul.f32 %v14257_v18, %v13805_v52  ;;  %v6092_v46 = vadd.f32 %v6091_v4, %v6003_v0  ;;  %v14275_v6 = vmul.f32 %v13943_v50, %v14257_v18  ;;  %v10071_v0 = vld [vmem:[%s16370_s15 + $0xfc] sm:$0xf0]  ;;  %v10077_v4 = vld [vmem:[%s16370_s15 + $0xf8] sm:$0xf]  ;;  %v6018_v18 = vadd.f32 %v14259_v7, %v14210_v45 }
0x109e   :  { %v6180_v58 = vpop.f32.mrf.mxu1  ;;  %v10074_v62 = vor.u32 %v10685_v37, %v10071_v0  ;;  %v10117_v37 = vld [vmem:[%s16370_s15 + $0x150] sm:$0xf]  ;;  %v10698_v0 = vld [vmem:[%s16370_s15 + $0x158] sm:$0xf0] }
0x109f   :  { %16374 = vst [vmem:[#allocation67_spill] sm:$0xff] %v14271_v25  ;;  %v6181_v28 = vadd.f32 %v6180_v58, %v6092_v46  ;;  %6130 = vmatmul.bf16.gmra.mxu0 %v10062_v17  ;;  %v6008_v46 = vadd.f32 %v14222_v39, %v14214_v22 }
0x10a1   :  { %6219 = vmatmul.bf16.gmra.mxu1 %v10066_v41  ;;  %v6257_v10 = vmul.f32 0.1, %v6181_v28  ;;  %v10687_v41 = vld [vmem:[%s16370_s15 + $0x100] sm:$0xf0] }
0x10a2   :  { %v10078_v43 = vor.u32 %v10687_v41, %v10077_v4 }
0x10a3   :  { %v14287_v36 = vpop.f32.mrf.mxu2  ;;  %v14289_v3 = vmax.f32 %v6181_v28, %v6257_v10 }
0x10a4   :  { %v6093_v32 = vpop.f32.mrf.mxu0 }
0x10a5   :  { %v6094_v53 = vadd.f32 %v6093_v32, %v6005_v47  ;;  %16375 = vst [vmem:[#allocation71_spill] sm:$0xff] %v14289_v3  ;;  %v14301_v58 = vmul.f32 %v14289_v3, %v13805_v52  ;;  %v14305_v11 = vmul.f32 %v13943_v50, %v14289_v3  ;;  %v10699_v3 = vld [vmem:[%s16370_s15 + $0x160] sm:$0xf0] }
0x10a6   :  { %v6182_v1 = vpop.f32.mrf.mxu1 }
0x10a7   :  { %v6183_v63 = vadd.f32 %v6182_v1, %v6094_v53  ;;  %16377 = vst [vmem:[#allocation73_spill] sm:$0xff] %v14301_v58  ;;  %v10690_v1 = vld [vmem:[%s16370_s15 + $0x118] sm:$0xf0] }
0x10a8   :  { %6061 = vmatmul.bf16.gmra.mxu2 %v10106_v30 }
0x10a9   :  { %v6258_v17 = vmul.f32 0.1, %v6183_v63 }
0x10ab   :  { %v14297_v26 = vmax.f32 %v6183_v63, %v6258_v17  ;;  %v14317_v32 = vpop.f32.mrf.mxu2  ;;  %v6010_v17 = vadd.f32 %v14232_v23, %v14244_v31  ;;  %v10089_v63 = vld [vmem:[%s16370_s15 + $0x110] sm:$0xf] }
0x10ac   :  { %v6096_v28 = vpop.f32.mrf.mxu0 }
0x10ad   :  { %16376 = vst [vmem:[#allocation72_spill] sm:$0xff] %v14297_v26  ;;  %v14309_v47 = vmul.f32 %v14297_v26, %v13805_v52  ;;  %v6097_v22 = vadd.f32 %v6096_v28, %v6008_v46  ;;  %v14313_v39 = vmul.f32 %v13943_v50, %v14297_v26  ;;  %v10118_v46 = vor.u32 %v10698_v0, %v10117_v37 }
0x10ae   :  { %v6185_v30 = vpop.f32.mrf.mxu1  ;;  %v10090_v0 = vor.u32 %v10690_v1, %v10089_v63  ;;  %v10691_v63 = vld [vmem:[%s16370_s15 + $0x124] sm:$0xf] }
0x10af   :  { %16378 = vst [vmem:[#allocation74_spill] sm:$0xff] %v14309_v47  ;;  %v6186_v53 = vadd.f32 %v6185_v30, %v6097_v22  ;;  %6135 = vmatmul.bf16.gmra.mxu0 %v10074_v62 }
0x10b1   :  { %6224 = vmatmul.bf16.gmra.mxu1 %v10078_v43  ;;  %v6259_v4 = vmul.f32 0.1, %v6186_v53  ;;  %v10083_v43 = vld [vmem:[%s16370_s15 + $0x114] sm:$0xf0] }
0x10b2   :  { %v10086_v31 = vor.u32 %v10688_v35, %v10083_v43 }
0x10b3   :  { %v14327_v30 = vmax.f32 %v6186_v53, %v6259_v4  ;;  %v14329_v16 = vpop.f32.mrf.mxu2 }
0x10b4   :  { %v6098_v41 = vpop.f32.mrf.mxu0 }
0x10b5   :  { %v6099_v62 = vadd.f32 %v6098_v41, %v6010_v17  ;;  %16379 = vst [vmem:[#allocation75_spill] sm:$0xff] %v14327_v30  ;;  %v14341_v53 = vmul.f32 %v14327_v30, %v13805_v52  ;;  %v14345_v17 = vmul.f32 %v13943_v50, %v14327_v30 }
0x10b6   :  { %v6187_v28 = vpop.f32.mrf.mxu1 }
0x10b7   :  { %v6188_v22 = vadd.f32 %v6187_v28, %v6099_v62  ;;  %16381 = vst [vmem:[#allocation77_spill] sm:$0xff] %v14341_v53  ;;  %v6015_v28 = vadd.f32 %v14248_v34, %v14200_v33 }
0x10b8   :  { %6066 = vmatmul.bf16.gmra.mxu2 %v10118_v46  ;;  %v10701_v46 = vld [vmem:[%s16370_s15 + $0x170] sm:$0xf0] }
0x10b9   :  { %v6260_v10 = vmul.f32 0.1, %v6188_v22 }
0x10bb   :  { %v14337_v23 = vmax.f32 %v6188_v22, %v6260_v10  ;;  %v14363_v62 = vpop.f32.mrf.mxu2 }
0x10bc   :  { %v6101_v37 = vpop.f32.mrf.mxu0 }
0x10bd   :  { %16380 = vst [vmem:[#allocation76_spill] sm:$0xff] %v14337_v23  ;;  %v14349_v4 = vmul.f32 %v14337_v23, %v13805_v52  ;;  %v6102_v5 = vadd.f32 %v6101_v37, %v6013_v12  ;;  %v14353_v54 = vmul.f32 %v13943_v50, %v14337_v23  ;;  %v10129_v12 = vld [vmem:[%s16370_s15 + $0x168] sm:$0xf] }
0x10be   :  { %v6190_v10 = vpop.f32.mrf.mxu1 }
0x10bf   :  { %16382 = vst [vmem:[#allocation78_spill] sm:$0xff] %v14349_v4  ;;  %v6191_v41 = vadd.f32 %v6190_v10, %v6102_v5  ;;  %6140 = vmatmul.bf16.gmra.mxu0 %v10086_v31  ;;  %v10130_v31 = vor.u32 %v10701_v46, %v10129_v12  ;;  %v10102_v46 = vor.u32 %v10693_v38, %v10101_v48  ;;  %v10107_v48 = vld [vmem:[%s16370_s15 + $0x144] sm:$0xf0]  ;;  %v10119_v38 = vld [vmem:[%s16370_s15 + $0x15c] sm:$0xf0] }
0x10c1   :  { %6229 = vmatmul.bf16.gmra.mxu1 %v10090_v0  ;;  %v6261_v22 = vmul.f32 0.1, %v6191_v41  ;;  %v10095_v0 = vld [vmem:[%s16370_s15 + $0x12c] sm:$0xf0] }
0x10c2   :  { %v10098_v33 = vor.u32 %v10691_v63, %v10095_v0 }
0x10c3   :  { %v14367_v35 = vmax.f32 %v6191_v41, %v6261_v22  ;;  %v14381_v12 = vpop.f32.mrf.mxu2 }
0x10c4   :  { %v6103_v43 = vpop.f32.mrf.mxu0 }
0x10c5   :  { %v6104_v37 = vadd.f32 %v6103_v43, %v6015_v28  ;;  %16383 = vst [vmem:[#allocation79_spill] sm:$0xff] %v14367_v35  ;;  %v14379_v34 = vmul.f32 %v14367_v35, %v13805_v52  ;;  %v14385_v28 = vmul.f32 %v13943_v50, %v14367_v35  ;;  %v6020_v43 = vadd.f32 %v14287_v36, %v14182_v59  ;;  %v10113_v35 = vld [vmem:[%s16370_s15 + $0x140] sm:$0xf] }
0x10c6   :  { %v6192_v5 = vpop.f32.mrf.mxu1 }
0x10c7   :  { %v6193_v10 = vadd.f32 %v6192_v5, %v6104_v37  ;;  %16385 = vst [vmem:[#allocation81_spill] sm:$0xff] %v14379_v34  ;;  %v10702_v34 = vld [vmem:[%s16370_s15 + $0x178] sm:$0xf0] }
0x10c8   :  { %6071 = vmatmul.bf16.gmra.mxu2 %v10130_v31 }
0x10c9   :  { %v6262_v1 = vmul.f32 0.1, %v6193_v10 }
0x10cb   :  { %v14375_v13 = vmax.f32 %v6193_v10, %v6262_v1  ;;  %v14403_v10 = vpop.f32.mrf.mxu2  ;;  %v10694_v1 = vld [vmem:[%s16370_s15 + $0x13c] sm:$0xf] }
0x10cc   :  { %v6106_v41 = vpop.f32.mrf.mxu0  ;;  %v10110_v59 = vor.u32 %v10694_v1, %v10107_v48 }
0x10cd   :  { %16384 = vst [vmem:[#allocation80_spill] sm:$0xff] %v14375_v13  ;;  %v14389_v22 = vmul.f32 %v14375_v13, %v13805_v52  ;;  %v6107_v45 = vadd.f32 %v6106_v41, %v6018_v18  ;;  %v14393_v7 = vmul.f32 %v13943_v50, %v14375_v13  ;;  %v10696_v13 = vld [vmem:[%s16370_s15 + $0x148] sm:$0xf0] }
0x10ce   :  { %v6195_v63 = vpop.f32.mrf.mxu1 }
0x10cf   :  { %16386 = vst [vmem:[#allocation82_spill] sm:$0xff] %v14389_v22  ;;  %6145 = vmatmul.bf16.gmra.mxu0 %v10098_v33  ;;  %v6196_v18 = vadd.f32 %v6195_v63, %v6107_v45 }
0x10d1   :  { %6234 = vmatmul.bf16.gmra.mxu1 %v10102_v46  ;;  %v6263_v31 = vmul.f32 0.1, %v6196_v18  ;;  %v6023_v46 = vadd.f32 %v14317_v32, %v14172_v44 }
0x10d3   :  { %v14405_v41 = vmax.f32 %v6196_v18, %v6263_v31 }
0x10d4   :  { %v6108_v37 = vpop.f32.mrf.mxu0 }
0x10d5   :  { %v6109_v5 = vadd.f32 %v6108_v37, %v6020_v43  ;;  %16387 = vst [vmem:[#allocation83_spill] sm:$0xff] %v14405_v41  ;;  %v14417_v36 = vmul.f32 %v14405_v41, %v13805_v52  ;;  %v10114_v43 = vor.u32 %v10696_v13, %v10113_v35  ;;  %v6327_v18 = vmul.f32 %v13943_v50, %v14405_v41  ;;  %v14431_v35 = vpop.f32.mrf.mxu2  ;;  %v10125_v13 = vld [vmem:[%s16370_s15 + $0x158] sm:$0xf] }
0x10d6   :  { %v6197_v0 = vpop.f32.mrf.mxu1 }
0x10d7   :  { %v6198_v33 = vadd.f32 %v6197_v0, %v6109_v5  ;;  %v6025_v5 = vadd.f32 %v14329_v16, %v14196_v15 }
0x10d9   :  { %v6264_v25 = vmul.f32 0.1, %v6198_v33 }
0x10db   :  { %v14413_v45 = vmax.f32 %v6198_v33, %v6264_v25 }
0x10dc   :  { %v6111_v63 = vpop.f32.mrf.mxu0 }
0x10dd   :  { %16388 = vst [vmem:[#allocation84_spill] sm:$0xff] %v14413_v45  ;;  %v14423_v31 = vmul.f32 %v14413_v45, %v13805_v52  ;;  %v6112_v37 = vadd.f32 %v6111_v63, %v6023_v46  ;;  %v6328_v44 = vmul.f32 %v13943_v50, %v14413_v45  ;;  %v14442_v26 = vpop.f32.mrf.mxu2 }
0x10de   :  { %v6200_v32 = vpop.f32.mrf.mxu1 }
0x10df   :  { %6150 = vmatmul.bf16.gmra.mxu0 %v10110_v59  ;;  %v6803_v1 = vpack.c.bf16 %v6328_v44, %v6327_v18  ;;  %v6201_v48 = vadd.f32 %v6200_v32, %v6112_v37  ;;  %v10697_v44 = vld [vmem:[%s16370_s15 + $0x154] sm:$0xf] }
0x10e0   :  { %v10122_v15 = vor.u32 %v10697_v44, %v10119_v38 }
0x10e1   :  { %6239 = vmatmul.bf16.gmra.mxu1 %v10114_v43  ;;  %7607 = vrot.lane.b32.xlu2 %v6803_v1, %s12096_s7  ;;  %v6265_v0 = vmul.f32 0.1, %v6201_v48  ;;  %v6028_v43 = vadd.f32 %v14363_v62, %v14154_v27  ;;  %v10126_v1 = vor.u32 %v10699_v3, %v10125_v13  ;;  %v10137_v3 = vld [vmem:[%s16370_s15 + $0x170] sm:$0xf] }
0x10e3   :  { %v14436_v18 = vmax.f32 %v6201_v48, %v6265_v0 }
0x10e4   :  { %v6113_v33 = vpop.f32.mrf.mxu0 }
0x10e5   :  { %v6114_v46 = vadd.f32 %v6113_v33, %v6025_v5  ;;  %v14450_v16 = vmul.f32 %v14436_v18, %v13805_v52  ;;  %v6329_v48 = vmul.f32 %v13943_v50, %v14436_v18  ;;  %v6030_v33 = vadd.f32 %v14381_v12, %v14162_v57 }
0x10e6   :  { %v6202_v63 = vpop.f32.mrf.mxu1 }
0x10e7   :  { %v6203_v59 = vadd.f32 %v6202_v63, %v6114_v46  ;;  %v6039_v46 = vpop.f32.mrf.mxu2 }
0x10e9   :  { %v6266_v25 = vmul.f32 0.1, %v6203_v59 }
0x10eb   :  { %v14446_v37 = vmax.f32 %v6203_v59, %v6266_v25 }
0x10ec   :  { %v6116_v32 = vpop.f32.mrf.mxu0 }
0x10ed   :  { %v14456_v5 = vmul.f32 %v14446_v37, %v13805_v52  ;;  %v6117_v0 = vadd.f32 %v6116_v32, %v6028_v43  ;;  %v6330_v27 = vmul.f32 %v13943_v50, %v14446_v37 }
0x10ee   :  { %v6205_v38 = vpop.f32.mrf.mxu1 }
0x10ef   :  { %6155 = vmatmul.bf16.gmra.mxu0 %v10122_v15  ;;  %v6804_v25 = vpack.c.bf16 %v6330_v27, %v6329_v48  ;;  %v6206_v13 = vadd.f32 %v6205_v38, %v6117_v0  ;;  %v10700_v48 = vld [vmem:[%s16370_s15 + $0x16c] sm:$0xf]  ;;  %v10131_v27 = vld [vmem:[%s16370_s15 + $0x174] sm:$0xf0] }
0x10f0   :  { %v10134_v38 = vor.u32 %v10700_v48, %v10131_v27  ;;  %v6035_v48 = vadd.f32 %v14431_v35, %v14148_v56 }
0x10f1   :  { %6244 = vmatmul.bf16.gmra.mxu1 %v10126_v1  ;;  %7609 = vrot.lane.b32.xlu0 %v6804_v25, %s12096_s7  ;;  %v6267_v63 = vmul.f32 0.1, %v6206_v13  ;;  %v6033_v1 = vadd.f32 %v14403_v10, %v14168_v29  ;;  %v10138_v25 = vor.u32 %v10702_v34, %v10137_v3 }
0x10f3   :  { %v14467_v15 = vmax.f32 %v6206_v13, %v6267_v63 }
0x10f4   :  { %v6118_v59 = vpop.f32.mrf.mxu0 }
0x10f5   :  { %v6119_v44 = vadd.f32 %v6118_v59, %v6030_v33  ;;  %16389 = vst [vmem:[#allocation85_spill] sm:$0xff] %v14467_v15  ;;  %v14479_v57 = vmul.f32 %v14467_v15, %v13805_v52  ;;  %v6331_v13 = vmul.f32 %v13943_v50, %v14467_v15  ;;  %v10639_v33 = vld [vmem:[#allocation31] sm:$0xff] }
0x10f6   :  { %v6207_v43 = vpop.f32.mrf.mxu1  ;;  %5010 = vmatmul.bf16.vlgmr.msrb.gmra.mxu3 %v10639_v33 }
0x10f7   :  { %v6208_v32 = vadd.f32 %v6207_v43, %v6119_v44  ;;  %v14493_v43 = vpop.permute.xlu0 %5529 }
0x10f9   :  { %v6268_v62 = vmul.f32 0.1, %v6208_v32 }
0x10fb   :  { %v14475_v0 = vmax.f32 %v6208_v32, %v6268_v62  ;;  %v6042_v62 = vpop.f32.mrf.mxu2 }
0x10fc   :  { %v6121_v12 = vpop.f32.mrf.mxu0 }
0x10fd   :  { %16390 = vst [vmem:[#allocation86_spill] sm:$0xff] %v14475_v0  ;;  %v14485_v63 = vmul.f32 %v14475_v0, %v13805_v52  ;;  %v6122_v59 = vadd.f32 %v6121_v12, %v6033_v1  ;;  %v6332_v29 = vmul.f32 %v13943_v50, %v14475_v0 }
0x10fe   :  { %v6210_v44 = vpop.f32.mrf.mxu1 }
0x10ff   :  { %6160 = vmatmul.bf16.gmra.mxu0 %v10134_v38  ;;  %v6805_v34 = vpack.c.bf16 %v6332_v29, %v6331_v13  ;;  %v6211_v32 = vadd.f32 %v6210_v44, %v6122_v59  ;;  %v5515_v29 = vpop.permute.xlu0 %5514  ;;  %v10640_v44 = vld [vmem:[#allocation31 + $0x8] sm:$0xff] }
0x1100   :  { %v6038_v3 = vadd.f32 %v14442_v26, %v5515_v29 }
0x1101   :  { %6249 = vmatmul.bf16.gmra.mxu1 %v10138_v25  ;;  %7611 = vrot.lane.b32.xlu1 %v6805_v34, %s12096_s7  ;;  %v6269_v27 = vmul.f32 0.1, %v6211_v32 }
0x1103   :  { %v14498_v33 = vpop.f32.mrf.mxu2  ;;  %v14500_v38 = vmax.f32 %v6211_v32, %v6269_v27 }
0x1104   :  { %v6123_v1 = vpop.f32.mrf.mxu0 }
0x1105   :  { %v6124_v12 = vadd.f32 %v6123_v1, %v6035_v48  ;;  %v14507_v25 = vmul.f32 %v14500_v38, %v13805_v52  ;;  %v6333_v35 = vmul.f32 %v13943_v50, %v14500_v38 }
0x1106   :  { %v6212_v10 = vpop.f32.mrf.mxu1  ;;  %5015 = vmatmul.bf16.gmra.mxu3 %v10640_v44  ;;  %v6043_v44 = vadd.f32 %v6042_v62, %v14236_v55 }
0x1107   :  { %v6213_v22 = vadd.f32 %v6212_v10, %v6124_v12  ;;  %v5520_v12 = vpop.permute.xlu1 %5519 }
0x1108   :  { %v6040_v29 = vadd.f32 %v6039_v46, %v5520_v12 }
0x1109   :  { %v6270_v13 = vmul.f32 0.1, %v6213_v22 }
0x110b   :  { %v14503_v59 = vmax.f32 %v6213_v22, %v6270_v13  ;;  %v6047_v13 = vpop.f32.mrf.mxu2 }
0x110c   :  { %v6126_v56 = vpop.f32.mrf.mxu0 }
0x110d   :  { %v14513_v10 = vmul.f32 %v14503_v59, %v13805_v52  ;;  %v6127_v34 = vadd.f32 %v6126_v56, %v6038_v3  ;;  %v6334_v32 = vmul.f32 %v13943_v50, %v14503_v59 }
0x110e   :  { %v6215_v22 = vpop.f32.mrf.mxu1 }
0x110f   :  { %v6216_v48 = vadd.f32 %v6215_v22, %v6127_v34  ;;  %v6806_v27 = vpack.c.bf16 %v6334_v32, %v6333_v35  ;;  %v10641_v22 = vld [vmem:[#allocation31 + $0x10] sm:$0xff] }
0x1111   :  { %7613 = vrot.lane.b32.xlu2 %v6806_v27, %s12096_s7  ;;  %v6271_v3 = vmul.f32 0.1, %v6216_v48 }
0x1113   :  { %v14522_v23 = vmax.f32 %v6216_v48, %v6271_v3  ;;  %v6049_v35 = vpop.f32.mrf.mxu2 }
0x1114   :  { %v6128_v58 = vpop.f32.mrf.mxu0 }
0x1115   :  { %v6129_v56 = vadd.f32 %v6128_v58, %v6040_v29  ;;  %v14529_v27 = vmul.f32 %v14522_v23, %v13805_v52  ;;  %v6048_v29 = vadd.f32 %v6047_v13, %v14216_v21 }
0x1116   :  { %v6217_v47 = vpop.f32.mrf.mxu1  ;;  %5020 = vmatmul.bf16.gmra.mxu3 %v10641_v22  ;;  %v6050_v22 = vadd.f32 %v6049_v35, %v14226_v19 }
0x1117   :  { %v6218_v30 = vadd.f32 %v6217_v47, %v6129_v56  ;;  %16391 = vst [vmem:[#allocation87_spill] sm:$0xff] %v14529_v27  ;;  %v10642_v56 = vld [vmem:[#allocation31 + $0x18] sm:$0xff] }
0x1119   :  { %v6272_v26 = vmul.f32 0.1, %v6218_v30 }
0x111b   :  { %v14525_v34 = vmax.f32 %v6218_v30, %v6272_v26  ;;  %v6052_v26 = vpop.f32.mrf.mxu2 }
0x111c   :  { %v6131_v32 = vpop.f32.mrf.mxu0  ;;  %v6053_v21 = vadd.f32 %v6052_v26, %v14234_v40 }
0x111d   :  { %v14533_v46 = vmul.f32 %v14525_v34, %v13805_v52  ;;  %v6132_v58 = vadd.f32 %v6131_v32, %v6043_v44 }
0x111e   :  { %v6220_v48 = vpop.f32.mrf.mxu1 }
0x111f   :  { %16392 = vst [vmem:[#allocation88_spill] sm:$0xff] %v14533_v46  ;;  %v14537_v55 = vadd.f32 %v6220_v48, %v6132_v58 }
0x1123   :  { %v6054_v1 = vpop.f32.mrf.mxu2 }
0x1124   :  { %v14541_v62 = vpop.f32.mrf.mxu0 }
0x1126   :  { %v14543_v12 = vpop.f32.mrf.mxu1  ;;  %5025 = vmatmul.bf16.gmra.mxu3 %v10642_v56 }
0x112b   :  { %v6057_v15 = vpop.f32.mrf.mxu2 }
0x112c   :  { %v6136_v3 = vpop.f32.mrf.mxu0 }
0x112d   :  { %v6137_v44 = vadd.f32 %v6136_v3, %v6048_v29  ;;  %v10643_v3 = vld [vmem:[#allocation31 + $0x20] sm:$0xff] }
0x112e   :  { %v6225_v32 = vpop.f32.mrf.mxu1 }
0x112f   :  { %v6226_v47 = vadd.f32 %v6225_v32, %v6137_v44 }
0x1131   :  { %v6275_v48 = vmul.f32 0.1, %v6226_v47 }
0x1133   :  { %v14547_v46 = vmax.f32 %v6226_v47, %v6275_v48 }
0x1134   :  { %v6138_v58 = vpop.f32.mrf.mxu0 }
0x1135   :  { %v6139_v53 = vadd.f32 %v6138_v58, %v6050_v22  ;;  %v14554_v56 = vmul.f32 %v14547_v46, %v13805_v52 }
0x1136   :  { %v6227_v30 = vpop.f32.mrf.mxu1  ;;  %5030 = vmatmul.bf16.gmra.mxu3 %v10643_v3 }
0x1137   :  { %v6228_v27 = vadd.f32 %v6227_v30, %v6139_v53  ;;  %16393 = vst [vmem:[#allocation89_spill] sm:$0xff] %v14554_v56 }
0x1139   :  { %v6276_v4 = vmul.f32 0.1, %v6228_v27 }
0x113b   :  { %v14550_v13 = vmax.f32 %v6228_v27, %v6276_v4  ;;  %v6055_v4 = vadd.f32 %v6054_v1, %v14202_v2  ;;  %v14565_v27 = vpop.f32.mrf.mxu2 }
0x113c   :  { %v6141_v29 = vpop.f32.mrf.mxu0 }
0x113d   :  { %v14558_v19 = vmul.f32 %v14550_v13, %v13805_v52  ;;  %v6142_v35 = vadd.f32 %v6141_v29, %v6053_v21  ;;  %v6058_v29 = vadd.f32 %v6057_v15, %v14190_v20 }
0x113e   :  { %v6230_v47 = vpop.f32.mrf.mxu1 }
0x113f   :  { %16394 = vst [vmem:[#allocation90_spill] sm:$0xff] %v14558_v19  ;;  %v6231_v30 = vadd.f32 %v6230_v47, %v6142_v35  ;;  %v10644_v35 = vld [vmem:[#allocation31 + $0x28] sm:$0xff] }
0x1141   :  { %v6277_v44 = vmul.f32 0.1, %v6231_v30 }
0x1143   :  { %v14567_v48 = vmax.f32 %v6231_v30, %v6277_v44 }
0x1144   :  { %v6143_v26 = vpop.f32.mrf.mxu0 }
0x1145   :  { %v6144_v32 = vadd.f32 %v6143_v26, %v6055_v4  ;;  %v14574_v47 = vmul.f32 %v14567_v48, %v13805_v52  ;;  %v6062_v4 = vpop.f32.mrf.mxu2 }
0x1146   :  { %v6232_v22 = vpop.f32.mrf.mxu1  ;;  %5035 = vmatmul.bf16.gmra.mxu3 %v10644_v35 }
0x1147   :  { %v6233_v58 = vadd.f32 %v6232_v22, %v6144_v32  ;;  %16395 = vst [vmem:[#allocation91_spill] sm:$0xff] %v14574_v47 }
0x1149   :  { %v6278_v21 = vmul.f32 0.1, %v6233_v58 }
0x114b   :  { %v14570_v53 = vmax.f32 %v6233_v58, %v6278_v21  ;;  %v6063_v58 = vadd.f32 %v6062_v4, %v14174_v42 }
0x114c   :  { %v6146_v3 = vpop.f32.mrf.mxu0 }
0x114d   :  { %v14578_v2 = vmul.f32 %v14570_v53, %v13805_v52  ;;  %v6147_v1 = vadd.f32 %v6146_v3, %v6058_v29  ;;  %v6064_v22 = vpop.f32.mrf.mxu2  ;;  %v10645_v29 = vld [vmem:[#allocation31 + $0x30] sm:$0xff] }
0x114e   :  { %v6235_v26 = vpop.f32.mrf.mxu1  ;;  %v6065_v35 = vadd.f32 %v6064_v22, %v14180_v51 }
0x114f   :  { %16396 = vst [vmem:[#allocation92_spill] sm:$0xff] %v14578_v2  ;;  %v14582_v20 = vadd.f32 %v6235_v26, %v6147_v1  ;;  %v7608_v1 = vpop.permute.xlu2 %7607 }
0x1154   :  { %v14586_v44 = vpop.f32.mrf.mxu0 }
0x1155   :  { %v6067_v56 = vpop.f32.mrf.mxu2 }
0x1156   :  { %v14588_v32 = vpop.f32.mrf.mxu1  ;;  %5040 = vmatmul.bf16.gmra.mxu3 %v10645_v29  ;;  %v6068_v42 = vadd.f32 %v6067_v56, %v14188_v24 }
0x115c   :  { %v6151_v21 = vpop.f32.mrf.mxu0 }
0x115d   :  { %v6152_v3 = vadd.f32 %v6151_v21, %v6063_v58  ;;  %v6069_v21 = vpop.f32.mrf.mxu2 }
0x115e   :  { %v6240_v40 = vpop.f32.mrf.mxu1 }
0x115f   :  { %v6241_v30 = vadd.f32 %v6240_v40, %v6152_v3 }
0x1161   :  { %v6281_v26 = vmul.f32 0.1, %v6241_v30 }
0x1163   :  { %v14592_v0 = vmax.f32 %v6241_v30, %v6281_v26 }
0x1164   :  { %v6153_v19 = vpop.f32.mrf.mxu0 }
0x1165   :  { %v6154_v15 = vadd.f32 %v6153_v19, %v6065_v35  ;;  %v14599_v40 = vmul.f32 %v14592_v0, %v13805_v52  ;;  %v6345_v19 = vmul.f32 %v13943_v50, %v14592_v0  ;;  %v6070_v35 = vadd.f32 %v6069_v21, %v14164_v49  ;;  %v6072_v56 = vpop.f32.mrf.mxu2  ;;  %v10647_v21 = vld [vmem:[#allocation31 + $0x40] sm:$0xff] }
0x1166   :  { %v6242_v47 = vpop.f32.mrf.mxu1  ;;  %v16397_v49 = vpack.c.bf16 %v14393_v7, %v14385_v28 }
0x1167   :  { %v6243_v2 = vadd.f32 %v6242_v47, %v6154_v15  ;;  %v10646_v47 = vld [vmem:[#allocation31 + $0x38] sm:$0xff] }
0x1168   :  { %5045 = vmatmul.bf16.gmra.mxu3 %v10646_v47 }
0x1169   :  { %v6282_v41 = vmul.f32 0.1, %v6243_v2 }
0x116b   :  { %v14595_v4 = vmax.f32 %v6243_v2, %v6282_v41  ;;  %v7614_v58 = vpop.permute.xlu2 %7613 }
0x116c   :  { %v7734_v51 = vsel %vm5947_vm2, %v14021_v61, %v7614_v58  ;;  %v6156_v22 = vpop.f32.mrf.mxu0 }
0x116d   :  { %v14607_v30 = vmul.f32 %v14595_v4, %v13805_v52  ;;  %v6157_v24 = vadd.f32 %v6156_v22, %v6068_v42  ;;  %7807 = vmatpush.bf16.msra.mxu3 %v7734_v51  ;;  %v6346_v41 = vmul.f32 %v13943_v50, %v14595_v4  ;;  %v7610_v51 = vpop.permute.xlu0 %7609 }
0x116e   :  { %v6245_v2 = vpop.f32.mrf.mxu1 }
0x116f   :  { %v6812_v15 = vpack.c.bf16 %v6346_v41, %v6345_v19  ;;  %v11366_v29 = vpack.i.bf16 %v14607_v30, %v14599_v40  ;;  %v6246_v3 = vadd.f32 %v6245_v2, %v6157_v24  ;;  %v7732_v41 = vsel %vm5947_vm2, %v14021_v61, %v7610_v51 }
0x1170   :  { %v16423_v40 = vpack.i.bf16 %v14595_v4, %v14592_v0  ;;  %v10653_v0 = vld [vmem:[#allocation31 + $0x70] sm:$0xff] }
0x1171   :  { %7625 = vrot.lane.b32.xlu1 %v6812_v15, %s12096_s7  ;;  %v6283_v22 = vmul.f32 0.1, %v6246_v3  ;;  %v6073_v15 = vadd.f32 %v6072_v56, %v14152_v14  ;;  %v6339_v14 = vmul.f32 %v13943_v50, %v14547_v46  ;;  %v16432_v4 = vld [vmem:[#allocation72_spill] sm:$0xff] }
0x1173   :  { %v7612_v26 = vpop.permute.xlu1 %7611  ;;  %v14621_v24 = vmax.f32 %v6246_v3, %v6283_v22  ;;  %v7731_v3 = vsel %vm5947_vm2, %v14021_v61, %v7608_v1  ;;  %v6074_v22 = vpop.f32.mrf.mxu2 }
0x1174   :  { %v6158_v42 = vpop.f32.mrf.mxu0  ;;  %v7733_v58 = vsel %vm5947_vm2, %v14021_v61, %v7612_v26 }
0x1175   :  { %v6159_v45 = vadd.f32 %v6158_v42, %v6070_v35  ;;  %7808 = vmatpush.bf16.msra.mxu3 %v7733_v58  ;;  %v6347_v58 = vmul.f32 %v13943_v50, %v14621_v24 }
0x1176   :  { %v6247_v47 = vpop.f32.mrf.mxu1 }
0x1177   :  { %v6248_v19 = vadd.f32 %v6247_v47, %v6159_v45  ;;  %v6340_v45 = vmul.f32 %v13943_v50, %v14550_v13  ;;  %v6060_v47 = vadd.f32 %v14565_v27, %v14224_v8  ;;  %v6341_v8 = vmul.f32 %v13943_v50, %v14567_v48 }
0x1178   :  { %5050 = vmatmul.bf16.gmra.mxu3 %v10647_v21 }
0x1179   :  { %v6284_v2 = vmul.f32 0.1, %v6248_v19  ;;  %7605 = vrot.lane.b32.xlu1 %v16397_v49, %s12096_s7  ;;  %7809 = vmatpush.bf16.msra.mxu3 %v7732_v41  ;;  %v6809_v51 = vpack.c.bf16 %v6340_v45, %v6339_v14  ;;  %v6075_v41 = vadd.f32 %v6074_v22, %v14178_v9  ;;  %v6342_v49 = vmul.f32 %v13943_v50, %v14570_v53  ;;  %v10648_v14 = vld [vmem:[#allocation31 + $0x48] sm:$0xff] }
0x117a   :  { %v16398_v9 = vpack.c.bf16 %v14275_v6, %v14267_v60  ;;  %v6045_v6 = vadd.f32 %v14498_v33, %v14493_v43  ;;  %v6335_v33 = vmul.f32 %v13943_v50, %v14522_v23 }
0x117b   :  { %v14628_v35 = vmax.f32 %v6248_v19, %v6284_v2  ;;  %v14644_v19 = vpop.f32.mrf.mxu3  ;;  %v6149_v2 = vadd.f32 %v14586_v44, %v6060_v47 }
0x117c   :  { %v6161_v26 = vpop.f32.mrf.mxu0 }
0x117d   :  { %v6162_v42 = vadd.f32 %v6161_v26, %v6073_v15  ;;  %7810 = vmatpush.bf16.msra.mxu3 %v7731_v3  ;;  %v6348_v28 = vmul.f32 %v13943_v50, %v14628_v35  ;;  %v6238_v26 = vadd.f32 %v14588_v32, %v6149_v2 }
0x117e   :  { %v6250_v7 = vpop.f32.mrf.mxu1 }
0x117f   :  { %v6813_v56 = vpack.c.bf16 %v6348_v28, %v6347_v58  ;;  %v6251_v1 = vadd.f32 %v6250_v7, %v6162_v42  ;;  %v6810_v42 = vpack.c.bf16 %v6342_v49, %v6341_v8  ;;  %v6280_v7 = vmul.f32 0.1, %v6238_v26 }
0x1180   :  { %v6336_v8 = vmul.f32 %v13943_v50, %v14525_v34 }
0x1181   :  { %7627 = vrot.lane.b32.xlu2 %v6813_v56, %s12096_s7  ;;  %7619 = vrot.lane.b32.xlu1 %v6809_v51, %s12096_s7  ;;  %v6285_v15 = vmul.f32 0.1, %v6251_v1  ;;  %v6279_v51 = vmul.f32 0.1, %v14582_v20 }
0x1183   :  { %v6317_v58 = vmax.f32 %v6251_v1, %v6285_v15  ;;  %v14658_v44 = vpop.f32.mrf.mxu3  ;;  %v6311_v49 = vmax.f32 %v14582_v20, %v6279_v51 }
0x1184   :  { %v6163_v21 = vpop.f32.mrf.mxu0 }
0x1185   :  { %v6164_v45 = vadd.f32 %v6163_v21, %v6075_v41  ;;  %v6381_v32 = vmul.f32 %v6317_v58, %v13805_v52  ;;  %v6349_v47 = vmul.f32 %v13943_v50, %v6317_v58  ;;  %v6312_v41 = vmax.f32 %v6238_v26, %v6280_v7 }
0x1186   :  { %v6252_v27 = vpop.f32.mrf.mxu1  ;;  %v16399_v21 = vpack.c.bf16 %v14313_v39, %v14305_v11  ;;  %v6343_v20 = vmul.f32 %v13943_v50, %v6311_v49  ;;  %v6807_v39 = vpack.c.bf16 %v6336_v8, %v6335_v33  ;;  %v16416_v8 = vld [vmem:[#allocation92_spill] sm:$0xff] }
0x1187   :  { %v6253_v3 = vadd.f32 %v6252_v27, %v6164_v45  ;;  %v6134_v45 = vadd.f32 %v14541_v62, %v6045_v6  ;;  %v6344_v43 = vmul.f32 %v13943_v50, %v6312_v41  ;;  %v16408_v6 = vld [vmem:[#allocation83_spill] sm:$0xff] }
0x1188   :  { %5055 = vmatmul.bf16.gmra.mxu3 %v10648_v14 }
0x1189   :  { %v6286_v28 = vmul.f32 0.1, %v6253_v3  ;;  %7621 = vrot.lane.b32.xlu2 %v6810_v42, %s12096_s7  ;;  %7599 = vrot.lane.b32.xlu1 %v16398_v9, %s12096_s7  ;;  %v6223_v11 = vadd.f32 %v14543_v12, %v6134_v45  ;;  %v6811_v27 = vpack.c.bf16 %v6344_v43, %v6343_v20  ;;  %v16400_v12 = vpack.i.bf16 %v14503_v59, %v14500_v38  ;;  %v16417_v43 = vld [vmem:[#allocation91_spill] sm:$0xff] }
0x118a   :  { %v6379_v38 = vmul.f32 %v14621_v24, %v13805_v52  ;;  %v16418_v33 = vpack.i.bf16 %v16416_v8, %v16417_v43  ;;  %v16453_v8 = vld [vmem:[#allocation70_spill] sm:$0xff]  ;;  %v16454_v43 = vld [vmem:[#allocation69_spill] sm:$0xff] }
0x118b   :  { %v6318_v56 = vmax.f32 %v6253_v3, %v6286_v28  ;;  %v14673_v15 = vpop.f32.mrf.mxu3  ;;  %v10649_v3 = vld [vmem:[#allocation31 + $0x50] sm:$0xff]  ;;  %v6274_v42 = vmul.f32 0.1, %v6223_v11  ;;  %v6273_v28 = vmul.f32 0.1, %v14537_v55 }
0x118d   :  { %v6382_v22 = vmul.f32 %v6318_v56, %v13805_v52  ;;  %v6350_v1 = vmul.f32 %v13943_v50, %v6318_v56  ;;  %v11341_v26 = vpack.i.bf16 %v6318_v56, %v6317_v58  ;;  %v6306_v9 = vmax.f32 %v6223_v11, %v6274_v42  ;;  %v16419_v11 = vld [vmem:[#allocation76_spill] sm:$0xff] }
0x118e   :  { %v6305_v14 = vmax.f32 %v14537_v55, %v6273_v28  ;;  %v16401_v58 = vpack.c.bf16 %v14353_v54, %v14345_v17  ;;  %v16402_v56 = vpack.i.bf16 %v14456_v5, %v14450_v16  ;;  %v6380_v55 = vmul.f32 %v14628_v35, %v13805_v52  ;;  %v10650_v5 = vld [vmem:[#allocation31 + $0x58] sm:$0xff] }
0x118f   :  { %v6814_v2 = vpack.c.bf16 %v6350_v1, %v6349_v47  ;;  %v11326_v60 = vpack.i.bf16 %v6382_v22, %v6381_v32  ;;  %v6338_v51 = vmul.f32 %v13943_v50, %v6306_v9  ;;  %v16403_v16 = vpack.i.bf16 %v14446_v37, %v14436_v18 }
0x1190   :  { %v6337_v59 = vmul.f32 %v13943_v50, %v6305_v14  ;;  %v11346_v32 = vpack.i.bf16 %v6380_v55, %v6379_v38  ;;  %v6376_v22 = vmul.f32 %v6312_v41, %v13805_v52  ;;  %v6375_v47 = vmul.f32 %v6311_v49, %v13805_v52  ;;  %v16428_v55 = vld [vmem:[#allocation82_spill] sm:$0xff]  ;;  %v16433_v38 = vld [vmem:[#allocation71_spill] sm:$0xff] }
0x1191   :  { %7601 = vrot.lane.b32.xlu2 %v16399_v21, %s12096_s7  ;;  %7629 = vrot.lane.b32.xlu0 %v6814_v2, %s12096_s7  ;;  %v11361_v50 = vpack.i.bf16 %v14628_v35, %v14621_v24  ;;  %v16404_v2 = vpack.i.bf16 %v14513_v10, %v14507_v25  ;;  %v11401_v18 = vpack.i.bf16 %v6312_v41, %v6311_v49  ;;  %v10651_v25 = vld [vmem:[#allocation31 + $0x60] sm:$0xff]  ;;  %v16407_v10 = vld [vmem:[#allocation84_spill] sm:$0xff] }
0x1192   :  { %11327 = vrot.lane.b32.xlu1 %v11326_v60, %s12132_s0  ;;  %v6808_v17 = vpack.c.bf16 %v6338_v51, %v6337_v59  ;;  %v11386_v1 = vpack.i.bf16 %v6376_v22, %v6375_v47  ;;  %v16405_v37 = vpack.i.bf16 %v14423_v31, %v14417_v36  ;;  %v16406_v24 = vpack.i.bf16 %v14485_v63, %v14479_v57  ;;  %v16410_v49 = vld [vmem:[#allocation86_spill] sm:$0xff]  ;;  %v16411_v36 = vld [vmem:[#allocation85_spill] sm:$0xff]  ;;  %v16436_v59 = vld [vmem:[#allocation79_spill] sm:$0xff] }
0x1193   :  { %v14686_v62 = vpop.f32.mrf.mxu3  ;;  %v16409_v41 = vpack.i.bf16 %v16407_v10, %v16408_v6  ;;  %v16412_v31 = vpack.i.bf16 %v16410_v49, %v16411_v36  ;;  %v16413_v57 = vld [vmem:[#allocation78_spill] sm:$0xff]  ;;  %v16414_v63 = vld [vmem:[#allocation77_spill] sm:$0xff]  ;;  %v6369_v42 = vmul.f32 %v6305_v14, %v13805_v52  ;;  %v16440_v47 = vld [vmem:[#allocation88_spill] sm:$0xff] }
0x1194   :  { %v16415_v45 = vpack.i.bf16 %v16413_v57, %v16414_v63  ;;  %v16429_v51 = vld [vmem:[#allocation81_spill] sm:$0xff]  ;;  %v16449_v49 = vld [vmem:[#allocation67_spill] sm:$0xff]  ;;  %v16450_v36 = vld [vmem:[#allocation68_spill] sm:$0xff] }
0x1198   :  { %5060 = vmatmul.bf16.gmra.mxu3 %v10649_v3  ;;  %v6370_v3 = vmul.f32 %v6306_v9, %v13805_v52  ;;  %v16426_v52 = vld [vmem:[#allocation73_spill] sm:$0xff] }
0x1199   :  { %7615 = vrot.lane.b32.xlu2 %v6807_v39, %s12096_s7  ;;  %7623 = vrot.lane.b32.xlu0 %v6811_v27, %s12096_s7  ;;  %v16420_v39 = vld [vmem:[#allocation75_spill] sm:$0xff] }
0x119a   :  { %11342 = vrot.lane.b32.xlu1 %v11341_v26, %s12131_s21  ;;  %v16421_v27 = vpack.i.bf16 %v16419_v11, %v16420_v39  ;;  %v10652_v26 = vld [vmem:[#allocation31 + $0x68] sm:$0xff]  ;;  %v11446_v28 = vpack.i.bf16 %v6370_v3, %v6369_v42 }
0x119b   :  { %v14699_v7 = vpop.f32.mrf.mxu3 }
0x11a1   :  { %11332 = vrot.lane.b32.xlu2 %v16400_v12, %s12131_s21  ;;  %7603 = vrot.lane.b32.xlu0 %v16401_v58, %s12096_s7  ;;  %v16422_v12 = vpack.i.bf16 %v14570_v53, %v14567_v48  ;;  %v16425_v58 = vld [vmem:[#allocation74_spill] sm:$0xff]  ;;  %v16430_v53 = vpack.i.bf16 %v16428_v55, %v16429_v51 }
0x11a2   :  { %11357 = vrot.lane.b32.xlu1 %v16402_v56, %s12132_s0  ;;  %v16427_v56 = vpack.i.bf16 %v16425_v58, %v16426_v52 }
0x11a3   :  { %v14713_v54 = vpop.f32.mrf.mxu3 }
0x11a8   :  { %5065 = vmatmul.bf16.gmra.mxu3 %v10650_v5 }
0x11a9   :  { %11347 = vrot.lane.b32.xlu2 %v11346_v32, %s12132_s0  ;;  %7617 = vrot.lane.b32.xlu0 %v6808_v17, %s12096_s7 }
0x11aa   :  { %11372 = vrot.lane.b32.xlu1 %v16403_v16, %s12131_s21  ;;  %v16439_v16 = vpack.i.bf16 %v14525_v34, %v14522_v23  ;;  %v16447_v34 = vpack.i.bf16 %v14550_v13, %v14547_v46 }
0x11ab   :  { %v14728_v60 = vpop.f32.mrf.mxu3 }
0x11b1   :  { %11362 = vrot.lane.b32.xlu2 %v11361_v50, %s12131_s21  ;;  %11322 = vrot.lane.b32.xlu0 %v16404_v2, %s12132_s0  ;;  %v16441_v50 = vld [vmem:[#allocation87_spill] sm:$0xff]  ;;  %v16443_v2 = vld [vmem:[#allocation90_spill] sm:$0xff] }
0x11b2   :  { %11387 = vrot.lane.b32.xlu1 %v11386_v1, %s12132_s0  ;;  %v16442_v1 = vpack.i.bf16 %v16440_v47, %v16441_v50 }
0x11b3   :  { %v14739_v35 = vpop.f32.mrf.mxu3 }
0x11b8   :  { %5070 = vmatmul.bf16.gmra.mxu3 %v10651_v25  ;;  %v10654_v25 = vld [vmem:[#allocation31 + $0x78] sm:$0xff] }
0x11b9   :  { %11377 = vrot.lane.b32.xlu2 %v16405_v37, %s12132_s0  ;;  %11337 = vrot.lane.b32.xlu0 %v16406_v24, %s12132_s0 }
0x11ba   :  { %11402 = vrot.lane.b32.xlu1 %v11401_v18, %s12131_s21  ;;  %v16444_v18 = vld [vmem:[#allocation89_spill] sm:$0xff] }
0x11bb   :  { %v14750_v21 = vpop.f32.mrf.mxu3  ;;  %v16445_v37 = vpack.i.bf16 %v16443_v2, %v16444_v18 }
0x11c1   :  { %11392 = vrot.lane.b32.xlu2 %v16409_v41, %s12131_s21  ;;  %11352 = vrot.lane.b32.xlu0 %v16412_v31, %s12131_s21  ;;  %v16451_v31 = vpack.i.bf16 %v16449_v49, %v16450_v36  ;;  %v10165_v36 = vld [vmem:[%s16457_s11 + $0x30] sm:$0xf] }
0x11c2   :  { %11417 = vrot.lane.b32.xlu1 %v16415_v45, %s12132_s0 }
0x11c3   :  { %v14764_v20 = vpop.f32.mrf.mxu3 }
0x11c8   :  { %5075 = vmatmul.bf16.gmra.mxu3 %v10652_v26 }
0x11c9   :  { %11407 = vrot.lane.b32.xlu2 %v16418_v33, %s12132_s0  ;;  %11367 = vrot.lane.b32.xlu0 %v11366_v29, %s12132_s0  ;;  %v11461_v29 = vpack.i.bf16 %v6306_v9, %v6305_v14  ;;  %v16434_v9 = vpack.i.bf16 %v16432_v4, %v16433_v38  ;;  %v16435_v14 = vld [vmem:[#allocation80_spill] sm:$0xff]  ;;  %v16455_v33 = vpack.i.bf16 %v16453_v8, %v16454_v43 }
0x11ca   :  { %11432 = vrot.lane.b32.xlu1 %v16421_v27, %s12131_s21  ;;  %v16437_v32 = vpack.i.bf16 %v16435_v14, %v16436_v59 }
0x11cb   :  { %v14780_v30 = vpop.f32.mrf.mxu3 }
0x11cc   :  { %16424 = vst [vmem:[#allocation84_spill] sm:$0xff] %v14780_v30 }
0x11d1   :  { %11422 = vrot.lane.b32.xlu2 %v16422_v12, %s12131_s21  ;;  %11382 = vrot.lane.b32.xlu0 %v16423_v40, %s12131_s21 }
0x11d2   :  { %11447 = vrot.lane.b32.xlu1 %v11446_v28, %s12132_s0 }
0x11d3   :  { %v14791_v48 = vpop.f32.mrf.mxu3 }
0x11d4   :  { %16431 = vst [vmem:[#allocation83_spill] sm:$0xff] %v14791_v48 }
0x11d8   :  { %5080 = vmatmul.bf16.gmra.mxu3 %v10653_v0  ;;  %v10706_v0 = vld [vmem:[%s16457_s11 + $0x14] sm:$0xf0] }
0x11d9   :  { %11437 = vrot.lane.b32.xlu2 %v16427_v56, %s12132_s0  ;;  %11397 = vrot.lane.b32.xlu0 %v16430_v53, %s12132_s0  ;;  %v10141_v53 = vld [vmem:[%s16457_s11] sm:$0xf] }
0x11da   :  { %11462 = vrot.lane.b32.xlu1 %v11461_v29, %s12131_s21 }
0x11db   :  { %v14802_v17 = vpop.f32.mrf.mxu3  ;;  %v7628_v22 = vpop.permute.xlu2 %7627 }
0x11dc   :  { %16438 = vst [vmem:[#allocation86_spill] sm:$0xff] %v14802_v17  ;;  %v7741_v26 = vsel %vm5947_vm2, %v14021_v61, %v7628_v22  ;;  %v10143_v22 = vld [vmem:[%s16457_s11 + $0x18] sm:$0xf0] }
0x11e1   :  { %11452 = vrot.lane.b32.xlu2 %v16434_v9, %s12131_s21  ;;  %11412 = vrot.lane.b32.xlu0 %v16437_v32, %s12131_s21 }
0x11e2   :  { %11477 = vrot.lane.b32.xlu1 %v16439_v16, %s12131_s21  ;;  %v10142_v16 = vor.u32 %v10706_v0, %v10141_v53 }
0x11e3   :  { %v7626_v5 = vpop.permute.xlu1 %7625  ;;  %v14816_v24 = vpop.f32.mrf.mxu3 }
0x11e4   :  { %16446 = vst [vmem:[#allocation85_spill] sm:$0xff] %v14816_v24  ;;  %v7622_v41 = vpop.permute.xlu2 %7621  ;;  %v7740_v42 = vsel %vm5947_vm2, %v14021_v61, %v7626_v5  ;;  %v10703_v5 = vld [vmem:[%s16457_s11 + $0x4] sm:$0xf]  ;;  %v10479_v24 = vld [vmem:[%s16457_s11 + $0x2b8] sm:$0xf0] }
0x11e5   :  { %v7738_v56 = vsel %vm5947_vm2, %v14021_v61, %v7622_v41  ;;  %v10146_v50 = vor.u32 %v10703_v5, %v10143_v22 }
0x11e8   :  { %5085 = vmatmul.bf16.gmra.mxu3 %v10654_v25 }
0x11e9   :  { %11467 = vrot.lane.b32.xlu2 %v16442_v1, %s12132_s0  ;;  %11427 = vrot.lane.b32.xlu0 %v16445_v37, %s12132_s0 }
0x11eb   :  { %v7606_v10 = vpop.permute.xlu1 %7605  ;;  %v14824_v6 = vpop.f32.mrf.mxu3 }
0x11ec   :  { %v7730_v23 = vsel %vm5947_vm2, %v14021_v61, %v7606_v10  ;;  %16448 = vst [vmem:[#allocation78_spill] sm:$0xff] %v14824_v6  ;;  %v7602_v63 = vpop.permute.xlu2 %7601  ;;  %v10787_v6 = vld [vmem:[%s16457_s11 + $0x2a4] sm:$0xf] }
0x11ed   :  { %7811 = vmatpush.bf16.msra.mxu3 %v7730_v23  ;;  %v7728_v55 = vsel %vm5947_vm2, %v14021_v61, %v7602_v63 }
0x11f1   :  { %11442 = vrot.lane.b32.xlu0 %v16447_v34, %s12131_s21  ;;  %v16461_v34 = vld [vmem:[#allocation66_spill] sm:$0xff] }
0x11f3   :  { %v14830_v57 = vpop.f32.mrf.mxu3  ;;  %v7620_v45 = vpop.permute.xlu1 %7619 }
0x11f4   :  { %16452 = vst [vmem:[#allocation77_spill] sm:$0xff] %v14830_v57  ;;  %v7616_v39 = vpop.permute.xlu2 %7615  ;;  %v7737_v51 = vsel %vm5947_vm2, %v14021_v61, %v7620_v45 }
0x11f5   :  { %v7735_v47 = vsel %vm5947_vm2, %v14021_v61, %v7616_v39  ;;  %v10167_v39 = vld [vmem:[%s16457_s11 + $0x48] sm:$0xf0] }
0x11f9   :  { %11457 = vrot.lane.b32.xlu0 %v16451_v31, %s12132_s0  ;;  %v10712_v31 = vld [vmem:[%s16457_s11 + $0x44] sm:$0xf0] }
0x11fb   :  { %v14838_v13 = vpop.f32.mrf.mxu3  ;;  %v7600_v27 = vpop.permute.xlu1 %7599 }
0x11fc   :  { %16456 = vst [vmem:[#allocation92_spill] sm:$0xff] %v14838_v13  ;;  %v11333_v12 = vpop.permute.xlu2 %11332  ;;  %v7727_v59 = vsel %vm5947_vm2, %v14021_v61, %v7600_v27  ;;  %v4724_v13 = vld [vmem:[#allocation33 + $0x50] sm:$0xff] }
0x11fd   :  { %v11335_v63 = vunpack.i.h.bf16 %v11333_v12  ;;  %v11334_v45 = vunpack.i.l.bf16 %v11333_v12 }
0x1201   :  { %11472 = vrot.lane.b32.xlu0 %v16455_v33, %s12131_s21 }
0x1203   :  { %v7630_v11 = vpop.permute.xlu0 %7629  ;;  %v14844_v28 = vpop.f32.mrf.mxu3 }
0x1204   :  { %v7742_v46 = vsel %vm5947_vm2, %v14021_v61, %v7630_v11  ;;  %16458 = vst [vmem:[#allocation91_spill] sm:$0xff] %v14844_v28  ;;  %v14848_v29 = vpop.permute.xlu1 %11327  ;;  %v14862_v38 = vpop.permute.xlu2 %11347  ;;  %v10166_v11 = vor.u32 %v10712_v31, %v10165_v36 }
0x1205   :  { %7896 = vmatpush.bf16.msra.mxu2 %v7742_v46  ;;  %v10709_v46 = vld [vmem:[%s16457_s11 + $0x34] sm:$0xf] }
0x1209   :  { %7897 = vmatpush.bf16.msra.mxu2 %v7741_v26 }
0x120b   :  { %v7624_v3 = vpop.permute.xlu0 %7623  ;;  %v14860_v4 = vpop.f32.mrf.mxu3 }
0x120c   :  { %v7739_v40 = vsel %vm5947_vm2, %v14021_v61, %v7624_v3  ;;  %16459 = vst [vmem:[#allocation76_spill] sm:$0xff] %v14860_v4  ;;  %v14864_v9 = vpop.permute.xlu1 %11342  ;;  %v14876_v18 = vpop.permute.xlu2 %11362 }
0x120d   :  { %7898 = vmatpush.bf16.msra.mxu2 %v7740_v42 }
0x1211   :  { %7899 = vmatpush.bf16.msra.mxu2 %v7739_v40 }
0x1213   :  { %v7604_v58 = vpop.permute.xlu0 %7603  ;;  %v14874_v2 = vpop.f32.mrf.mxu3 }
0x1214   :  { %v7729_v52 = vsel %vm5947_vm2, %v14021_v61, %v7604_v58  ;;  %16460 = vst [vmem:[#allocation75_spill] sm:$0xff] %v14874_v2  ;;  %v11358_v10 = vpop.permute.xlu1 %11357  ;;  %v11378_v26 = vpop.permute.xlu2 %11377 }
0x1215   :  { %7812 = vmatpush.bf16.msra.mxu3 %v7729_v52  ;;  %7900 = vmatpush.bf16.msra.mxu2 %v7738_v56  ;;  %v6822_v56 = vpack.c.bf16 %v11335_v63, %v11334_v45  ;;  %v11360_v12 = vunpack.i.h.bf16 %v11358_v10  ;;  %v10715_v45 = vld [vmem:[%s16457_s11 + $0x64] sm:$0xf] }
0x1219   :  { %7813 = vmatpush.bf16.msra.mxu3 %v7728_v55  ;;  %7901 = vmatpush.bf16.msra.mxu2 %v7737_v51  ;;  %v11359_v55 = vunpack.i.l.bf16 %v11358_v10  ;;  %v10170_v51 = vor.u32 %v10709_v46, %v10167_v39  ;;  %v10189_v10 = vld [vmem:[%s16457_s11 + $0x60] sm:$0xf] }
0x121b   :  { %v7618_v14 = vpop.permute.xlu0 %7617  ;;  %v14888_v27 = vpop.f32.mrf.mxu3 }
0x121c   :  { %v7736_v32 = vsel %vm5947_vm2, %v14021_v61, %v7618_v14  ;;  %16462 = vst [vmem:[#allocation74_spill] sm:$0xff] %v14888_v27  ;;  %v11373_v58 = vpop.permute.xlu1 %11372 }
0x121d   :  { %7814 = vmatpush.bf16.msra.mxu3 %v7727_v59  ;;  %7902 = vmatpush.bf16.msra.mxu2 %v7736_v32  ;;  %v6617_v59 = vsel %vm5254_vm1, %v11359_v55, %v16461_v34  ;;  %v6618_v32 = vsel %vm5254_vm1, %v11360_v12, %v16461_v34 }
0x121e   :  { %v6842_v22 = vpack.c.bf16 %v6618_v32, %v6617_v59 }
0x1220   :  { %7815 = vmatmul.bf16.vlgmr.msra.gmra.mxu3 %v10142_v16  ;;  %v6841_v16 = vpack.c.bf16 %v11360_v12, %v11359_v55  ;;  %v10724_v12 = vld [vmem:[%s16457_s11 + $0xa4] sm:$0xf0] }
0x1221   :  { %7903 = vmatpush.bf16.msra.mxu2 %v7735_v47 }
0x1223   :  { %v11323_v1 = vpop.permute.xlu0 %11322  ;;  %v14901_v47 = vpop.f32.mrf.mxu3 }
0x1224   :  { %v11325_v37 = vunpack.i.h.bf16 %v11323_v1  ;;  %v11324_v25 = vunpack.i.l.bf16 %v11323_v1  ;;  %7904 = vmatmul.bf16.vlgmr.msra.gmra.mxu2 %v10146_v50  ;;  %16463 = vst [vmem:[#allocation73_spill] sm:$0xff] %v14901_v47  ;;  %v11380_v50 = vunpack.i.h.bf16 %v11378_v26  ;;  %v11379_v1 = vunpack.i.l.bf16 %v11378_v26  ;;  %v10781_v47 = vld [vmem:[%s16457_s11 + $0x274] sm:$0xf] }
0x1226   :  { %v6845_v23 = vpack.c.bf16 %v11325_v37, %v11324_v25  ;;  %v6621_v41 = vsel %vm5254_vm1, %v11324_v25, %v16461_v34  ;;  %v6622_v61 = vsel %vm5254_vm1, %v11325_v37, %v16461_v34  ;;  %v11393_v37 = vpop.permute.xlu2 %11392  ;;  %v14904_v25 = vpop.permute.xlu1 %11387  ;;  %v6615_v31 = vsel %vm5254_vm1, %v11379_v1, %v16461_v34 }
0x1227   :  { %v6846_v49 = vpack.c.bf16 %v6622_v61, %v6621_v41  ;;  %v11375_v41 = vunpack.i.h.bf16 %v11373_v58  ;;  %v11374_v61 = vunpack.i.l.bf16 %v11373_v58  ;;  %v6616_v63 = vsel %vm5254_vm1, %v11380_v50, %v16461_v34 }
0x1228   :  { %7691 = vrot.lane.b32.xlu2 %v6845_v23, %s12096_s7  ;;  %v10718_v23 = vld [vmem:[%s16457_s11 + $0x74] sm:$0xf0] }
0x1229   :  { %7693 = vrot.lane.b32.xlu0 %v6846_v49, %s12096_s7  ;;  %v10190_v36 = vor.u32 %v10718_v23, %v10189_v10 }
0x122b   :  { %v11338_v8 = vpop.permute.xlu0 %11337  ;;  %v14921_v39 = vpop.f32.mrf.mxu3 }
0x122c   :  { %v11340_v43 = vunpack.i.h.bf16 %v11338_v8  ;;  %v11339_v33 = vunpack.i.l.bf16 %v11338_v8  ;;  %v10191_v8 = vld [vmem:[%s16457_s11 + $0x78] sm:$0xf0]  ;;  %16464 = vst [vmem:[#allocation82_spill] sm:$0xff] %v14921_v39 }
0x122d   :  { %v10194_v46 = vor.u32 %v10715_v45, %v10191_v8 }
0x122e   :  { %v6843_v3 = vpack.c.bf16 %v11340_v43, %v11339_v33  ;;  %v6619_v42 = vsel %vm5254_vm1, %v11339_v33, %v16461_v34  ;;  %v6620_v40 = vsel %vm5254_vm1, %v11340_v43, %v16461_v34  ;;  %v6839_v43 = vpack.c.bf16 %v11380_v50, %v11379_v1  ;;  %v14923_v26 = vpop.permute.xlu2 %11407 }
0x122f   :  { %v6844_v52 = vpack.c.bf16 %v6620_v40, %v6619_v42  ;;  %v6840_v33 = vpack.c.bf16 %v6616_v63, %v6615_v31  ;;  %v11394_v42 = vunpack.i.l.bf16 %v11393_v37  ;;  %v14925_v40 = vpop.permute.xlu1 %11402 }
0x1230   :  { %7687 = vrot.lane.b32.xlu1 %v6843_v3, %s12096_s7  ;;  %7820 = vmatmul.bf16.gmra.mxu3 %v10166_v11  ;;  %v6820_v11 = vpack.c.bf16 %v11375_v41, %v11374_v61  ;;  %v11395_v3 = vunpack.i.h.bf16 %v11393_v37 }
0x1231   :  { %7689 = vrot.lane.b32.xlu2 %v6844_v52, %s12096_s7  ;;  %7645 = vrot.lane.b32.xlu0 %v6822_v56, %s12096_s7  ;;  %v10213_v56 = vld [vmem:[%s16457_s11 + $0x90] sm:$0xf] }
0x1232   :  { %v6819_v52 = vpack.c.bf16 %v11395_v3, %v11394_v42 }
0x1233   :  { %v11353_v53 = vpop.permute.xlu0 %11352 }
0x1234   :  { %v11355_v0 = vunpack.i.h.bf16 %v11353_v53  ;;  %v11354_v14 = vunpack.i.l.bf16 %v11353_v53  ;;  %7909 = vmatmul.bf16.gmra.mxu2 %v10170_v51  ;;  %v14932_v51 = vpop.f32.mrf.mxu3 }
0x1235   :  { %16465 = vst [vmem:[#allocation81_spill] sm:$0xff] %v14932_v51  ;;  %v4722_v51 = vld [vmem:[#allocation33 + $0x40] sm:$0xff] }
0x1236   :  { %v6821_v5 = vpack.c.bf16 %v11355_v0, %v11354_v14  ;;  %v10214_v14 = vor.u32 %v10724_v12, %v10213_v56  ;;  %v11423_v59 = vpop.permute.xlu2 %11422 }
0x1237   :  { %v11418_v32 = vpop.permute.xlu1 %11417 }
0x1238   :  { %7683 = vrot.lane.b32.xlu1 %v6841_v16, %s12096_s7  ;;  %v10721_v16 = vld [vmem:[%s16457_s11 + $0x94] sm:$0xf]  ;;  %v11420_v10 = vunpack.i.h.bf16 %v11418_v32  ;;  %v11419_v23 = vunpack.i.l.bf16 %v11418_v32 }
0x1239   :  { %7685 = vrot.lane.b32.xlu2 %v6842_v22, %s12096_s7  ;;  %7643 = vrot.lane.b32.xlu0 %v6821_v5, %s12096_s7  ;;  %v10215_v5 = vld [vmem:[%s16457_s11 + $0xa8] sm:$0xf0] }
0x123a   :  { %v10218_v41 = vor.u32 %v10721_v16, %v10215_v5  ;;  %v6611_v63 = vsel %vm5254_vm1, %v11419_v23, %v16461_v34  ;;  %v6612_v45 = vsel %vm5254_vm1, %v11420_v10, %v16461_v34  ;;  %v10727_v5 = vld [vmem:[%s16457_s11 + $0xc4] sm:$0xf] }
0x123b   :  { %v14910_v49 = vpop.permute.xlu0 %11367  ;;  %v6836_v3 = vpack.c.bf16 %v6612_v45, %v6611_v63  ;;  %v11425_v63 = vunpack.i.h.bf16 %v11423_v59  ;;  %v11424_v45 = vunpack.i.l.bf16 %v11423_v59 }
0x123c   :  { %v14946_v8 = vpop.f32.mrf.mxu3 }
0x123d   :  { %16466 = vst [vmem:[#allocation72_spill] sm:$0xff] %v14946_v8  ;;  %v6875_v8 = vld [vmem:[#allocation30 + $0x60] sm:$0xff] }
0x1240   :  { %7679 = vrot.lane.b32.xlu1 %v6839_v43, %s12096_s7  ;;  %7825 = vmatmul.bf16.gmra.mxu3 %v10190_v36  ;;  %v6835_v43 = vpack.c.bf16 %v11420_v10, %v11419_v23 }
0x1241   :  { %7681 = vrot.lane.b32.xlu2 %v6840_v33, %s12096_s7  ;;  %7641 = vrot.lane.b32.xlu0 %v6820_v11, %s12096_s7  ;;  %v14948_v11 = vpop.permute.xlu2 %11437 }
0x1242   :  { %v11440_v42 = vunpack.i.h.bf16 %v14948_v11 }
0x1243   :  { %v14927_v58 = vpop.permute.xlu0 %11382 }
0x1244   :  { %7914 = vmatmul.bf16.gmra.mxu2 %v10194_v46  ;;  %v11433_v46 = vpop.permute.xlu1 %11432 }
0x1245   :  { %v11435_v56 = vunpack.i.h.bf16 %v11433_v46  ;;  %v11434_v12 = vunpack.i.l.bf16 %v11433_v46  ;;  %v6826_v46 = vpack.c.bf16 %v11425_v63, %v11424_v45  ;;  %v11385_v63 = vunpack.i.h.bf16 %v14927_v58 }
0x1249   :  { %7639 = vrot.lane.b32.xlu0 %v6819_v52, %s12096_s7  ;;  %v11439_v52 = vunpack.i.l.bf16 %v14948_v11 }
0x124b   :  { %v11398_v55 = vpop.permute.xlu0 %11397 }
0x124c   :  { %v11400_v53 = vunpack.i.h.bf16 %v11398_v55  ;;  %v11399_v0 = vunpack.i.l.bf16 %v11398_v55  ;;  %v10237_v55 = vld [vmem:[%s16457_s11 + $0xc0] sm:$0xf] }
0x124e   :  { %v6837_v22 = vpack.c.bf16 %v11400_v53, %v11399_v0  ;;  %v6613_v50 = vsel %vm5254_vm1, %v11399_v0, %v16461_v34  ;;  %v6614_v1 = vsel %vm5254_vm1, %v11400_v53, %v16461_v34  ;;  %v10730_v53 = vld [vmem:[%s16457_s11 + $0xd4] sm:$0xf0] }
0x124f   :  { %v6838_v37 = vpack.c.bf16 %v6614_v1, %v6613_v50  ;;  %v10238_v16 = vor.u32 %v10730_v53, %v10237_v55  ;;  %v6833_v50 = vpack.c.bf16 %v11440_v42, %v11439_v52  ;;  %v6817_v1 = vpack.c.bf16 %v11435_v56, %v11434_v12 }
0x1250   :  { %7675 = vrot.lane.b32.xlu1 %v6837_v22, %s12096_s7  ;;  %7830 = vmatmul.bf16.gmra.mxu3 %v10214_v14  ;;  %v10239_v22 = vld [vmem:[%s16457_s11 + $0xd8] sm:$0xf0]  ;;  %v11390_v56 = vunpack.i.h.bf16 %v14904_v25  ;;  %v11389_v12 = vunpack.i.l.bf16 %v14904_v25  ;;  %v11405_v55 = vunpack.i.h.bf16 %v14925_v40  ;;  %v11404_v53 = vunpack.i.l.bf16 %v14925_v40 }
0x1251   :  { %7677 = vrot.lane.b32.xlu2 %v6838_v37, %s12096_s7 }
0x1252   :  { %v6632_v25 = vsel %vm5254_vm1, %v11390_v56, %v16461_v34 }
0x1253   :  { %v11413_v61 = vpop.permute.xlu0 %11412 }
0x1254   :  { %v11415_v36 = vunpack.i.h.bf16 %v11413_v61  ;;  %v11414_v31 = vunpack.i.l.bf16 %v11413_v61  ;;  %7919 = vmatmul.bf16.gmra.mxu2 %v10218_v41  ;;  %v14967_v41 = vpop.f32.mrf.mxu3  ;;  %v11410_v61 = vunpack.i.h.bf16 %v14923_v26 }
0x1255   :  { %16467 = vst [vmem:[#allocation71_spill] sm:$0xff] %v14967_v41 }
0x1256   :  { %v6818_v33 = vpack.c.bf16 %v11415_v36, %v11414_v31  ;;  %v11409_v36 = vunpack.i.l.bf16 %v14923_v26  ;;  %v10242_v31 = vor.u32 %v10727_v5, %v10239_v22  ;;  %v10733_v5 = vld [vmem:[%s16457_s11 + $0xf4] sm:$0xf]  ;;  %v10263_v22 = vld [vmem:[%s16457_s11 + $0x108] sm:$0xf0] }
0x1257   :  { %v10266_v40 = vor.u32 %v10733_v5, %v10263_v22 }
0x1258   :  { %7671 = vrot.lane.b32.xlu1 %v6835_v43, %s12096_s7  ;;  %7637 = vrot.lane.b32.xlu0 %v6818_v33, %s12096_s7  ;;  %v6629_v43 = vsel %vm5254_vm1, %v11409_v36, %v16461_v34  ;;  %v6630_v33 = vsel %vm5254_vm1, %v11410_v61, %v16461_v34 }
0x1259   :  { %7673 = vrot.lane.b32.xlu2 %v6836_v3, %s12096_s7  ;;  %v6854_v3 = vpack.c.bf16 %v6630_v33, %v6629_v43  ;;  %v6855_v43 = vpack.c.bf16 %v11390_v56, %v11389_v12  ;;  %v10742_v56 = vld [vmem:[%s16457_s11 + $0x134] sm:$0xf0] }
0x125b   :  { %v11428_v0 = vpop.permute.xlu0 %11427 }
0x125c   :  { %v11430_v14 = vunpack.i.h.bf16 %v11428_v0  ;;  %v11429_v32 = vunpack.i.l.bf16 %v11428_v0  ;;  %v14983_v59 = vpop.f32.mrf.mxu3  ;;  %v10261_v0 = vld [vmem:[%s16457_s11 + $0xf0] sm:$0xf] }
0x125d   :  { %16468 = vst [vmem:[#allocation80_spill] sm:$0xff] %v14983_v59 }
0x125e   :  { %v6627_v37 = vsel %vm5254_vm1, %v11429_v32, %v16461_v34  ;;  %v6628_v10 = vsel %vm5254_vm1, %v11430_v14, %v16461_v34  ;;  %v6851_v26 = vpack.c.bf16 %v11430_v14, %v11429_v32  ;;  %v10736_v14 = vld [vmem:[%s16457_s11 + $0x104] sm:$0xf0]  ;;  %v6631_v32 = vsel %vm5254_vm1, %v11389_v12, %v16461_v34 }
0x125f   :  { %v6852_v23 = vpack.c.bf16 %v6628_v10, %v6627_v37  ;;  %v6856_v37 = vpack.c.bf16 %v6632_v25, %v6631_v32  ;;  %v11370_v10 = vunpack.i.h.bf16 %v14910_v49  ;;  %v10739_v25 = vld [vmem:[%s16457_s11 + $0x124] sm:$0xf] }
0x1260   :  { %7667 = vrot.lane.b32.xlu1 %v6833_v50, %s12096_s7  ;;  %7635 = vrot.lane.b32.xlu0 %v6817_v1, %s12096_s7  ;;  %v6853_v50 = vpack.c.bf16 %v11410_v61, %v11409_v36  ;;  %v6827_v1 = vpack.c.bf16 %v11405_v55, %v11404_v53  ;;  %v11384_v61 = vunpack.i.l.bf16 %v14927_v58  ;;  %v11365_v58 = vunpack.i.h.bf16 %v14876_v18  ;;  %v10285_v53 = vld [vmem:[%s16457_s11 + $0x120] sm:$0xf] }
0x1261   :  { %7835 = vmatmul.bf16.gmra.mxu3 %v10238_v16  ;;  %7705 = vrot.lane.b32.xlu2 %v6852_v23, %s12096_s7  ;;  %v10262_v16 = vor.u32 %v10736_v14, %v10261_v0  ;;  %v11369_v23 = vunpack.i.l.bf16 %v14910_v49  ;;  %v6634_v45 = vsel %vm5254_vm1, %v11370_v10, %v16461_v34  ;;  %v11364_v55 = vunpack.i.l.bf16 %v14876_v18 }
0x1262   :  { %v6828_v33 = vpack.c.bf16 %v11385_v63, %v11384_v61  ;;  %v10286_v32 = vor.u32 %v10742_v56, %v10285_v53  ;;  %v11330_v18 = vunpack.i.h.bf16 %v14848_v29  ;;  %v11345_v63 = vunpack.i.h.bf16 %v14864_v9  ;;  %v10309_v53 = vld [vmem:[%s16457_s11 + $0x150] sm:$0xf]  ;;  %v10748_v56 = vld [vmem:[%s16457_s11 + $0x164] sm:$0xf0] }
0x1263   :  { %v6633_v49 = vsel %vm5254_vm1, %v11369_v23, %v16461_v34  ;;  %v6857_v5 = vpack.c.bf16 %v11370_v10, %v11369_v23  ;;  %v6829_v22 = vpack.c.bf16 %v11365_v58, %v11364_v55  ;;  %v11344_v61 = vunpack.i.l.bf16 %v14864_v9 }
0x1264   :  { %7924 = vmatmul.bf16.gmra.mxu2 %v10242_v31  ;;  %v15000_v31 = vpop.permute.xlu2 %11452  ;;  %v15004_v36 = vpop.f32.mrf.mxu3 }
0x1265   :  { %16469 = vst [vmem:[#allocation79_spill] sm:$0xff] %v15004_v36  ;;  %v11455_v11 = vunpack.i.h.bf16 %v15000_v31  ;;  %v4721_v36 = vld [vmem:[#allocation33 + $0x38] sm:$0xff] }
0x1268   :  { %7703 = vrot.lane.b32.xlu1 %v6851_v26, %s12096_s7  ;;  %7653 = vrot.lane.b32.xlu0 %v6826_v46, %s12096_s7  ;;  %v6858_v26 = vpack.c.bf16 %v6634_v45, %v6633_v49  ;;  %v11350_v46 = vunpack.i.h.bf16 %v14862_v38  ;;  %v11448_v49 = vpop.permute.xlu1 %11447 }
0x1269   :  { %7709 = vrot.lane.b32.xlu2 %v6854_v3, %s12096_s7  ;;  %v11349_v3 = vunpack.i.l.bf16 %v14862_v38 }
0x126a   :  { %v6636_v38 = vsel %vm5254_vm1, %v11350_v46, %v16461_v34 }
0x126b   :  { %v6635_v0 = vsel %vm5254_vm1, %v11349_v3, %v16461_v34  ;;  %v6859_v45 = vpack.c.bf16 %v11350_v46, %v11349_v3  ;;  %v6609_v46 = vsel %vm5254_vm1, %v11439_v52, %v16461_v34  ;;  %v6610_v3 = vsel %vm5254_vm1, %v11440_v42, %v16461_v34 }
0x126c   :  { %v15019_v12 = vpop.permute.xlu2 %11467  ;;  %v15025_v14 = vpop.f32.mrf.mxu3  ;;  %v11454_v42 = vunpack.i.l.bf16 %v15000_v31 }
0x126d   :  { %16470 = vst [vmem:[#allocation88_spill] sm:$0xff] %v15025_v14 }
0x1270   :  { %7707 = vrot.lane.b32.xlu1 %v6853_v50, %s12096_s7  ;;  %7655 = vrot.lane.b32.xlu0 %v6827_v1, %s12096_s7  ;;  %v11443_v50 = vpop.permute.xlu0 %11442  ;;  %v6860_v1 = vpack.c.bf16 %v6636_v38, %v6635_v0  ;;  %v10310_v0 = vor.u32 %v10748_v56, %v10309_v53  ;;  %v10745_v38 = vld [vmem:[%s16457_s11 + $0x154] sm:$0xf]  ;;  %v10333_v53 = vld [vmem:[%s16457_s11 + $0x180] sm:$0xf] }
0x1271   :  { %7840 = vmatmul.bf16.gmra.mxu3 %v10262_v16  ;;  %7713 = vrot.lane.b32.xlu2 %v6856_v37, %s12096_s7  ;;  %v10287_v16 = vld [vmem:[%s16457_s11 + $0x138] sm:$0xf0]  ;;  %v11329_v37 = vunpack.i.l.bf16 %v14848_v29  ;;  %v6638_v29 = vsel %vm5254_vm1, %v11330_v18, %v16461_v34  ;;  %v11445_v58 = vunpack.i.h.bf16 %v11443_v50  ;;  %v11444_v55 = vunpack.i.l.bf16 %v11443_v50  ;;  %v10754_v56 = vld [vmem:[%s16457_s11 + $0x194] sm:$0xf0] }
0x1272   :  { %v11450_v50 = vunpack.i.h.bf16 %v11448_v49 }
0x1273   :  { %v6637_v23 = vsel %vm5254_vm1, %v11329_v37, %v16461_v34 }
0x1274   :  { %7929 = vmatmul.bf16.gmra.mxu2 %v10266_v40  ;;  %v10290_v40 = vor.u32 %v10739_v25, %v10287_v16  ;;  %v6861_v16 = vpack.c.bf16 %v11330_v18, %v11329_v37 }
0x1278   :  { %7711 = vrot.lane.b32.xlu1 %v6855_v43, %s12096_s7  ;;  %7657 = vrot.lane.b32.xlu0 %v6828_v33, %s12096_s7  ;;  %v6830_v43 = vpack.c.bf16 %v11345_v63, %v11344_v61  ;;  %v15040_v33 = vpop.f32.mrf.mxu3  ;;  %v11458_v9 = vpop.permute.xlu0 %11457  ;;  %v6626_v61 = vsel %vm5254_vm1, %v11450_v50, %v16461_v34 }
0x1279   :  { %7717 = vrot.lane.b32.xlu2 %v6858_v26, %s12096_s7  ;;  %16471 = vst [vmem:[#allocation87_spill] sm:$0xff] %v15040_v33  ;;  %v6862_v26 = vpack.c.bf16 %v6638_v29, %v6637_v23  ;;  %v6816_v29 = vpack.c.bf16 %v11455_v11, %v11454_v42 }
0x1280   :  { %7715 = vrot.lane.b32.xlu1 %v6857_v5, %s12096_s7  ;;  %7659 = vrot.lane.b32.xlu0 %v6829_v22, %s12096_s7  ;;  %v6825_v5 = vpack.c.bf16 %v11445_v58, %v11444_v55  ;;  %v6834_v22 = vpack.c.bf16 %v6610_v3, %v6609_v46  ;;  %v15059_v63 = vpop.f32.mrf.mxu3  ;;  %v11473_v18 = vpop.permute.xlu0 %11472 }
0x1281   :  { %7845 = vmatmul.bf16.gmra.mxu3 %v10286_v32  ;;  %7721 = vrot.lane.b32.xlu2 %v6860_v1, %s12096_s7  ;;  %v10311_v32 = vld [vmem:[%s16457_s11 + $0x168] sm:$0xf0]  ;;  %v11449_v1 = vunpack.i.l.bf16 %v11448_v49  ;;  %16472 = vst [vmem:[#allocation90_spill] sm:$0xff] %v15059_v63  ;;  %v11475_v11 = vunpack.i.h.bf16 %v11473_v18  ;;  %v11474_v42 = vunpack.i.l.bf16 %v11473_v18 }
0x1282   :  { %v7692_v10 = vpop.permute.xlu2 %7691  ;;  %v10314_v52 = vor.u32 %v10745_v38, %v10311_v32  ;;  %v10334_v32 = vor.u32 %v10754_v56, %v10333_v53 }
0x1283   :  { %v6625_v37 = vsel %vm5254_vm1, %v11449_v1, %v16461_v34  ;;  %v6849_v23 = vpack.c.bf16 %v11450_v50, %v11449_v1  ;;  %v6815_v18 = vpack.c.bf16 %v11475_v11, %v11474_v42 }
0x1284   :  { %7934 = vmatmul.bf16.gmra.mxu2 %v10290_v40  ;;  %v11463_v40 = vpop.permute.xlu1 %11462  ;;  %v6850_v49 = vpack.c.bf16 %v6626_v61, %v6625_v37 }
0x1285   :  { %v11465_v31 = vunpack.i.h.bf16 %v11463_v40  ;;  %v11464_v58 = vunpack.i.l.bf16 %v11463_v40  ;;  %v11470_v40 = vunpack.i.h.bf16 %v15019_v12 }
0x1287   :  { %v6824_v50 = vpack.c.bf16 %v11465_v31, %v11464_v58 }
0x1288   :  { %7719 = vrot.lane.b32.xlu1 %v6859_v45, %s12096_s7  ;;  %7661 = vrot.lane.b32.xlu0 %v6830_v43, %s12096_s7  ;;  %v11460_v45 = vunpack.i.h.bf16 %v11458_v9  ;;  %v11459_v43 = vunpack.i.l.bf16 %v11458_v9  ;;  %v15073_v46 = vpop.f32.mrf.mxu3 }
0x1289   :  { %7725 = vrot.lane.b32.xlu2 %v6862_v26, %s12096_s7  ;;  %16473 = vst [vmem:[#allocation89_spill] sm:$0xff] %v15073_v46  ;;  %v10431_v46 = vld [vmem:[%s16457_s11 + $0x258] sm:$0xf0] }
0x128a   :  { %v6607_v9 = vsel %vm5254_vm1, %v11459_v43, %v16461_v34  ;;  %v6608_v38 = vsel %vm5254_vm1, %v11460_v45, %v16461_v34 }
0x128b   :  { %v7690_v25 = vpop.permute.xlu2 %7689  ;;  %v6832_v1 = vpack.c.bf16 %v6608_v38, %v6607_v9 }
0x128c   :  { %v11478_v55 = vpop.permute.xlu1 %11477 }
0x128d   :  { %v11479_v53 = vunpack.i.l.bf16 %v11478_v55 }
0x1290   :  { %7723 = vrot.lane.b32.xlu1 %v6861_v16, %s12096_s7  ;;  %7651 = vrot.lane.b32.xlu0 %v6825_v5, %s12096_s7  ;;  %v10751_v16 = vld [vmem:[%s16457_s11 + $0x184] sm:$0xf]  ;;  %v10335_v5 = vld [vmem:[%s16457_s11 + $0x198] sm:$0xf0] }
0x1291   :  { %7850 = vmatmul.bf16.gmra.mxu3 %v10310_v0  ;;  %7669 = vrot.lane.b32.xlu2 %v6834_v22, %s12096_s7  ;;  %v6831_v22 = vpack.c.bf16 %v11460_v45, %v11459_v43  ;;  %v6624_v45 = vsel %vm5254_vm1, %v11470_v40, %v16461_v34 }
0x1293   :  { %v7686_v26 = vpop.permute.xlu2 %7685 }
0x1294   :  { %7939 = vmatmul.bf16.gmra.mxu2 %v10314_v52  ;;  %v11469_v52 = vunpack.i.l.bf16 %v15019_v12 }
0x1296   :  { %v6623_v12 = vsel %vm5254_vm1, %v11469_v52, %v16461_v34  ;;  %v6847_v43 = vpack.c.bf16 %v11470_v40, %v11469_v52  ;;  %v6863_v40 = vld [vmem:[#allocation30] sm:$0xff] }
0x1297   :  { %v6848_v58 = vpack.c.bf16 %v6624_v45, %v6623_v12  ;;  %v6866_v12 = vld [vmem:[#allocation30 + $0x18] sm:$0xff] }
0x1298   :  { %7699 = vrot.lane.b32.xlu1 %v6849_v23, %s12096_s7  ;;  %7633 = vrot.lane.b32.xlu0 %v6816_v29, %s12096_s7 }
0x1299   :  { %7701 = vrot.lane.b32.xlu2 %v6850_v49, %s12096_s7 }
0x129b   :  { %v7694_v3 = vpop.permute.xlu0 %7693  ;;  %v7682_v37 = vpop.permute.xlu2 %7681 }
0x129c   :  { %v7750_v0 = vsel %vm5947_vm2, %v7692_v10, %v7694_v3  ;;  %v10338_v10 = vor.u32 %v10751_v16, %v10335_v5  ;;  %v10357_v3 = vld [vmem:[%s16457_s11 + $0x1b0] sm:$0xf] }
0x129d   :  { %8163 = vmatpush.bf16.msrb.mxu3 %v7750_v0  ;;  %v10760_v0 = vld [vmem:[%s16457_s11 + $0x1c4] sm:$0xf0] }
0x129e   :  { %v6864_v16 = vld [vmem:[#allocation30 + $0x8] sm:$0xff]  ;;  %v10358_v5 = vor.u32 %v10760_v0, %v10357_v3  ;;  %v10763_v0 = vld [vmem:[%s16457_s11 + $0x1e4] sm:$0xf] }
0x12a0   :  { %7663 = vrot.lane.b32.xlu1 %v6831_v22, %s12096_s7  ;;  %7649 = vrot.lane.b32.xlu0 %v6824_v50, %s12096_s7  ;;  %v10757_v22 = vld [vmem:[%s16457_s11 + $0x1b4] sm:$0xf]  ;;  %v10359_v50 = vld [vmem:[%s16457_s11 + $0x1c8] sm:$0xf0] }
0x12a1   :  { %7855 = vmatmul.bf16.gmra.mxu3 %v10334_v32  ;;  %7665 = vrot.lane.b32.xlu2 %v6832_v1, %s12096_s7 }
0x12a2   :  { %v7688_v61 = vpop.permute.xlu1 %7687 }
0x12a3   :  { %v7646_v23 = vpop.permute.xlu0 %7645  ;;  %v15087_v29 = vpop.f32.mrf.mxu3  ;;  %v7749_v49 = vsel %vm5947_vm2, %v7688_v61, %v7690_v25  ;;  %v11480_v25 = vunpack.i.h.bf16 %v11478_v55  ;;  %v10362_v55 = vor.u32 %v10757_v22, %v10359_v50 }
0x12a4   :  { %7944 = vmatmul.bf16.gmra.mxu2 %v10338_v10  ;;  %7985 = vmatpush.bf16.msra.mxu0 %v7646_v23  ;;  %v6865_v23 = vld [vmem:[#allocation30 + $0x10] sm:$0xff] }
0x12a5   :  { %8164 = vmatpush.bf16.msrb.mxu3 %v7749_v49  ;;  %v6823_v1 = vpack.c.bf16 %v11480_v25, %v11479_v53  ;;  %v6867_v49 = vld [vmem:[#allocation30 + $0x20] sm:$0xff]  ;;  %v6868_v53 = vld [vmem:[#allocation30 + $0x28] sm:$0xff] }
0x12a7   :  { %v15094_v31 = vpop.f32.mrf.mxu2 }
0x12a8   :  { %7695 = vrot.lane.b32.xlu1 %v6847_v43, %s12096_s7  ;;  %7631 = vrot.lane.b32.xlu0 %v6815_v18, %s12096_s7  ;;  %v10381_v43 = vld [vmem:[%s16457_s11 + $0x1e0] sm:$0xf]  ;;  %v10766_v18 = vld [vmem:[%s16457_s11 + $0x1f4] sm:$0xf0] }
0x12a9   :  { %7697 = vrot.lane.b32.xlu2 %v6848_v58, %s12096_s7  ;;  %v10382_v3 = vor.u32 %v10766_v18, %v10381_v43  ;;  %v10772_v43 = vld [vmem:[%s16457_s11 + $0x224] sm:$0xf0] }
0x12aa   :  { %v7684_v56 = vpop.permute.xlu1 %7683 }
0x12ab   :  { %v7678_v34 = vpop.permute.xlu2 %7677  ;;  %v7644_v9 = vpop.permute.xlu0 %7643  ;;  %v7748_v38 = vsel %vm5947_vm2, %v7684_v56, %v7686_v26  ;;  %v4715_v56 = vld [vmem:[#allocation33 + $0x8] sm:$0xff] }
0x12ac   :  { %v15102_v32 = vpop.f32.mrf.mxu3  ;;  %7986 = vmatpush.bf16.msra.mxu0 %v7644_v9  ;;  %8165 = vmatpush.bf16.msrb.mxu3 %v7748_v38  ;;  %v10383_v9 = vld [vmem:[%s16457_s11 + $0x1f8] sm:$0xf0]  ;;  %v4714_v38 = vld [vmem:[#allocation33] sm:$0xff] }
0x12af   :  { %v15106_v52 = vpop.f32.mrf.mxu2 }
0x12b0   :  { %7647 = vrot.lane.b32.xlu1 %v6823_v1, %s12096_s7  ;;  %6902 = vperm.xlu0 %10878, %v6864_v16   ;;  %s16474_s7 = sld [smem:[#allocation64_spill]] }
0x12b1   :  { %7860 = vmatmul.bf16.gmra.mxu3 %v10358_v5  ;;  %6897 = vperm.xlu2 %10880, %v6863_v40   ;;  %v10386_v5 = vor.u32 %v10763_v0, %v10383_v9  ;;  %v10769_v0 = vld [vmem:[%s16457_s11 + $0x214] sm:$0xf]  ;;  %v10407_v9 = vld [vmem:[%s16457_s11 + $0x228] sm:$0xf0] }
0x12b2   :  { %v7680_v26 = vpop.permute.xlu1 %7679 }
0x12b3   :  { %v7674_v10 = vpop.permute.xlu2 %7673  ;;  %v7642_v11 = vpop.permute.xlu0 %7641  ;;  %v7747_v42 = vsel %vm5947_vm2, %v7680_v26, %v7682_v37  ;;  %v6870_v26 = vld [vmem:[#allocation30 + $0x38] sm:$0xff] }
0x12b4   :  { %v15110_v61 = vpop.f32.mrf.mxu3  ;;  %7949 = vmatmul.bf16.gmra.mxu2 %v10362_v55  ;;  %7987 = vmatpush.bf16.msra.mxu0 %v7642_v11  ;;  %v6869_v55 = vld [vmem:[#allocation30 + $0x30] sm:$0xff] }
0x12b5   :  { %8166 = vmatpush.bf16.msrb.mxu3 %v7747_v42  ;;  %v4716_v11 = vld [vmem:[#allocation33 + $0x10] sm:$0xff] }
0x12b6   :  { %v8438_v63 = vld [vmem:[%s16474_s7 + $0x8] sm:$0xff]  ;;  %v8439_v59 = vld [vmem:[%s16474_s7 + $0x10] sm:$0xff]  ;;  %v8440_v27 = vld [vmem:[%s16474_s7 + $0x18] sm:$0xff] }
0x12b7   :  { %v15112_v45 = vpop.f32.mrf.mxu2  ;;  %v8442_v17 = vld [vmem:[%s16474_s7 + $0x28] sm:$0xff] }
0x12b8   :  { %6907 = vperm.xlu1 %10879, %v6865_v23   ;;  %6917 = vperm.xlu0 %10878, %v6867_v49  }
0x12b9   :  { %6912 = vperm.xlu2 %10880, %v6866_v12   ;;  %v10405_v12 = vld [vmem:[%s16457_s11 + $0x210] sm:$0xf] }
0x12bb   :  { %v15116_v58 = vpop.permute.xlu2 %7705  ;;  %v7640_v37 = vpop.permute.xlu0 %7639 }
0x12bc   :  { %v15118_v25 = vpop.f32.mrf.mxu3  ;;  %7988 = vmatpush.bf16.msra.mxu0 %v7640_v37 }
0x12bf   :  { %v15122_v16 = vpop.f32.mrf.mxu2 }
0x12c0   :  { %6922 = vperm.xlu1 %10879, %v6868_v53   ;;  %4753 = vperm.xlu0 %10878, %v4715_v56   ;;  %v4717_v53 = vld [vmem:[#allocation33 + $0x18] sm:$0xff]  ;;  %v4718_v56 = vld [vmem:[#allocation33 + $0x20] sm:$0xff] }
0x12c1   :  { %7865 = vmatmul.bf16.gmra.mxu3 %v10382_v3  ;;  %4748 = vperm.xlu2 %10880, %v4714_v38   ;;  %v10406_v3 = vor.u32 %v10772_v43, %v10405_v12  ;;  %v6871_v38 = vld [vmem:[#allocation30 + $0x40] sm:$0xff] }
0x12c2   :  { %v7676_v22 = vpop.permute.xlu1 %7675 }
0x12c3   :  { %v15124_v50 = vpop.permute.xlu2 %7709  ;;  %v7746_v1 = vsel %vm5947_vm2, %v7676_v22, %v7678_v34  ;;  %v10410_v22 = vor.u32 %v10769_v0, %v10407_v9  ;;  %v8437_v9 = vld [vmem:[%s16474_s7] sm:$0xff] }
0x12c4   :  { %v15127_v40 = vpop.f32.mrf.mxu3  ;;  %7954 = vmatmul.bf16.gmra.mxu2 %v10386_v5  ;;  %8167 = vmatpush.bf16.msrb.mxu3 %v7746_v1 }
0x12c7   :  { %v15129_v42 = vpop.f32.mrf.mxu2 }
0x12c8   :  { %6927 = vperm.xlu1 %10879, %v6869_v55   ;;  %6932 = vperm.xlu0 %10878, %v6870_v26  }
0x12c9   :  { %4758 = vperm.xlu2 %10880, %v4716_v11   ;;  %v6872_v11 = vld [vmem:[#allocation30 + $0x48] sm:$0xff] }
0x12ca   :  { %v7672_v23 = vpop.permute.xlu1 %7671  ;;  %v7638_v49 = vpop.permute.xlu0 %7637 }
0x12cb   :  { %v15133_v18 = vpop.permute.xlu2 %7713  ;;  %7989 = vmatpush.bf16.msra.mxu0 %v7638_v49  ;;  %v7745_v34 = vsel %vm5947_vm2, %v7672_v23, %v7674_v10  ;;  %v6873_v23 = vld [vmem:[#allocation30 + $0x50] sm:$0xff]  ;;  %v4719_v49 = vld [vmem:[#allocation33 + $0x28] sm:$0xff] }
0x12cc   :  { %v15136_v37 = vpop.f32.mrf.mxu3  ;;  %8168 = vmatpush.bf16.msrb.mxu3 %v7745_v34 }
0x12cf   :  { %v15140_v5 = vpop.f32.mrf.mxu2 }
0x12d0   :  { %4763 = vperm.xlu1 %10879, %v4717_v53   ;;  %4768 = vperm.xlu0 %10878, %v4718_v56   ;;  %v10429_v53 = vld [vmem:[%s16457_s11 + $0x240] sm:$0xf]  ;;  %v10778_v56 = vld [vmem:[%s16457_s11 + $0x254] sm:$0xf0] }
0x12d1   :  { %7870 = vmatmul.bf16.gmra.mxu3 %v10406_v3  ;;  %6937 = vperm.xlu2 %10880, %v6871_v38   ;;  %v4720_v38 = vld [vmem:[#allocation33 + $0x30] sm:$0xff] }
0x12d2   :  { %v7668_v1 = vpop.permute.xlu1 %7667  ;;  %v7636_v10 = vpop.permute.xlu0 %7635 }
0x12d3   :  { %v15142_v55 = vpop.permute.xlu2 %7717  ;;  %7990 = vmatpush.bf16.msra.mxu0 %v7636_v10  ;;  %v10775_v10 = vld [vmem:[%s16457_s11 + $0x244] sm:$0xf] }
0x12d4   :  { %v15144_v26 = vpop.f32.mrf.mxu3  ;;  %7959 = vmatmul.bf16.gmra.mxu2 %v10410_v22  ;;  %v10430_v22 = vor.u32 %v10778_v56, %v10429_v53  ;;  %v6874_v56 = vld [vmem:[#allocation30 + $0x58] sm:$0xff] }
0x12d7   :  { %v15146_v12 = vpop.f32.mrf.mxu2 }
0x12d8   :  { %6942 = vperm.xlu1 %10879, %v6872_v11   ;;  %6947 = vperm.xlu0 %10878, %v6873_v23   ;;  %v10434_v23 = vor.u32 %v10775_v10, %v10431_v46 }
0x12d9   :  { %4773 = vperm.xlu2 %10880, %v4719_v49  }
0x12da   :  { %v15148_v43 = vpop.permute.xlu1 %7703  ;;  %v15150_v34 = vpop.permute.xlu0 %7653 }
0x12db   :  { %v15154_v3 = vpop.permute.xlu2 %7721 }
0x12dc   :  { %v15156_v0 = vpop.f32.mrf.mxu3 }
0x12df   :  { %v15162_v11 = vpop.f32.mrf.mxu2 }
0x12e0   :  { %8471 = vperm.xlu1 %10879, %v8437_v9   ;;  %4778 = vperm.xlu0 %10878, %v4720_v38   ;;  %v10453_v38 = vld [vmem:[%s16457_s11 + $0x270] sm:$0xf] }
0x12e1   :  { %7875 = vmatmul.bf16.gmra.mxu3 %v10430_v22  ;;  %8476 = vperm.xlu2 %10880, %v8438_v63   ;;  %v10784_v22 = vld [vmem:[%s16457_s11 + $0x284] sm:$0xf0] }
0x12e2   :  { %v15164_v49 = vpop.permute.xlu1 %7707  ;;  %v15166_v33 = vpop.permute.xlu0 %7655  ;;  %v10454_v39 = vor.u32 %v10784_v22, %v10453_v38  ;;  %v6876_v38 = vld [vmem:[#allocation30 + $0x68] sm:$0xff] }
0x12e3   :  { %v15168_v14 = vpop.permute.xlu2 %7725  ;;  %v4723_v22 = vld [vmem:[#allocation33 + $0x48] sm:$0xff] }
0x12e4   :  { %v15170_v53 = vpop.f32.mrf.mxu3  ;;  %7964 = vmatmul.bf16.gmra.mxu2 %v10434_v23 }
0x12e7   :  { %v15173_v9 = vpop.f32.mrf.mxu2 }
0x12e8   :  { %6952 = vperm.xlu1 %10879, %v6874_v56   ;;  %4783 = vperm.xlu0 %10878, %v4721_v36   ;;  %v10455_v56 = vld [vmem:[%s16457_s11 + $0x288] sm:$0xf0] }
0x12e9   :  { %8481 = vperm.xlu2 %10880, %v8439_v59   ;;  %v10458_v59 = vor.u32 %v10781_v47, %v10455_v56 }
0x12ea   :  { %v15175_v63 = vpop.permute.xlu1 %7711  ;;  %v7658_v46 = vpop.permute.xlu0 %7657 }
0x12eb   :  { %v7670_v10 = vpop.permute.xlu2 %7669 }
0x12ec   :  { %v15179_v41 = vpop.f32.mrf.mxu3  ;;  %v7744_v23 = vsel %vm5947_vm2, %v7668_v1, %v7670_v10 }
0x12ed   :  { %8169 = vmatpush.bf16.msrb.mxu3 %v7744_v23  ;;  %v8441_v23 = vld [vmem:[%s16474_s7 + $0x20] sm:$0xff] }
0x12ef   :  { %v15185_v36 = vpop.f32.mrf.mxu2 }
0x12f0   :  { %6957 = vperm.xlu1 %10879, %v6875_v8   ;;  %4788 = vperm.xlu0 %10878, %v4722_v51   ;;  %v10790_v51 = vld [vmem:[%s16457_s11 + $0x2b4] sm:$0xf0] }
0x12f1   :  { %7880 = vmatmul.bf16.gmra.mxu3 %v10454_v39  ;;  %8486 = vperm.xlu2 %10880, %v8440_v27   ;;  %v10477_v39 = vld [vmem:[%s16457_s11 + $0x2a0] sm:$0xf] }
0x12f2   :  { %v7716_v2 = vpop.permute.xlu1 %7715  ;;  %v7660_v4 = vpop.permute.xlu0 %7659  ;;  %v10478_v57 = vor.u32 %v10790_v51, %v10477_v39  ;;  %v4725_v51 = vld [vmem:[#allocation33 + $0x58] sm:$0xff] }
0x12f3   :  { %v15187_v1 = vpop.permute.xlu2 %7701 }
0x12f4   :  { %v15189_v10 = vpop.f32.mrf.mxu3  ;;  %7969 = vmatmul.bf16.gmra.mxu2 %v10458_v59  ;;  %v6877_v59 = vld [vmem:[#allocation30 + $0x70] sm:$0xff] }
0x12f7   :  { %v15192_v28 = vpop.f32.mrf.mxu2 }
0x12f8   :  { %6962 = vperm.xlu1 %10879, %v6876_v38   ;;  %4793 = vperm.xlu0 %10878, %v4723_v22   ;;  %v10482_v38 = vor.u32 %v10787_v6, %v10479_v24 }
0x12f9   :  { %8491 = vperm.xlu2 %10880, %v8441_v23  }
0x12fa   :  { %v7720_v27 = vpop.permute.xlu1 %7719  ;;  %v7662_v47 = vpop.permute.xlu0 %7661 }
0x12fb   :  { %v15196_v8 = vpop.permute.xlu2 %7665  ;;  %8074 = vmatpush.bf16.msra.mxu1 %v7662_v47 }
0x12fc   :  { %v15198_v56 = vpop.f32.mrf.mxu3 }
0x12ff   :  { %v15203_v48 = vpop.f32.mrf.mxu2  ;;  %8075 = vmatpush.bf16.msra.mxu1 %v7660_v4  ;;  %v6878_v4 = vld [vmem:[#allocation30 + $0x78] sm:$0xff] }
0x1300   :  { %6967 = vperm.xlu1 %10879, %v6877_v59   ;;  %4798 = vperm.xlu0 %10878, %v4724_v13   ;;  %v8443_v13 = vld [vmem:[%s16474_s7 + $0x30] sm:$0xff] }
0x1301   :  { %7885 = vmatmul.bf16.gmra.mxu3 %v10478_v57  ;;  %8496 = vperm.xlu2 %10880, %v8442_v17   ;;  %v7757_v17 = vsel %vm5947_vm2, %v7720_v27, %v15154_v3  ;;  %v7756_v3 = vsel %vm5947_vm2, %v7716_v2, %v15142_v55  ;;  %v6879_v27 = vld [vmem:[#allocation30 + $0x80] sm:$0xff] }
0x1302   :  { %v7724_v22 = vpop.permute.xlu1 %7723  ;;  %v7652_v23 = vpop.permute.xlu0 %7651 }
0x1303   :  { %v7758_v47 = vsel %vm5947_vm2, %v7724_v22, %v15168_v14  ;;  %v15207_v30 = vpop.permute.xlu2 %7697  ;;  %8076 = vmatpush.bf16.msra.mxu1 %v7658_v46  ;;  %v10501_v14 = vld [vmem:[%s16457_s11 + $0x2d0] sm:$0xf]  ;;  %v10796_v46 = vld [vmem:[%s16457_s11 + $0x2e4] sm:$0xf0] }
0x1304   :  { %v15209_v39 = vpop.f32.mrf.mxu3  ;;  %7974 = vmatmul.bf16.gmra.mxu2 %v10482_v38  ;;  %v4726_v38 = vld [vmem:[#allocation33 + $0x60] sm:$0xff]  ;;  %v10502_v22 = vor.u32 %v10796_v46, %v10501_v14  ;;  %v4727_v46 = vld [vmem:[#allocation33 + $0x68] sm:$0xff] }
0x1305   :  { %16475 = vst [vmem:[#allocation67_spill] sm:$0xff] %v15209_v39  ;;  %8252 = vmatpush.bf16.msrb.mxu2 %v7758_v47  ;;  %v10793_v47 = vld [vmem:[%s16457_s11 + $0x2d4] sm:$0xf]  ;;  %v8465_v39 = vld [vmem:[%s16474_s7 + $0xe0] sm:$0xff] }
0x1307   :  { %v15212_v24 = vpop.f32.mrf.mxu2  ;;  %8077 = vmatpush.bf16.msra.mxu1 %v15166_v33 }
0x1308   :  { %16476 = vst [vmem:[#allocation68_spill] sm:$0xff] %v15212_v24  ;;  %6972 = vperm.xlu1 %10879, %v6878_v4   ;;  %4803 = vperm.xlu0 %10878, %v4725_v51   ;;  %v10503_v4 = vld [vmem:[%s16457_s11 + $0x2e8] sm:$0xf0]  ;;  %v10753_v24 = vld [vmem:[%s16457_s11 + $0x194] sm:$0xf] }
0x1309   :  { %8253 = vmatpush.bf16.msrb.mxu2 %v7757_v17  ;;  %8501 = vperm.xlu2 %10880, %v8443_v13   ;;  %v8444_v13 = vld [vmem:[%s16474_s7 + $0x38] sm:$0xff]  ;;  %v10506_v17 = vor.u32 %v10793_v47, %v10503_v4  ;;  %v10157_v4 = vld [vmem:[%s16457_s11 + $0x10] sm:$0xf] }
0x130a   :  { %v7700_v6 = vpop.permute.xlu1 %7699  ;;  %v7634_v57 = vpop.permute.xlu0 %7633 }
0x130b   :  { %v15219_v59 = vpop.permute.xlu2 %6897  ;;  %7991 = vmatpush.bf16.msra.mxu0 %v7634_v57  ;;  %8078 = vmatpush.bf16.msra.mxu1 %v15150_v34  ;;  %v7755_v34 = vsel %vm5947_vm2, %v15175_v63, %v15133_v18  ;;  %v7754_v18 = vsel %vm5947_vm2, %v15164_v49, %v15124_v50  ;;  %v6880_v63 = vld [vmem:[#allocation30 + $0x88] sm:$0xff] }
0x130c   :  { %v15222_v33 = vpop.f32.mrf.mxu3 }
0x130d   :  { %16477 = vst [vmem:[#allocation70_spill] sm:$0xff] %v15222_v33  ;;  %8254 = vmatpush.bf16.msrb.mxu2 %v7756_v3 }
0x130f   :  { %v15228_v51 = vpop.f32.mrf.mxu2  ;;  %8079 = vmatpush.bf16.msra.mxu1 %v7652_v23 }
0x1310   :  { %16478 = vst [vmem:[#allocation69_spill] sm:$0xff] %v15228_v51  ;;  %6977 = vperm.xlu1 %10879, %v6879_v27   ;;  %4808 = vperm.xlu0 %10878, %v4726_v38   ;;  %v8445_v27 = vld [vmem:[%s16474_s7 + $0x40] sm:$0xff]  ;;  %v10149_v38 = vld [vmem:[%s16457_s11 + $0x8] sm:$0xf]  ;;  %v10319_v51 = vld [vmem:[%s16457_s11 + $0x170] sm:$0xf0] }
0x1311   :  { %8255 = vmatpush.bf16.msrb.mxu2 %v7755_v34  ;;  %7890 = vmatmul.bf16.gmra.mxu3 %v10502_v22  ;;  %v10707_v22 = vld [vmem:[%s16457_s11 + $0x1c] sm:$0xf0] }
0x1312   :  { %8506 = vperm.xlu2 %10880, %v8444_v13   ;;  %v7664_v2 = vpop.permute.xlu1 %7663  ;;  %v7650_v55 = vpop.permute.xlu0 %7649  ;;  %v10150_v47 = vor.u32 %v10707_v22, %v10149_v38  ;;  %v10708_v13 = vld [vmem:[%s16457_s11 + $0x24] sm:$0xf0]  ;;  %v10151_v38 = vld [vmem:[%s16457_s11 + $0x20] sm:$0xf0] }
0x1313   :  { %v15234_v57 = vpop.permute.xlu2 %6912  ;;  %8080 = vmatpush.bf16.msra.mxu1 %v7650_v55  ;;  %v7743_v23 = vsel %vm5947_vm2, %v7664_v2, %v15196_v8  ;;  %v7753_v8 = vsel %vm5947_vm2, %v15148_v43, %v15116_v58  ;;  %v7752_v58 = vsel %vm5947_vm2, %v7700_v6, %v15187_v1  ;;  %v6881_v43 = vld [vmem:[#allocation30 + $0x90] sm:$0xff]  ;;  %v10158_v55 = vor.u32 %v10708_v13, %v10157_v4  ;;  %v6882_v4 = vld [vmem:[#allocation30 + $0x98] sm:$0xff] }
0x1314   :  { %v15238_v14 = vpop.f32.mrf.mxu3  ;;  %7979 = vmatmul.bf16.gmra.mxu2 %v10506_v17  ;;  %8170 = vmatpush.bf16.msrb.mxu3 %v7743_v23  ;;  %v4728_v2 = vld [vmem:[#allocation33 + $0x70] sm:$0xff] }
0x1315   :  { %16479 = vst [vmem:[#allocation66_spill] sm:$0xff] %v15238_v14  ;;  %8256 = vmatpush.bf16.msrb.mxu2 %v7754_v18  ;;  %v10705_v23 = vld [vmem:[%s16457_s11 + $0x14] sm:$0xf]  ;;  %v10159_v18 = vld [vmem:[%s16457_s11 + $0x28] sm:$0xf0] }
0x1316   :  { %v10162_v1 = vor.u32 %v10705_v23, %v10159_v18  ;;  %v8447_v13 = vld [vmem:[%s16474_s7 + $0x50] sm:$0xff]  ;;  %v10714_v23 = vld [vmem:[%s16457_s11 + $0x54] sm:$0xf0]  ;;  %v10746_v14 = vld [vmem:[%s16457_s11 + $0x15c] sm:$0xf] }
0x1317   :  { %v15243_v3 = vpop.f32.mrf.mxu2 }
0x1318   :  { %16480 = vst [vmem:[#allocation93_spill] sm:$0xff] %v15243_v3  ;;  %6982 = vperm.xlu1 %10879, %v6880_v63   ;;  %4813 = vperm.xlu0 %10878, %v4727_v46   ;;  %v8446_v46 = vld [vmem:[%s16474_s7 + $0x48] sm:$0xff] }
0x1319   :  { %8257 = vmatpush.bf16.msrb.mxu2 %v7753_v8 }
0x131a   :  { %8511 = vperm.xlu2 %10880, %v8445_v27   ;;  %v7696_v50 = vpop.permute.xlu1 %7695  ;;  %v7632_v49 = vpop.permute.xlu0 %7631  ;;  %v10704_v27 = vld [vmem:[%s16457_s11 + $0xc] sm:$0xf] }
0x131b   :  { %v15253_v34 = vpop.permute.xlu2 %4748  ;;  %7992 = vmatpush.bf16.msra.mxu0 %v7632_v49  ;;  %v7751_v22 = vsel %vm5947_vm2, %v7696_v50, %v15207_v30  ;;  %v10154_v8 = vor.u32 %v10704_v27, %v10151_v38  ;;  %v4729_v30 = vld [vmem:[#allocation33 + $0x78] sm:$0xff]  ;;  %v6883_v38 = vld [vmem:[#allocation30 + $0xa0] sm:$0xff] }
0x131c   :  { %v15255_v17 = vpop.f32.mrf.mxu3 }
0x131d   :  { %16481 = vst [vmem:[#allocation94_spill] sm:$0xff] %v15255_v17  ;;  %8258 = vmatpush.bf16.msrb.mxu2 %v7752_v58  ;;  %v10173_v58 = vld [vmem:[%s16457_s11 + $0x38] sm:$0xf] }
0x131e   :  { %7993 = vmatmul.bf16.vlgmr.msra.gmra.mxu0 %v10150_v47 }
0x131f   :  { %v15261_v63 = vpop.f32.mrf.mxu2 }
0x1320   :  { %16482 = vst [vmem:[#allocation95_spill] sm:$0xff] %v15261_v63  ;;  %6987 = vperm.xlu1 %10879, %v6881_v43   ;;  %4818 = vperm.xlu0 %10878, %v4728_v2   ;;  %v10713_v43 = vld [vmem:[%s16457_s11 + $0x4c] sm:$0xf0]  ;;  %v10740_v63 = vld [vmem:[%s16457_s11 + $0x12c] sm:$0xf] }
0x1321   :  { %8259 = vmatpush.bf16.msrb.mxu2 %v7751_v22  ;;  %8171 = vmatmul.bf16.vlgmr.msrb.gmra.mxu3 %v10158_v55  ;;  %v10174_v2 = vor.u32 %v10713_v43, %v10173_v58  ;;  %v10181_v55 = vld [vmem:[%s16457_s11 + $0x40] sm:$0xf]  ;;  %v10710_v58 = vld [vmem:[%s16457_s11 + $0x3c] sm:$0xf]  ;;  %v10175_v43 = vld [vmem:[%s16457_s11 + $0x50] sm:$0xf0] }
0x1322   :  { %8516 = vperm.xlu2 %10880, %v8446_v46   ;;  %v7648_v6 = vpop.permute.xlu1 %7647  ;;  %v4730_v22 = vld [vmem:[#allocation33 + $0x80] sm:$0xff] }
0x1323   :  { %v15268_v49 = vpop.permute.xlu2 %4758  ;;  %8081 = vmatpush.bf16.msra.mxu1 %v7648_v6  ;;  %v10711_v6 = vld [vmem:[%s16457_s11 + $0x44] sm:$0xf] }
0x1324   :  { %v15270_v47 = vpop.f32.mrf.mxu3  ;;  %8260 = vmatmul.bf16.vlgmr.msrb.gmra.mxu2 %v10162_v1  ;;  %v10182_v1 = vor.u32 %v10714_v23, %v10181_v55  ;;  %v10178_v55 = vor.u32 %v10710_v58, %v10175_v43  ;;  %v4732_v58 = vld [vmem:[#allocation33 + $0x90] sm:$0xff] }
0x1325   :  { %16483 = vst [vmem:[#allocation96_spill] sm:$0xff] %v15270_v47 }
0x1326   :  { %8082 = vmatmul.bf16.vlgmr.msra.gmra.mxu1 %v10154_v8  ;;  %v10183_v8 = vld [vmem:[%s16457_s11 + $0x58] sm:$0xf0] }
0x1327   :  { %v15272_v50 = vpop.f32.mrf.mxu2 }
0x1328   :  { %16484 = vst [vmem:[#allocation97_spill] sm:$0xff] %v15272_v50  ;;  %6992 = vperm.xlu1 %10879, %v6882_v4   ;;  %4823 = vperm.xlu0 %10878, %v4729_v30   ;;  %v10303_v50 = vld [vmem:[%s16457_s11 + $0x148] sm:$0xf0] }
0x132a   :  { %8521 = vperm.xlu2 %10880, %v8447_v13   ;;  %v8448_v13 = vld [vmem:[%s16474_s7 + $0x58] sm:$0xff] }
0x132b   :  { %v6938_v18 = vpop.permute.xlu2 %6937 }
0x132c   :  { %v7837_v46 = vadd.f32 %v15170_v53, %v6938_v18  ;;  %v15280_v27 = vpop.f32.mrf.mxu3  ;;  %v10186_v53 = vor.u32 %v10711_v6, %v10183_v8  ;;  %v10720_v6 = vld [vmem:[%s16457_s11 + $0x84] sm:$0xf0] }
0x132d   :  { %16485 = vst [vmem:[#allocation98_spill] sm:$0xff] %v15280_v27  ;;  %v10734_v27 = vld [vmem:[%s16457_s11 + $0xfc] sm:$0xf] }
0x132e   :  { %v15285_v4 = vadd.f32 %v15173_v9, %v7837_v46  ;;  %7998 = vmatmul.bf16.gmra.mxu0 %v10174_v2  ;;  %v6884_v9 = vld [vmem:[#allocation30 + $0xa8] sm:$0xff]  ;;  %v8449_v46 = vld [vmem:[%s16474_s7 + $0x60] sm:$0xff] }
0x132f   :  { %v15287_v30 = vpop.f32.mrf.mxu2  ;;  %v4731_v2 = vld [vmem:[#allocation33 + $0x88] sm:$0xff] }
0x1330   :  { %16486 = vst [vmem:[#allocation99_spill] sm:$0xff] %v15287_v30  ;;  %6997 = vperm.xlu1 %10879, %v6883_v38   ;;  %4828 = vperm.xlu0 %10878, %v4730_v22   ;;  %v10197_v30 = vld [vmem:[%s16457_s11 + $0x68] sm:$0xf]  ;;  %v10719_v38 = vld [vmem:[%s16457_s11 + $0x7c] sm:$0xf0] }
0x1331   :  { %8176 = vmatmul.bf16.gmra.mxu3 %v10182_v1  ;;  %v10198_v22 = vor.u32 %v10719_v38, %v10197_v30  ;;  %v10205_v1 = vld [vmem:[%s16457_s11 + $0x70] sm:$0xf] }
0x1332   :  { %8526 = vperm.xlu2 %10880, %v8448_v13   ;;  %v6885_v13 = vld [vmem:[#allocation30 + $0xb0] sm:$0xff]  ;;  %v10206_v43 = vor.u32 %v10720_v6, %v10205_v1  ;;  %v4733_v1 = vld [vmem:[#allocation33 + $0x98] sm:$0xff] }
0x1334   :  { %v15292_v23 = vpop.f32.mrf.mxu3  ;;  %8265 = vmatmul.bf16.gmra.mxu2 %v10186_v53  ;;  %v10717_v53 = vld [vmem:[%s16457_s11 + $0x74] sm:$0xf] }
0x1335   :  { %16487 = vst [vmem:[#allocation100_spill] sm:$0xff] %v15292_v23  ;;  %v8450_v23 = vld [vmem:[%s16474_s7 + $0x68] sm:$0xff] }
0x1336   :  { %8087 = vmatmul.bf16.gmra.mxu1 %v10178_v55  ;;  %v10207_v55 = vld [vmem:[%s16457_s11 + $0x88] sm:$0xf0] }
0x1337   :  { %v15294_v18 = vpop.f32.mrf.mxu2  ;;  %v10210_v30 = vor.u32 %v10717_v53, %v10207_v55  ;;  %v6887_v55 = vld [vmem:[#allocation30 + $0xc0] sm:$0xff] }
0x1338   :  { %16488 = vst [vmem:[#allocation101_spill] sm:$0xff] %v15294_v18  ;;  %7002 = vperm.xlu1 %10879, %v6884_v9   ;;  %4833 = vperm.xlu0 %10878, %v4731_v2   ;;  %v10716_v9 = vld [vmem:[%s16457_s11 + $0x6c] sm:$0xf]  ;;  %v10199_v2 = vld [vmem:[%s16457_s11 + $0x80] sm:$0xf0] }
0x133a   :  { %8531 = vperm.xlu2 %10880, %v8449_v46   ;;  %v10202_v46 = vor.u32 %v10716_v9, %v10199_v2  ;;  %v4734_v9 = vld [vmem:[#allocation33 + $0xa0] sm:$0xff] }
0x133c   :  { %v15301_v8 = vpop.f32.mrf.mxu3 }
0x133d   :  { %16489 = vst [vmem:[#allocation102_spill] sm:$0xff] %v15301_v8  ;;  %v10221_v8 = vld [vmem:[%s16457_s11 + $0x98] sm:$0xf] }
0x133e   :  { %8003 = vmatmul.bf16.gmra.mxu0 %v10198_v22  ;;  %v6886_v22 = vld [vmem:[#allocation30 + $0xb8] sm:$0xff] }
0x133f   :  { %v15305_v18 = vpop.f32.mrf.mxu2 }
0x1340   :  { %16490 = vst [vmem:[#allocation103_spill] sm:$0xff] %v15305_v18  ;;  %7007 = vperm.xlu1 %10879, %v6885_v13   ;;  %4838 = vperm.xlu0 %10878, %v4732_v58   ;;  %v8451_v18 = vld [vmem:[%s16474_s7 + $0x70] sm:$0xff]  ;;  %v10229_v58 = vld [vmem:[%s16457_s11 + $0xa0] sm:$0xf] }
0x1341   :  { %8181 = vmatmul.bf16.gmra.mxu3 %v10206_v43  ;;  %v10725_v13 = vld [vmem:[%s16457_s11 + $0xac] sm:$0xf0]  ;;  %v10726_v43 = vld [vmem:[%s16457_s11 + $0xb4] sm:$0xf0] }
0x1342   :  { %8536 = vperm.xlu2 %10880, %v8450_v23   ;;  %v10222_v23 = vor.u32 %v10725_v13, %v10221_v8  ;;  %v10230_v2 = vor.u32 %v10726_v43, %v10229_v58  ;;  %v4735_v58 = vld [vmem:[#allocation33 + $0xa8] sm:$0xff] }
0x1344   :  { %v15310_v38 = vpop.f32.mrf.mxu3  ;;  %8270 = vmatmul.bf16.gmra.mxu2 %v10210_v30  ;;  %v10723_v30 = vld [vmem:[%s16457_s11 + $0xa4] sm:$0xf] }
0x1345   :  { %16491 = vst [vmem:[#allocation104_spill] sm:$0xff] %v15310_v38  ;;  %v8452_v38 = vld [vmem:[%s16474_s7 + $0x78] sm:$0xff] }
0x1346   :  { %8092 = vmatmul.bf16.gmra.mxu1 %v10202_v46  ;;  %v10231_v46 = vld [vmem:[%s16457_s11 + $0xb8] sm:$0xf0] }
0x1347   :  { %v15312_v6 = vpop.f32.mrf.mxu2 }
0x1348   :  { %16492 = vst [vmem:[#allocation105_spill] sm:$0xff] %v15312_v6  ;;  %7012 = vperm.xlu1 %10879, %v6886_v22   ;;  %4843 = vperm.xlu0 %10878, %v4733_v1   ;;  %v10722_v22 = vld [vmem:[%s16457_s11 + $0x9c] sm:$0xf]  ;;  %v10223_v1 = vld [vmem:[%s16457_s11 + $0xb0] sm:$0xf0] }
0x1349   :  { %v10226_v8 = vor.u32 %v10722_v22, %v10223_v1  ;;  %v4736_v22 = vld [vmem:[#allocation33 + $0xb0] sm:$0xff] }
0x134a   :  { %8541 = vperm.xlu2 %10880, %v8451_v18   ;;  %v10234_v18 = vor.u32 %v10723_v30, %v10231_v46  ;;  %v6889_v46 = vld [vmem:[#allocation30 + $0xd0] sm:$0xff] }
0x134c   :  { %v15319_v53 = vpop.f32.mrf.mxu3 }
0x134d   :  { %16493 = vst [vmem:[#allocation106_spill] sm:$0xff] %v15319_v53  ;;  %v10245_v53 = vld [vmem:[%s16457_s11 + $0xc8] sm:$0xf] }
0x134e   :  { %8008 = vmatmul.bf16.gmra.mxu0 %v10222_v23  ;;  %v6888_v23 = vld [vmem:[#allocation30 + $0xc8] sm:$0xff] }
0x134f   :  { %v15323_v6 = vpop.f32.mrf.mxu2 }
0x1350   :  { %16494 = vst [vmem:[#allocation107_spill] sm:$0xff] %v15323_v6  ;;  %7017 = vperm.xlu1 %10879, %v6887_v55   ;;  %4848 = vperm.xlu0 %10878, %v4734_v9   ;;  %v8453_v6 = vld [vmem:[%s16474_s7 + $0x80] sm:$0xff]  ;;  %v10253_v9 = vld [vmem:[%s16457_s11 + $0xd0] sm:$0xf] }
0x1351   :  { %8186 = vmatmul.bf16.gmra.mxu3 %v10230_v2  ;;  %v10731_v55 = vld [vmem:[%s16457_s11 + $0xdc] sm:$0xf0]  ;;  %v10732_v2 = vld [vmem:[%s16457_s11 + $0xe4] sm:$0xf0] }
0x1352   :  { %8546 = vperm.xlu2 %10880, %v8452_v38   ;;  %v10246_v38 = vor.u32 %v10731_v55, %v10245_v53  ;;  %v10254_v1 = vor.u32 %v10732_v2, %v10253_v9  ;;  %v4737_v9 = vld [vmem:[#allocation33 + $0xb8] sm:$0xff] }
0x1354   :  { %v15328_v13 = vpop.f32.mrf.mxu3  ;;  %8275 = vmatmul.bf16.gmra.mxu2 %v10234_v18  ;;  %v10729_v18 = vld [vmem:[%s16457_s11 + $0xd4] sm:$0xf] }
0x1355   :  { %16495 = vst [vmem:[#allocation108_spill] sm:$0xff] %v15328_v13  ;;  %v8454_v13 = vld [vmem:[%s16474_s7 + $0x88] sm:$0xff] }
0x1356   :  { %8097 = vmatmul.bf16.gmra.mxu1 %v10226_v8  ;;  %v10255_v8 = vld [vmem:[%s16457_s11 + $0xe8] sm:$0xf0] }
0x1357   :  { %v15330_v43 = vpop.f32.mrf.mxu2 }
0x1358   :  { %16496 = vst [vmem:[#allocation109_spill] sm:$0xff] %v15330_v43  ;;  %7022 = vperm.xlu1 %10879, %v6888_v23   ;;  %4853 = vperm.xlu0 %10878, %v4735_v58   ;;  %v10728_v23 = vld [vmem:[%s16457_s11 + $0xcc] sm:$0xf]  ;;  %v10247_v58 = vld [vmem:[%s16457_s11 + $0xe0] sm:$0xf0] }
0x1359   :  { %v10250_v53 = vor.u32 %v10728_v23, %v10247_v58  ;;  %v6891_v23 = vld [vmem:[#allocation30 + $0xe0] sm:$0xff] }
0x135a   :  { %8551 = vperm.xlu2 %10880, %v8453_v6   ;;  %v10258_v6 = vor.u32 %v10729_v18, %v10255_v8  ;;  %v15355_v18 = vpop.permute.xlu0 %6902  ;;  %v4738_v58 = vld [vmem:[#allocation33 + $0xc0] sm:$0xff] }
0x135c   :  { %v15337_v30 = vpop.f32.mrf.mxu3 }
0x135d   :  { %16497 = vst [vmem:[#allocation110_spill] sm:$0xff] %v15337_v30  ;;  %v10269_v30 = vld [vmem:[%s16457_s11 + $0xf8] sm:$0xf] }
0x135e   :  { %8013 = vmatmul.bf16.gmra.mxu0 %v10246_v38  ;;  %v6890_v38 = vld [vmem:[#allocation30 + $0xd8] sm:$0xff] }
0x135f   :  { %v15341_v43 = vpop.f32.mrf.mxu2 }
0x1360   :  { %16498 = vst [vmem:[#allocation111_spill] sm:$0xff] %v15341_v43  ;;  %7027 = vperm.xlu1 %10879, %v6889_v46   ;;  %4858 = vperm.xlu0 %10878, %v4736_v22   ;;  %v8455_v43 = vld [vmem:[%s16474_s7 + $0x90] sm:$0xff]  ;;  %v10277_v22 = vld [vmem:[%s16457_s11 + $0x100] sm:$0xf] }
0x1361   :  { %8191 = vmatmul.bf16.gmra.mxu3 %v10254_v1  ;;  %v10737_v46 = vld [vmem:[%s16457_s11 + $0x10c] sm:$0xf0]  ;;  %v10738_v1 = vld [vmem:[%s16457_s11 + $0x114] sm:$0xf0] }
0x1362   :  { %8556 = vperm.xlu2 %10880, %v8454_v13   ;;  %v10270_v13 = vor.u32 %v10737_v46, %v10269_v30 }
0x1364   :  { %v15346_v55 = vpop.f32.mrf.mxu3  ;;  %8280 = vmatmul.bf16.gmra.mxu2 %v10258_v6  ;;  %v10278_v6 = vor.u32 %v10738_v1, %v10277_v22  ;;  %v4739_v1 = vld [vmem:[#allocation33 + $0xc8] sm:$0xff] }
0x1365   :  { %16499 = vst [vmem:[#allocation112_spill] sm:$0xff] %v15346_v55 }
0x1366   :  { %8102 = vmatmul.bf16.gmra.mxu1 %v10250_v53  ;;  %v10735_v53 = vld [vmem:[%s16457_s11 + $0x104] sm:$0xf] }
0x1367   :  { %v15348_v2 = vpop.f32.mrf.mxu2 }
0x1368   :  { %16500 = vst [vmem:[#allocation113_spill] sm:$0xff] %v15348_v2  ;;  %7032 = vperm.xlu1 %10879, %v6890_v38   ;;  %4863 = vperm.xlu0 %10878, %v4737_v9   ;;  %v10279_v2 = vld [vmem:[%s16457_s11 + $0x118] sm:$0xf0]  ;;  %v10271_v9 = vld [vmem:[%s16457_s11 + $0x110] sm:$0xf0] }
0x1369   :  { %v8456_v38 = vld [vmem:[%s16474_s7 + $0x98] sm:$0xff]  ;;  %v10282_v30 = vor.u32 %v10735_v53, %v10279_v2  ;;  %v10274_v46 = vor.u32 %v10734_v27, %v10271_v9  ;;  %v10743_v2 = vld [vmem:[%s16457_s11 + $0x13c] sm:$0xf0]  ;;  %v10301_v53 = vld [vmem:[%s16457_s11 + $0x130] sm:$0xf] }
0x136a   :  { %8561 = vperm.xlu2 %10880, %v8455_v43   ;;  %v15366_v43 = vpop.permute.xlu1 %6907 }
0x136c   :  { %v15357_v8 = vpop.f32.mrf.mxu3 }
0x136d   :  { %16501 = vst [vmem:[#allocation114_spill] sm:$0xff] %v15357_v8 }
0x136e   :  { %8018 = vmatmul.bf16.gmra.mxu0 %v10270_v13  ;;  %v6892_v13 = vld [vmem:[#allocation30 + $0xe8] sm:$0xff] }
0x136f   :  { %v15361_v55 = vpop.f32.mrf.mxu2 }
0x1370   :  { %16502 = vst [vmem:[#allocation115_spill] sm:$0xff] %v15361_v55  ;;  %7037 = vperm.xlu1 %10879, %v6891_v23   ;;  %4868 = vperm.xlu0 %10878, %v4738_v58   ;;  %v15370_v55 = vpop.permute.xlu0 %6917  ;;  %v8457_v23 = vld [vmem:[%s16474_s7 + $0xa0] sm:$0xff]  ;;  %v10293_v58 = vld [vmem:[%s16457_s11 + $0x128] sm:$0xf] }
0x1371   :  { %8196 = vmatmul.bf16.gmra.mxu3 %v10278_v6  ;;  %v10294_v6 = vor.u32 %v10743_v2, %v10293_v58 }
0x1372   :  { %8566 = vperm.xlu2 %10880, %v8456_v38   ;;  %v15377_v27 = vpop.permute.xlu1 %6922  ;;  %v10744_v38 = vld [vmem:[%s16457_s11 + $0x144] sm:$0xf0] }
0x1374   :  { %v15368_v22 = vpop.f32.mrf.mxu3  ;;  %8285 = vmatmul.bf16.gmra.mxu2 %v10282_v30  ;;  %v6893_v30 = vld [vmem:[#allocation30 + $0xf0] sm:$0xff] }
0x1375   :  { %16503 = vst [vmem:[#allocation116_spill] sm:$0xff] %v15368_v22  ;;  %v10741_v22 = vld [vmem:[%s16457_s11 + $0x134] sm:$0xf] }
0x1376   :  { %8107 = vmatmul.bf16.gmra.mxu1 %v10274_v46  ;;  %v4740_v46 = vld [vmem:[#allocation33 + $0xd0] sm:$0xff] }
0x1377   :  { %v15372_v8 = vpop.f32.mrf.mxu2 }
0x1378   :  { %16504 = vst [vmem:[#allocation117_spill] sm:$0xff] %v15372_v8  ;;  %7042 = vperm.xlu1 %10879, %v6892_v13   ;;  %4873 = vperm.xlu0 %10878, %v4739_v1   ;;  %v10302_v8 = vor.u32 %v10744_v38, %v10301_v53  ;;  %v8458_v13 = vld [vmem:[%s16474_s7 + $0xa8] sm:$0xff]  ;;  %v10295_v1 = vld [vmem:[%s16457_s11 + $0x140] sm:$0xf0]  ;;  %v15390_v17 = vpop.permute.xlu0 %4753  ;;  %v6894_v53 = vld [vmem:[#allocation30 + $0xf8] sm:$0xff] }
0x1379   :  { %v10298_v58 = vor.u32 %v10740_v63, %v10295_v1  ;;  %v4741_v38 = vld [vmem:[#allocation33 + $0xd8] sm:$0xff] }
0x137a   :  { %8571 = vperm.xlu2 %10880, %v8457_v23   ;;  %v10306_v23 = vor.u32 %v10741_v22, %v10303_v50  ;;  %v15392_v2 = vpop.permute.xlu1 %6927  ;;  %v8459_v50 = vld [vmem:[%s16474_s7 + $0xb0] sm:$0xff] }
0x137b   :  { %v10749_v22 = vld [vmem:[%s16457_s11 + $0x16c] sm:$0xf0] }
0x137c   :  { %v15381_v9 = vpop.f32.mrf.mxu3 }
0x137d   :  { %16505 = vst [vmem:[#allocation118_spill] sm:$0xff] %v15381_v9  ;;  %v10327_v9 = vld [vmem:[%s16457_s11 + $0x178] sm:$0xf0] }
0x137e   :  { %8023 = vmatmul.bf16.gmra.mxu0 %v10294_v6 }
0x137f   :  { %v15385_v47 = vpop.f32.mrf.mxu2 }
0x1380   :  { %16506 = vst [vmem:[#allocation119_spill] sm:$0xff] %v15385_v47  ;;  %7047 = vperm.xlu1 %10879, %v6893_v30   ;;  %4878 = vperm.xlu0 %10878, %v4740_v46   ;;  %v15401_v63 = vpop.permute.xlu0 %6932  ;;  %v10325_v46 = vld [vmem:[%s16457_s11 + $0x160] sm:$0xf] }
0x1381   :  { %8201 = vmatmul.bf16.gmra.mxu3 %v10302_v8  ;;  %v10317_v8 = vld [vmem:[%s16457_s11 + $0x158] sm:$0xf] }
0x1382   :  { %8576 = vperm.xlu2 %10880, %v8458_v13   ;;  %v10318_v30 = vor.u32 %v10749_v22, %v10317_v8  ;;  %v10750_v13 = vld [vmem:[%s16457_s11 + $0x174] sm:$0xf0]  ;;  %v15411_v3 = vpop.permute.xlu1 %4763  ;;  %v10322_v8 = vor.u32 %v10746_v14, %v10319_v51  ;;  %v10755_v51 = vld [vmem:[%s16457_s11 + $0x19c] sm:$0xf0] }
0x1384   :  { %v15394_v6 = vpop.f32.mrf.mxu3  ;;  %8290 = vmatmul.bf16.gmra.mxu2 %v10306_v23  ;;  %v8460_v23 = vld [vmem:[%s16474_s7 + $0xb8] sm:$0xff] }
0x1385   :  { %16507 = vst [vmem:[#allocation120_spill] sm:$0xff] %v15394_v6  ;;  %v10326_v6 = vor.u32 %v10750_v13, %v10325_v46  ;;  %v4744_v13 = vld [vmem:[#allocation33 + $0xf0] sm:$0xff] }
0x1386   :  { %8112 = vmatmul.bf16.gmra.mxu1 %v10298_v58  ;;  %v8461_v58 = vld [vmem:[%s16474_s7 + $0xc0] sm:$0xff] }
0x1387   :  { %v15396_v47 = vpop.f32.mrf.mxu2 }
0x1388   :  { %16508 = vst [vmem:[#allocation121_spill] sm:$0xff] %v15396_v47  ;;  %7052 = vperm.xlu1 %10879, %v6894_v53   ;;  %4883 = vperm.xlu0 %10878, %v4741_v38   ;;  %v10747_v47 = vld [vmem:[%s16457_s11 + $0x164] sm:$0xf]  ;;  %v15417_v22 = vpop.permute.xlu0 %4768 }
0x1389   :  { %v4742_v38 = vld [vmem:[#allocation33 + $0xe0] sm:$0xff] }
0x138a   :  { %8581 = vperm.xlu2 %10880, %v8459_v50   ;;  %v10330_v50 = vor.u32 %v10747_v47, %v10327_v9  ;;  %v8462_v47 = vld [vmem:[%s16474_s7 + $0xc8] sm:$0xff]  ;;  %v15428_v14 = vpop.permute.xlu1 %6942 }
0x138b   :  { %v10341_v9 = vld [vmem:[%s16457_s11 + $0x188] sm:$0xf] }
0x138c   :  { %v15405_v1 = vpop.f32.mrf.mxu3 }
0x138d   :  { %16509 = vst [vmem:[#allocation122_spill] sm:$0xff] %v15405_v1  ;;  %v8464_v1 = vld [vmem:[%s16474_s7 + $0xd8] sm:$0xff] }
0x138e   :  { %8028 = vmatmul.bf16.gmra.mxu0 %v10318_v30  ;;  %v4743_v30 = vld [vmem:[#allocation33 + $0xe8] sm:$0xff] }
0x138f   :  { %v15413_v53 = vpop.f32.mrf.mxu2 }
0x1390   :  { %16510 = vst [vmem:[#allocation123_spill] sm:$0xff] %v15413_v53  ;;  %8586 = vperm.xlu1 %10879, %v8460_v23   ;;  %8591 = vperm.xlu0 %10878, %v8461_v58   ;;  %v7817_v53 = vadd.f32 %v15087_v29, %v15219_v59  ;;  %v10342_v58 = vor.u32 %v10755_v51, %v10341_v9  ;;  %v10756_v29 = vld [vmem:[%s16457_s11 + $0x1a4] sm:$0xf0]  ;;  %v10752_v9 = vld [vmem:[%s16457_s11 + $0x18c] sm:$0xf] }
0x1391   :  { %8206 = vmatmul.bf16.gmra.mxu3 %v10326_v6  ;;  %v10343_v51 = vld [vmem:[%s16457_s11 + $0x1a0] sm:$0xf0] }
0x1392   :  { %4888 = vperm.xlu2 %10880, %v4742_v38   ;;  %v7906_v6 = vadd.f32 %v15094_v31, %v7817_v53  ;;  %v10349_v38 = vld [vmem:[%s16457_s11 + $0x190] sm:$0xf]  ;;  %v15443_v31 = vpop.permute.xlu0 %6947 }
0x1393   :  { %v10350_v33 = vor.u32 %v10756_v29, %v10349_v38  ;;  %v15450_v29 = vpop.permute.xlu1 %8471 }
0x1394   :  { %v15419_v46 = vpop.f32.mrf.mxu3  ;;  %8295 = vmatmul.bf16.gmra.mxu2 %v10330_v50  ;;  %v15433_v50 = vpop.permute.xlu2 %4773  ;;  %16515 = vst [vmem:[#allocation128_spill] sm:$0xff] %v15450_v29  ;;  %v5014_v29 = vadd.f32 %v14658_v44, %v15390_v17 }
0x1395   :  { %16511 = vst [vmem:[#allocation124_spill] sm:$0xff] %v15419_v46  ;;  %v8463_v46 = vld [vmem:[%s16474_s7 + $0xd0] sm:$0xff] }
0x1396   :  { %8117 = vmatmul.bf16.gmra.mxu1 %v10322_v8 }
0x1397   :  { %v15423_v23 = vpop.f32.mrf.mxu2 }
0x1398   :  { %16512 = vst [vmem:[#allocation125_spill] sm:$0xff] %v15423_v23  ;;  %4893 = vperm.xlu1 %10879, %v4743_v30   ;;  %4898 = vperm.xlu0 %10878, %v4744_v13   ;;  %v10351_v30 = vld [vmem:[%s16457_s11 + $0x1a8] sm:$0xf0]  ;;  %v7819_v13 = vadd.f32 %v15102_v32, %v15355_v18  ;;  %v10346_v32 = vor.u32 %v10752_v9, %v10343_v51 }
0x139a   :  { %8596 = vperm.xlu2 %10880, %v8462_v47   ;;  %v4745_v47 = vld [vmem:[#allocation33 + $0xf8] sm:$0xff]  ;;  %v7908_v38 = vadd.f32 %v15106_v52, %v7819_v13  ;;  %v15463_v9 = vpop.permute.xlu0 %4778 }
0x139b   :  { %v7994_v59 = vpop.f32.mrf.mxu0  ;;  %v10365_v13 = vld [vmem:[%s16457_s11 + $0x1b8] sm:$0xf] }
0x139c   :  { %v15435_v8 = vpop.f32.mrf.mxu3  ;;  %v7995_v23 = vadd.f32 %v7994_v59, %v7906_v6  ;;  %v10354_v6 = vor.u32 %v10753_v24, %v10351_v30  ;;  %v7822_v24 = vadd.f32 %v15110_v61, %v15366_v43  ;;  %v8466_v30 = vld [vmem:[%s16474_s7 + $0xe8] sm:$0xff] }
0x139d   :  { %16513 = vst [vmem:[#allocation126_spill] sm:$0xff] %v15435_v8 }
0x139e   :  { %8033 = vmatmul.bf16.gmra.mxu0 %v10342_v58  ;;  %v7911_v43 = vadd.f32 %v15112_v45, %v7822_v24  ;;  %v7824_v45 = vadd.f32 %v15118_v25, %v15234_v57 }
0x139f   :  { %v15445_v53 = vpop.f32.mrf.mxu2 }
0x13a0   :  { %16514 = vst [vmem:[#allocation127_spill] sm:$0xff] %v15445_v53  ;;  %8601 = vperm.xlu1 %10879, %v8463_v46   ;;  %8606 = vperm.xlu0 %10878, %v8464_v1   ;;  %v8467_v46 = vld [vmem:[%s16474_s7 + $0xf0] sm:$0xff] }
0x13a1   :  { %8211 = vmatmul.bf16.gmra.mxu3 %v10350_v33  ;;  %v15456_v33 = vpop.permute.xlu2 %8476 }
0x13a2   :  { %4903 = vperm.xlu2 %10880, %v4745_v47   ;;  %v10761_v47 = vld [vmem:[%s16457_s11 + $0x1cc] sm:$0xf0] }
0x13a3   :  { %v7996_v18 = vpop.f32.mrf.mxu0  ;;  %v8083_v58 = vpop.f32.mrf.mxu1 }
0x13a4   :  { %v7997_v59 = vadd.f32 %v7996_v18, %v7908_v38  ;;  %v8084_v53 = vadd.f32 %v8083_v58, %v7995_v23  ;;  %v8172_v8 = vpop.f32.mrf.mxu3  ;;  %8300 = vmatmul.bf16.gmra.mxu2 %v10354_v6  ;;  %v5012_v23 = vadd.f32 %v14644_v19, %v15253_v34  ;;  %v10762_v6 = vld [vmem:[%s16457_s11 + $0x1d4] sm:$0xf0]  ;;  %v15470_v19 = vpop.permute.xlu1 %6952 }
0x13a5   :  { %v8468_v58 = vld [vmem:[%s16474_s7 + $0xf8] sm:$0xff] }
0x13a6   :  { %v8173_v52 = vadd.f32 %v8172_v8, %v8084_v53  ;;  %8122 = vmatmul.bf16.gmra.mxu1 %v10346_v32  ;;  %v10366_v8 = vor.u32 %v10761_v47, %v10365_v13  ;;  %v10373_v53 = vld [vmem:[%s16457_s11 + $0x1c0] sm:$0xf]  ;;  %v10758_v47 = vld [vmem:[%s16457_s11 + $0x1bc] sm:$0xf] }
0x13a7   :  { %v8261_v1 = vpop.f32.mrf.mxu2  ;;  %v8698_v13 = vld [vmem:[#allocation2] sm:$0x1] }
0x13a8   :  { %v8262_v51 = vadd.f32 %v8261_v1, %v8173_v52  ;;  %8611 = vperm.xlu1 %10879, %v8465_v39   ;;  %8621 = vperm.xlu0 %10878, %v8467_v46   ;;  %v8918_v46 = vld [vmem:[#allocation36] sm:$0xff]  ;;  %v10374_v52 = vor.u32 %v10762_v6, %v10373_v53  ;;  %v7913_v6 = vadd.f32 %v15122_v16, %v7824_v45 }
0x13a9   :  { %v10759_v1 = vld [vmem:[%s16457_s11 + $0x1c4] sm:$0xf]  ;;  %v10767_v45 = vld [vmem:[%s16457_s11 + $0x1fc] sm:$0xf0] }
0x13aa   :  { %v15465_v61 = vadd.f32 %v8262_v51, %v5012_v23  ;;  %8616 = vperm.xlu2 %10880, %v8466_v30   ;;  %v10375_v23 = vld [vmem:[%s16457_s11 + $0x1d8] sm:$0xf0]  ;;  %v10367_v51 = vld [vmem:[%s16457_s11 + $0x1d0] sm:$0xf0] }
0x13ab   :  { %v7999_v38 = vpop.f32.mrf.mxu0  ;;  %v8085_v32 = vpop.f32.mrf.mxu1  ;;  %v10378_v53 = vor.u32 %v10759_v1, %v10375_v23  ;;  %v10370_v57 = vor.u32 %v10758_v47, %v10367_v51  ;;  %v8920_v1 = vld [vmem:[#allocation36 + $0x10] sm:$0xff]  ;;  %v10389_v23 = vld [vmem:[%s16457_s11 + $0x1e8] sm:$0xf] }
0x13ac   :  { %v8000_v34 = vadd.f32 %v7999_v38, %v7911_v43  ;;  %v8086_v18 = vadd.f32 %v8085_v32, %v7997_v59  ;;  %v8174_v39 = vpop.f32.mrf.mxu3  ;;  %v15481_v43 = vpop.permute.xlu2 %8481  ;;  %v10397_v47 = vld [vmem:[%s16457_s11 + $0x1f0] sm:$0xf]  ;;  %v10768_v51 = vld [vmem:[%s16457_s11 + $0x204] sm:$0xf0] }
0x13ad   :  { %v15484_v38 = vpop.permute.xlu0 %4783  ;;  %v15490_v16 = vpop.permute.xlu1 %6957 }
0x13ae   :  { %v8175_v24 = vadd.f32 %v8174_v39, %v8086_v18  ;;  %8038 = vmatmul.bf16.gmra.mxu0 %v10366_v8  ;;  %v8919_v39 = vld [vmem:[#allocation36 + $0x8] sm:$0xff] }
0x13af   :  { %v8263_v30 = vpop.f32.mrf.mxu2 }
0x13b0   :  { %v8264_v59 = vadd.f32 %v8263_v30, %v8175_v24  ;;  %8626 = vperm.xlu1 %10879, %v8468_v58   ;;  %8936 = vperm.xlu0 %10878, %v8918_v46   ;;  %v8921_v58 = vld [vmem:[#allocation36 + $0x18] sm:$0xff]  ;;  %v7827_v46 = vadd.f32 %v15127_v40, %v15370_v55 }
0x13b1   :  { %8216 = vmatmul.bf16.gmra.mxu3 %v10374_v52 }
0x13b2   :  { %v15486_v25 = vadd.f32 %v8264_v59, %v5014_v29  ;;  %8701 = vperm.xlu2 %10880, %v8698_v13   ;;  %v7916_v55 = vadd.f32 %v15129_v42, %v7827_v46  ;;  %v10390_v13 = vor.u32 %v10767_v45, %v10389_v23  ;;  %v7829_v42 = vadd.f32 %v15136_v37, %v15377_v27 }
0x13b3   :  { %v8001_v8 = vpop.f32.mrf.mxu0  ;;  %v8088_v32 = vpop.f32.mrf.mxu1  ;;  %v5019_v23 = vadd.f32 %v14686_v62, %v15411_v3 }
0x13b4   :  { %v8002_v44 = vadd.f32 %v8001_v8, %v7913_v6  ;;  %v8089_v17 = vadd.f32 %v8088_v32, %v8000_v34  ;;  %v8177_v18 = vpop.f32.mrf.mxu3  ;;  %8305 = vmatmul.bf16.gmra.mxu2 %v10378_v53  ;;  %v5017_v34 = vadd.f32 %v14673_v15, %v15268_v49  ;;  %v15496_v30 = vpop.permute.xlu2 %8486  ;;  %v8922_v8 = vld [vmem:[#allocation36 + $0x20] sm:$0xff]  ;;  %v8924_v32 = vld [vmem:[#allocation36 + $0x30] sm:$0xff] }
0x13b5   :  { %v15503_v15 = vpop.permute.xlu0 %4788  ;;  %v15513_v45 = vpop.permute.xlu1 %6962 }
0x13b6   :  { %v8178_v29 = vadd.f32 %v8177_v18, %v8089_v17  ;;  %8127 = vmatmul.bf16.gmra.mxu1 %v10370_v57  ;;  %v10398_v17 = vor.u32 %v10768_v51, %v10397_v47  ;;  %v10765_v18 = vld [vmem:[%s16457_s11 + $0x1f4] sm:$0xf] }
0x13b7   :  { %v8266_v52 = vpop.f32.mrf.mxu2 }
0x13b8   :  { %v8267_v24 = vadd.f32 %v8266_v52, %v8178_v29  ;;  %8941 = vperm.xlu1 %10879, %v8919_v39   ;;  %8951 = vperm.xlu0 %10878, %v8921_v58   ;;  %v10399_v39 = vld [vmem:[%s16457_s11 + $0x208] sm:$0xf0] }
0x13b9   :  { %v8923_v29 = vld [vmem:[#allocation36 + $0x28] sm:$0xff] }
0x13ba   :  { %v15498_v40 = vadd.f32 %v8267_v24, %v5017_v34  ;;  %8946 = vperm.xlu2 %10880, %v8920_v1   ;;  %v10764_v52 = vld [vmem:[%s16457_s11 + $0x1ec] sm:$0xf]  ;;  %v10391_v1 = vld [vmem:[%s16457_s11 + $0x200] sm:$0xf0]  ;;  %v10402_v34 = vor.u32 %v10765_v18, %v10399_v39  ;;  %v7918_v24 = vadd.f32 %v15140_v5, %v7829_v42  ;;  %v10773_v18 = vld [vmem:[%s16457_s11 + $0x22c] sm:$0xf0] }
0x13bb   :  { %v8004_v59 = vpop.f32.mrf.mxu0  ;;  %v8090_v53 = vpop.f32.mrf.mxu1  ;;  %v10394_v37 = vor.u32 %v10764_v52, %v10391_v1 }
0x13bc   :  { %v8005_v49 = vadd.f32 %v8004_v59, %v7916_v55  ;;  %v8091_v6 = vadd.f32 %v8090_v53, %v8002_v44  ;;  %v8179_v57 = vpop.f32.mrf.mxu3  ;;  %v15518_v47 = vpop.permute.xlu2 %8491  ;;  %v8925_v59 = vld [vmem:[#allocation36 + $0x38] sm:$0xff]  ;;  %v8927_v53 = vld [vmem:[#allocation36 + $0x48] sm:$0xff] }
0x13bd   :  { %v15522_v5 = vpop.permute.xlu0 %4793  ;;  %v15528_v42 = vpop.permute.xlu1 %6967 }
0x13be   :  { %v8180_v58 = vadd.f32 %v8179_v57, %v8091_v6  ;;  %8043 = vmatmul.bf16.gmra.mxu0 %v10390_v13  ;;  %v7832_v6 = vadd.f32 %v15144_v26, %v15392_v2 }
0x13bf   :  { %v8268_v46 = vpop.f32.mrf.mxu2 }
0x13c0   :  { %v8269_v44 = vadd.f32 %v8268_v46, %v8180_v58  ;;  %8956 = vperm.xlu1 %10879, %v8922_v8   ;;  %8966 = vperm.xlu0 %10878, %v8924_v32   ;;  %v8926_v32 = vld [vmem:[#allocation36 + $0x40] sm:$0xff]  ;;  %v7921_v2 = vadd.f32 %v15146_v12, %v7832_v6  ;;  %v10415_v6 = vld [vmem:[%s16457_s11 + $0x230] sm:$0xf0] }
0x13c1   :  { %8221 = vmatmul.bf16.gmra.mxu3 %v10398_v17  ;;  %v10413_v17 = vld [vmem:[%s16457_s11 + $0x218] sm:$0xf]  ;;  %v10421_v46 = vld [vmem:[%s16457_s11 + $0x220] sm:$0xf] }
0x13c2   :  { %v15516_v55 = vadd.f32 %v8269_v44, %v5019_v23  ;;  %8961 = vperm.xlu2 %10880, %v8923_v29   ;;  %v10414_v58 = vor.u32 %v10773_v18, %v10413_v17  ;;  %v10774_v29 = vld [vmem:[%s16457_s11 + $0x234] sm:$0xf0] }
0x13c3   :  { %v8006_v27 = vpop.f32.mrf.mxu0  ;;  %v8093_v13 = vpop.f32.mrf.mxu1  ;;  %v8928_v44 = vld [vmem:[#allocation36 + $0x50] sm:$0xff] }
0x13c4   :  { %v8007_v62 = vadd.f32 %v8006_v27, %v7918_v24  ;;  %v8094_v3 = vadd.f32 %v8093_v13, %v8005_v49  ;;  %v8182_v51 = vpop.f32.mrf.mxu3  ;;  %8310 = vmatmul.bf16.gmra.mxu2 %v10402_v34  ;;  %v5022_v49 = vadd.f32 %v14699_v7, %v15417_v22  ;;  %v8930_v34 = vld [vmem:[#allocation36 + $0x60] sm:$0xff]  ;;  %v10422_v24 = vor.u32 %v10774_v29, %v10421_v46  ;;  %v10423_v27 = vld [vmem:[%s16457_s11 + $0x238] sm:$0xf0] }
0x13c5   :  { %v7834_v13 = vadd.f32 %v15156_v0, %v15401_v63  ;;  %v8933_v46 = vld [vmem:[#allocation36 + $0x78] sm:$0xff] }
0x13c6   :  { %v8183_v57 = vadd.f32 %v8182_v51, %v8094_v3  ;;  %8132 = vmatmul.bf16.gmra.mxu1 %v10394_v37  ;;  %v10771_v37 = vld [vmem:[%s16457_s11 + $0x224] sm:$0xf]  ;;  %v15539_v3 = vpop.permute.xlu2 %8496 }
0x13c7   :  { %v8271_v8 = vpop.f32.mrf.mxu2  ;;  %v7923_v0 = vadd.f32 %v15162_v11, %v7834_v13  ;;  %v10780_v13 = vld [vmem:[%s16457_s11 + $0x264] sm:$0xf0] }
0x13c8   :  { %v8272_v39 = vadd.f32 %v8271_v8, %v8183_v57  ;;  %8971 = vperm.xlu1 %10879, %v8925_v59   ;;  %8981 = vperm.xlu0 %10878, %v8927_v53   ;;  %v8929_v59 = vld [vmem:[#allocation36 + $0x58] sm:$0xff]  ;;  %v15545_v57 = vpop.permute.xlu0 %4798 }
0x13c9   :  { %v10770_v53 = vld [vmem:[%s16457_s11 + $0x21c] sm:$0xf] }
0x13ca   :  { %v15530_v26 = vadd.f32 %v8272_v39, %v5022_v49  ;;  %8976 = vperm.xlu2 %10880, %v8926_v32   ;;  %v10426_v32 = vor.u32 %v10771_v37, %v10423_v27  ;;  %v10418_v17 = vor.u32 %v10770_v53, %v10415_v6  ;;  %v15550_v39 = vpop.permute.xlu1 %6972  ;;  %v10445_v27 = vld [vmem:[%s16457_s11 + $0x250] sm:$0xf] }
0x13cb   :  { %v8009_v52 = vpop.f32.mrf.mxu0  ;;  %v8095_v1 = vpop.f32.mrf.mxu1  ;;  %v9162_v53 = vld [vmem:[#allocation37 + $0x10] sm:$0xff]  ;;  %v10446_v6 = vor.u32 %v10780_v13, %v10445_v27  ;;  %v9165_v27 = vld [vmem:[#allocation37 + $0x28] sm:$0xff] }
0x13cc   :  { %v8010_v7 = vadd.f32 %v8009_v52, %v7921_v2  ;;  %v8096_v22 = vadd.f32 %v8095_v1, %v8007_v62  ;;  %v8184_v23 = vpop.f32.mrf.mxu3  ;;  %v5024_v62 = vadd.f32 %v14713_v54, %v15433_v50  ;;  %v8932_v52 = vld [vmem:[#allocation36 + $0x70] sm:$0xff]  ;;  %v10437_v1 = vld [vmem:[%s16457_s11 + $0x248] sm:$0xf] }
0x13ce   :  { %v8185_v12 = vadd.f32 %v8184_v23, %v8096_v22  ;;  %8048 = vmatmul.bf16.gmra.mxu0 %v10414_v58  ;;  %v8931_v58 = vld [vmem:[#allocation36 + $0x68] sm:$0xff]  ;;  %v10779_v22 = vld [vmem:[%s16457_s11 + $0x25c] sm:$0xf0]  ;;  %v5027_v23 = vadd.f32 %v14728_v60, %v15463_v9 }
0x13cf   :  { %v8273_v51 = vpop.f32.mrf.mxu2  ;;  %v10438_v37 = vor.u32 %v10779_v22, %v10437_v1 }
0x13d0   :  { %v8274_v8 = vadd.f32 %v8273_v51, %v8185_v12  ;;  %8986 = vperm.xlu1 %10879, %v8928_v44   ;;  %8996 = vperm.xlu0 %10878, %v8930_v34   ;;  %v15556_v44 = vpop.permute.xlu2 %8501 }
0x13d1   :  { %8226 = vmatmul.bf16.gmra.mxu3 %v10422_v24 }
0x13d2   :  { %v15548_v63 = vadd.f32 %v8274_v8, %v5024_v62  ;;  %8991 = vperm.xlu2 %10880, %v8929_v59   ;;  %v9160_v59 = vld [vmem:[#allocation37] sm:$0xff]  ;;  %v10777_v62 = vld [vmem:[%s16457_s11 + $0x254] sm:$0xf]  ;;  %v10447_v8 = vld [vmem:[%s16457_s11 + $0x268] sm:$0xf0] }
0x13d3   :  { %v8011_v18 = vpop.f32.mrf.mxu0  ;;  %v8098_v49 = vpop.f32.mrf.mxu1 }
0x13d4   :  { %v8012_v54 = vadd.f32 %v8011_v18, %v7923_v0  ;;  %v8099_v50 = vadd.f32 %v8098_v49, %v8010_v7  ;;  %v8187_v2 = vpop.f32.mrf.mxu3  ;;  %8315 = vmatmul.bf16.gmra.mxu2 %v10426_v32  ;;  %v15558_v7 = vpop.permute.xlu0 %4803  ;;  %v9161_v18 = vld [vmem:[#allocation37 + $0x8] sm:$0xff] }
0x13d5   :  { %v15566_v32 = vpop.permute.xlu1 %6977  ;;  %v10776_v49 = vld [vmem:[%s16457_s11 + $0x24c] sm:$0xf] }
0x13d6   :  { %v8188_v29 = vadd.f32 %v8187_v2, %v8099_v50  ;;  %8137 = vmatmul.bf16.gmra.mxu1 %v10418_v17  ;;  %v10439_v50 = vld [vmem:[%s16457_s11 + $0x260] sm:$0xf0]  ;;  %v5029_v2 = vadd.f32 %v14739_v35, %v15484_v38  ;;  %v7839_v35 = vadd.f32 %v15179_v41, %v15428_v14  ;;  %v5032_v41 = vadd.f32 %v14750_v21, %v15503_v15 }
0x13d7   :  { %v8276_v11 = vpop.f32.mrf.mxu2 }
0x13d8   :  { %v8277_v34 = vadd.f32 %v8276_v11, %v8188_v29  ;;  %9001 = vperm.xlu1 %10879, %v8931_v58   ;;  %9011 = vperm.xlu0 %10878, %v8933_v46   ;;  %v15572_v46 = vpop.permute.xlu2 %8506 }
0x13da   :  { %v15560_v24 = vadd.f32 %v8277_v34, %v5027_v23  ;;  %9006 = vperm.xlu2 %10880, %v8932_v52   ;;  %v10442_v52 = vor.u32 %v10776_v49, %v10439_v50  ;;  %v9166_v50 = vld [vmem:[#allocation37 + $0x30] sm:$0xff] }
0x13db   :  { %v8014_v12 = vpop.f32.mrf.mxu0  ;;  %v8100_v51 = vpop.f32.mrf.mxu1 }
0x13dc   :  { %v8101_v60 = vadd.f32 %v8100_v51, %v8012_v54  ;;  %v8189_v9 = vpop.f32.mrf.mxu3  ;;  %v10450_v54 = vor.u32 %v10777_v62, %v10447_v8  ;;  %v8015_v29 = vadd.f32 %v8014_v12, %v15285_v4  ;;  %v15579_v38 = vpop.permute.xlu0 %4808  ;;  %v9164_v12 = vld [vmem:[#allocation37 + $0x20] sm:$0xff]  ;;  %v10461_v51 = vld [vmem:[%s16457_s11 + $0x278] sm:$0xf] }
0x13dd   :  { %v15586_v14 = vpop.permute.xlu1 %6982  ;;  %v10469_v8 = vld [vmem:[%s16457_s11 + $0x280] sm:$0xf] }
0x13de   :  { %v8190_v0 = vadd.f32 %v8189_v9, %v8101_v60  ;;  %8053 = vmatmul.bf16.gmra.mxu0 %v10438_v37  ;;  %v9163_v37 = vld [vmem:[#allocation37 + $0x18] sm:$0xff]  ;;  %v10785_v60 = vld [vmem:[%s16457_s11 + $0x28c] sm:$0xf0]  ;;  %v7928_v9 = vadd.f32 %v15185_v36, %v7839_v35  ;;  %v7842_v36 = vadd.f32 %v15189_v10, %v15443_v31 }
0x13df   :  { %v8278_v17 = vpop.f32.mrf.mxu2  ;;  %v10462_v62 = vor.u32 %v10785_v60, %v10461_v51  ;;  %v9167_v31 = vld [vmem:[#allocation37 + $0x38] sm:$0xff] }
0x13e0   :  { %v8279_v58 = vadd.f32 %v8278_v17, %v8190_v0  ;;  %9178 = vperm.xlu1 %10879, %v9160_v59   ;;  %9188 = vperm.xlu0 %10878, %v9162_v53   ;;  %v10786_v0 = vld [vmem:[%s16457_s11 + $0x294] sm:$0xf0]  ;;  %v15594_v15 = vpop.permute.xlu2 %8511  ;;  %v10782_v35 = vld [vmem:[%s16457_s11 + $0x27c] sm:$0xf] }
0x13e1   :  { %8231 = vmatmul.bf16.gmra.mxu3 %v10446_v6 }
0x13e2   :  { %v15575_v11 = vadd.f32 %v8279_v58, %v5029_v2  ;;  %9183 = vperm.xlu2 %10880, %v9161_v18   ;;  %v9168_v2 = vld [vmem:[#allocation37 + $0x40] sm:$0xff]  ;;  %v10470_v58 = vor.u32 %v10786_v0, %v10469_v8  ;;  %v9170_v0 = vld [vmem:[#allocation37 + $0x50] sm:$0xff] }
0x13e3   :  { %v8016_v1 = vpop.f32.mrf.mxu0  ;;  %v8103_v22 = vpop.f32.mrf.mxu1 }
0x13e4   :  { %v8104_v23 = vadd.f32 %v8103_v22, %v8015_v29  ;;  %v8192_v34 = vpop.f32.mrf.mxu3  ;;  %8320 = vmatmul.bf16.gmra.mxu2 %v10450_v54  ;;  %v8017_v53 = vadd.f32 %v8016_v1, %v7928_v9  ;;  %v10783_v54 = vld [vmem:[%s16457_s11 + $0x284] sm:$0xf]  ;;  %v10471_v29 = vld [vmem:[%s16457_s11 + $0x298] sm:$0xf0]  ;;  %v7931_v22 = vadd.f32 %v15192_v28, %v7842_v36  ;;  %v7844_v9 = vadd.f32 %v15198_v56, %v15470_v19  ;;  %v10485_v36 = vld [vmem:[%s16457_s11 + $0x2a8] sm:$0xf] }
0x13e6   :  { %v8193_v13 = vadd.f32 %v8192_v34, %v8104_v23  ;;  %8142 = vmatmul.bf16.gmra.mxu1 %v10442_v52  ;;  %v15598_v52 = vpop.permute.xlu0 %4813  ;;  %v10463_v23 = vld [vmem:[%s16457_s11 + $0x290] sm:$0xf0]  ;;  %v5034_v34 = vadd.f32 %v14764_v20, %v15522_v5 }
0x13e7   :  { %v8281_v4 = vpop.f32.mrf.mxu2  ;;  %v10466_v28 = vor.u32 %v10782_v35, %v10463_v23  ;;  %v9172_v23 = vld [vmem:[#allocation37 + $0x60] sm:$0xff] }
0x13e8   :  { %v8282_v59 = vadd.f32 %v8281_v4, %v8193_v13  ;;  %9193 = vperm.xlu1 %10879, %v9163_v37   ;;  %9203 = vperm.xlu0 %10878, %v9165_v27   ;;  %v10474_v27 = vor.u32 %v10783_v54, %v10471_v29  ;;  %v15605_v13 = vpop.permute.xlu1 %6987  ;;  %v10493_v54 = vld [vmem:[%s16457_s11 + $0x2b0] sm:$0xf]  ;;  %v10792_v29 = vld [vmem:[%s16457_s11 + $0x2c4] sm:$0xf0] }
0x13ea   :  { %v15588_v6 = vadd.f32 %v8282_v59, %v5032_v41  ;;  %9198 = vperm.xlu2 %10880, %v9164_v12   ;;  %v9169_v41 = vld [vmem:[#allocation37 + $0x48] sm:$0xff]  ;;  %v9171_v59 = vld [vmem:[#allocation37 + $0x58] sm:$0xff] }
0x13eb   :  { %v8019_v17 = vpop.f32.mrf.mxu0  ;;  %v8105_v21 = vpop.f32.mrf.mxu1 }
0x13ec   :  { %v8106_v18 = vadd.f32 %v8105_v21, %v8017_v53  ;;  %v8194_v49 = vpop.f32.mrf.mxu3  ;;  %v8020_v4 = vadd.f32 %v8019_v17, %v7931_v22  ;;  %v15611_v53 = vpop.permute.xlu2 %8516  ;;  %v10791_v17 = vld [vmem:[%s16457_s11 + $0x2bc] sm:$0xf0]  ;;  %v7933_v21 = vadd.f32 %v15203_v48, %v7844_v9 }
0x13ee   :  { %v8195_v1 = vadd.f32 %v8194_v49, %v8106_v18  ;;  %8058 = vmatmul.bf16.gmra.mxu0 %v10462_v62  ;;  %v16516_v18 = vld [vmem:[#allocation84_spill] sm:$0xff]  ;;  %v15618_v19 = vpop.permute.xlu0 %4818 }
0x13ef   :  { %v8283_v10 = vpop.f32.mrf.mxu2  ;;  %v5037_v56 = vadd.f32 %v16516_v18, %v15545_v57 }
0x13f0   :  { %v8284_v37 = vadd.f32 %v8283_v10, %v8195_v1  ;;  %9208 = vperm.xlu1 %10879, %v9166_v50   ;;  %9218 = vperm.xlu0 %10878, %v9168_v2   ;;  %v16517_v1 = vld [vmem:[#allocation67_spill] sm:$0xff]  ;;  %v15626_v10 = vpop.permute.xlu1 %6992 }
0x13f1   :  { %8236 = vmatmul.bf16.gmra.mxu3 %v10470_v58  ;;  %v10486_v58 = vor.u32 %v10791_v17, %v10485_v36  ;;  %v7847_v48 = vadd.f32 %v16517_v1, %v15490_v16  ;;  %v10788_v16 = vld [vmem:[%s16457_s11 + $0x2ac] sm:$0xf] }
0x13f2   :  { %v15607_v12 = vadd.f32 %v8284_v37, %v5034_v34  ;;  %9213 = vperm.xlu2 %10880, %v9167_v31   ;;  %v9174_v34 = vld [vmem:[#allocation37 + $0x70] sm:$0xff]  ;;  %v10494_v37 = vor.u32 %v10792_v29, %v10493_v54  ;;  %v9175_v29 = vld [vmem:[#allocation37 + $0x78] sm:$0xff] }
0x13f3   :  { %v8021_v51 = vpop.f32.mrf.mxu0  ;;  %v8108_v60 = vpop.f32.mrf.mxu1 }
0x13f4   :  { %v8109_v20 = vadd.f32 %v8108_v60, %v8020_v4  ;;  %v8197_v5 = vpop.f32.mrf.mxu3  ;;  %8325 = vmatmul.bf16.gmra.mxu2 %v10474_v27  ;;  %v8022_v50 = vadd.f32 %v8021_v51, %v7933_v21  ;;  %v10789_v27 = vld [vmem:[%s16457_s11 + $0x2b4] sm:$0xf]  ;;  %v10495_v4 = vld [vmem:[%s16457_s11 + $0x2c8] sm:$0xf0] }
0x13f5   :  { %v16518_v51 = vld [vmem:[#allocation68_spill] sm:$0xff] }
0x13f6   :  { %v8198_v62 = vadd.f32 %v8197_v5, %v8109_v20  ;;  %8147 = vmatmul.bf16.gmra.mxu1 %v10466_v28  ;;  %v7936_v60 = vadd.f32 %v16518_v51, %v7847_v48  ;;  %v9173_v20 = vld [vmem:[#allocation37 + $0x68] sm:$0xff]  ;;  %v10487_v5 = vld [vmem:[%s16457_s11 + $0x2c0] sm:$0xf0]  ;;  %v15637_v36 = vpop.permute.xlu0 %4823 }
0x13f7   :  { %v8286_v8 = vpop.f32.mrf.mxu2  ;;  %v10490_v18 = vor.u32 %v10788_v16, %v10487_v5 }
0x13f8   :  { %v8287_v49 = vadd.f32 %v8286_v8, %v8198_v62  ;;  %9223 = vperm.xlu1 %10879, %v9169_v41   ;;  %9233 = vperm.xlu0 %10878, %v9171_v59   ;;  %v16519_v41 = vld [vmem:[#allocation83_spill] sm:$0xff]  ;;  %v15635_v62 = vpop.permute.xlu2 %8521  ;;  %v15643_v1 = vpop.permute.xlu1 %6997 }
0x13f9   :  { %v5039_v59 = vadd.f32 %v16519_v41, %v15558_v7  ;;  %v16520_v7 = vld [vmem:[#allocation70_spill] sm:$0xff] }
0x13fa   :  { %v15620_v2 = vadd.f32 %v8287_v49, %v5037_v56  ;;  %9228 = vperm.xlu2 %10880, %v9170_v0   ;;  %v10498_v0 = vor.u32 %v10789_v27, %v10495_v4  ;;  %v16523_v41 = vld [vmem:[#allocation66_spill] sm:$0xff] }
0x13fb   :  { %v8024_v22 = vpop.f32.mrf.mxu0  ;;  %v8110_v57 = vpop.f32.mrf.mxu1 }
0x13fc   :  { %v8111_v31 = vadd.f32 %v8110_v57, %v8022_v50  ;;  %v8199_v35 = vpop.f32.mrf.mxu3  ;;  %v8025_v17 = vadd.f32 %v8024_v22, %v7936_v60  ;;  %v7849_v50 = vadd.f32 %v16520_v7, %v15513_v45  ;;  %v9310_v57 = vld [vmem:[#allocation3] sm:$0x1] }
0x13fe   :  { %v8200_v28 = vadd.f32 %v8199_v35, %v8111_v31  ;;  %8063 = vmatmul.bf16.gmra.mxu0 %v10486_v58  ;;  %v10509_v31 = vld [vmem:[%s16457_s11 + $0x2d8] sm:$0xf]  ;;  %v10797_v35 = vld [vmem:[%s16457_s11 + $0x2ec] sm:$0xf0] }
0x13ff   :  { %v8288_v9 = vpop.f32.mrf.mxu2  ;;  %v10510_v60 = vor.u32 %v10797_v35, %v10509_v31 }
0x1400   :  { %v8289_v8 = vadd.f32 %v8288_v9, %v8200_v28  ;;  %9238 = vperm.xlu1 %10879, %v9172_v23   ;;  %9248 = vperm.xlu0 %10878, %v9174_v34   ;;  %v16521_v23 = vld [vmem:[#allocation69_spill] sm:$0xff]  ;;  %v15650_v4 = vpop.permute.xlu2 %8526 }
0x1401   :  { %8241 = vmatmul.bf16.gmra.mxu3 %v10494_v37  ;;  %v7938_v34 = vadd.f32 %v16521_v23, %v7849_v50  ;;  %v16522_v37 = vld [vmem:[#allocation86_spill] sm:$0xff]  ;;  %v10517_v9 = vld [vmem:[%s16457_s11 + $0x2e0] sm:$0xf]  ;;  %v10794_v50 = vld [vmem:[%s16457_s11 + $0x2dc] sm:$0xf] }
0x1402   :  { %v15639_v21 = vadd.f32 %v8289_v8, %v5039_v59  ;;  %9243 = vperm.xlu2 %10880, %v9173_v20   ;;  %v5042_v27 = vadd.f32 %v16522_v37, %v15579_v38  ;;  %v10798_v20 = vld [vmem:[%s16457_s11 + $0x2f4] sm:$0xf0]  ;;  %v7852_v38 = vadd.f32 %v16523_v41, %v15528_v42  ;;  %v4829_v59 = vpop.permute.xlu0 %4828 }
0x1403   :  { %v8026_v56 = vpop.f32.mrf.mxu0  ;;  %v8113_v49 = vpop.f32.mrf.mxu1 }
0x1404   :  { %v8114_v58 = vadd.f32 %v8113_v49, %v8025_v17  ;;  %v8202_v54 = vpop.f32.mrf.mxu3  ;;  %8330 = vmatmul.bf16.gmra.mxu2 %v10498_v0  ;;  %v8027_v28 = vadd.f32 %v8026_v56, %v7938_v34  ;;  %v10518_v17 = vor.u32 %v10798_v20, %v10517_v9  ;;  %v10519_v49 = vld [vmem:[%s16457_s11 + $0x2f8] sm:$0xf0] }
0x1406   :  { %v8203_v48 = vadd.f32 %v8202_v54, %v8114_v58  ;;  %8152 = vmatmul.bf16.gmra.mxu1 %v10490_v18  ;;  %v10795_v18 = vld [vmem:[%s16457_s11 + $0x2e4] sm:$0xf]  ;;  %v10511_v58 = vld [vmem:[%s16457_s11 + $0x2f0] sm:$0xf0]  ;;  %v16524_v54 = vld [vmem:[#allocation93_spill] sm:$0xff] }
0x1407   :  { %v8291_v22 = vpop.f32.mrf.mxu2  ;;  %v10522_v42 = vor.u32 %v10795_v18, %v10519_v49  ;;  %v10514_v34 = vor.u32 %v10794_v50, %v10511_v58  ;;  %v16529_v50 = vld [vmem:[#allocation96_spill] sm:$0xff] }
0x1408   :  { %v8292_v45 = vadd.f32 %v8291_v22, %v8203_v48  ;;  %9253 = vperm.xlu1 %10879, %v9175_v29   ;;  %v7941_v29 = vadd.f32 %v16524_v54, %v7852_v38  ;;  %v16525_v48 = vld [vmem:[#allocation85_spill] sm:$0xff]  ;;  %v16527_v38 = vld [vmem:[#allocation95_spill] sm:$0xff]  ;;  %v7857_v58 = vadd.f32 %v16529_v50, %v15566_v32  ;;  %v16532_v32 = vld [vmem:[#allocation98_spill] sm:$0xff] }
0x1409   :  { %v5044_v22 = vadd.f32 %v16525_v48, %v15598_v52 }
0x140a   :  { %v15652_v51 = vadd.f32 %v8292_v45, %v5042_v27  ;;  %9313 = vperm.xlu2 %10880, %v9310_v57   ;;  %v15665_v57 = vpop.permute.xlu1 %7002  ;;  %v16526_v45 = vld [vmem:[#allocation94_spill] sm:$0xff]  ;;  %v4834_v52 = vpop.permute.xlu0 %4833 }
0x140b   :  { %v8029_v16 = vpop.f32.mrf.mxu0  ;;  %v8115_v5 = vpop.f32.mrf.mxu1 }
0x140c   :  { %v8116_v8 = vadd.f32 %v8115_v5, %v8027_v28  ;;  %v8204_v0 = vpop.f32.mrf.mxu3  ;;  %v8030_v35 = vadd.f32 %v8029_v16, %v7941_v29  ;;  %v7854_v28 = vadd.f32 %v16526_v45, %v15550_v39  ;;  %v16528_v16 = vld [vmem:[#allocation78_spill] sm:$0xff] }
0x140e   :  { %v8205_v56 = vadd.f32 %v8204_v0, %v8116_v8  ;;  %8068 = vmatmul.bf16.gmra.mxu0 %v10510_v60  ;;  %v15671_v60 = vpop.permute.xlu2 %8531  ;;  %v7943_v8 = vadd.f32 %v16527_v38, %v7854_v28  ;;  %v5047_v0 = vadd.f32 %v16528_v16, %v15618_v19  ;;  %v16531_v19 = vld [vmem:[#allocation77_spill] sm:$0xff] }
0x140f   :  { %v8293_v7 = vpop.f32.mrf.mxu2 }
0x1410   :  { %v8294_v31 = vadd.f32 %v8293_v7, %v8205_v56 }
0x1411   :  { %8246 = vmatmul.bf16.gmra.mxu3 %v10518_v17 }
0x1412   :  { %v15667_v23 = vadd.f32 %v8294_v31, %v5044_v22  ;;  %v15676_v18 = vpop.permute.xlu1 %7007 }
0x1413   :  { %v8031_v37 = vpop.f32.mrf.mxu0  ;;  %v8118_v27 = vpop.f32.mrf.mxu1 }
0x1414   :  { %v8119_v9 = vadd.f32 %v8118_v27, %v8030_v35  ;;  %v8207_v20 = vpop.f32.mrf.mxu3  ;;  %8335 = vmatmul.bf16.gmra.mxu2 %v10522_v42  ;;  %v8032_v49 = vadd.f32 %v8031_v37, %v7943_v8  ;;  %v16530_v42 = vld [vmem:[#allocation97_spill] sm:$0xff]  ;;  %v4839_v27 = vpop.permute.xlu0 %4838 }
0x1415   :  { %v7946_v35 = vadd.f32 %v16530_v42, %v7857_v58 }
0x1416   :  { %v8208_v5 = vadd.f32 %v8207_v20, %v8119_v9  ;;  %8157 = vmatmul.bf16.gmra.mxu1 %v10514_v34  ;;  %v15682_v48 = vpop.permute.xlu2 %8536  ;;  %v5049_v34 = vadd.f32 %v16531_v19, %v15637_v36 }
0x1417   :  { %v8296_v41 = vpop.f32.mrf.mxu2 }
0x1418   :  { %v8297_v17 = vadd.f32 %v8296_v41, %v8208_v5  ;;  %v7859_v5 = vadd.f32 %v16532_v32, %v15586_v14  ;;  %v16536_v14 = vld [vmem:[#allocation100_spill] sm:$0xff]  ;;  %v16538_v32 = vld [vmem:[#allocation91_spill] sm:$0xff] }
0x1419   :  { %v7862_v42 = vadd.f32 %v16536_v14, %v15605_v13  ;;  %v16541_v13 = vld [vmem:[#allocation102_spill] sm:$0xff]  ;;  %v16542_v14 = vld [vmem:[#allocation103_spill] sm:$0xff] }
0x141a   :  { %v15678_v56 = vadd.f32 %v8297_v17, %v5047_v0  ;;  %v15691_v41 = vpop.permute.xlu1 %7012  ;;  %v16533_v17 = vld [vmem:[#allocation99_spill] sm:$0xff] }
0x141b   :  { %v8034_v39 = vpop.f32.mrf.mxu0  ;;  %v8120_v7 = vpop.f32.mrf.mxu1 }
0x141c   :  { %v8121_v54 = vadd.f32 %v8120_v7, %v8032_v49  ;;  %v8209_v29 = vpop.f32.mrf.mxu3  ;;  %v8035_v45 = vadd.f32 %v8034_v39, %v7946_v35  ;;  %v7948_v49 = vadd.f32 %v16533_v17, %v7859_v5  ;;  %v16534_v7 = vld [vmem:[#allocation92_spill] sm:$0xff]  ;;  %v4844_v58 = vpop.permute.xlu0 %4843  ;;  %v5054_v5 = vadd.f32 %v16538_v32, %v4834_v52 }
0x141d   :  { %v5052_v36 = vadd.f32 %v16534_v7, %v4829_v59  ;;  %v16543_v52 = vld [vmem:[#allocation76_spill] sm:$0xff] }
0x141e   :  { %v8210_v22 = vadd.f32 %v8209_v29, %v8121_v54  ;;  %v15695_v50 = vpop.permute.xlu2 %8541 }
0x141f   :  { %v8298_v31 = vpop.f32.mrf.mxu2  ;;  %16535 = vst [vmem:[#allocation84_spill] sm:$0xff] %v15695_v50 }
0x1420   :  { %v8299_v37 = vadd.f32 %v8298_v31, %v8210_v22 }
0x1422   :  { %v15687_v28 = vadd.f32 %v8299_v37, %v5049_v34  ;;  %v15701_v34 = vpop.permute.xlu1 %7017 }
0x1423   :  { %v8036_v9 = vpop.f32.mrf.mxu0  ;;  %v8123_v20 = vpop.f32.mrf.mxu1 }
0x1424   :  { %v8124_v38 = vadd.f32 %v8123_v20, %v8035_v45  ;;  %v8212_v8 = vpop.f32.mrf.mxu3  ;;  %v8037_v54 = vadd.f32 %v8036_v9, %v7948_v49  ;;  %v16537_v20 = vld [vmem:[#allocation101_spill] sm:$0xff]  ;;  %v7864_v49 = vadd.f32 %v16541_v13, %v15626_v10  ;;  %v15711_v7 = vpop.permute.xlu0 %4848  ;;  %v16545_v10 = vld [vmem:[#allocation104_spill] sm:$0xff] }
0x1425   :  { %v7951_v59 = vadd.f32 %v16537_v20, %v7862_v42  ;;  %v7867_v32 = vadd.f32 %v16545_v10, %v15643_v1 }
0x1426   :  { %v8213_v16 = vadd.f32 %v8212_v8, %v8124_v38  ;;  %v15705_v8 = vpop.permute.xlu2 %8546  ;;  %v7953_v42 = vadd.f32 %v16542_v14, %v7864_v49 }
0x1427   :  { %v8301_v0 = vpop.f32.mrf.mxu2  ;;  %16539 = vst [vmem:[#allocation67_spill] sm:$0xff] %v15705_v8  ;;  %v8375_v8 = vmul.f32 0.1, %v15498_v40 }
0x1428   :  { %v8302_v39 = vadd.f32 %v8301_v0, %v8213_v16 }
0x142a   :  { %v15697_v29 = vadd.f32 %v8302_v39, %v5052_v36 }
0x142b   :  { %v8039_v22 = vpop.f32.mrf.mxu0  ;;  %v8125_v31 = vpop.f32.mrf.mxu1 }
0x142c   :  { %v8126_v35 = vadd.f32 %v8125_v31, %v8037_v54  ;;  %v8214_v19 = vpop.f32.mrf.mxu3  ;;  %v8040_v9 = vadd.f32 %v8039_v22, %v7951_v59 }
0x142e   :  { %v8215_v37 = vadd.f32 %v8214_v19, %v8126_v35  ;;  %v5057_v35 = vadd.f32 %v16543_v52, %v4839_v27  ;;  %v15715_v19 = vpop.permute.xlu1 %7022  ;;  %v16547_v27 = vld [vmem:[#allocation105_spill] sm:$0xff] }
0x142f   :  { %v8303_v45 = vpop.f32.mrf.mxu2 }
0x1430   :  { %v8304_v38 = vadd.f32 %v8303_v45, %v8215_v37 }
0x1432   :  { %v15707_v16 = vadd.f32 %v8304_v38, %v5054_v5  ;;  %v15721_v5 = vpop.permute.xlu2 %8551 }
0x1433   :  { %v8041_v0 = vpop.f32.mrf.mxu0  ;;  %v8128_v17 = vpop.f32.mrf.mxu1  ;;  %16546 = vst [vmem:[#allocation70_spill] sm:$0xff] %v15721_v5 }
0x1434   :  { %16540 = vst [vmem:[#allocation68_spill] sm:$0xff] %v15707_v16  ;;  %v8129_v36 = vadd.f32 %v8128_v17, %v8040_v9  ;;  %v8217_v39 = vpop.f32.mrf.mxu3  ;;  %v8042_v37 = vadd.f32 %v8041_v0, %v7953_v42  ;;  %v15723_v17 = vpop.permute.xlu0 %4853 }
0x1436   :  { %v8218_v54 = vadd.f32 %v8217_v39, %v8129_v36  ;;  %v7956_v36 = vadd.f32 %v16547_v27, %v7867_v32  ;;  %v16548_v39 = vld [vmem:[#allocation75_spill] sm:$0xff] }
0x1437   :  { %v8306_v31 = vpop.f32.mrf.mxu2 }
0x1438   :  { %v8307_v22 = vadd.f32 %v8306_v31, %v8218_v54  ;;  %v5059_v54 = vadd.f32 %v16548_v39, %v4844_v58  ;;  %v15727_v31 = vpop.permute.xlu1 %7027 }
0x143a   :  { %v15717_v45 = vadd.f32 %v8307_v22, %v5057_v35 }
0x143b   :  { %v8044_v20 = vpop.f32.mrf.mxu0  ;;  %v8130_v59 = vpop.f32.mrf.mxu1 }
0x143c   :  { %16544 = vst [vmem:[#allocation83_spill] sm:$0xff] %v15717_v45  ;;  %v8131_v38 = vadd.f32 %v8130_v59, %v8042_v37  ;;  %v8219_v9 = vpop.f32.mrf.mxu3  ;;  %v8045_v14 = vadd.f32 %v8044_v20, %v7956_v36  ;;  %v15733_v37 = vpop.permute.xlu2 %8556 }
0x143d   :  { %16550 = vst [vmem:[#allocation86_spill] sm:$0xff] %v15733_v37  ;;  %v8374_v37 = vmul.f32 0.1, %v15486_v25 }
0x143e   :  { %v8220_v13 = vadd.f32 %v8219_v9, %v8131_v38  ;;  %v15735_v38 = vpop.permute.xlu0 %4858 }
0x143f   :  { %v8308_v49 = vpop.f32.mrf.mxu2 }
0x1440   :  { %v8309_v0 = vadd.f32 %v8308_v49, %v8220_v13  ;;  %v15743_v20 = vpop.permute.xlu1 %7032 }
0x1442   :  { %v15729_v42 = vadd.f32 %v8309_v0, %v5059_v54 }
0x1443   :  { %v15731_v52 = vpop.f32.mrf.mxu0  ;;  %v8133_v1 = vpop.f32.mrf.mxu1 }
0x1444   :  { %16549 = vst [vmem:[#allocation69_spill] sm:$0xff] %v15729_v42  ;;  %v8134_v35 = vadd.f32 %v8133_v1, %v8045_v14  ;;  %v8222_v22 = vpop.f32.mrf.mxu3  ;;  %v15749_v27 = vpop.permute.xlu2 %8561  ;;  %v8373_v42 = vmul.f32 0.1, %v15465_v61 }
0x1445   :  { %16553 = vst [vmem:[#allocation85_spill] sm:$0xff] %v15749_v27 }
0x1446   :  { %v8223_v59 = vadd.f32 %v8222_v22, %v8134_v35  ;;  %v15751_v36 = vpop.permute.xlu0 %4863 }
0x1447   :  { %v8311_v10 = vpop.f32.mrf.mxu2 }
0x1448   :  { %v15737_v32 = vadd.f32 %v8311_v10, %v8223_v59  ;;  %v15759_v14 = vpop.permute.xlu1 %7037 }
0x144a   :  { %16551 = vst [vmem:[#allocation66_spill] sm:$0xff] %v15737_v32 }
0x144b   :  { %v15739_v58 = vpop.f32.mrf.mxu0  ;;  %v15741_v9 = vpop.f32.mrf.mxu1 }
0x144c   :  { %v15745_v13 = vpop.f32.mrf.mxu3  ;;  %v15763_v35 = vpop.permute.xlu2 %8566 }
0x144d   :  { %16556 = vst [vmem:[#allocation78_spill] sm:$0xff] %v15763_v35  ;;  %v15781_v35 = vmax.f32 %v15486_v25, %v8374_v37 }
0x144e   :  { %v15769_v10 = vpop.permute.xlu0 %4868 }
0x144f   :  { %v15747_v49 = vpop.f32.mrf.mxu2  ;;  %16559 = vst [vmem:[#allocation77_spill] sm:$0xff] %v15781_v35  ;;  %v8630_v25 = vmul.f32 %v15456_v33, %v15781_v35  ;;  %v8379_v33 = vmul.f32 0.1, %v15560_v24 }
0x1450   :  { %16552 = vst [vmem:[#allocation93_spill] sm:$0xff] %v15747_v49  ;;  %v15778_v32 = vpop.permute.xlu1 %7042  ;;  %v8377_v49 = vmul.f32 0.1, %v15530_v26 }
0x1453   :  { %v15753_v39 = vpop.f32.mrf.mxu0  ;;  %v15755_v54 = vpop.f32.mrf.mxu1 }
0x1454   :  { %v15757_v0 = vpop.f32.mrf.mxu3  ;;  %v15795_v16 = vpop.permute.xlu2 %8571 }
0x1455   :  { %16554 = vst [vmem:[#allocation94_spill] sm:$0xff] %v15757_v0 }
0x1456   :  { %16564 = vst [vmem:[#allocation101_spill] sm:$0xff] %v15795_v16  ;;  %v15814_v16 = vmax.f32 %v15530_v26, %v8377_v49  ;;  %v15832_v49 = vmax.f32 %v15560_v24, %v8379_v33  ;;  %v16574_v24 = vld [vmem:[#allocation108_spill] sm:$0xff] }
0x1457   :  { %v15761_v1 = vpop.f32.mrf.mxu2  ;;  %v7872_v33 = vadd.f32 %v16574_v24, %v15676_v18  ;;  %v16579_v24 = vld [vmem:[#allocation109_spill] sm:$0xff] }
0x1458   :  { %16555 = vst [vmem:[#allocation95_spill] sm:$0xff] %v15761_v1  ;;  %v8376_v1 = vmul.f32 0.1, %v15516_v55  ;;  %v8633_v26 = vmul.f32 %v15518_v47, %v15814_v16  ;;  %v16573_v47 = vld [vmem:[#allocation106_spill] sm:$0xff] }
0x1459   :  { %16569 = vst [vmem:[#allocation76_spill] sm:$0xff] %v15814_v16 }
0x145a   :  { %v15802_v37 = vmax.f32 %v15516_v55, %v8376_v1  ;;  %16571 = vst [vmem:[#allocation105_spill] sm:$0xff] %v15832_v49 }
0x145b   :  { %v15765_v22 = vpop.f32.mrf.mxu0  ;;  %v15767_v59 = vpop.f32.mrf.mxu1 }
0x145c   :  { %v15771_v27 = vpop.f32.mrf.mxu3  ;;  %16566 = vst [vmem:[#allocation102_spill] sm:$0xff] %v15802_v37  ;;  %v8632_v55 = vmul.f32 %v15496_v30, %v15802_v37  ;;  %v8381_v30 = vmul.f32 0.1, %v15588_v6 }
0x145d   :  { %16557 = vst [vmem:[#allocation96_spill] sm:$0xff] %v15771_v27  ;;  %v15789_v27 = vmax.f32 %v15465_v61, %v8373_v42 }
0x145f   :  { %v15774_v5 = vpop.f32.mrf.mxu2  ;;  %16562 = vst [vmem:[#allocation92_spill] sm:$0xff] %v15789_v27 }
0x1460   :  { %16558 = vst [vmem:[#allocation97_spill] sm:$0xff] %v15774_v5  ;;  %v15792_v5 = vmax.f32 %v15498_v40, %v8375_v8  ;;  %v16568_v40 = vld [vmem:[#allocation128_spill] sm:$0xff] }
0x1461   :  { %v8629_v8 = vmul.f32 %v16568_v40, %v15789_v27 }
0x1462   :  { %16563 = vst [vmem:[#allocation100_spill] sm:$0xff] %v15792_v5  ;;  %v8631_v42 = vmul.f32 %v15481_v43, %v15792_v5 }
0x1463   :  { %v15784_v45 = vpop.f32.mrf.mxu0  ;;  %v15786_v50 = vpop.f32.mrf.mxu1  ;;  %v8661_v35 = vadd.f32 %v8630_v25, %v8629_v8 }
0x1464   :  { %16560 = vst [vmem:[#allocation98_spill] sm:$0xff] %v15784_v45  ;;  %v15797_v0 = vpop.f32.mrf.mxu3  ;;  %v15805_v45 = vpop.permute.xlu0 %4873 }
0x1465   :  { %16561 = vst [vmem:[#allocation99_spill] sm:$0xff] %v15786_v50  ;;  %v8378_v50 = vmul.f32 0.1, %v15548_v63  ;;  %v8662_v43 = vadd.f32 %v8661_v35, %v8631_v42  ;;  %v15839_v8 = vpop.permute.xlu2 %8576  ;;  %v8382_v35 = vmul.f32 0.1, %v15607_v12  ;;  %v7869_v42 = vadd.f32 %v16573_v47, %v15665_v57  ;;  %v16577_v57 = vld [vmem:[#allocation112_spill] sm:$0xff] }
0x1466   :  { %16565 = vst [vmem:[#allocation91_spill] sm:$0xff] %v15797_v0  ;;  %v15823_v0 = vpop.permute.xlu1 %7047  ;;  %v7877_v47 = vadd.f32 %v16577_v57, %v15701_v34 }
0x1467   :  { %v15807_v61 = vpop.f32.mrf.mxu2  ;;  %v15820_v1 = vmax.f32 %v15548_v63, %v8378_v50  ;;  %v8663_v63 = vadd.f32 %v8662_v43, %v8632_v55  ;;  %16572 = vst [vmem:[#allocation75_spill] sm:$0xff] %v15839_v8  ;;  %v8635_v55 = vmul.f32 %v15556_v44, %v15832_v49  ;;  %v8384_v44 = vmul.f32 0.1, %v15639_v21  ;;  %v16580_v8 = vld [vmem:[#allocation114_spill] sm:$0xff] }
0x1468   :  { %16567 = vst [vmem:[#allocation103_spill] sm:$0xff] %v15807_v61  ;;  %v8380_v61 = vmul.f32 0.1, %v15575_v11  ;;  %v7961_v49 = vadd.f32 %v16579_v24, %v7872_v33  ;;  %v16582_v33 = vld [vmem:[#allocation113_spill] sm:$0xff]  ;;  %v16585_v24 = vld [vmem:[#allocation115_spill] sm:$0xff] }
0x1469   :  { %16570 = vst [vmem:[#allocation104_spill] sm:$0xff] %v15820_v1  ;;  %v8634_v50 = vmul.f32 %v15539_v3, %v15820_v1  ;;  %v8664_v5 = vadd.f32 %v8663_v63, %v8633_v26  ;;  %v15854_v3 = vmax.f32 %v15588_v6, %v8381_v30  ;;  %v15866_v63 = vmax.f32 %v15607_v12, %v8382_v35  ;;  %v16578_v6 = vld [vmem:[#allocation107_spill] sm:$0xff] }
0x146a   :  { %v15842_v37 = vmax.f32 %v15575_v11, %v8380_v61  ;;  %v8383_v11 = vmul.f32 0.1, %v15620_v2  ;;  %v16576_v61 = vld [vmem:[#allocation110_spill] sm:$0xff]  ;;  %v7958_v30 = vadd.f32 %v16578_v6, %v7869_v42  ;;  %v16581_v35 = vld [vmem:[#allocation111_spill] sm:$0xff]  ;;  %v7966_v57 = vadd.f32 %v16582_v33, %v7877_v47 }
0x146b   :  { %v15825_v40 = vpop.f32.mrf.mxu0  ;;  %v15827_v27 = vpop.f32.mrf.mxu1  ;;  %v7874_v1 = vadd.f32 %v16576_v61, %v15691_v41  ;;  %v8665_v18 = vadd.f32 %v8664_v5, %v8634_v50  ;;  %v8385_v5 = vmul.f32 0.1, %v15652_v51  ;;  %v16587_v33 = vld [vmem:[#allocation118_spill] sm:$0xff] }
0x146c   :  { %v15835_v25 = vpop.f32.mrf.mxu3  ;;  %v15856_v43 = vpop.permute.xlu0 %4878  ;;  %v8636_v26 = vmul.f32 %v15572_v46, %v15842_v37  ;;  %v8637_v46 = vmul.f32 %v15594_v15, %v15854_v3  ;;  %v15880_v12 = vmax.f32 %v15620_v2, %v8383_v11  ;;  %v8638_v2 = vmul.f32 %v15611_v53, %v15866_v63  ;;  %v16588_v53 = vld [vmem:[#allocation82_spill] sm:$0xff] }
0x146d   :  { %16575 = vst [vmem:[#allocation128_spill] sm:$0xff] %v15856_v43  ;;  %v7879_v43 = vadd.f32 %v16580_v8, %v15715_v19  ;;  %v8666_v34 = vadd.f32 %v8665_v18, %v8635_v55  ;;  %v7963_v42 = vadd.f32 %v16581_v35, %v7874_v1  ;;  %v16583_v19 = vld [vmem:[#allocation74_spill] sm:$0xff]  ;;  %v16584_v55 = vld [vmem:[#allocation116_spill] sm:$0xff]  ;;  %v15898_v11 = vmax.f32 %v15639_v21, %v8384_v44  ;;  %v16586_v35 = vld [vmem:[#allocation73_spill] sm:$0xff]  ;;  %v15915_v21 = vpop.permute.xlu2 %8581 }
0x146e   :  { %v15889_v8 = vadd.f32 %v16583_v19, %v15711_v7  ;;  %v7882_v18 = vadd.f32 %v16584_v55, %v15727_v31  ;;  %v15893_v6 = vpop.permute.xlu1 %7052  ;;  %v8386_v1 = vmul.f32 0.1, %v15667_v23  ;;  %v15904_v7 = vadd.f32 %v16586_v35, %v15723_v17  ;;  %v16589_v55 = vld [vmem:[#allocation117_spill] sm:$0xff] }
0x146f   :  { %v15849_v16 = vpop.f32.mrf.mxu2  ;;  %v8667_v15 = vadd.f32 %v8666_v34, %v8636_v26  ;;  %v7968_v47 = vadd.f32 %v16585_v24, %v7879_v43  ;;  %v7884_v31 = vadd.f32 %v16587_v33, %v15743_v20  ;;  %v8047_v19 = vadd.f32 %v15731_v52, %v7958_v30  ;;  %v16590_v20 = vld [vmem:[#allocation81_spill] sm:$0xff] }
0x1470   :  { %v15913_v34 = vadd.f32 %v16588_v53, %v15735_v38  ;;  %v8639_v43 = vmul.f32 %v15635_v62, %v15880_v12  ;;  %v15920_v17 = vmax.f32 %v15652_v51, %v8385_v5  ;;  %v7971_v24 = vadd.f32 %v16589_v55, %v7882_v18  ;;  %v16591_v5 = vld [vmem:[#allocation119_spill] sm:$0xff] }
0x1471   :  { %v8668_v44 = vadd.f32 %v8667_v15, %v8637_v46  ;;  %v15925_v52 = vadd.f32 %v16590_v20, %v15751_v36  ;;  %v8050_v30 = vadd.f32 %v15739_v58, %v7961_v49  ;;  %v8136_v38 = vadd.f32 %v15741_v9, %v8047_v19  ;;  %v16592_v36 = vld [vmem:[#allocation120_spill] sm:$0xff]  ;;  %v16596_v20 = vld [vmem:[#allocation121_spill] sm:$0xff] }
0x1472   :  { %v8640_v46 = vmul.f32 %v15650_v4, %v15898_v11  ;;  %v15934_v62 = vmax.f32 %v15667_v23, %v8386_v1  ;;  %v8387_v51 = vmul.f32 0.1, %v15678_v56  ;;  %v7973_v18 = vadd.f32 %v16591_v5, %v7884_v31  ;;  %v16593_v19 = vld [vmem:[#allocation72_spill] sm:$0xff] }
0x1473   :  { %v15873_v41 = vpop.f32.mrf.mxu0  ;;  %v15875_v61 = vpop.f32.mrf.mxu1  ;;  %v8669_v35 = vadd.f32 %v8668_v44, %v8638_v2  ;;  %v7887_v15 = vadd.f32 %v16592_v36, %v15759_v14  ;;  %v8052_v58 = vadd.f32 %v15753_v39, %v7963_v42  ;;  %v8139_v9 = vadd.f32 %v15755_v54, %v8050_v30  ;;  %v16594_v14 = vld [vmem:[#allocation122_spill] sm:$0xff]  ;;  %v16602_v36 = vld [vmem:[#allocation68_spill] sm:$0xff] }
0x1474   :  { %v15883_v50 = vpop.f32.mrf.mxu3  ;;  %v15929_v33 = vpop.permute.xlu0 %4883  ;;  %v15944_v53 = vadd.f32 %v16593_v19, %v15769_v10  ;;  %v8641_v23 = vmul.f32 %v15671_v60, %v15920_v17  ;;  %v8388_v1 = vmul.f32 0.1, %v15687_v28  ;;  %v7889_v44 = vadd.f32 %v16594_v14, %v15778_v32  ;;  %v16597_v32 = vld [vmem:[#allocation94_spill] sm:$0xff]  ;;  %v16605_v14 = vld [vmem:[#allocation96_spill] sm:$0xff] }
0x1475   :  { %v8670_v4 = vadd.f32 %v8669_v35, %v8639_v43  ;;  %v8225_v39 = vadd.f32 %v15745_v13, %v8136_v38  ;;  %v8055_v54 = vadd.f32 %v15765_v22, %v7966_v57  ;;  %v8141_v42 = vadd.f32 %v15767_v59, %v8052_v58  ;;  %v16598_v13 = vld [vmem:[#allocation98_spill] sm:$0xff]  ;;  %v16599_v22 = vld [vmem:[#allocation99_spill] sm:$0xff] }
0x1476   :  { %v8642_v10 = vmul.f32 %v15682_v48, %v15934_v62  ;;  %v15959_v43 = vmax.f32 %v15678_v56, %v8387_v51  ;;  %v8389_v60 = vmul.f32 0.1, %v15697_v29  ;;  %v7976_v30 = vadd.f32 %v16596_v20, %v7887_v15  ;;  %v15963_v35 = vpop.permute.xlu1 %8586  ;;  %v16603_v58 = vld [vmem:[#allocation123_spill] sm:$0xff]  ;;  %v15982_v20 = vpop.permute.xlu2 %4888 }
0x1477   :  { %v15909_v26 = vpop.f32.mrf.mxu2  ;;  %v8671_v55 = vadd.f32 %v8670_v4, %v8640_v46  ;;  %v8228_v5 = vadd.f32 %v16597_v32, %v8139_v9  ;;  %v8057_v38 = vadd.f32 %v16598_v13, %v7968_v47  ;;  %v8144_v57 = vadd.f32 %v16599_v22, %v8055_v54  ;;  %v16600_v46 = vld [vmem:[#allocation71_spill] sm:$0xff]  ;;  %v16604_v4 = vld [vmem:[#allocation93_spill] sm:$0xff] }
0x1478   :  { %16595 = vst [vmem:[#allocation106_spill] sm:$0xff] %v15959_v43  ;;  %v15972_v48 = vadd.f32 %v16600_v46, %v15805_v45  ;;  %v15975_v51 = vmax.f32 %v15687_v28, %v8388_v1  ;;  %v8390_v15 = vmul.f32 0.1, %v16602_v36  ;;  %v7978_v19 = vadd.f32 %v16603_v58, %v7889_v44  ;;  %v16606_v45 = vld [vmem:[#allocation84_spill] sm:$0xff]  ;;  %v16607_v1 = vld [vmem:[#allocation83_spill] sm:$0xff]  ;;  %v16608_v44 = vld [vmem:[#allocation66_spill] sm:$0xff] }
0x1479   :  { %v8672_v56 = vadd.f32 %v8671_v55, %v8641_v23  ;;  %v8314_v9 = vadd.f32 %v16604_v4, %v8225_v39  ;;  %v8230_v47 = vadd.f32 %v16605_v14, %v8141_v42  ;;  %v8146_v54 = vadd.f32 %v15827_v27, %v8057_v38  ;;  %v16609_v22 = vld [vmem:[#allocation95_spill] sm:$0xff] }
0x147a   :  { %16601 = vst [vmem:[#allocation108_spill] sm:$0xff] %v15975_v51  ;;  %v8643_v13 = vmul.f32 %v16606_v45, %v15959_v43  ;;  %v15987_v23 = vmax.f32 %v15697_v29, %v8389_v60  ;;  %v8060_v28 = vadd.f32 %v15825_v40, %v7971_v24  ;;  %v8391_v55 = vmul.f32 0.1, %v16607_v1  ;;  %v16610_v46 = vld [vmem:[#allocation91_spill] sm:$0xff] }
0x147b   :  { %v8064_v49 = vpop.f32.mrf.mxu0  ;;  %v8150_v2 = vpop.f32.mrf.mxu1  ;;  %v8673_v32 = vadd.f32 %v8672_v56, %v8642_v10  ;;  %v8361_v39 = vadd.f32 %v16608_v44, %v15889_v8  ;;  %v8317_v42 = vadd.f32 %v16609_v22, %v8228_v5  ;;  %v8233_v27 = vadd.f32 %v16610_v46, %v8144_v57  ;;  %v16611_v10 = vld [vmem:[#allocation67_spill] sm:$0xff]  ;;  %v16612_v8 = vld [vmem:[#allocation69_spill] sm:$0xff]  ;;  %v16614_v46 = vld [vmem:[#allocation70_spill] sm:$0xff] }
0x147c   :  { %v15949_v31 = vpop.f32.mrf.mxu3  ;;  %v8644_v56 = vmul.f32 %v16611_v10, %v15975_v51  ;;  %v15998_v4 = vmax.f32 %v16602_v36, %v8390_v15  ;;  %v8062_v29 = vadd.f32 %v15873_v41, %v7973_v18  ;;  %v8149_v40 = vadd.f32 %v15875_v61, %v8060_v28  ;;  %v16002_v60 = vpop.permute.xlu0 %8591  ;;  %v16613_v57 = vld [vmem:[#allocation97_spill] sm:$0xff]  ;;  %v16615_v28 = vld [vmem:[#allocation103_spill] sm:$0xff] }
0x147d   :  { %v8392_v14 = vmul.f32 0.1, %v16612_v8  ;;  %v8362_v5 = vadd.f32 %v8314_v9, %v15904_v7  ;;  %v8319_v45 = vadd.f32 %v16613_v57, %v8230_v47  ;;  %v8235_v44 = vadd.f32 %v15835_v25, %v8146_v54  ;;  %v16616_v9 = vld [vmem:[#allocation86_spill] sm:$0xff] }
0x147e   :  { %v8674_v22 = vadd.f32 %v8673_v32, %v8643_v13  ;;  %v8645_v36 = vmul.f32 %v16614_v46, %v15987_v23  ;;  %v8065_v15 = vadd.f32 %v8064_v49, %v7976_v30  ;;  %v8151_v10 = vadd.f32 %v8150_v2, %v8062_v29  ;;  %v4894_v32 = vpop.permute.xlu1 %4893  ;;  %v16620_v46 = vld [vmem:[#allocation128_spill] sm:$0xff] }
0x147f   :  { %v15968_v59 = vpop.f32.mrf.mxu2  ;;  %v16011_v41 = vmax.f32 %v16607_v1, %v8391_v55  ;;  %v8393_v61 = vmul.f32 0.1, %v8361_v39  ;;  %v8363_v18 = vadd.f32 %v8317_v42, %v15913_v34  ;;  %v8322_v51 = vadd.f32 %v16615_v28, %v8233_v27  ;;  %v16617_v34 = vld [vmem:[#allocation124_spill] sm:$0xff] }
0x1480   :  { %v8675_v7 = vadd.f32 %v8674_v22, %v8644_v56  ;;  %v8646_v47 = vmul.f32 %v16616_v9, %v15998_v4  ;;  %v8238_v25 = vadd.f32 %v15883_v50, %v8149_v40  ;;  %v16019_v49 = vmax.f32 %v16612_v8, %v8392_v14  ;;  %v16618_v56 = vld [vmem:[#allocation85_spill] sm:$0xff]  ;;  %v8597_v14 = vpop.permute.xlu2 %8596 }
0x1481   :  { %v8394_v2 = vmul.f32 0.1, %v8362_v5  ;;  %v8364_v30 = vadd.f32 %v8319_v45, %v15925_v52  ;;  %v8324_v13 = vadd.f32 %v15849_v16, %v8235_v44  ;;  %v7892_v1 = vadd.f32 %v16617_v34, %v15823_v0  ;;  %v16619_v44 = vld [vmem:[#allocation78_spill] sm:$0xff]  ;;  %v16623_v9 = vld [vmem:[#allocation125_spill] sm:$0xff] }
0x1482   :  { %v8676_v55 = vadd.f32 %v8675_v7, %v8645_v36  ;;  %v8240_v42 = vadd.f32 %v15949_v31, %v8151_v10  ;;  %v8647_v50 = vmul.f32 %v16618_v56, %v16011_v41  ;;  %v8395_v29 = vmul.f32 0.1, %v8363_v18  ;;  %v16621_v36 = vld [vmem:[#allocation80_spill] sm:$0xff] }
0x1483   :  { %v8066_v38 = vpop.f32.mrf.mxu0  ;;  %v8153_v58 = vpop.f32.mrf.mxu1  ;;  %v8365_v40 = vadd.f32 %v8322_v51, %v15944_v53  ;;  %v8327_v16 = vadd.f32 %v15909_v26, %v8238_v25  ;;  %v8648_v31 = vmul.f32 %v16619_v44, %v16019_v49  ;;  %v5077_v53 = vadd.f32 %v16621_v36, %v16620_v46 }
0x1484   :  { %v8242_v24 = vpop.f32.mrf.mxu3  ;;  %v8154_v54 = vadd.f32 %v8153_v58, %v8065_v15  ;;  %v8067_v27 = vadd.f32 %v8066_v38, %v7978_v19  ;;  %v16028_v58 = vmax.f32 %v8361_v39, %v8393_v61  ;;  %v8677_v52 = vadd.f32 %v8676_v55, %v8646_v47  ;;  %v4899_v10 = vpop.permute.xlu0 %4898 }
0x1485   :  { %v16034_v19 = vmax.f32 %v8362_v5, %v8394_v2  ;;  %v8396_v38 = vmul.f32 0.1, %v8364_v30  ;;  %v8366_v39 = vadd.f32 %v8324_v13, %v15972_v48  ;;  %v8329_v51 = vadd.f32 %v15968_v59, %v8240_v42  ;;  %v16624_v48 = vld [vmem:[#allocation79_spill] sm:$0xff] }
0x1486   :  { %v8243_v57 = vadd.f32 %v8242_v24, %v8154_v54  ;;  %v8678_v26 = vadd.f32 %v8677_v52, %v8647_v50  ;;  %v16622_v24 = vld [vmem:[#allocation101_spill] sm:$0xff]  ;;  %v16042_v28 = vmax.f32 %v8363_v18, %v8395_v29  ;;  %v8397_v7 = vmul.f32 0.1, %v8365_v40  ;;  %v16625_v59 = vld [vmem:[#allocation75_spill] sm:$0xff]  ;;  %v8602_v52 = vpop.permute.xlu1 %8601 }
0x1487   :  { %v8331_v43 = vpop.f32.mrf.mxu2  ;;  %v8649_v61 = vmul.f32 %v16622_v24, %v16028_v58  ;;  %v7981_v47 = vadd.f32 %v16623_v9, %v7892_v1  ;;  %v5079_v25 = vadd.f32 %v16624_v48, %v15929_v33  ;;  %v8367_v54 = vadd.f32 %v8327_v16, %v5077_v53  ;;  %v16627_v1 = vld [vmem:[#allocation126_spill] sm:$0xff] }
0x1488   :  { %v8332_v2 = vadd.f32 %v8331_v43, %v8243_v57  ;;  %v8679_v13 = vadd.f32 %v8678_v26, %v8648_v31  ;;  %v8650_v34 = vmul.f32 %v16625_v59, %v16034_v19  ;;  %v16049_v55 = vmax.f32 %v8364_v30, %v8396_v38  ;;  %v16628_v30 = vld [vmem:[#allocation87_spill] sm:$0xff] }
0x1489   :  { %v8398_v42 = vmul.f32 0.1, %v8366_v39  ;;  %v8368_v56 = vadd.f32 %v8329_v51, %v5079_v25  ;;  %v8651_v43 = vmul.f32 %v15915_v21, %v16042_v28  ;;  %v16057_v16 = vmax.f32 %v8365_v40, %v8397_v7  ;;  %v16629_v21 = vld [vmem:[#allocation127_spill] sm:$0xff] }
0x148a   :  { %v8680_v33 = vadd.f32 %v8679_v13, %v8649_v61  ;;  %v16630_v61 = vld [vmem:[#allocation90_spill] sm:$0xff] }
0x148b   :  { %v8155_v8 = vpop.f32.mrf.mxu1  ;;  %v8069_v22 = vpop.f32.mrf.mxu0  ;;  %v16062_v46 = vmax.f32 %v8366_v39, %v8398_v42  ;;  %v8400_v36 = vmul.f32 0.1, %v8368_v56  ;;  %v5087_v7 = vadd.f32 %v16630_v61, %v4899_v10 }
0x148c   :  { %v8156_v45 = vadd.f32 %v8155_v8, %v8067_v27  ;;  %v8244_v0 = vpop.f32.mrf.mxu3  ;;  %v16626_v27 = vld [vmem:[#allocation88_spill] sm:$0xff]  ;;  %v8070_v50 = vadd.f32 %v8069_v22, %v7981_v47  ;;  %v7894_v8 = vadd.f32 %v16627_v1, %v15893_v6  ;;  %v8681_v38 = vadd.f32 %v8680_v33, %v8650_v34  ;;  %v4904_v6 = vpop.permute.xlu2 %4903  ;;  %v16632_v33 = vld [vmem:[#allocation89_spill] sm:$0xff] }
0x148d   :  { %v5082_v18 = vadd.f32 %v16626_v27, %v15982_v20  ;;  %v8652_v22 = vmul.f32 %v15963_v35, %v16049_v55  ;;  %v8607_v39 = vpop.permute.xlu0 %8606  ;;  %v8654_v48 = vmul.f32 %v8597_v14, %v16062_v46  ;;  %v16071_v25 = vmax.f32 %v8368_v56, %v8400_v36  ;;  %v8770_v36 = vld [vmem:[%s16631_s17 + $0x68] sm:$0xff] }
0x148e   :  { %v8245_v15 = vadd.f32 %v8244_v0, %v8156_v45  ;;  %v5084_v45 = vadd.f32 %v16628_v30, %v4894_v32  ;;  %v8399_v0 = vmul.f32 0.1, %v8367_v54  ;;  %v7983_v40 = vadd.f32 %v16629_v21, %v7894_v8  ;;  %v8772_v8 = vld [vmem:[%s16631_s17 + $0x78] sm:$0xff] }
0x148f   :  { %v8333_v5 = vpop.f32.mrf.mxu2  ;;  %v8369_v44 = vadd.f32 %v8332_v2, %v5082_v18  ;;  %v8653_v32 = vmul.f32 %v16002_v60, %v16057_v16  ;;  %v8612_v18 = vpop.permute.xlu1 %8611  ;;  %v8656_v14 = vmul.f32 %v8607_v39, %v16071_v25  ;;  %8773 = vmatpush.msrb.mxu0 %v8772_v8  ;;  %v8766_v39 = vld [vmem:[%s16631_s17 + $0x48] sm:$0xff]  ;;  %v8759_v8 = vld [vmem:[%s16631_s17 + $0x10] sm:$0xff] }
0x1490   :  { %v8334_v29 = vadd.f32 %v8333_v5, %v8245_v15  ;;  %v8682_v15 = vadd.f32 %v8681_v38, %v8651_v43  ;;  %v16068_v5 = vmax.f32 %v8367_v54, %v8399_v0  ;;  %v5089_v43 = vadd.f32 %v16632_v33, %v4904_v6  ;;  %v8758_v33 = vld [vmem:[%s16631_s17 + $0x8] sm:$0xff] }
0x1491   :  { %v8401_v9 = vmul.f32 0.1, %v8369_v44 }
0x1492   :  { %v8370_v53 = vadd.f32 %v8334_v29, %v5084_v45  ;;  %v8683_v47 = vadd.f32 %v8682_v15, %v8652_v22  ;;  %v8655_v42 = vmul.f32 %v8602_v52, %v16068_v5 }
0x1493   :  { %v8158_v57 = vpop.f32.mrf.mxu1  ;;  %v8071_v26 = vpop.f32.mrf.mxu0  ;;  %v16074_v27 = vmax.f32 %v8369_v44, %v8401_v9  ;;  %v8771_v44 = vld [vmem:[%s16631_s17 + $0x70] sm:$0xff] }
0x1494   :  { %v8159_v31 = vadd.f32 %v8158_v57, %v8070_v50  ;;  %v8247_v20 = vpop.f32.mrf.mxu3  ;;  %v8402_v2 = vmul.f32 0.1, %v8370_v53  ;;  %v8072_v13 = vadd.f32 %v8071_v26, %v7983_v40  ;;  %v8684_v34 = vadd.f32 %v8683_v47, %v8653_v32  ;;  %8774 = vmatpush.msrb.mxu0 %v8771_v44  ;;  %v8769_v40 = vld [vmem:[%s16631_s17 + $0x60] sm:$0xff]  ;;  %v8768_v26 = vld [vmem:[%s16631_s17 + $0x58] sm:$0xff]  ;;  %v8767_v9 = vld [vmem:[%s16631_s17 + $0x50] sm:$0xff] }
0x1495   :  { %v8657_v30 = vmul.f32 %v8612_v18, %v16074_v27  ;;  %v8622_v6 = vpop.permute.xlu0 %8621  ;;  %v8761_v18 = vld [vmem:[%s16631_s17 + $0x20] sm:$0xff] }
0x1496   :  { %v8248_v51 = vadd.f32 %v8247_v20, %v8159_v31  ;;  %v8685_v29 = vadd.f32 %v8684_v34, %v8654_v48  ;;  %v16077_v56 = vmax.f32 %v8370_v53, %v8402_v2  ;;  %v8617_v31 = vpop.permute.xlu2 %8616  ;;  %8775 = vmatpush.msrb.mxu0 %v8770_v36  ;;  %v8765_v48 = vld [vmem:[%s16631_s17 + $0x40] sm:$0xff]  ;;  %v8763_v34 = vld [vmem:[%s16631_s17 + $0x30] sm:$0xff] }
0x1497   :  { %v8336_v24 = vpop.f32.mrf.mxu2 }
0x1498   :  { %v8337_v35 = vadd.f32 %v8336_v24, %v8248_v51  ;;  %v8686_v52 = vadd.f32 %v8685_v29, %v8655_v42  ;;  %v8658_v38 = vmul.f32 %v8617_v31, %v16077_v56  ;;  %8776 = vmatpush.msrb.mxu0 %v8769_v40  ;;  %v8627_v24 = vpop.permute.xlu1 %8626  ;;  %v8762_v42 = vld [vmem:[%s16631_s17 + $0x28] sm:$0xff]  ;;  %v16633_v40 = vld [vmem:[#allocation92_spill] sm:$0xff] }
0x149a   :  { %v8371_v59 = vadd.f32 %v8337_v35, %v5087_v7  ;;  %v8687_v20 = vadd.f32 %v8686_v52, %v8656_v14  ;;  %8777 = vmatpush.msrb.mxu0 %v8768_v26  ;;  %v8760_v14 = vld [vmem:[%s16631_s17 + $0x18] sm:$0xff] }
0x149b   :  { %v8160_v60 = vpop.f32.mrf.mxu1 }
0x149c   :  { %v8403_v10 = vmul.f32 0.1, %v8371_v59  ;;  %v8161_v54 = vadd.f32 %v8160_v60, %v8072_v13  ;;  %v8249_v50 = vpop.f32.mrf.mxu3  ;;  %v8688_v53 = vadd.f32 %v8687_v20, %v8657_v30  ;;  %8778 = vmatpush.msrb.mxu0 %v8767_v9  ;;  %v8764_v13 = vld [vmem:[%s16631_s17 + $0x38] sm:$0xff] }
0x149d   :  { %v16635_v9 = vld [vmem:[#allocation100_spill] sm:$0xff] }
0x149e   :  { %v8250_v1 = vadd.f32 %v8249_v50, %v8161_v54  ;;  %v16082_v45 = vmax.f32 %v8371_v59, %v8403_v10  ;;  %v8689_v15 = vadd.f32 %v8688_v53, %v8658_v38  ;;  %8779 = vmatpush.msrb.mxu0 %v8766_v39  ;;  %v8702_v10 = vpop.permute.xlu2 %8701  ;;  %v16636_v39 = vld [vmem:[#allocation102_spill] sm:$0xff] }
0x149f   :  { %v8338_v57 = vpop.f32.mrf.mxu2  ;;  %v8704_v50 = vperm.slane %v8702_v10, 0 }
0x14a0   :  { %v8339_v0 = vadd.f32 %v8338_v57, %v8250_v1  ;;  %v8659_v51 = vmul.f32 %v8622_v6, %v16082_v45  ;;  %8780 = vmatpush.msrb.mxu0 %v8765_v48  ;;  %v8757_v57 = vld [vmem:[%s16631_s17] sm:$0xff]  ;;  %v16637_v48 = vld [vmem:[#allocation76_spill] sm:$0xff] }
0x14a2   :  { %v8372_v22 = vadd.f32 %v8339_v0, %v5089_v43  ;;  %v8690_v61 = vadd.f32 %v8689_v15, %v8659_v51  ;;  %8781 = vmatpush.msrb.mxu0 %v8764_v13  ;;  %v16639_v13 = vld [vmem:[#allocation105_spill] sm:$0xff] }
0x14a4   :  { %v8404_v21 = vmul.f32 0.1, %v8372_v22  ;;  %8782 = vmatpush.msrb.mxu0 %v8763_v34 }
0x14a6   :  { %v8436_v32 = vmax.f32 %v8372_v22, %v8404_v21  ;;  %8783 = vmatpush.msrb.mxu0 %v8762_v42 }
0x14a8   :  { %v8660_v7 = vmul.f32 %v8627_v24, %v8436_v32  ;;  %8784 = vmatpush.msrb.mxu0 %v8761_v18  ;;  %v16640_v18 = vld [vmem:[#allocation106_spill] sm:$0xff] }
0x14aa   :  { %v8691_v35 = vadd.f32 %v8690_v61, %v8660_v7  ;;  %8785 = vmatpush.msrb.mxu0 %v8760_v14  ;;  %v16634_v61 = vld [vmem:[#allocation77_spill] sm:$0xff] }
0x14ac   :  { %v8692_v47 = vrot.slane %v8691_v35, 4  ;;  %8786 = vmatpush.msrb.mxu0 %v8759_v8 }
0x14ae   :  { %v8693_v2 = vadd.f32 %v8692_v47, %v8691_v35  ;;  %8787 = vmatpush.msrb.mxu0 %v8758_v33 }
0x14b0   :  { %v8694_v59 = vrot.slane %v8693_v2, 2  ;;  %8788 = vmatpush.msrb.mxu0 %v8757_v57 }
0x14b2   :  { %v8695_v60 = vadd.f32 %v8694_v59, %v8693_v2 }
0x14b4   :  { %v8696_v54 = vrot.slane %v8695_v60, 1 }
0x14b6   :  { %v8697_v29 = vadd.f32 %v8696_v54, %v8695_v60 }
0x14b8   :  { %v8705_v1 = vadd.f32 %v8704_v50, %v8697_v29  ;;  %v16641_v50 = vld [vmem:[#allocation108_spill] sm:$0xff] }
0x14ba   :  { %v8706_v43 = vsub.f32 0.0, %v8705_v1 }
0x14bc   :  { %v8707_v52 = vmul.f32 1.442695, %v8706_v43 }
0x14be   :  { %11481 = vpow2.f32 %v8707_v52 }
0x14c4   :  { %v11482_v30 = vpop.eup %11481 }
0x14c5   :  { %v8709_v0 = vadd.f32 1.0, %v11482_v30 }
0x14c7   :  { %11483 = vrcp.f32 %v8709_v0  ;;  %v8721_v38 = vand.u32 2147483648, %v8709_v0  ;;  %v8719_v36 = vand.u32 2147483647, %v8709_v0  ;;  %vm8715_vm4 = vweird.f32 %v8709_v0 }
0x14c9   :  { %v8722_v53 = vor.u32 1.1754944e-38, %v8721_v38  ;;  %vm8720_vm6 = vcmp.eq.f32.partialorder %v8719_v36, 8.507059e+37 }
0x14cd   :  { %v11484_v44 = vpop.eup %11483 }
0x14ce   :  { %v8711_v31 = vmul.f32 %v11484_v44, %v8709_v0  ;;  %vm8716_vm3 = vweird.f32 %v11484_v44 }
0x14cf   :  { %vm8717_vm5 = vmor %vm8715_vm4, %vm8716_vm3 }
0x14d0   :  { %v8712_v20 = vsub.f32 1.0, %v8711_v31 }
0x14d2   :  { %v8713_v22 = vmul.f32 %v11484_v44, %v8712_v20 }
0x14d4   :  { %v8714_v6 = vadd.f32 %v11484_v44, %v8713_v22 }
0x14d6   :  { %v8718_v51 = vsel %vm8717_vm5, %v11484_v44, %v8714_v6  ;;  %v8886_v6 = vld [vmem:[#allocation34] sm:$0xff] }
0x14d7   :  { %v16101_v21 = vsel %vm8720_vm6, %v8722_v53, %v8718_v51  ;;  %v8888_v51 = vld [vmem:[#allocation34 + $0x10] sm:$0xff] }
0x14d8   :  { %v8725_v15 = vmul.f32 %v16101_v21, %v16633_v40  ;;  %v16107_v26 = vmul.f32 %v16101_v21, %v16082_v45  ;;  %v16110_v24 = vmul.f32 %v16101_v21, %v8436_v32  ;;  %v8726_v7 = vmul.f32 %v16101_v21, %v16634_v61  ;;  %v16638_v45 = vld [vmem:[#allocation104_spill] sm:$0xff]  ;;  %v8890_v40 = vld [vmem:[#allocation34 + $0x20] sm:$0xff] }
0x14d9   :  { %v8727_v35 = vmul.f32 %v16101_v21, %v16635_v9  ;;  %v8728_v47 = vmul.f32 %v16101_v21, %v16636_v39  ;;  %v8729_v2 = vmul.f32 %v16101_v21, %v16637_v48  ;;  %v8730_v32 = vmul.f32 %v16101_v21, %v16638_v45  ;;  %v8894_v61 = vld [vmem:[#allocation34 + $0x40] sm:$0xff]  ;;  %v8896_v9 = vld [vmem:[#allocation34 + $0x50] sm:$0xff] }
0x14da   :  { %8789 = vmatmul.f32.vlgmr.msrb.gmra.mxu0 %v8725_v15  ;;  %v8731_v59 = vmul.f32 %v16101_v21, %v16639_v13  ;;  %v8732_v34 = vmul.f32 %v16101_v21, %v15842_v37  ;;  %v8733_v60 = vmul.f32 %v16101_v21, %v15854_v3  ;;  %v8734_v42 = vmul.f32 %v16101_v21, %v15866_v63  ;;  %v8898_v39 = vld [vmem:[#allocation34 + $0x60] sm:$0xff]  ;;  %v8900_v48 = vld [vmem:[#allocation34 + $0x70] sm:$0xff] }
0x14db   :  { %v8735_v10 = vmul.f32 %v16101_v21, %v15880_v12  ;;  %v8736_v54 = vmul.f32 %v16101_v21, %v15898_v11  ;;  %v8737_v37 = vmul.f32 %v16101_v21, %v15920_v17  ;;  %v8738_v3 = vmul.f32 %v16101_v21, %v15934_v62  ;;  %v8902_v45 = vld [vmem:[#allocation34 + $0x80] sm:$0xff]  ;;  %v8904_v13 = vld [vmem:[#allocation34 + $0x90] sm:$0xff] }
0x14dc   :  { %v8739_v63 = vmul.f32 %v16101_v21, %v16640_v18  ;;  %v8740_v12 = vmul.f32 %v16101_v21, %v16641_v50  ;;  %v8741_v11 = vmul.f32 %v16101_v21, %v15987_v23  ;;  %v8742_v14 = vmul.f32 %v16101_v21, %v15998_v4  ;;  %v8914_v18 = vld [vmem:[#allocation34 + $0xe0] sm:$0xff] }
0x14dd   :  { %v8743_v1 = vmul.f32 %v16101_v21, %v16011_v41  ;;  %v8744_v33 = vmul.f32 %v16101_v21, %v16019_v49  ;;  %v8745_v23 = vmul.f32 %v16101_v21, %v16028_v58  ;;  %v8746_v4 = vmul.f32 %v16101_v21, %v16034_v19 }
0x14de   :  { %v8747_v41 = vmul.f32 %v16101_v21, %v16042_v28  ;;  %v8748_v49 = vmul.f32 %v16101_v21, %v16049_v55  ;;  %v8749_v58 = vmul.f32 %v16101_v21, %v16057_v16  ;;  %v8750_v19 = vmul.f32 %v16101_v21, %v16062_v46 }
0x14df   :  { %v8751_v28 = vmul.f32 %v16101_v21, %v16068_v5  ;;  %v8752_v55 = vmul.f32 %v16101_v21, %v16071_v25  ;;  %v8753_v16 = vmul.f32 %v16101_v21, %v16074_v27  ;;  %v8754_v46 = vmul.f32 %v16101_v21, %v16077_v56 }
0x14e2   :  { %8792 = vmatmul.f32.gmra.mxu0 %v8726_v7 }
0x14ea   :  { %8795 = vmatmul.f32.gmra.mxu0 %v8727_v35 }
0x14f2   :  { %8798 = vmatmul.f32.gmra.mxu0 %v8728_v47 }
0x14fa   :  { %8801 = vmatmul.f32.gmra.mxu0 %v8729_v2 }
0x1502   :  { %8804 = vmatmul.f32.gmra.mxu0 %v8730_v32 }
0x150a   :  { %8807 = vmatmul.f32.gmra.mxu0 %v8731_v59 }
0x1512   :  { %8810 = vmatmul.f32.gmra.mxu0 %v8732_v34  ;;  %v8906_v34 = vld [vmem:[#allocation34 + $0xa0] sm:$0xff] }
0x151a   :  { %8813 = vmatmul.f32.gmra.mxu0 %v8733_v60 }
0x1522   :  { %8816 = vmatmul.f32.gmra.mxu0 %v8734_v42  ;;  %v8908_v42 = vld [vmem:[#allocation34 + $0xb0] sm:$0xff] }
0x152a   :  { %8819 = vmatmul.f32.gmra.mxu0 %v8735_v10 }
0x1532   :  { %8822 = vmatmul.f32.gmra.mxu0 %v8736_v54  ;;  %v8910_v54 = vld [vmem:[#allocation34 + $0xc0] sm:$0xff] }
0x153a   :  { %8825 = vmatmul.f32.gmra.mxu0 %v8737_v37 }
0x1542   :  { %8828 = vmatmul.f32.gmra.mxu0 %v8738_v3  ;;  %v8912_v3 = vld [vmem:[#allocation34 + $0xd0] sm:$0xff] }
0x154a   :  { %8831 = vmatmul.f32.gmra.mxu0 %v8739_v63  ;;  %v8916_v63 = vld [vmem:[#allocation34 + $0xf0] sm:$0xff] }
0x1552   :  { %8834 = vmatmul.f32.gmra.mxu0 %v8740_v12  ;;  %v8887_v12 = vld [vmem:[#allocation34 + $0x8] sm:$0xff] }
0x1557   :  { %v16142_v29 = vpop.f32.mrf.mxu0 }
0x155a   :  { %8837 = vmatmul.f32.gmra.mxu0 %v8741_v11  ;;  %v8889_v11 = vld [vmem:[#allocation34 + $0x18] sm:$0xff] }
0x155f   :  { %v8793_v17 = vpop.f32.mrf.mxu0 }
0x1562   :  { %8840 = vmatmul.f32.gmra.mxu0 %v8742_v14  ;;  %v8891_v14 = vld [vmem:[#allocation34 + $0x28] sm:$0xff] }
0x1567   :  { %v8796_v62 = vpop.f32.mrf.mxu0 }
0x156a   :  { %8843 = vmatmul.f32.gmra.mxu0 %v8743_v1  ;;  %v8893_v1 = vld [vmem:[#allocation34 + $0x38] sm:$0xff] }
0x156f   :  { %v8799_v8 = vpop.f32.mrf.mxu0 }
0x1572   :  { %8846 = vmatmul.f32.gmra.mxu0 %v8744_v33  ;;  %v8895_v33 = vld [vmem:[#allocation34 + $0x48] sm:$0xff] }
0x1577   :  { %v8802_v43 = vpop.f32.mrf.mxu0 }
0x157a   :  { %8849 = vmatmul.f32.gmra.mxu0 %v8745_v23  ;;  %v8897_v23 = vld [vmem:[#allocation34 + $0x58] sm:$0xff] }
0x157f   :  { %v8805_v57 = vpop.f32.mrf.mxu0 }
0x1582   :  { %8852 = vmatmul.f32.gmra.mxu0 %v8746_v4  ;;  %v8899_v4 = vld [vmem:[#allocation34 + $0x68] sm:$0xff] }
0x1587   :  { %v8808_v52 = vpop.f32.mrf.mxu0 }
0x158a   :  { %8855 = vmatmul.f32.gmra.mxu0 %v8747_v41  ;;  %v8901_v41 = vld [vmem:[#allocation34 + $0x78] sm:$0xff] }
0x158f   :  { %v8811_v30 = vpop.f32.mrf.mxu0 }
0x1592   :  { %8858 = vmatmul.f32.gmra.mxu0 %v8748_v49  ;;  %v8903_v49 = vld [vmem:[#allocation34 + $0x88] sm:$0xff] }
0x1597   :  { %v8814_v0 = vpop.f32.mrf.mxu0 }
0x159a   :  { %8861 = vmatmul.f32.gmra.mxu0 %v8749_v58  ;;  %v8905_v58 = vld [vmem:[#allocation34 + $0x98] sm:$0xff] }
0x159f   :  { %v8817_v44 = vpop.f32.mrf.mxu0 }
0x15a2   :  { %8864 = vmatmul.f32.gmra.mxu0 %v8750_v19  ;;  %v8907_v19 = vld [vmem:[#allocation34 + $0xa8] sm:$0xff] }
0x15a7   :  { %v8820_v31 = vpop.f32.mrf.mxu0 }
0x15aa   :  { %8867 = vmatmul.f32.gmra.mxu0 %v8751_v28  ;;  %v8942_v28 = vpop.permute.xlu1 %8941 }
0x15af   :  { %v8823_v20 = vpop.f32.mrf.mxu0 }
0x15b2   :  { %8870 = vmatmul.f32.gmra.mxu0 %v8752_v55  ;;  %v8909_v55 = vld [vmem:[#allocation34 + $0xb8] sm:$0xff] }
0x15b7   :  { %v8826_v38 = vpop.f32.mrf.mxu0 }
0x15ba   :  { %8873 = vmatmul.f32.gmra.mxu0 %v8753_v16 }
0x15bf   :  { %v8829_v22 = vpop.f32.mrf.mxu0 }
0x15c2   :  { %8876 = vmatmul.f32.gmra.mxu0 %v8754_v46 }
0x15c7   :  { %v8832_v36 = vpop.f32.mrf.mxu0 }
0x15ca   :  { %8879 = vmatmul.f32.gmra.mxu0 %v16107_v26  ;;  %v8892_v26 = vld [vmem:[#allocation34 + $0x30] sm:$0xff] }
0x15cf   :  { %v8835_v5 = vpop.f32.mrf.mxu0 }
0x15d0   :  { %9014 = vmatpush.msrb.mxu1 %v8835_v5 }
0x15d2   :  { %8882 = vmatmul.f32.gmra.mxu0 %v16110_v24  ;;  %9015 = vmatpush.msrb.mxu1 %v8832_v36  ;;  %v8957_v36 = vpop.permute.xlu1 %8956 }
0x15d4   :  { %9016 = vmatpush.msrb.mxu1 %v8829_v22  ;;  %v8911_v22 = vld [vmem:[#allocation34 + $0xc8] sm:$0xff] }
0x15d6   :  { %9017 = vmatpush.msrb.mxu1 %v8826_v38  ;;  %v8947_v38 = vpop.permute.xlu2 %8946 }
0x15d7   :  { %v16174_v25 = vpop.f32.mrf.mxu0 }
0x15d8   :  { %9018 = vmatpush.msrb.mxu1 %v8823_v20 }
0x15da   :  { %9019 = vmatpush.msrb.mxu1 %v8820_v31  ;;  %v8937_v31 = vpop.permute.xlu0 %8936 }
0x15dc   :  { %9020 = vmatpush.msrb.mxu1 %v8817_v44 }
0x15de   :  { %9021 = vmatpush.msrb.mxu1 %v8814_v0  ;;  %v8962_v5 = vpop.permute.xlu2 %8961 }
0x15df   :  { %v16176_v27 = vpop.f32.mrf.mxu0 }
0x15e0   :  { %9022 = vmatpush.msrb.mxu1 %v8811_v30 }
0x15e2   :  { %9023 = vmatpush.msrb.mxu1 %v8808_v52  ;;  %v8952_v46 = vpop.permute.xlu0 %8951 }
0x15e4   :  { %9024 = vmatpush.msrb.mxu1 %v8805_v57 }
0x15e6   :  { %9025 = vmatpush.msrb.mxu1 %v8802_v43 }
0x15e7   :  { %v8844_v56 = vpop.f32.mrf.mxu0 }
0x15e8   :  { %9026 = vmatpush.msrb.mxu1 %v8799_v8 }
0x15ea   :  { %9027 = vmatpush.msrb.mxu1 %v8796_v62 }
0x15ec   :  { %9028 = vmatpush.msrb.mxu1 %v8793_v17 }
0x15ee   :  { %9029 = vmatpush.msrb.mxu1 %v16142_v29 }
0x15ef   :  { %v8847_v53 = vpop.f32.mrf.mxu0  ;;  %9030 = vmatmul.f32.vlgmr.msrb.gmra.mxu1 %v8886_v6  ;;  %v8972_v6 = vpop.permute.xlu1 %8971 }
0x15f7   :  { %v8850_v21 = vpop.f32.mrf.mxu0  ;;  %9033 = vmatmul.f32.gmra.mxu1 %v8888_v51 }
0x15ff   :  { %v8853_v15 = vpop.f32.mrf.mxu0  ;;  %9036 = vmatmul.f32.gmra.mxu1 %v8890_v40 }
0x1607   :  { %v8856_v24 = vpop.f32.mrf.mxu0  ;;  %9039 = vmatmul.f32.gmra.mxu1 %v8892_v26 }
0x160f   :  { %v8859_v7 = vpop.f32.mrf.mxu0  ;;  %9042 = vmatmul.f32.gmra.mxu1 %v8894_v61  ;;  %v8917_v61 = vld [vmem:[#allocation34 + $0xf8] sm:$0xff] }
0x1617   :  { %v8862_v35 = vpop.f32.mrf.mxu0  ;;  %9045 = vmatmul.f32.gmra.mxu1 %v8896_v9 }
0x161f   :  { %v8865_v47 = vpop.f32.mrf.mxu0  ;;  %9048 = vmatmul.f32.gmra.mxu1 %v8898_v39 }
0x1627   :  { %v8868_v2 = vpop.f32.mrf.mxu0  ;;  %9051 = vmatmul.f32.gmra.mxu1 %v8900_v48 }
0x162f   :  { %v8871_v32 = vpop.f32.mrf.mxu0  ;;  %9054 = vmatmul.f32.gmra.mxu1 %v8902_v45 }
0x1637   :  { %v8874_v59 = vpop.f32.mrf.mxu0  ;;  %9057 = vmatmul.f32.gmra.mxu1 %v8904_v13 }
0x163f   :  { %v8877_v60 = vpop.f32.mrf.mxu0  ;;  %9060 = vmatmul.f32.gmra.mxu1 %v8906_v34 }
0x1647   :  { %v8880_v10 = vpop.f32.mrf.mxu0  ;;  %9063 = vmatmul.f32.gmra.mxu1 %v8908_v42 }
0x164f   :  { %v8883_v37 = vpop.f32.mrf.mxu0  ;;  %9066 = vmatmul.f32.gmra.mxu1 %v8910_v54 }
0x1650   :  { %9079 = vmatpush.msra.mxu1 %v8883_v37 }
0x1652   :  { %9080 = vmatpush.msra.mxu1 %v8880_v10 }
0x1654   :  { %9081 = vmatpush.msra.mxu1 %v8877_v60 }
0x1656   :  { %9082 = vmatpush.msra.mxu1 %v8874_v59 }
0x1657   :  { %9069 = vmatmul.f32.gmra.mxu1 %v8912_v3 }
0x1658   :  { %9083 = vmatpush.msra.mxu1 %v8871_v32 }
0x165a   :  { %9084 = vmatpush.msra.mxu1 %v8868_v2 }
0x165c   :  { %9085 = vmatpush.msra.mxu1 %v8865_v47 }
0x165e   :  { %9086 = vmatpush.msra.mxu1 %v8862_v35 }
0x165f   :  { %9072 = vmatmul.f32.gmra.mxu1 %v8914_v18 }
0x1660   :  { %9087 = vmatpush.msra.mxu1 %v8859_v7 }
0x1662   :  { %9088 = vmatpush.msra.mxu1 %v8856_v24 }
0x1664   :  { %9089 = vmatpush.msra.mxu1 %v8853_v15  ;;  %v16215_v15 = vpop.permute.xlu1 %8986 }
0x1666   :  { %9090 = vmatpush.msra.mxu1 %v8850_v21  ;;  %v8915_v21 = vld [vmem:[#allocation34 + $0xe8] sm:$0xff] }
0x1667   :  { %9075 = vmatmul.f32.gmra.mxu1 %v8916_v63 }
0x1668   :  { %9091 = vmatpush.msra.mxu1 %v8847_v53  ;;  %v16209_v53 = vpop.permute.xlu2 %8976 }
0x166a   :  { %9092 = vmatpush.msra.mxu1 %v8844_v56  ;;  %v8967_v56 = vpop.permute.xlu0 %8966 }
0x166c   :  { %v16179_v50 = vpop.f32.mrf.mxu1  ;;  %9093 = vmatpush.msra.mxu1 %v16176_v27  ;;  %v8913_v27 = vld [vmem:[#allocation34 + $0xd8] sm:$0xff]  ;;  %v16223_v9 = vpop.permute.xlu1 %9001 }
0x166d   :  { %v9032_v39 = vadd.f32 %v16179_v50, %v8937_v31 }
0x166e   :  { %9094 = vmatpush.msra.mxu1 %v16174_v25 }
0x166f   :  { %9095 = vmatmul.f32.vlgmr.msra.gmra.mxu1 %v8887_v12 }
0x1670   :  { %v16217_v26 = vpop.permute.xlu2 %8991 }
0x1672   :  { %v16213_v40 = vpop.permute.xlu0 %8981 }
0x1674   :  { %v16183_v29 = vpop.f32.mrf.mxu1  ;;  %v9179_v34 = vpop.permute.xlu1 %9178 }
0x1675   :  { %v9035_v2 = vadd.f32 %v16183_v29, %v8942_v28 }
0x1677   :  { %9098 = vmatmul.f32.gmra.mxu1 %v8889_v11 }
0x1678   :  { %v16226_v47 = vpop.permute.xlu2 %9006 }
0x167a   :  { %v16221_v7 = vpop.permute.xlu0 %8996 }
0x167c   :  { %v16185_v17 = vpop.f32.mrf.mxu1 }
0x167d   :  { %v9038_v37 = vadd.f32 %v16185_v17, %v8947_v38 }
0x167f   :  { %9101 = vmatmul.f32.gmra.mxu1 %v8891_v14 }
0x1680   :  { %v9184_v10 = vpop.permute.xlu2 %9183 }
0x1682   :  { %v16229_v59 = vpop.permute.xlu0 %9011 }
0x1684   :  { %v16187_v62 = vpop.f32.mrf.mxu1 }
0x1687   :  { %9104 = vmatmul.f32.gmra.mxu1 %v8893_v1  ;;  %v9041_v1 = vadd.f32 %v16187_v62, %v8952_v46 }
0x168a   :  { %v9189_v11 = vpop.permute.xlu0 %9188 }
0x168c   :  { %v16189_v8 = vpop.f32.mrf.mxu1 }
0x168f   :  { %9107 = vmatmul.f32.gmra.mxu1 %v8895_v33 }
0x1694   :  { %v16191_v43 = vpop.f32.mrf.mxu1 }
0x1697   :  { %9110 = vmatmul.f32.gmra.mxu1 %v8897_v23 }
0x169c   :  { %v16193_v57 = vpop.f32.mrf.mxu1 }
0x169f   :  { %9113 = vmatmul.f32.gmra.mxu1 %v8899_v4 }
0x16a4   :  { %v16195_v52 = vpop.f32.mrf.mxu1 }
0x16a7   :  { %9116 = vmatmul.f32.gmra.mxu1 %v8901_v41 }
0x16ac   :  { %v16197_v30 = vpop.f32.mrf.mxu1 }
0x16af   :  { %9119 = vmatmul.f32.gmra.mxu1 %v8903_v49 }
0x16b4   :  { %v16199_v0 = vpop.f32.mrf.mxu1 }
0x16b7   :  { %9122 = vmatmul.f32.gmra.mxu1 %v8905_v58  ;;  %v9194_v58 = vpop.permute.xlu1 %9193 }
0x16bc   :  { %v16201_v44 = vpop.f32.mrf.mxu1 }
0x16bf   :  { %9125 = vmatmul.f32.gmra.mxu1 %v8907_v19  ;;  %v9044_v19 = vadd.f32 %v16189_v8, %v8957_v36  ;;  %v9053_v8 = vadd.f32 %v16195_v52, %v8972_v6 }
0x16c4   :  { %v16203_v20 = vpop.f32.mrf.mxu1 }
0x16c7   :  { %9128 = vmatmul.f32.gmra.mxu1 %v8909_v55 }
0x16cc   :  { %v16205_v16 = vpop.f32.mrf.mxu1 }
0x16cf   :  { %9131 = vmatmul.f32.gmra.mxu1 %v8911_v22 }
0x16d4   :  { %v16207_v25 = vpop.f32.mrf.mxu1 }
0x16d7   :  { %9134 = vmatmul.f32.gmra.mxu1 %v8913_v27  ;;  %v9199_v27 = vpop.permute.xlu2 %9198 }
0x16dc   :  { %v16211_v51 = vpop.f32.mrf.mxu1 }
0x16df   :  { %9137 = vmatmul.f32.gmra.mxu1 %v8915_v21 }
0x16e4   :  { %v16219_v24 = vpop.f32.mrf.mxu1 }
0x16e7   :  { %9140 = vmatmul.f32.gmra.mxu1 %v8917_v61 }
0x16ec   :  { %v9096_v35 = vpop.f32.mrf.mxu1 }
0x16ed   :  { %v9097_v48 = vadd.f32 %v9096_v35, %v9032_v39  ;;  %v9047_v39 = vadd.f32 %v16191_v43, %v8962_v5 }
0x16ef   :  { %v9144_v45 = vmax.f32 %v9097_v48, 0.0  ;;  %v9050_v48 = vadd.f32 %v16193_v57, %v8967_v56 }
0x16f1   :  { %v9256_v60 = vmul.f32 %v9179_v34, %v9144_v45 }
0x16f3   :  { %v9273_v3 = vsel %vm2057_vm10, %v9256_v60, 0.0  ;;  %v9204_v60 = vpop.permute.xlu0 %9203 }
0x16f4   :  { %v9099_v32 = vpop.f32.mrf.mxu1 }
0x16f5   :  { %v9100_v13 = vadd.f32 %v9099_v32, %v9035_v2 }
0x16f7   :  { %v9145_v42 = vmax.f32 %v9100_v13, 0.0 }
0x16f9   :  { %v9257_v54 = vmul.f32 %v9184_v10, %v9145_v42 }
0x16fb   :  { %v9274_v18 = vsel %vm2057_vm10, %v9257_v54, 0.0  ;;  %v9209_v54 = vpop.permute.xlu1 %9208 }
0x16fc   :  { %v9275_v63 = vadd.f32 %v9274_v18, %v9273_v3  ;;  %v9102_v50 = vpop.f32.mrf.mxu1  ;;  %v9214_v3 = vpop.permute.xlu2 %9213  ;;  %v9056_v18 = vadd.f32 %v16197_v30, %v16209_v53 }
0x16fd   :  { %v9103_v12 = vadd.f32 %v9102_v50, %v9038_v37 }
0x16ff   :  { %v9146_v29 = vmax.f32 %v9103_v12, 0.0  ;;  %v9219_v12 = vpop.permute.xlu0 %9218 }
0x1701   :  { %v9258_v14 = vmul.f32 %v9189_v11, %v9146_v29 }
0x1703   :  { %v9276_v33 = vsel %vm2057_vm10, %v9258_v14, 0.0 }
0x1704   :  { %v9277_v23 = vadd.f32 %v9276_v33, %v9275_v63  ;;  %v9105_v4 = vpop.f32.mrf.mxu1 }
0x1705   :  { %v9106_v41 = vadd.f32 %v9105_v4, %v9041_v1  ;;  %v9059_v1 = vadd.f32 %v16199_v0, %v16213_v40  ;;  %v9065_v0 = vadd.f32 %v16203_v20, %v16217_v26  ;;  %v9071_v20 = vadd.f32 %v16207_v25, %v16223_v9 }
0x1706   :  { %v9077_v25 = vadd.f32 %v16219_v24, %v16229_v59 }
0x1707   :  { %v9147_v49 = vmax.f32 %v9106_v41, 0.0  ;;  %v9224_v41 = vpop.permute.xlu1 %9223 }
0x1709   :  { %v9259_v17 = vmul.f32 %v9194_v58, %v9147_v49  ;;  %v9062_v58 = vadd.f32 %v16201_v44, %v16215_v15  ;;  %v9068_v44 = vadd.f32 %v16205_v16, %v16221_v7  ;;  %v9074_v16 = vadd.f32 %v16211_v51, %v16226_v47 }
0x170b   :  { %v9278_v31 = vsel %vm2057_vm10, %v9259_v17, 0.0 }
0x170c   :  { %v9279_v28 = vadd.f32 %v9278_v31, %v9277_v23  ;;  %v9108_v55 = vpop.f32.mrf.mxu1 }
0x170d   :  { %v9109_v38 = vadd.f32 %v9108_v55, %v9044_v19 }
0x170f   :  { %v9148_v22 = vmax.f32 %v9109_v38, 0.0  ;;  %v9229_v38 = vpop.permute.xlu2 %9228 }
0x1711   :  { %v9260_v21 = vmul.f32 %v9199_v27, %v9148_v22 }
0x1713   :  { %v9280_v62 = vsel %vm2057_vm10, %v9260_v21, 0.0 }
0x1714   :  { %v9281_v46 = vadd.f32 %v9280_v62, %v9279_v28  ;;  %v9111_v61 = vpop.f32.mrf.mxu1 }
0x1715   :  { %v9112_v2 = vadd.f32 %v9111_v61, %v9047_v39  ;;  %v9234_v61 = vpop.permute.xlu0 %9233 }
0x1717   :  { %v9149_v36 = vmax.f32 %v9112_v2, 0.0 }
0x1719   :  { %v9261_v42 = vmul.f32 %v9204_v60, %v9149_v36 }
0x171b   :  { %v9282_v43 = vsel %vm2057_vm10, %v9261_v42, 0.0  ;;  %v9244_v42 = vpop.permute.xlu2 %9243 }
0x171c   :  { %v9114_v35 = vpop.f32.mrf.mxu1  ;;  %v9283_v6 = vadd.f32 %v9282_v43, %v9281_v46 }
0x171d   :  { %v9115_v45 = vadd.f32 %v9114_v35, %v9050_v48  ;;  %v9249_v43 = vpop.permute.xlu0 %9248 }
0x171f   :  { %v9150_v13 = vmax.f32 %v9115_v45, 0.0 }
0x1721   :  { %v9262_v37 = vmul.f32 %v9209_v54, %v9150_v13 }
0x1723   :  { %v9284_v56 = vsel %vm2057_vm10, %v9262_v37, 0.0 }
0x1724   :  { %v9117_v32 = vpop.f32.mrf.mxu1  ;;  %v9285_v29 = vadd.f32 %v9284_v56, %v9283_v6 }
0x1725   :  { %v9118_v34 = vadd.f32 %v9117_v32, %v9053_v8  ;;  %v9239_v8 = vpop.permute.xlu1 %9238 }
0x1727   :  { %v9151_v10 = vmax.f32 %v9118_v34, 0.0 }
0x1729   :  { %v9263_v57 = vmul.f32 %v9214_v3, %v9151_v10 }
0x172b   :  { %v9286_v63 = vsel %vm2057_vm10, %v9263_v57, 0.0 }
0x172c   :  { %v9120_v5 = vpop.f32.mrf.mxu1  ;;  %v9287_v14 = vadd.f32 %v9286_v63, %v9285_v29 }
0x172d   :  { %v9121_v52 = vadd.f32 %v9120_v5, %v9056_v18  ;;  %v9254_v63 = vpop.permute.xlu1 %9253 }
0x172f   :  { %v9152_v50 = vmax.f32 %v9121_v52, 0.0 }
0x1731   :  { %v9264_v11 = vmul.f32 %v9219_v12, %v9152_v50 }
0x1733   :  { %v9288_v30 = vsel %vm2057_vm10, %v9264_v11, 0.0 }
0x1734   :  { %v9289_v53 = vadd.f32 %v9288_v30, %v9287_v14  ;;  %v9123_v33 = vpop.f32.mrf.mxu1 }
0x1735   :  { %v9124_v23 = vadd.f32 %v9123_v33, %v9059_v1  ;;  %v9314_v1 = vpop.permute.xlu2 %9313 }
0x1736   :  { %v9316_v24 = vperm.slane %v9314_v1, 0 }
0x1737   :  { %v9153_v4 = vmax.f32 %v9124_v23, 0.0 }
0x1739   :  { %v9265_v49 = vmul.f32 %v9224_v41, %v9153_v4 }
0x173b   :  { %v9290_v17 = vsel %vm2057_vm10, %v9265_v49, 0.0 }
0x173c   :  { %v9291_v19 = vadd.f32 %v9290_v17, %v9289_v53  ;;  %v9126_v31 = vpop.f32.mrf.mxu1 }
0x173d   :  { %v9127_v28 = vadd.f32 %v9126_v31, %v9062_v58 }
0x173f   :  { %v9154_v55 = vmax.f32 %v9127_v28, 0.0 }
0x1741   :  { %v9266_v22 = vmul.f32 %v9229_v38, %v9154_v55 }
0x1743   :  { %v9292_v40 = vsel %vm2057_vm10, %v9266_v22, 0.0 }
0x1744   :  { %v9293_v27 = vadd.f32 %v9292_v40, %v9291_v19  ;;  %v9129_v21 = vpop.f32.mrf.mxu1 }
0x1745   :  { %v9130_v62 = vadd.f32 %v9129_v21, %v9065_v0 }
0x1747   :  { %v9155_v46 = vmax.f32 %v9130_v62, 0.0 }
0x1749   :  { %v9267_v35 = vmul.f32 %v9234_v61, %v9155_v46 }
0x174b   :  { %v9294_v15 = vsel %vm2057_vm10, %v9267_v35, 0.0 }
0x174c   :  { %v9295_v39 = vadd.f32 %v9294_v15, %v9293_v27  ;;  %v9132_v48 = vpop.f32.mrf.mxu1 }
0x174d   :  { %v9133_v2 = vadd.f32 %v9132_v48, %v9068_v44 }
0x174f   :  { %v9156_v45 = vmax.f32 %v9133_v2, 0.0 }
0x1751   :  { %v9268_v36 = vmul.f32 %v9239_v8, %v9156_v45 }
0x1753   :  { %v9296_v26 = vsel %vm2057_vm10, %v9268_v36, 0.0 }
0x1754   :  { %v9297_v32 = vadd.f32 %v9296_v26, %v9295_v39  ;;  %v9135_v13 = vpop.f32.mrf.mxu1 }
0x1755   :  { %v9136_v34 = vadd.f32 %v9135_v13, %v9071_v20 }
0x1757   :  { %v9157_v60 = vmax.f32 %v9136_v34, 0.0 }
0x1759   :  { %v9269_v10 = vmul.f32 %v9244_v42, %v9157_v60 }
0x175b   :  { %v9298_v7 = vsel %vm2057_vm10, %v9269_v10, 0.0 }
0x175c   :  { %v9299_v54 = vadd.f32 %v9298_v7, %v9297_v32  ;;  %v9138_v37 = vpop.f32.mrf.mxu1 }
0x175d   :  { %v9139_v3 = vadd.f32 %v9138_v37, %v9074_v16 }
0x175f   :  { %v9158_v18 = vmax.f32 %v9139_v3, 0.0 }
0x1761   :  { %v9270_v57 = vmul.f32 %v9249_v43, %v9158_v18 }
0x1763   :  { %v9300_v9 = vsel %vm2057_vm10, %v9270_v57, 0.0 }
0x1764   :  { %v9301_v5 = vadd.f32 %v9300_v9, %v9299_v54  ;;  %v9141_v56 = vpop.f32.mrf.mxu1 }
0x1765   :  { %v9142_v52 = vadd.f32 %v9141_v56, %v9077_v25 }
0x1767   :  { %v9159_v6 = vmax.f32 %v9142_v52, 0.0 }
0x1769   :  { %v9271_v51 = vmul.f32 %v9254_v63, %v9159_v6 }
0x176b   :  { %v9302_v47 = vsel %vm2057_vm10, %v9271_v51, 0.0 }
0x176c   :  { %v9303_v50 = vadd.f32 %v9302_v47, %v9301_v5 }
0x176e   :  { %v9304_v12 = vrot.slane %v9303_v50, 4 }
0x1770   :  { %v9305_v29 = vadd.f32 %v9304_v12, %v9303_v50 }
0x1772   :  { %v9306_v11 = vrot.slane %v9305_v29, 2 }
0x1774   :  { %v9307_v14 = vadd.f32 %v9306_v11, %v9305_v29 }
0x1776   :  { %v9308_v30 = vrot.slane %v9307_v14, 1 }
0x1778   :  { %v9309_v59 = vadd.f32 %v9308_v30, %v9307_v14 }
0x177a   :  { %v9317_v53 = vadd.f32 %v9316_v24, %v9309_v59 }
0x177c   :  { %9319 = vst.msk [vmem:[#allocation39] sm:$0x1] %vm9318_vm7, %v9317_v53 }
0x177d   :  { %12036 = shalt.err (!%p12033_p2)
}
0x177e   :  { %9330 = dma.vmem_to_hbm [thread:$0]  %s9326_s16, 16, %s9328_s8, [#allocation6]  }
0x177f   :  { %12061 = dma.done.wait [#allocation6], 16  }
0x1780   :  { %12062 = vsyncadd [#allocation6], 4294967280 }
0x1781   :  { %9335 = vsyncpa [#allocation5], 1 }
0x1782   :  { %9336 = vsyncpa [#allocation8], 1 }
0x1783   :  { %9337 = vsyncpa [#allocation11], 1 }
0x1784   :  { %9338 = vsyncpa [#allocation14], 1 }
0x1785   :  { %9339 = vsyncpa [#allocation17], 1 }
0x1786   :  { %9340 = vsyncpa [#allocation20], 1 }
0x1787   :  { %9341 = vsyncpa [#allocation23], 1 }
0x1788   :  { %9342 = vsyncpa [#allocation26], 1 }
0x1789   :  { %9343 = vsyncpa [#allocation29], 1 }
0x178a   :  { %9344 = vsyncpa [#allocation32], 1 }
0x178b   :  { %9345 = vsyncpa [#allocation35], 1 }
0x178c   :  { %9346 = vsyncpa [#allocation38], 1 }
0x178d   :  { %9347 = vsyncpa [#allocation6], 1 }

</bundles_post_ra>
